<compile_context>
chip_gen: v6e
topology: v6e:2x2x1
jax: 0.10.0
libtpu: 0.0.40
codegen_flags: <defaults>
</compile_context>

<pallas_src>
import functools

import numpy as np
import jax
import jax.numpy as jnp
from jax.experimental import pallas as pl
from jax.experimental.pallas import tpu as pltpu

# Normalize constants from torchvision.transforms.Normalize in the module.
NORM_MEAN = np.array([0.1688, 0.1590, 0.1803], np.float32)
NORM_STD = np.array([0.3746, 0.3657, 0.3845], np.float32)

CP = 128          # all activation channels are zero-padded to 128 lanes
NUM_GROUPS = 8
GN_EPS = 1e-5


# ---------------------------------------------------------------------------
# Pallas kernels
# ---------------------------------------------------------------------------
def _stem_gemm_kernel(x_ref, w_ref, b_ref, o_ref):
    # Conv-as-GEMM + bias + ReLU for the stem (Normalize already folded in w/b).
    acc = jnp.dot(x_ref[...], w_ref[...], preferred_element_type=jnp.float32)
    acc = acc + b_ref[...]
    o_ref[...] = jnp.maximum(acc, 0.0).astype(o_ref.dtype)


def _conv_gn_kernel(*refs, nb, eps, relu, has_residual):
    # Fused conv-as-GEMM + bias + GroupNorm (+ReLU | +residual) epilogue.
    # x: (M, K) bf16 patches (M = nb * OH * OW, batch-major rows)
    # w: (K, 128) bf16, b/gamma/beta: (1, 128) f32
    # p: (128, 128) f32 block-diagonal group-average matrix (1/group_size)
    if has_residual:
        x_ref, w_ref, b_ref, g_ref, bt_ref, p_ref, r_ref, o_ref = refs
    else:
        x_ref, w_ref, b_ref, g_ref, bt_ref, p_ref, o_ref = refs
        r_ref = None
    acc = jnp.dot(x_ref[...], w_ref[...], preferred_element_type=jnp.float32)
    acc = acc + b_ref[...]                                       # (M, 128) f32
    m = acc.shape[0]
    mb = m // nb
    gamma = g_ref[...]
    beta = bt_ref[...]
    pmat = p_ref[...]
    for b in range(nb):                                          # per-image GN stats
        a = acc[b * mb:(b + 1) * mb]                             # (mb, 128)
        s = jnp.concatenate(
            [jnp.sum(a, axis=0, keepdims=True),
             jnp.sum(a * a, axis=0, keepdims=True)], axis=0) * (1.0 / mb)
        gstat = jnp.dot(s, pmat, preferred_element_type=jnp.float32)   # (2, 128)
        mean = gstat[0:1]
        var = jnp.maximum(gstat[1:2] - mean * mean, 0.0)
        y = (a - mean) * jax.lax.rsqrt(var + eps) * gamma + beta
        if relu:
            y = jnp.maximum(y, 0.0)
        if r_ref is not None:
            y = y + r_ref[pl.ds(b * mb, mb), :].astype(jnp.float32)
        o_ref[pl.ds(b * mb, mb), :] = y.astype(o_ref.dtype)


def _maxpool_kernel(x_ref, o_ref, *, oh, ow, c):
    # 3x3 / stride-2 max pool; the 9 taps are taken IN-KERNEL from the
    # (PH, 2, PW, 2*C) "pair" view of the zero-padded input (no HBM tap arrays).
    x = x_ref[0].astype(jnp.float32)                 # (oh+1, 2, ow+1, 2*c)
    best = None
    for kh in range(3):
        ph0, rh = kh // 2, kh % 2
        xh = x[ph0:ph0 + oh, rh]                     # (oh, ow+1, 2*c)
        for kw in range(3):
            pw0, rw = kw // 2, kw % 2
            t = xh[:, pw0:pw0 + ow, rw * c:(rw + 1) * c]   # (oh, ow, c)
            best = t if best is None else jnp.maximum(best, t)
    o_ref[0] = best.astype(o_ref.dtype)


def _head_kernel(x_ref, w_ref, b_ref, o_ref):
    # Global average pool over HW + linear classifier.
    xm = jnp.mean(x_ref[...].astype(jnp.float32), axis=1)          # (B, C)
    o_ref[...] = jnp.dot(xm.astype(w_ref.dtype), w_ref[...],
                         preferred_element_type=jnp.float32) + b_ref[...]


# ---------------------------------------------------------------------------
# Pallas wrappers
# ---------------------------------------------------------------------------
def _pick_tile(m, candidates=(512, 256, 128)):
    for t in candidates:
        if m % t == 0:
            return t
    return m


def stem_conv(patches, w, b):
    m, k = patches.shape
    n = w.shape[1]
    tm = _pick_tile(m)
    return pl.pallas_call(
        _stem_gemm_kernel,
        out_shape=jax.ShapeDtypeStruct((m, n), jnp.bfloat16),
        grid=(m // tm,),
        in_specs=[pl.BlockSpec((tm, k), lambda i: (i, 0)),
                  pl.BlockSpec((k, n), lambda i: (0, 0)),
                  pl.BlockSpec((1, n), lambda i: (0, 0))],
        out_specs=pl.BlockSpec((tm, n), lambda i: (i, 0)),
        compiler_params=pltpu.CompilerParams(dimension_semantics=("parallel",)),
    )(patches, w, b)


def conv_gn(patches, w, b, gamma, beta, pmat, *, nb, relu, residual=None):
    m, k = patches.shape
    n = w.shape[1]
    kern = functools.partial(_conv_gn_kernel, nb=nb, eps=GN_EPS, relu=relu,
                             has_residual=residual is not None)
    ins = [patches, w, b, gamma, beta, pmat]
    specs = [pl.BlockSpec((m, k), lambda i: (0, 0)),
             pl.BlockSpec((k, n), lambda i: (0, 0)),
             pl.BlockSpec((1, n), lambda i: (0, 0)),
             pl.BlockSpec((1, n), lambda i: (0, 0)),
             pl.BlockSpec((1, n), lambda i: (0, 0)),
             pl.BlockSpec((n, n), lambda i: (0, 0))]
    if residual is not None:
        ins.append(residual)
        specs.append(pl.BlockSpec((m, n), lambda i: (0, 0)))
    return pl.pallas_call(
        kern,
        out_shape=jax.ShapeDtypeStruct((m, n), jnp.bfloat16),
        grid=(1,),
        in_specs=specs,
        out_specs=pl.BlockSpec((m, n), lambda i: (0, 0)),
    )(*ins)


def maxpool2d(x):
    # x: (B, H, W, C), post-ReLU (>= 0); MaxPool2d(kernel=3, stride=2, pad=1).
    b, h, w, c = x.shape
    oh, ow = h // 2, w // 2
    # Zero padding is exact here because the input is non-negative (post-ReLU),
    # so it matches PyTorch's -inf border semantics.
    xp = jnp.pad(x, ((0, 0), (1, 1), (1, 1), (0, 0)))
    xp = xp.reshape(b, oh + 1, 2, ow + 1, 2 * c)       # metadata-only pair view
    kern = functools.partial(_maxpool_kernel, oh=oh, ow=ow, c=c)
    return pl.pallas_call(
        kern,
        out_shape=jax.ShapeDtypeStruct((b, oh, ow, c), x.dtype),
        grid=(b,),
        in_specs=[pl.BlockSpec((1, oh + 1, 2, ow + 1, 2 * c),
                               lambda i: (i, 0, 0, 0, 0))],
        out_specs=pl.BlockSpec((1, oh, ow, c), lambda i: (i, 0, 0, 0)),
        compiler_params=pltpu.CompilerParams(dimension_semantics=("parallel",)),
    )(xp)


def classifier_head(x, w, b, num_classes):
    bb, hw, c = x.shape
    n = w.shape[1]
    out = pl.pallas_call(
        _head_kernel,
        out_shape=jax.ShapeDtypeStruct((bb, n), jnp.float32),
        grid=(1,),
        in_specs=[pl.BlockSpec((bb, hw, c), lambda i: (0, 0, 0)),
                  pl.BlockSpec((c, n), lambda i: (0, 0)),
                  pl.BlockSpec((1, n), lambda i: (0, 0))],
        out_specs=pl.BlockSpec((bb, n), lambda i: (0, 0)),
    )(x, w, b)
    return out[:, :num_classes]


# ---------------------------------------------------------------------------
# JAX glue (im2col / padding — metadata or small one-pass XLA ops)
# ---------------------------------------------------------------------------
def _im2col(xp, ksize, stride):
    """xp: spatially pre-padded NHWC -> (B*OH*OW, ksize*ksize*C) bf16 patches."""
    # TODO(synk): stream the taps from VMEM inside the GEMM kernel (per-tap
    # accumulated matmuls) instead of materializing the patch matrix with XLA.
    b, hp, wp, c = xp.shape
    oh = (hp - ksize) // stride + 1
    ow = (wp - ksize) // stride + 1
    taps = []
    for kh in range(ksize):
        for kw in range(ksize):
            taps.append(xp[:, kh:kh + stride * (oh - 1) + 1:stride,
                              kw:kw + stride * (ow - 1) + 1:stride, :])
    patches = jnp.concatenate(taps, axis=-1)
    return patches.reshape(b * oh * ow, ksize * ksize * c), oh, ow


def _pad_hw_with_channel_value(x, pad, value_c):
    b, h, w, c = x.shape
    base = jnp.broadcast_to(value_c.reshape(1, 1, 1, c).astype(x.dtype),
                            (b, h + 2 * pad, w + 2 * pad, c))
    return jax.lax.dynamic_update_slice(base, x, (0, pad, pad, 0))


# ---------------------------------------------------------------------------
# Model assembly
# ---------------------------------------------------------------------------
def block_forward(x, p):
    # Block: net = conv3x3(s2)->GN->ReLU->conv3x3->GN->ReLU;
    #        out = net(x) + GN(conv1x1(s2)(x))   (residual fused into last call)
    b = x.shape[0]
    # conv1 (stride 2) + GN + ReLU
    pt1, oh, ow = _im2col(jnp.pad(x, ((0, 0), (1, 1), (1, 1), (0, 0))), 3, 2)
    y1 = conv_gn(pt1, p["w1"], p["b1"], p["g1"], p["bt1"], p["p"], nb=b, relu=True)
    # conv2 (stride 1) + GN + ReLU
    y1 = y1.reshape(b, oh, ow, CP)
    pt2, _, _ = _im2col(jnp.pad(y1, ((0, 0), (1, 1), (1, 1), (0, 0))), 3, 1)
    y2 = conv_gn(pt2, p["w2"], p["b2"], p["g2"], p["bt2"], p["p"], nb=b, relu=True)
    # downsample conv1x1 (stride 2) + GN, fused with the residual add of y2
    xd = x[:, ::2, ::2, :].reshape(b * oh * ow, CP)
    out = conv_gn(xd, p["wd"], p["bd"], p["gd"], p["btd"], p["p"], nb=b,
                  relu=False, residual=y2)
    return out.reshape(b, oh, ow, CP)


def cnn_classifier_forward(prep, x_nchw, num_classes=6):
    # NCHW -> NHWC; bf16 activations throughout (f32 accumulation in-kernel).
    x = jnp.transpose(x_nchw, (0, 2, 3, 1)).astype(jnp.bfloat16)
    b = x.shape[0]
    # Stem conv7x7(s2,p3)+ReLU.  Normalize is folded exactly into the weights;
    # the raw input is spatially padded with the per-channel MEAN so that the
    # border behaves like zero-padded *normalized* pixels.
    xp = _pad_hw_with_channel_value(x, 3, prep["stem_pad"])
    patches, oh, ow = _im2col(xp, 7, 2)
    y = stem_conv(patches, prep["stem_w"], prep["stem_b"]).reshape(b, oh, ow, CP)
    y = maxpool2d(y)
    for blk in prep["blocks"]:
        y = block_forward(y, blk)
    bb, hh, ww, cc = y.shape
    # TODO(synk): Dropout(p=0.1) is identity at inference; not applied here.
    return classifier_head(y.reshape(bb, hh * ww, cc),
                           prep["fc_w"], prep["fc_b"], num_classes)


# ---------------------------------------------------------------------------
# One-time parameter preparation (runs OUTSIDE jit)
# ---------------------------------------------------------------------------
def _pad_vec(v, cp=CP):
    v = jnp.asarray(v, jnp.float32)
    return jnp.pad(v, (0, cp - v.shape[0])).reshape(1, cp)


def _prep_conv(w, b, cin_pad, cp=CP):
    kh, kw, cin, cout = w.shape
    wp = jnp.pad(jnp.asarray(w, jnp.float32),
                 ((0, 0), (0, 0), (0, cin_pad - cin), (0, cp - cout)))
    return wp.reshape(kh * kw * cin_pad, cp).astype(jnp.bfloat16), _pad_vec(b, cp)


def _group_avg_matrix(c_real, num_groups, cp=CP):
    gs = c_real // num_groups
    m = np.zeros((cp, cp), np.float32)
    for g in range(num_groups):
        m[g * gs:(g + 1) * gs, g * gs:(g + 1) * gs] = 1.0 / gs
    return jnp.asarray(m)


def prepare_params(params):
    """Normalize fold, GEMM reshape, channel pad to 128, bf16 cast, GN matrices."""
    prep = {}
    mean = jnp.asarray(NORM_MEAN)
    std = jnp.asarray(NORM_STD)
    w0 = jnp.asarray(params["stem_w"], jnp.float32)          # (7,7,3,32) HWIO
    b0 = jnp.asarray(params["stem_b"], jnp.float32)
    ws = w0 / std.reshape(1, 1, 3, 1)                         # w' = w / std
    bs = b0 - jnp.sum(w0 * (mean / std).reshape(1, 1, 3, 1), axis=(0, 1, 2))
    kh, kw, cin, cout = ws.shape
    wm = jnp.pad(ws.reshape(kh * kw * cin, cout), ((0, 0), (0, CP - cout)))
    prep["stem_w"] = wm.astype(jnp.bfloat16)
    prep["stem_b"] = _pad_vec(bs)
    prep["stem_pad"] = mean                                   # raw-space border value
    blocks = []
    for blk in params["blocks"]:
        cout = blk["w1"].shape[3]
        bp = {"p": _group_avg_matrix(cout, NUM_GROUPS)}
        bp["w1"], bp["b1"] = _prep_conv(blk["w1"], blk["b1"], CP)
        bp["g1"], bp["bt1"] = _pad_vec(blk["gn1_g"]), _pad_vec(blk["gn1_b"])
        bp["w2"], bp["b2"] = _prep_conv(blk["w2"], blk["b2"], CP)
        bp["g2"], bp["bt2"] = _pad_vec(blk["gn2_g"]), _pad_vec(blk["gn2_b"])
        bp["wd"], bp["bd"] = _prep_conv(blk["wd"], blk["bd"], CP)
        bp["gd"], bp["btd"] = _pad_vec(blk["gnd_g"]), _pad_vec(blk["gnd_b"])
        blocks.append(bp)
    prep["blocks"] = blocks
    fcw = jnp.asarray(params["fc_w"], jnp.float32)            # (128, num_classes)
    cin_fc, ncls = fcw.shape
    prep["fc_w"] = jnp.pad(fcw, ((0, CP - cin_fc), (0, CP - ncls))).astype(jnp.bfloat16)
    prep["fc_b"] = _pad_vec(params["fc_b"])
    return prep


# ---------------------------------------------------------------------------
# Parameter init (mirrors PyTorch defaults)
# ---------------------------------------------------------------------------
def _conv_init(key, kh, kw, cin, cout):
    kw_, kb_ = jax.random.split(key)
    bound = 1.0 / np.sqrt(kh * kw * cin)
    w = jax.random.uniform(kw_, (kh, kw, cin, cout), jnp.float32, -bound, bound)
    b = jax.random.uniform(kb_, (cout,), jnp.float32, -bound, bound)
    return w, b


def init_params(key, layer_sizes=(32, 64, 128), input_channels=3, num_classes=6):
    keys = iter(jax.random.split(key, 16))
    params = {}
    params["stem_w"], params["stem_b"] = _conv_init(next(keys), 7, 7, input_channels, 32)
    blocks = []
    cin = 32
    for cout in layer_sizes:
        blk = {}
        blk["w1"], blk["b1"] = _conv_init(next(keys), 3, 3, cin, cout)
        blk["gn1_g"], blk["gn1_b"] = jnp.ones((cout,), jnp.float32), jnp.zeros((cout,), jnp.float32)
        blk["w2"], blk["b2"] = _conv_init(next(keys), 3, 3, cout, cout)
        blk["gn2_g"], blk["gn2_b"] = jnp.ones((cout,), jnp.float32), jnp.zeros((cout,), jnp.float32)
        blk["wd"], blk["bd"] = _conv_init(next(keys), 1, 1, cin, cout)
        blk["gnd_g"], blk["gnd_b"] = jnp.ones((cout,), jnp.float32), jnp.zeros((cout,), jnp.float32)
        blocks.append(blk)
        cin = cout
    params["blocks"] = blocks
    # Note: `self.classifier.weight.zero_` in the reference is a no-op (missing
    # call parentheses), so the classifier keeps its random init.
    kfw, kfb = jax.random.split(next(keys))
    bound = 1.0 / np.sqrt(cin)
    params["fc_w"] = jax.random.uniform(kfw, (cin, num_classes), jnp.float32, -bound, bound)
    params["fc_b"] = jax.random.uniform(kfb, (num_classes,), jnp.float32, -bound, bound)
    return params


if __name__ == "__main__":
    key = jax.random.PRNGKey(0)
    pkey, xkey = jax.random.split(key)
    params = init_params(pkey)
    prep = prepare_params(params)                 # one-time weight prep (outside jit)
    x = jax.random.uniform(xkey, (2, 3, 64, 64), jnp.float32)  # NCHW like PyTorch
    fwd = jax.jit(cnn_classifier_forward)
    logits = fwd(prep, x)
    jax.block_until_ready(logits)
    assert logits.shape == (2, 6) and logits.dtype == jnp.float32
    assert bool(jnp.all(jnp.isfinite(logits)))
    print("KERNEL_OK")
</pallas_src>

<mosaic_0001>
module attributes {stable_mosaic.version = 11 : i64} {
  func.func @_stem_gemm_kernel(%arg0: i32, %arg1: memref<512x147xbf16, #tpu.memory_space<vmem>>, %arg2: memref<147x128xbf16, #tpu.memory_space<vmem>>, %arg3: memref<1x128xf32, #tpu.memory_space<vmem>>, %arg4: memref<512x128xbf16, #tpu.memory_space<vmem>>) attributes {dimension_semantics = [#tpu.dimension_semantics<parallel>], iteration_bounds = array<i64: 4>, scalar_prefetch = 0 : i64, scratch_operands = 0 : i64, tpu.core_type = #tpu.core_type<tc>, window_params = [{transform_indices = @transform_0, window_bounds = array<i64: 512, 147>}, {pipeline_mode = #tpu.pipeline_mode<synchronous>, transform_indices = @transform_1, window_bounds = array<i64: 147, 128>}, {pipeline_mode = #tpu.pipeline_mode<synchronous>, transform_indices = @transform_2, window_bounds = array<i64: 1, 128>}, {transform_indices = @transform_3, window_bounds = array<i64: 512, 128>}]} {
    %c0 = arith.constant 0 : index
    %c0_0 = arith.constant 0 : index
    %0 = vector.load %arg1[%c0, %c0_0] : memref<512x147xbf16, #tpu.memory_space<vmem>>, vector<512x147xbf16>
    %c0_1 = arith.constant 0 : index
    %c0_2 = arith.constant 0 : index
    %1 = vector.load %arg2[%c0_1, %c0_2] : memref<147x128xbf16, #tpu.memory_space<vmem>>, vector<147x128xbf16>
    %cst = arith.constant dense<0.000000e+00> : vector<512x128xf32>
    %2 = tpu.matmul %0, %1, %cst {dimension_numbers = #tpu.dot_dimension_numbers<[1], [0], [0], [1], [0, 0, 1, 1], [], []>} : vector<512x147xbf16>, vector<147x128xbf16>, vector<512x128xf32> -> vector<512x128xf32>
    %c0_3 = arith.constant 0 : index
    %c0_4 = arith.constant 0 : index
    %3 = vector.load %arg3[%c0_3, %c0_4] : memref<1x128xf32, #tpu.memory_space<vmem>>, vector<1x128xf32>
    %4 = vector.broadcast %3 : vector<1x128xf32> to vector<512x128xf32>
    %5 = arith.addf %2, %4 : vector<512x128xf32>
    %cst_5 = arith.constant 0.000000e+00 : f32
    %6 = vector.broadcast %cst_5 : f32 to vector<512x128xf32>
    %7 = arith.maximumf %5, %6 : vector<512x128xf32>
    %8 = arith.truncf %7 : vector<512x128xf32> to vector<512x128xbf16>
    %c0_6 = arith.constant 0 : index
    %c0_7 = arith.constant 0 : index
    %9 = vector.load %arg4[%c0_6, %c0_7] : memref<512x128xbf16, #tpu.memory_space<vmem>>, vector<512x128xbf16>
    tpu.vector_store %arg4[%c0_6, %c0_7], %8 {strides = array<i32>} : memref<512x128xbf16, #tpu.memory_space<vmem>>, vector<512x128xbf16>,
    return
  }
  func.func @transform_0(%arg0: i32) -> (i32, i32) {
    %c0_i32 = arith.constant 0 : i32
    %c0_i32_0 = arith.constant 0 : i32
    return %arg0, %c0_i32 : i32, i32
  }
  func.func @transform_1(%arg0: i32) -> (i32, i32) {
    %c0_i32 = arith.constant 0 : i32
    %c0_i32_0 = arith.constant 0 : i32
    %c0_i32_1 = arith.constant 0 : i32
    return %c0_i32, %c0_i32_0 : i32, i32
  }
  func.func @transform_2(%arg0: i32) -> (i32, i32) {
    %c0_i32 = arith.constant 0 : i32
    %c0_i32_0 = arith.constant 0 : i32
    %c0_i32_1 = arith.constant 0 : i32
    return %c0_i32, %c0_i32_0 : i32, i32
  }
  func.func @transform_3(%arg0: i32) -> (i32, i32) {
    %c0_i32 = arith.constant 0 : i32
    %c0_i32_0 = arith.constant 0 : i32
    return %arg0, %c0_i32 : i32, i32
  }
}

module attributes {stable_mosaic.version = 11 : i64} {
  func.func @_maxpool_kernel(%arg0: i32, %arg1: memref<1x17x2x17x256xbf16, #tpu.memory_space<vmem>>, %arg2: memref<1x16x16x128xbf16, #tpu.memory_space<vmem>>) attributes {dimension_semantics = [#tpu.dimension_semantics<parallel>], iteration_bounds = array<i64: 2>, scalar_prefetch = 0 : i64, scratch_operands = 0 : i64, tpu.core_type = #tpu.core_type<tc>, window_params = [{transform_indices = @transform_0, window_bounds = array<i64: 1, 17, 2, 17, 256>}, {transform_indices = @transform_1, window_bounds = array<i64: 1, 16, 16, 128>}]} {
    %c0 = arith.constant 0 : index
    %c0_0 = arith.constant 0 : index
    %c0_1 = arith.constant 0 : index
    %c0_2 = arith.constant 0 : index
    %c0_3 = arith.constant 0 : index
    %0 = vector.load %arg1[%c0, %c0_0, %c0_1, %c0_2, %c0_3] : memref<1x17x2x17x256xbf16, #tpu.memory_space<vmem>>, vector<1x17x2x17x256xbf16>
    %1 = vector.shape_cast %0 : vector<1x17x2x17x256xbf16> to vector<17x2x17x256xbf16>
    %2 = arith.extf %1 : vector<17x2x17x256xbf16> to vector<17x2x17x256xf32>
    %3 = vector.extract_strided_slice %2 {offsets = [0, 0, 0, 0], sizes = [16, 1, 17, 256], strides = [1, 1, 1, 1]} : vector<17x2x17x256xf32> to vector<16x1x17x256xf32>
    %4 = vector.shape_cast %3 : vector<16x1x17x256xf32> to vector<16x17x256xf32>
    %5 = vector.extract_strided_slice %4 {offsets = [0, 0, 0], sizes = [16, 16, 128], strides = [1, 1, 1]} : vector<16x17x256xf32> to vector<16x16x128xf32>
    %6 = vector.extract_strided_slice %4 {offsets = [0, 0, 128], sizes = [16, 16, 128], strides = [1, 1, 1]} : vector<16x17x256xf32> to vector<16x16x128xf32>
    %7 = arith.maximumf %5, %6 : vector<16x16x128xf32>
    %8 = vector.extract_strided_slice %4 {offsets = [0, 1, 0], sizes = [16, 16, 128], strides = [1, 1, 1]} : vector<16x17x256xf32> to vector<16x16x128xf32>
    %9 = arith.maximumf %7, %8 : vector<16x16x128xf32>
    %10 = vector.extract_strided_slice %2 {offsets = [0, 1, 0, 0], sizes = [16, 1, 17, 256], strides = [1, 1, 1, 1]} : vector<17x2x17x256xf32> to vector<16x1x17x256xf32>
    %11 = vector.shape_cast %10 : vector<16x1x17x256xf32> to vector<16x17x256xf32>
    %12 = vector.extract_strided_slice %11 {offsets = [0, 0, 0], sizes = [16, 16, 128], strides = [1, 1, 1]} : vector<16x17x256xf32> to vector<16x16x128xf32>
    %13 = arith.maximumf %9, %12 : vector<16x16x128xf32>
    %14 = vector.extract_strided_slice %11 {offsets = [0, 0, 128], sizes = [16, 16, 128], strides = [1, 1, 1]} : vector<16x17x256xf32> to vector<16x16x128xf32>
    %15 = arith.maximumf %13, %14 : vector<16x16x128xf32>
    %16 = vector.extract_strided_slice %11 {offsets = [0, 1, 0], sizes = [16, 16, 128], strides = [1, 1, 1]} : vector<16x17x256xf32> to vector<16x16x128xf32>
    %17 = arith.maximumf %15, %16 : vector<16x16x128xf32>
    %18 = vector.extract_strided_slice %2 {offsets = [1, 0, 0, 0], sizes = [16, 1, 17, 256], strides = [1, 1, 1, 1]} : vector<17x2x17x256xf32> to vector<16x1x17x256xf32>
    %19 = vector.shape_cast %18 : vector<16x1x17x256xf32> to vector<16x17x256xf32>
    %20 = vector.extract_strided_slice %19 {offsets = [0, 0, 0], sizes = [16, 16, 128], strides = [1, 1, 1]} : vector<16x17x256xf32> to vector<16x16x128xf32>
    %21 = arith.maximumf %17, %20 : vector<16x16x128xf32>
    %22 = vector.extract_strided_slice %19 {offsets = [0, 0, 128], sizes = [16, 16, 128], strides = [1, 1, 1]} : vector<16x17x256xf32> to vector<16x16x128xf32>
    %23 = arith.maximumf %21, %22 : vector<16x16x128xf32>
    %24 = vector.extract_strided_slice %19 {offsets = [0, 1, 0], sizes = [16, 16, 128], strides = [1, 1, 1]} : vector<16x17x256xf32> to vector<16x16x128xf32>
    %25 = arith.maximumf %23, %24 : vector<16x16x128xf32>
    %26 = arith.truncf %25 : vector<16x16x128xf32> to vector<16x16x128xbf16>
    %c0_4 = arith.constant 0 : index
    %c0_5 = arith.constant 0 : index
    %c0_6 = arith.constant 0 : index
    %c0_7 = arith.constant 0 : index
    %27 = vector.load %arg2[%c0_4, %c0_5, %c0_6, %c0_7] : memref<1x16x16x128xbf16, #tpu.memory_space<vmem>>, vector<1x16x16x128xbf16>
    %28 = vector.shape_cast %27 : vector<1x16x16x128xbf16> to vector<16x16x128xbf16>
    %29 = vector.shape_cast %26 : vector<16x16x128xbf16> to vector<1x16x16x128xbf16>
    tpu.vector_store %arg2[%c0_4, %c0_5, %c0_6, %c0_7], %29 {strides = array<i32>} : memref<1x16x16x128xbf16, #tpu.memory_space<vmem>>, vector<1x16x16x128xbf16>,
    return
  }
  func.func @transform_0(%arg0: i32) -> (i32, i32, i32, i32, i32) {
    %c0_i32 = arith.constant 0 : i32
    %c0_i32_0 = arith.constant 0 : i32
    %c0_i32_1 = arith.constant 0 : i32
    %c0_i32_2 = arith.constant 0 : i32
    %c0_i32_3 = arith.constant 0 : i32
    return %arg0, %c0_i32, %c0_i32_0, %c0_i32_1, %c0_i32_2 : i32, i32, i32, i32, i32
  }
  func.func @transform_1(%arg0: i32) -> (i32, i32, i32, i32) {
    %c0_i32 = arith.constant 0 : i32
    %c0_i32_0 = arith.constant 0 : i32
    %c0_i32_1 = arith.constant 0 : i32
    %c0_i32_2 = arith.constant 0 : i32
    return %arg0, %c0_i32, %c0_i32_0, %c0_i32_1 : i32, i32, i32, i32
  }
}

module attributes {stable_mosaic.version = 11 : i64} {
  func.func @_conv_gn_kernel(%arg0: i32, %arg1: memref<128x1152xbf16, #tpu.memory_space<vmem>>, %arg2: memref<1152x128xbf16, #tpu.memory_space<vmem>>, %arg3: memref<1x128xf32, #tpu.memory_space<vmem>>, %arg4: memref<1x128xf32, #tpu.memory_space<vmem>>, %arg5: memref<1x128xf32, #tpu.memory_space<vmem>>, %arg6: memref<128x128xf32, #tpu.memory_space<vmem>>, %arg7: memref<128x128xbf16, #tpu.memory_space<vmem>>) attributes {dimension_semantics = [#tpu.dimension_semantics<arbitrary>], iteration_bounds = array<i64: 1>, scalar_prefetch = 0 : i64, scratch_operands = 0 : i64, tpu.core_type = #tpu.core_type<tc>, window_params = [{pipeline_mode = #tpu.pipeline_mode<synchronous>, transform_indices = @transform_0, window_bounds = array<i64: 128, 1152>}, {pipeline_mode = #tpu.pipeline_mode<synchronous>, transform_indices = @transform_1, window_bounds = array<i64: 1152, 128>}, {pipeline_mode = #tpu.pipeline_mode<synchronous>, transform_indices = @transform_2, window_bounds = array<i64: 1, 128>}, {pipeline_mode = #tpu.pipeline_mode<synchronous>, transform_indices = @transform_3, window_bounds = array<i64: 1, 128>}, {pipeline_mode = #tpu.pipeline_mode<synchronous>, transform_indices = @transform_4, window_bounds = array<i64: 1, 128>}, {pipeline_mode = #tpu.pipeline_mode<synchronous>, transform_indices = @transform_5, window_bounds = array<i64: 128, 128>}, {pipeline_mode = #tpu.pipeline_mode<synchronous>, transform_indices = @transform_6, window_bounds = array<i64: 128, 128>}]} {
    %c0 = arith.constant 0 : index
    %c0_0 = arith.constant 0 : index
    %0 = vector.load %arg1[%c0, %c0_0] : memref<128x1152xbf16, #tpu.memory_space<vmem>>, vector<128x1152xbf16>
    %c0_1 = arith.constant 0 : index
    %c0_2 = arith.constant 0 : index
    %1 = vector.load %arg2[%c0_1, %c0_2] : memref<1152x128xbf16, #tpu.memory_space<vmem>>, vector<1152x128xbf16>
    %cst = arith.constant dense<0.000000e+00> : vector<128x128xf32>
    %2 = tpu.matmul %0, %1, %cst {dimension_numbers = #tpu.dot_dimension_numbers<[1], [0], [0], [1], [0, 0, 1, 1], [], []>} : vector<128x1152xbf16>, vector<1152x128xbf16>, vector<128x128xf32> -> vector<128x128xf32>
    %c0_3 = arith.constant 0 : index
    %c0_4 = arith.constant 0 : index
    %3 = vector.load %arg3[%c0_3, %c0_4] : memref<1x128xf32, #tpu.memory_space<vmem>>, vector<1x128xf32>
    %4 = vector.broadcast %3 : vector<1x128xf32> to vector<128x128xf32>
    %5 = arith.addf %2, %4 : vector<128x128xf32>
    %c0_5 = arith.constant 0 : index
    %c0_6 = arith.constant 0 : index
    %6 = vector.load %arg4[%c0_5, %c0_6] : memref<1x128xf32, #tpu.memory_space<vmem>>, vector<1x128xf32>
    %c0_7 = arith.constant 0 : index
    %c0_8 = arith.constant 0 : index
    %7 = vector.load %arg5[%c0_7, %c0_8] : memref<1x128xf32, #tpu.memory_space<vmem>>, vector<1x128xf32>
    %c0_9 = arith.constant 0 : index
    %c0_10 = arith.constant 0 : index
    %8 = vector.load %arg6[%c0_9, %c0_10] : memref<128x128xf32, #tpu.memory_space<vmem>>, vector<128x128xf32>
    %9 = vector.extract_strided_slice %5 {offsets = [0, 0], sizes = [64, 128], strides = [1, 1]} : vector<128x128xf32> to vector<64x128xf32>
    %cst_11 = arith.constant dense<0.000000e+00> : vector<128xf32>
    %10 = vector.multi_reduction <add>, %9, %cst_11 [0] : vector<64x128xf32> to vector<128xf32>
    %11 = vector.shape_cast %10 : vector<128xf32> to vector<1x128xf32>
    %12 = arith.mulf %9, %9 : vector<64x128xf32>
    %cst_12 = arith.constant dense<0.000000e+00> : vector<128xf32>
    %13 = vector.multi_reduction <add>, %12, %cst_12 [0] : vector<64x128xf32> to vector<128xf32>
    %14 = vector.shape_cast %13 : vector<128xf32> to vector<1x128xf32>
    %15 = tpu.concatenate %11, %14 in 0 : vector<1x128xf32>, vector<1x128xf32> -> vector<2x128xf32>
    %cst_13 = arith.constant 1.562500e-02 : f32
    %16 = vector.broadcast %cst_13 : f32 to vector<2x128xf32>
    %17 = arith.mulf %15, %16 : vector<2x128xf32>
    %cst_14 = arith.constant dense<0.000000e+00> : vector<2x128xf32>
    %18 = tpu.matmul %17, %8, %cst_14 {dimension_numbers = #tpu.dot_dimension_numbers<[1], [0], [0], [1], [0, 0, 1, 1], [], []>} : vector<2x128xf32>, vector<128x128xf32>, vector<2x128xf32> -> vector<2x128xf32>
    %19 = vector.extract_strided_slice %18 {offsets = [0, 0], sizes = [1, 128], strides = [1, 1]} : vector<2x128xf32> to vector<1x128xf32>
    %20 = vector.extract_strided_slice %18 {offsets = [1, 0], sizes = [1, 128], strides = [1, 1]} : vector<2x128xf32> to vector<1x128xf32>
    %21 = arith.mulf %19, %19 : vector<1x128xf32>
    %22 = arith.subf %20, %21 : vector<1x128xf32>
    %cst_15 = arith.constant 0.000000e+00 : f32
    %23 = vector.broadcast %cst_15 : f32 to vector<1x128xf32>
    %24 = arith.maximumf %22, %23 : vector<1x128xf32>
    %25 = vector.broadcast %19 : vector<1x128xf32> to vector<64x128xf32>
    %26 = arith.subf %9, %25 : vector<64x128xf32>
    %cst_16 = arith.constant 9.99999974E-6 : f32
    %27 = vector.broadcast %cst_16 : f32 to vector<1x128xf32>
    %28 = arith.addf %24, %27 : vector<1x128xf32>
    %29 = math.rsqrt %28 : vector<1x128xf32>
    %30 = vector.broadcast %29 : vector<1x128xf32> to vector<64x128xf32>
    %31 = arith.mulf %26, %30 : vector<64x128xf32>
    %32 = vector.broadcast %6 : vector<1x128xf32> to vector<64x128xf32>
    %33 = arith.mulf %31, %32 : vector<64x128xf32>
    %34 = vector.broadcast %7 : vector<1x128xf32> to vector<64x128xf32>
    %35 = arith.addf %33, %34 : vector<64x128xf32>
    %cst_17 = arith.constant 0.000000e+00 : f32
    %36 = vector.broadcast %cst_17 : f32 to vector<64x128xf32>
    %37 = arith.maximumf %35, %36 : vector<64x128xf32>
    %38 = arith.truncf %37 : vector<64x128xf32> to vector<64x128xbf16>
    %c0_18 = arith.constant 0 : index
    %c0_19 = arith.constant 0 : index
    %39 = vector.load %arg7[%c0_18, %c0_19] : memref<128x128xbf16, #tpu.memory_space<vmem>>, vector<64x128xbf16>
    tpu.vector_store %arg7[%c0_18, %c0_19], %38 {strides = array<i32>} : memref<128x128xbf16, #tpu.memory_space<vmem>>, vector<64x128xbf16>,
    %40 = vector.extract_strided_slice %5 {offsets = [64, 0], sizes = [64, 128], strides = [1, 1]} : vector<128x128xf32> to vector<64x128xf32>
    %cst_20 = arith.constant dense<0.000000e+00> : vector<128xf32>
    %41 = vector.multi_reduction <add>, %40, %cst_20 [0] : vector<64x128xf32> to vector<128xf32>
    %42 = vector.shape_cast %41 : vector<128xf32> to vector<1x128xf32>
    %43 = arith.mulf %40, %40 : vector<64x128xf32>
    %cst_21 = arith.constant dense<0.000000e+00> : vector<128xf32>
    %44 = vector.multi_reduction <add>, %43, %cst_21 [0] : vector<64x128xf32> to vector<128xf32>
    %45 = vector.shape_cast %44 : vector<128xf32> to vector<1x128xf32>
    %46 = tpu.concatenate %42, %45 in 0 : vector<1x128xf32>, vector<1x128xf32> -> vector<2x128xf32>
    %cst_22 = arith.constant 1.562500e-02 : f32
    %47 = vector.broadcast %cst_22 : f32 to vector<2x128xf32>
    %48 = arith.mulf %46, %47 : vector<2x128xf32>
    %cst_23 = arith.constant dense<0.000000e+00> : vector<2x128xf32>
    %49 = tpu.matmul %48, %8, %cst_23 {dimension_numbers = #tpu.dot_dimension_numbers<[1], [0], [0], [1], [0, 0, 1, 1], [], []>} : vector<2x128xf32>, vector<128x128xf32>, vector<2x128xf32> -> vector<2x128xf32>
    %50 = vector.extract_strided_slice %49 {offsets = [0, 0], sizes = [1, 128], strides = [1, 1]} : vector<2x128xf32> to vector<1x128xf32>
    %51 = vector.extract_strided_slice %49 {offsets = [1, 0], sizes = [1, 128], strides = [1, 1]} : vector<2x128xf32> to vector<1x128xf32>
    %52 = arith.mulf %50, %50 : vector<1x128xf32>
    %53 = arith.subf %51, %52 : vector<1x128xf32>
    %cst_24 = arith.constant 0.000000e+00 : f32
    %54 = vector.broadcast %cst_24 : f32 to vector<1x128xf32>
    %55 = arith.maximumf %53, %54 : vector<1x128xf32>
    %56 = vector.broadcast %50 : vector<1x128xf32> to vector<64x128xf32>
    %57 = arith.subf %40, %56 : vector<64x128xf32>
    %cst_25 = arith.constant 9.99999974E-6 : f32
    %58 = vector.broadcast %cst_25 : f32 to vector<1x128xf32>
    %59 = arith.addf %55, %58 : vector<1x128xf32>
    %60 = math.rsqrt %59 : vector<1x128xf32>
    %61 = vector.broadcast %60 : vector<1x128xf32> to vector<64x128xf32>
    %62 = arith.mulf %57, %61 : vector<64x128xf32>
    %63 = vector.broadcast %6 : vector<1x128xf32> to vector<64x128xf32>
    %64 = arith.mulf %62, %63 : vector<64x128xf32>
    %65 = vector.broadcast %7 : vector<1x128xf32> to vector<64x128xf32>
    %66 = arith.addf %64, %65 : vector<64x128xf32>
    %cst_26 = arith.constant 0.000000e+00 : f32
    %67 = vector.broadcast %cst_26 : f32 to vector<64x128xf32>
    %68 = arith.maximumf %66, %67 : vector<64x128xf32>
    %69 = arith.truncf %68 : vector<64x128xf32> to vector<64x128xbf16>
    %c64 = arith.constant 64 : index
    %c0_27 = arith.constant 0 : index
    %70 = vector.load %arg7[%c64, %c0_27] : memref<128x128xbf16, #tpu.memory_space<vmem>>, vector<64x128xbf16>
    tpu.vector_store %arg7[%c64, %c0_27], %69 {strides = array<i32>} : memref<128x128xbf16, #tpu.memory_space<vmem>>, vector<64x128xbf16>,
    return
  }
  func.func @transform_0(%arg0: i32) -> (i32, i32) {
    %c0_i32 = arith.constant 0 : i32
    %c0_i32_0 = arith.constant 0 : i32
    %c0_i32_1 = arith.constant 0 : i32
    return %c0_i32, %c0_i32_0 : i32, i32
  }
  func.func @transform_1(%arg0: i32) -> (i32, i32) {
    %c0_i32 = arith.constant 0 : i32
    %c0_i32_0 = arith.constant 0 : i32
    %c0_i32_1 = arith.constant 0 : i32
    return %c0_i32, %c0_i32_0 : i32, i32
  }
  func.func @transform_2(%arg0: i32) -> (i32, i32) {
    %c0_i32 = arith.constant 0 : i32
    %c0_i32_0 = arith.constant 0 : i32
    %c0_i32_1 = arith.constant 0 : i32
    return %c0_i32, %c0_i32_0 : i32, i32
  }
  func.func @transform_3(%arg0: i32) -> (i32, i32) {
    %c0_i32 = arith.constant 0 : i32
    %c0_i32_0 = arith.constant 0 : i32
    %c0_i32_1 = arith.constant 0 : i32
    return %c0_i32, %c0_i32_0 : i32, i32
  }
  func.func @transform_4(%arg0: i32) -> (i32, i32) {
    %c0_i32 = arith.constant 0 : i32
    %c0_i32_0 = arith.constant 0 : i32
    %c0_i32_1 = arith.constant 0 : i32
    return %c0_i32, %c0_i32_0 : i32, i32
  }
  func.func @transform_5(%arg0: i32) -> (i32, i32) {
    %c0_i32 = arith.constant 0 : i32
    %c0_i32_0 = arith.constant 0 : i32
    %c0_i32_1 = arith.constant 0 : i32
    return %c0_i32, %c0_i32_0 : i32, i32
  }
  func.func @transform_6(%arg0: i32) -> (i32, i32) {
    %c0_i32 = arith.constant 0 : i32
    %c0_i32_0 = arith.constant 0 : i32
    %c0_i32_1 = arith.constant 0 : i32
    return %c0_i32, %c0_i32_0 : i32, i32
  }
}

module attributes {stable_mosaic.version = 11 : i64} {
  func.func @_conv_gn_kernel(%arg0: i32, %arg1: memref<128x128xbf16, #tpu.memory_space<vmem>>, %arg2: memref<128x128xbf16, #tpu.memory_space<vmem>>, %arg3: memref<1x128xf32, #tpu.memory_space<vmem>>, %arg4: memref<1x128xf32, #tpu.memory_space<vmem>>, %arg5: memref<1x128xf32, #tpu.memory_space<vmem>>, %arg6: memref<128x128xf32, #tpu.memory_space<vmem>>, %arg7: memref<128x128xbf16, #tpu.memory_space<vmem>>, %arg8: memref<128x128xbf16, #tpu.memory_space<vmem>>) attributes {dimension_semantics = [#tpu.dimension_semantics<arbitrary>], iteration_bounds = array<i64: 1>, scalar_prefetch = 0 : i64, scratch_operands = 0 : i64, tpu.core_type = #tpu.core_type<tc>, window_params = [{pipeline_mode = #tpu.pipeline_mode<synchronous>, transform_indices = @transform_0, window_bounds = array<i64: 128, 128>}, {pipeline_mode = #tpu.pipeline_mode<synchronous>, transform_indices = @transform_1, window_bounds = array<i64: 128, 128>}, {pipeline_mode = #tpu.pipeline_mode<synchronous>, transform_indices = @transform_2, window_bounds = array<i64: 1, 128>}, {pipeline_mode = #tpu.pipeline_mode<synchronous>, transform_indices = @transform_3, window_bounds = array<i64: 1, 128>}, {pipeline_mode = #tpu.pipeline_mode<synchronous>, transform_indices = @transform_4, window_bounds = array<i64: 1, 128>}, {pipeline_mode = #tpu.pipeline_mode<synchronous>, transform_indices = @transform_5, window_bounds = array<i64: 128, 128>}, {pipeline_mode = #tpu.pipeline_mode<synchronous>, transform_indices = @transform_6, window_bounds = array<i64: 128, 128>}, {pipeline_mode = #tpu.pipeline_mode<synchronous>, transform_indices = @transform_7, window_bounds = array<i64: 128, 128>}]} {
    %c0 = arith.constant 0 : index
    %c0_0 = arith.constant 0 : index
    %0 = vector.load %arg1[%c0, %c0_0] : memref<128x128xbf16, #tpu.memory_space<vmem>>, vector<128x128xbf16>
    %c0_1 = arith.constant 0 : index
    %c0_2 = arith.constant 0 : index
    %1 = vector.load %arg2[%c0_1, %c0_2] : memref<128x128xbf16, #tpu.memory_space<vmem>>, vector<128x128xbf16>
    %cst = arith.constant dense<0.000000e+00> : vector<128x128xf32>
    %2 = tpu.matmul %0, %1, %cst {dimension_numbers = #tpu.dot_dimension_numbers<[1], [0], [0], [1], [0, 0, 1, 1], [], []>} : vector<128x128xbf16>, vector<128x128xbf16>, vector<128x128xf32> -> vector<128x128xf32>
    %c0_3 = arith.constant 0 : index
    %c0_4 = arith.constant 0 : index
    %3 = vector.load %arg3[%c0_3, %c0_4] : memref<1x128xf32, #tpu.memory_space<vmem>>, vector<1x128xf32>
    %4 = vector.broadcast %3 : vector<1x128xf32> to vector<128x128xf32>
    %5 = arith.addf %2, %4 : vector<128x128xf32>
    %c0_5 = arith.constant 0 : index
    %c0_6 = arith.constant 0 : index
    %6 = vector.load %arg4[%c0_5, %c0_6] : memref<1x128xf32, #tpu.memory_space<vmem>>, vector<1x128xf32>
    %c0_7 = arith.constant 0 : index
    %c0_8 = arith.constant 0 : index
    %7 = vector.load %arg5[%c0_7, %c0_8] : memref<1x128xf32, #tpu.memory_space<vmem>>, vector<1x128xf32>
    %c0_9 = arith.constant 0 : index
    %c0_10 = arith.constant 0 : index
    %8 = vector.load %arg6[%c0_9, %c0_10] : memref<128x128xf32, #tpu.memory_space<vmem>>, vector<128x128xf32>
    %9 = vector.extract_strided_slice %5 {offsets = [0, 0], sizes = [64, 128], strides = [1, 1]} : vector<128x128xf32> to vector<64x128xf32>
    %cst_11 = arith.constant dense<0.000000e+00> : vector<128xf32>
    %10 = vector.multi_reduction <add>, %9, %cst_11 [0] : vector<64x128xf32> to vector<128xf32>
    %11 = vector.shape_cast %10 : vector<128xf32> to vector<1x128xf32>
    %12 = arith.mulf %9, %9 : vector<64x128xf32>
    %cst_12 = arith.constant dense<0.000000e+00> : vector<128xf32>
    %13 = vector.multi_reduction <add>, %12, %cst_12 [0] : vector<64x128xf32> to vector<128xf32>
    %14 = vector.shape_cast %13 : vector<128xf32> to vector<1x128xf32>
    %15 = tpu.concatenate %11, %14 in 0 : vector<1x128xf32>, vector<1x128xf32> -> vector<2x128xf32>
    %cst_13 = arith.constant 1.562500e-02 : f32
    %16 = vector.broadcast %cst_13 : f32 to vector<2x128xf32>
    %17 = arith.mulf %15, %16 : vector<2x128xf32>
    %cst_14 = arith.constant dense<0.000000e+00> : vector<2x128xf32>
    %18 = tpu.matmul %17, %8, %cst_14 {dimension_numbers = #tpu.dot_dimension_numbers<[1], [0], [0], [1], [0, 0, 1, 1], [], []>} : vector<2x128xf32>, vector<128x128xf32>, vector<2x128xf32> -> vector<2x128xf32>
    %19 = vector.extract_strided_slice %18 {offsets = [0, 0], sizes = [1, 128], strides = [1, 1]} : vector<2x128xf32> to vector<1x128xf32>
    %20 = vector.extract_strided_slice %18 {offsets = [1, 0], sizes = [1, 128], strides = [1, 1]} : vector<2x128xf32> to vector<1x128xf32>
    %21 = arith.mulf %19, %19 : vector<1x128xf32>
    %22 = arith.subf %20, %21 : vector<1x128xf32>
    %cst_15 = arith.constant 0.000000e+00 : f32
    %23 = vector.broadcast %cst_15 : f32 to vector<1x128xf32>
    %24 = arith.maximumf %22, %23 : vector<1x128xf32>
    %25 = vector.broadcast %19 : vector<1x128xf32> to vector<64x128xf32>
    %26 = arith.subf %9, %25 : vector<64x128xf32>
    %cst_16 = arith.constant 9.99999974E-6 : f32
    %27 = vector.broadcast %cst_16 : f32 to vector<1x128xf32>
    %28 = arith.addf %24, %27 : vector<1x128xf32>
    %29 = math.rsqrt %28 : vector<1x128xf32>
    %30 = vector.broadcast %29 : vector<1x128xf32> to vector<64x128xf32>
    %31 = arith.mulf %26, %30 : vector<64x128xf32>
    %32 = vector.broadcast %6 : vector<1x128xf32> to vector<64x128xf32>
    %33 = arith.mulf %31, %32 : vector<64x128xf32>
    %34 = vector.broadcast %7 : vector<1x128xf32> to vector<64x128xf32>
    %35 = arith.addf %33, %34 : vector<64x128xf32>
    %c0_17 = arith.constant 0 : index
    %c0_18 = arith.constant 0 : index
    %36 = vector.load %arg7[%c0_17, %c0_18] : memref<128x128xbf16, #tpu.memory_space<vmem>>, vector<64x128xbf16>
    %37 = arith.extf %36 : vector<64x128xbf16> to vector<64x128xf32>
    %38 = arith.addf %35, %37 : vector<64x128xf32>
    %39 = arith.truncf %38 : vector<64x128xf32> to vector<64x128xbf16>
    %c0_19 = arith.constant 0 : index
    %c0_20 = arith.constant 0 : index
    %40 = vector.load %arg8[%c0_19, %c0_20] : memref<128x128xbf16, #tpu.memory_space<vmem>>, vector<64x128xbf16>
    tpu.vector_store %arg8[%c0_19, %c0_20], %39 {strides = array<i32>} : memref<128x128xbf16, #tpu.memory_space<vmem>>, vector<64x128xbf16>,
    %41 = vector.extract_strided_slice %5 {offsets = [64, 0], sizes = [64, 128], strides = [1, 1]} : vector<128x128xf32> to vector<64x128xf32>
    %cst_21 = arith.constant dense<0.000000e+00> : vector<128xf32>
    %42 = vector.multi_reduction <add>, %41, %cst_21 [0] : vector<64x128xf32> to vector<128xf32>
    %43 = vector.shape_cast %42 : vector<128xf32> to vector<1x128xf32>
    %44 = arith.mulf %41, %41 : vector<64x128xf32>
    %cst_22 = arith.constant dense<0.000000e+00> : vector<128xf32>
    %45 = vector.multi_reduction <add>, %44, %cst_22 [0] : vector<64x128xf32> to vector<128xf32>
    %46 = vector.shape_cast %45 : vector<128xf32> to vector<1x128xf32>
    %47 = tpu.concatenate %43, %46 in 0 : vector<1x128xf32>, vector<1x128xf32> -> vector<2x128xf32>
    %cst_23 = arith.constant 1.562500e-02 : f32
    %48 = vector.broadcast %cst_23 : f32 to vector<2x128xf32>
    %49 = arith.mulf %47, %48 : vector<2x128xf32>
    %cst_24 = arith.constant dense<0.000000e+00> : vector<2x128xf32>
    %50 = tpu.matmul %49, %8, %cst_24 {dimension_numbers = #tpu.dot_dimension_numbers<[1], [0], [0], [1], [0, 0, 1, 1], [], []>} : vector<2x128xf32>, vector<128x128xf32>, vector<2x128xf32> -> vector<2x128xf32>
    %51 = vector.extract_strided_slice %50 {offsets = [0, 0], sizes = [1, 128], strides = [1, 1]} : vector<2x128xf32> to vector<1x128xf32>
    %52 = vector.extract_strided_slice %50 {offsets = [1, 0], sizes = [1, 128], strides = [1, 1]} : vector<2x128xf32> to vector<1x128xf32>
    %53 = arith.mulf %51, %51 : vector<1x128xf32>
    %54 = arith.subf %52, %53 : vector<1x128xf32>
    %cst_25 = arith.constant 0.000000e+00 : f32
    %55 = vector.broadcast %cst_25 : f32 to vector<1x128xf32>
    %56 = arith.maximumf %54, %55 : vector<1x128xf32>
    %57 = vector.broadcast %51 : vector<1x128xf32> to vector<64x128xf32>
    %58 = arith.subf %41, %57 : vector<64x128xf32>
    %cst_26 = arith.constant 9.99999974E-6 : f32
    %59 = vector.broadcast %cst_26 : f32 to vector<1x128xf32>
    %60 = arith.addf %56, %59 : vector<1x128xf32>
    %61 = math.rsqrt %60 : vector<1x128xf32>
    %62 = vector.broadcast %61 : vector<1x128xf32> to vector<64x128xf32>
    %63 = arith.mulf %58, %62 : vector<64x128xf32>
    %64 = vector.broadcast %6 : vector<1x128xf32> to vector<64x128xf32>
    %65 = arith.mulf %63, %64 : vector<64x128xf32>
    %66 = vector.broadcast %7 : vector<1x128xf32> to vector<64x128xf32>
    %67 = arith.addf %65, %66 : vector<64x128xf32>
    %c64 = arith.constant 64 : index
    %c0_27 = arith.constant 0 : index
    %68 = vector.load %arg7[%c64, %c0_27] : memref<128x128xbf16, #tpu.memory_space<vmem>>, vector<64x128xbf16>
    %69 = arith.extf %68 : vector<64x128xbf16> to vector<64x128xf32>
    %70 = arith.addf %67, %69 : vector<64x128xf32>
    %71 = arith.truncf %70 : vector<64x128xf32> to vector<64x128xbf16>
    %c64_28 = arith.constant 64 : index
    %c0_29 = arith.constant 0 : index
    %72 = vector.load %arg8[%c64_28, %c0_29] : memref<128x128xbf16, #tpu.memory_space<vmem>>, vector<64x128xbf16>
    tpu.vector_store %arg8[%c64_28, %c0_29], %71 {strides = array<i32>} : memref<128x128xbf16, #tpu.memory_space<vmem>>, vector<64x128xbf16>,
    return
  }
  func.func @transform_0(%arg0: i32) -> (i32, i32) {
    %c0_i32 = arith.constant 0 : i32
    %c0_i32_0 = arith.constant 0 : i32
    %c0_i32_1 = arith.constant 0 : i32
    return %c0_i32, %c0_i32_0 : i32, i32
  }
  func.func @transform_1(%arg0: i32) -> (i32, i32) {
    %c0_i32 = arith.constant 0 : i32
    %c0_i32_0 = arith.constant 0 : i32
    %c0_i32_1 = arith.constant 0 : i32
    return %c0_i32, %c0_i32_0 : i32, i32
  }
  func.func @transform_2(%arg0: i32) -> (i32, i32) {
    %c0_i32 = arith.constant 0 : i32
    %c0_i32_0 = arith.constant 0 : i32
    %c0_i32_1 = arith.constant 0 : i32
    return %c0_i32, %c0_i32_0 : i32, i32
  }
  func.func @transform_3(%arg0: i32) -> (i32, i32) {
    %c0_i32 = arith.constant 0 : i32
    %c0_i32_0 = arith.constant 0 : i32
    %c0_i32_1 = arith.constant 0 : i32
    return %c0_i32, %c0_i32_0 : i32, i32
  }
  func.func @transform_4(%arg0: i32) -> (i32, i32) {
    %c0_i32 = arith.constant 0 : i32
    %c0_i32_0 = arith.constant 0 : i32
    %c0_i32_1 = arith.constant 0 : i32
    return %c0_i32, %c0_i32_0 : i32, i32
  }
  func.func @transform_5(%arg0: i32) -> (i32, i32) {
    %c0_i32 = arith.constant 0 : i32
    %c0_i32_0 = arith.constant 0 : i32
    %c0_i32_1 = arith.constant 0 : i32
    return %c0_i32, %c0_i32_0 : i32, i32
  }
  func.func @transform_6(%arg0: i32) -> (i32, i32) {
    %c0_i32 = arith.constant 0 : i32
    %c0_i32_0 = arith.constant 0 : i32
    %c0_i32_1 = arith.constant 0 : i32
    return %c0_i32, %c0_i32_0 : i32, i32
  }
  func.func @transform_7(%arg0: i32) -> (i32, i32) {
    %c0_i32 = arith.constant 0 : i32
    %c0_i32_0 = arith.constant 0 : i32
    %c0_i32_1 = arith.constant 0 : i32
    return %c0_i32, %c0_i32_0 : i32, i32
  }
}

module attributes {stable_mosaic.version = 11 : i64} {
  func.func @_conv_gn_kernel(%arg0: i32, %arg1: memref<128x1152xbf16, #tpu.memory_space<vmem>>, %arg2: memref<1152x128xbf16, #tpu.memory_space<vmem>>, %arg3: memref<1x128xf32, #tpu.memory_space<vmem>>, %arg4: memref<1x128xf32, #tpu.memory_space<vmem>>, %arg5: memref<1x128xf32, #tpu.memory_space<vmem>>, %arg6: memref<128x128xf32, #tpu.memory_space<vmem>>, %arg7: memref<128x128xbf16, #tpu.memory_space<vmem>>) attributes {dimension_semantics = [#tpu.dimension_semantics<arbitrary>], iteration_bounds = array<i64: 1>, scalar_prefetch = 0 : i64, scratch_operands = 0 : i64, tpu.core_type = #tpu.core_type<tc>, window_params = [{pipeline_mode = #tpu.pipeline_mode<synchronous>, transform_indices = @transform_0, window_bounds = array<i64: 128, 1152>}, {pipeline_mode = #tpu.pipeline_mode<synchronous>, transform_indices = @transform_1, window_bounds = array<i64: 1152, 128>}, {pipeline_mode = #tpu.pipeline_mode<synchronous>, transform_indices = @transform_2, window_bounds = array<i64: 1, 128>}, {pipeline_mode = #tpu.pipeline_mode<synchronous>, transform_indices = @transform_3, window_bounds = array<i64: 1, 128>}, {pipeline_mode = #tpu.pipeline_mode<synchronous>, transform_indices = @transform_4, window_bounds = array<i64: 1, 128>}, {pipeline_mode = #tpu.pipeline_mode<synchronous>, transform_indices = @transform_5, window_bounds = array<i64: 128, 128>}, {pipeline_mode = #tpu.pipeline_mode<synchronous>, transform_indices = @transform_6, window_bounds = array<i64: 128, 128>}]} {
    %c0 = arith.constant 0 : index
    %c0_0 = arith.constant 0 : index
    %0 = vector.load %arg1[%c0, %c0_0] : memref<128x1152xbf16, #tpu.memory_space<vmem>>, vector<128x1152xbf16>
    %c0_1 = arith.constant 0 : index
    %c0_2 = arith.constant 0 : index
    %1 = vector.load %arg2[%c0_1, %c0_2] : memref<1152x128xbf16, #tpu.memory_space<vmem>>, vector<1152x128xbf16>
    %cst = arith.constant dense<0.000000e+00> : vector<128x128xf32>
    %2 = tpu.matmul %0, %1, %cst {dimension_numbers = #tpu.dot_dimension_numbers<[1], [0], [0], [1], [0, 0, 1, 1], [], []>} : vector<128x1152xbf16>, vector<1152x128xbf16>, vector<128x128xf32> -> vector<128x128xf32>
    %c0_3 = arith.constant 0 : index
    %c0_4 = arith.constant 0 : index
    %3 = vector.load %arg3[%c0_3, %c0_4] : memref<1x128xf32, #tpu.memory_space<vmem>>, vector<1x128xf32>
    %4 = vector.broadcast %3 : vector<1x128xf32> to vector<128x128xf32>
    %5 = arith.addf %2, %4 : vector<128x128xf32>
    %c0_5 = arith.constant 0 : index
    %c0_6 = arith.constant 0 : index
    %6 = vector.load %arg4[%c0_5, %c0_6] : memref<1x128xf32, #tpu.memory_space<vmem>>, vector<1x128xf32>
    %c0_7 = arith.constant 0 : index
    %c0_8 = arith.constant 0 : index
    %7 = vector.load %arg5[%c0_7, %c0_8] : memref<1x128xf32, #tpu.memory_space<vmem>>, vector<1x128xf32>
    %c0_9 = arith.constant 0 : index
    %c0_10 = arith.constant 0 : index
    %8 = vector.load %arg6[%c0_9, %c0_10] : memref<128x128xf32, #tpu.memory_space<vmem>>, vector<128x128xf32>
    %9 = vector.extract_strided_slice %5 {offsets = [0, 0], sizes = [64, 128], strides = [1, 1]} : vector<128x128xf32> to vector<64x128xf32>
    %cst_11 = arith.constant dense<0.000000e+00> : vector<128xf32>
    %10 = vector.multi_reduction <add>, %9, %cst_11 [0] : vector<64x128xf32> to vector<128xf32>
    %11 = vector.shape_cast %10 : vector<128xf32> to vector<1x128xf32>
    %12 = arith.mulf %9, %9 : vector<64x128xf32>
    %cst_12 = arith.constant dense<0.000000e+00> : vector<128xf32>
    %13 = vector.multi_reduction <add>, %12, %cst_12 [0] : vector<64x128xf32> to vector<128xf32>
    %14 = vector.shape_cast %13 : vector<128xf32> to vector<1x128xf32>
    %15 = tpu.concatenate %11, %14 in 0 : vector<1x128xf32>, vector<1x128xf32> -> vector<2x128xf32>
    %cst_13 = arith.constant 1.562500e-02 : f32
    %16 = vector.broadcast %cst_13 : f32 to vector<2x128xf32>
    %17 = arith.mulf %15, %16 : vector<2x128xf32>
    %cst_14 = arith.constant dense<0.000000e+00> : vector<2x128xf32>
    %18 = tpu.matmul %17, %8, %cst_14 {dimension_numbers = #tpu.dot_dimension_numbers<[1], [0], [0], [1], [0, 0, 1, 1], [], []>} : vector<2x128xf32>, vector<128x128xf32>, vector<2x128xf32> -> vector<2x128xf32>
    %19 = vector.extract_strided_slice %18 {offsets = [0, 0], sizes = [1, 128], strides = [1, 1]} : vector<2x128xf32> to vector<1x128xf32>
    %20 = vector.extract_strided_slice %18 {offsets = [1, 0], sizes = [1, 128], strides = [1, 1]} : vector<2x128xf32> to vector<1x128xf32>
    %21 = arith.mulf %19, %19 : vector<1x128xf32>
    %22 = arith.subf %20, %21 : vector<1x128xf32>
    %cst_15 = arith.constant 0.000000e+00 : f32
    %23 = vector.broadcast %cst_15 : f32 to vector<1x128xf32>
    %24 = arith.maximumf %22, %23 : vector<1x128xf32>
    %25 = vector.broadcast %19 : vector<1x128xf32> to vector<64x128xf32>
    %26 = arith.subf %9, %25 : vector<64x128xf32>
    %cst_16 = arith.constant 9.99999974E-6 : f32
    %27 = vector.broadcast %cst_16 : f32 to vector<1x128xf32>
    %28 = arith.addf %24, %27 : vector<1x128xf32>
    %29 = math.rsqrt %28 : vector<1x128xf32>
    %30 = vector.broadcast %29 : vector<1x128xf32> to vector<64x128xf32>
    %31 = arith.mulf %26, %30 : vector<64x128xf32>
    %32 = vector.broadcast %6 : vector<1x128xf32> to vector<64x128xf32>
    %33 = arith.mulf %31, %32 : vector<64x128xf32>
    %34 = vector.broadcast %7 : vector<1x128xf32> to vector<64x128xf32>
    %35 = arith.addf %33, %34 : vector<64x128xf32>
    %cst_17 = arith.constant 0.000000e+00 : f32
    %36 = vector.broadcast %cst_17 : f32 to vector<64x128xf32>
    %37 = arith.maximumf %35, %36 : vector<64x128xf32>
    %38 = arith.truncf %37 : vector<64x128xf32> to vector<64x128xbf16>
    %c0_18 = arith.constant 0 : index
    %c0_19 = arith.constant 0 : index
    %39 = vector.load %arg7[%c0_18, %c0_19] : memref<128x128xbf16, #tpu.memory_space<vmem>>, vector<64x128xbf16>
    tpu.vector_store %arg7[%c0_18, %c0_19], %38 {strides = array<i32>} : memref<128x128xbf16, #tpu.memory_space<vmem>>, vector<64x128xbf16>,
    %40 = vector.extract_strided_slice %5 {offsets = [64, 0], sizes = [64, 128], strides = [1, 1]} : vector<128x128xf32> to vector<64x128xf32>
    %cst_20 = arith.constant dense<0.000000e+00> : vector<128xf32>
    %41 = vector.multi_reduction <add>, %40, %cst_20 [0] : vector<64x128xf32> to vector<128xf32>
    %42 = vector.shape_cast %41 : vector<128xf32> to vector<1x128xf32>
    %43 = arith.mulf %40, %40 : vector<64x128xf32>
    %cst_21 = arith.constant dense<0.000000e+00> : vector<128xf32>
    %44 = vector.multi_reduction <add>, %43, %cst_21 [0] : vector<64x128xf32> to vector<128xf32>
    %45 = vector.shape_cast %44 : vector<128xf32> to vector<1x128xf32>
    %46 = tpu.concatenate %42, %45 in 0 : vector<1x128xf32>, vector<1x128xf32> -> vector<2x128xf32>
    %cst_22 = arith.constant 1.562500e-02 : f32
    %47 = vector.broadcast %cst_22 : f32 to vector<2x128xf32>
    %48 = arith.mulf %46, %47 : vector<2x128xf32>
    %cst_23 = arith.constant dense<0.000000e+00> : vector<2x128xf32>
    %49 = tpu.matmul %48, %8, %cst_23 {dimension_numbers = #tpu.dot_dimension_numbers<[1], [0], [0], [1], [0, 0, 1, 1], [], []>} : vector<2x128xf32>, vector<128x128xf32>, vector<2x128xf32> -> vector<2x128xf32>
    %50 = vector.extract_strided_slice %49 {offsets = [0, 0], sizes = [1, 128], strides = [1, 1]} : vector<2x128xf32> to vector<1x128xf32>
    %51 = vector.extract_strided_slice %49 {offsets = [1, 0], sizes = [1, 128], strides = [1, 1]} : vector<2x128xf32> to vector<1x128xf32>
    %52 = arith.mulf %50, %50 : vector<1x128xf32>
    %53 = arith.subf %51, %52 : vector<1x128xf32>
    %cst_24 = arith.constant 0.000000e+00 : f32
    %54 = vector.broadcast %cst_24 : f32 to vector<1x128xf32>
    %55 = arith.maximumf %53, %54 : vector<1x128xf32>
    %56 = vector.broadcast %50 : vector<1x128xf32> to vector<64x128xf32>
    %57 = arith.subf %40, %56 : vector<64x128xf32>
    %cst_25 = arith.constant 9.99999974E-6 : f32
    %58 = vector.broadcast %cst_25 : f32 to vector<1x128xf32>
    %59 = arith.addf %55, %58 : vector<1x128xf32>
    %60 = math.rsqrt %59 : vector<1x128xf32>
    %61 = vector.broadcast %60 : vector<1x128xf32> to vector<64x128xf32>
    %62 = arith.mulf %57, %61 : vector<64x128xf32>
    %63 = vector.broadcast %6 : vector<1x128xf32> to vector<64x128xf32>
    %64 = arith.mulf %62, %63 : vector<64x128xf32>
    %65 = vector.broadcast %7 : vector<1x128xf32> to vector<64x128xf32>
    %66 = arith.addf %64, %65 : vector<64x128xf32>
    %cst_26 = arith.constant 0.000000e+00 : f32
    %67 = vector.broadcast %cst_26 : f32 to vector<64x128xf32>
    %68 = arith.maximumf %66, %67 : vector<64x128xf32>
    %69 = arith.truncf %68 : vector<64x128xf32> to vector<64x128xbf16>
    %c64 = arith.constant 64 : index
    %c0_27 = arith.constant 0 : index
    %70 = vector.load %arg7[%c64, %c0_27] : memref<128x128xbf16, #tpu.memory_space<vmem>>, vector<64x128xbf16>
    tpu.vector_store %arg7[%c64, %c0_27], %69 {strides = array<i32>} : memref<128x128xbf16, #tpu.memory_space<vmem>>, vector<64x128xbf16>,
    return
  }
  func.func @transform_0(%arg0: i32) -> (i32, i32) {
    %c0_i32 = arith.constant 0 : i32
    %c0_i32_0 = arith.constant 0 : i32
    %c0_i32_1 = arith.constant 0 : i32
    return %c0_i32, %c0_i32_0 : i32, i32
  }
  func.func @transform_1(%arg0: i32) -> (i32, i32) {
    %c0_i32 = arith.constant 0 : i32
    %c0_i32_0 = arith.constant 0 : i32
    %c0_i32_1 = arith.constant 0 : i32
    return %c0_i32, %c0_i32_0 : i32, i32
  }
  func.func @transform_2(%arg0: i32) -> (i32, i32) {
    %c0_i32 = arith.constant 0 : i32
    %c0_i32_0 = arith.constant 0 : i32
    %c0_i32_1 = arith.constant 0 : i32
    return %c0_i32, %c0_i32_0 : i32, i32
  }
  func.func @transform_3(%arg0: i32) -> (i32, i32) {
    %c0_i32 = arith.constant 0 : i32
    %c0_i32_0 = arith.constant 0 : i32
    %c0_i32_1 = arith.constant 0 : i32
    return %c0_i32, %c0_i32_0 : i32, i32
  }
  func.func @transform_4(%arg0: i32) -> (i32, i32) {
    %c0_i32 = arith.constant 0 : i32
    %c0_i32_0 = arith.constant 0 : i32
    %c0_i32_1 = arith.constant 0 : i32
    return %c0_i32, %c0_i32_0 : i32, i32
  }
  func.func @transform_5(%arg0: i32) -> (i32, i32) {
    %c0_i32 = arith.constant 0 : i32
    %c0_i32_0 = arith.constant 0 : i32
    %c0_i32_1 = arith.constant 0 : i32
    return %c0_i32, %c0_i32_0 : i32, i32
  }
  func.func @transform_6(%arg0: i32) -> (i32, i32) {
    %c0_i32 = arith.constant 0 : i32
    %c0_i32_0 = arith.constant 0 : i32
    %c0_i32_1 = arith.constant 0 : i32
    return %c0_i32, %c0_i32_0 : i32, i32
  }
}

module attributes {stable_mosaic.version = 11 : i64} {
  func.func @_conv_gn_kernel(%arg0: i32, %arg1: memref<32x1152xbf16, #tpu.memory_space<vmem>>, %arg2: memref<1152x128xbf16, #tpu.memory_space<vmem>>, %arg3: memref<1x128xf32, #tpu.memory_space<vmem>>, %arg4: memref<1x128xf32, #tpu.memory_space<vmem>>, %arg5: memref<1x128xf32, #tpu.memory_space<vmem>>, %arg6: memref<128x128xf32, #tpu.memory_space<vmem>>, %arg7: memref<32x128xbf16, #tpu.memory_space<vmem>>) attributes {dimension_semantics = [#tpu.dimension_semantics<arbitrary>], iteration_bounds = array<i64: 1>, scalar_prefetch = 0 : i64, scratch_operands = 0 : i64, tpu.core_type = #tpu.core_type<tc>, window_params = [{pipeline_mode = #tpu.pipeline_mode<synchronous>, transform_indices = @transform_0, window_bounds = array<i64: 32, 1152>}, {pipeline_mode = #tpu.pipeline_mode<synchronous>, transform_indices = @transform_1, window_bounds = array<i64: 1152, 128>}, {pipeline_mode = #tpu.pipeline_mode<synchronous>, transform_indices = @transform_2, window_bounds = array<i64: 1, 128>}, {pipeline_mode = #tpu.pipeline_mode<synchronous>, transform_indices = @transform_3, window_bounds = array<i64: 1, 128>}, {pipeline_mode = #tpu.pipeline_mode<synchronous>, transform_indices = @transform_4, window_bounds = array<i64: 1, 128>}, {pipeline_mode = #tpu.pipeline_mode<synchronous>, transform_indices = @transform_5, window_bounds = array<i64: 128, 128>}, {pipeline_mode = #tpu.pipeline_mode<synchronous>, transform_indices = @transform_6, window_bounds = array<i64: 32, 128>}]} {
    %c0 = arith.constant 0 : index
    %c0_0 = arith.constant 0 : index
    %0 = vector.load %arg1[%c0, %c0_0] : memref<32x1152xbf16, #tpu.memory_space<vmem>>, vector<32x1152xbf16>
    %c0_1 = arith.constant 0 : index
    %c0_2 = arith.constant 0 : index
    %1 = vector.load %arg2[%c0_1, %c0_2] : memref<1152x128xbf16, #tpu.memory_space<vmem>>, vector<1152x128xbf16>
    %cst = arith.constant dense<0.000000e+00> : vector<32x128xf32>
    %2 = tpu.matmul %0, %1, %cst {dimension_numbers = #tpu.dot_dimension_numbers<[1], [0], [0], [1], [0, 0, 1, 1], [], []>} : vector<32x1152xbf16>, vector<1152x128xbf16>, vector<32x128xf32> -> vector<32x128xf32>
    %c0_3 = arith.constant 0 : index
    %c0_4 = arith.constant 0 : index
    %3 = vector.load %arg3[%c0_3, %c0_4] : memref<1x128xf32, #tpu.memory_space<vmem>>, vector<1x128xf32>
    %4 = vector.broadcast %3 : vector<1x128xf32> to vector<32x128xf32>
    %5 = arith.addf %2, %4 : vector<32x128xf32>
    %c0_5 = arith.constant 0 : index
    %c0_6 = arith.constant 0 : index
    %6 = vector.load %arg4[%c0_5, %c0_6] : memref<1x128xf32, #tpu.memory_space<vmem>>, vector<1x128xf32>
    %c0_7 = arith.constant 0 : index
    %c0_8 = arith.constant 0 : index
    %7 = vector.load %arg5[%c0_7, %c0_8] : memref<1x128xf32, #tpu.memory_space<vmem>>, vector<1x128xf32>
    %c0_9 = arith.constant 0 : index
    %c0_10 = arith.constant 0 : index
    %8 = vector.load %arg6[%c0_9, %c0_10] : memref<128x128xf32, #tpu.memory_space<vmem>>, vector<128x128xf32>
    %9 = vector.extract_strided_slice %5 {offsets = [0, 0], sizes = [16, 128], strides = [1, 1]} : vector<32x128xf32> to vector<16x128xf32>
    %cst_11 = arith.constant dense<0.000000e+00> : vector<128xf32>
    %10 = vector.multi_reduction <add>, %9, %cst_11 [0] : vector<16x128xf32> to vector<128xf32>
    %11 = vector.shape_cast %10 : vector<128xf32> to vector<1x128xf32>
    %12 = arith.mulf %9, %9 : vector<16x128xf32>
    %cst_12 = arith.constant dense<0.000000e+00> : vector<128xf32>
    %13 = vector.multi_reduction <add>, %12, %cst_12 [0] : vector<16x128xf32> to vector<128xf32>
    %14 = vector.shape_cast %13 : vector<128xf32> to vector<1x128xf32>
    %15 = tpu.concatenate %11, %14 in 0 : vector<1x128xf32>, vector<1x128xf32> -> vector<2x128xf32>
    %cst_13 = arith.constant 6.250000e-02 : f32
    %16 = vector.broadcast %cst_13 : f32 to vector<2x128xf32>
    %17 = arith.mulf %15, %16 : vector<2x128xf32>
    %cst_14 = arith.constant dense<0.000000e+00> : vector<2x128xf32>
    %18 = tpu.matmul %17, %8, %cst_14 {dimension_numbers = #tpu.dot_dimension_numbers<[1], [0], [0], [1], [0, 0, 1, 1], [], []>} : vector<2x128xf32>, vector<128x128xf32>, vector<2x128xf32> -> vector<2x128xf32>
    %19 = vector.extract_strided_slice %18 {offsets = [0, 0], sizes = [1, 128], strides = [1, 1]} : vector<2x128xf32> to vector<1x128xf32>
    %20 = vector.extract_strided_slice %18 {offsets = [1, 0], sizes = [1, 128], strides = [1, 1]} : vector<2x128xf32> to vector<1x128xf32>
    %21 = arith.mulf %19, %19 : vector<1x128xf32>
    %22 = arith.subf %20, %21 : vector<1x128xf32>
    %cst_15 = arith.constant 0.000000e+00 : f32
    %23 = vector.broadcast %cst_15 : f32 to vector<1x128xf32>
    %24 = arith.maximumf %22, %23 : vector<1x128xf32>
    %25 = vector.broadcast %19 : vector<1x128xf32> to vector<16x128xf32>
    %26 = arith.subf %9, %25 : vector<16x128xf32>
    %cst_16 = arith.constant 9.99999974E-6 : f32
    %27 = vector.broadcast %cst_16 : f32 to vector<1x128xf32>
    %28 = arith.addf %24, %27 : vector<1x128xf32>
    %29 = math.rsqrt %28 : vector<1x128xf32>
    %30 = vector.broadcast %29 : vector<1x128xf32> to vector<16x128xf32>
    %31 = arith.mulf %26, %30 : vector<16x128xf32>
    %32 = vector.broadcast %6 : vector<1x128xf32> to vector<16x128xf32>
    %33 = arith.mulf %31, %32 : vector<16x128xf32>
    %34 = vector.broadcast %7 : vector<1x128xf32> to vector<16x128xf32>
    %35 = arith.addf %33, %34 : vector<16x128xf32>
    %cst_17 = arith.constant 0.000000e+00 : f32
    %36 = vector.broadcast %cst_17 : f32 to vector<16x128xf32>
    %37 = arith.maximumf %35, %36 : vector<16x128xf32>
    %38 = arith.truncf %37 : vector<16x128xf32> to vector<16x128xbf16>
    %c0_18 = arith.constant 0 : index
    %c0_19 = arith.constant 0 : index
    %39 = vector.load %arg7[%c0_18, %c0_19] : memref<32x128xbf16, #tpu.memory_space<vmem>>, vector<16x128xbf16>
    tpu.vector_store %arg7[%c0_18, %c0_19], %38 {strides = array<i32>} : memref<32x128xbf16, #tpu.memory_space<vmem>>, vector<16x128xbf16>,
    %40 = vector.extract_strided_slice %5 {offsets = [16, 0], sizes = [16, 128], strides = [1, 1]} : vector<32x128xf32> to vector<16x128xf32>
    %cst_20 = arith.constant dense<0.000000e+00> : vector<128xf32>
    %41 = vector.multi_reduction <add>, %40, %cst_20 [0] : vector<16x128xf32> to vector<128xf32>
    %42 = vector.shape_cast %41 : vector<128xf32> to vector<1x128xf32>
    %43 = arith.mulf %40, %40 : vector<16x128xf32>
    %cst_21 = arith.constant dense<0.000000e+00> : vector<128xf32>
    %44 = vector.multi_reduction <add>, %43, %cst_21 [0] : vector<16x128xf32> to vector<128xf32>
    %45 = vector.shape_cast %44 : vector<128xf32> to vector<1x128xf32>
    %46 = tpu.concatenate %42, %45 in 0 : vector<1x128xf32>, vector<1x128xf32> -> vector<2x128xf32>
    %cst_22 = arith.constant 6.250000e-02 : f32
    %47 = vector.broadcast %cst_22 : f32 to vector<2x128xf32>
    %48 = arith.mulf %46, %47 : vector<2x128xf32>
    %cst_23 = arith.constant dense<0.000000e+00> : vector<2x128xf32>
    %49 = tpu.matmul %48, %8, %cst_23 {dimension_numbers = #tpu.dot_dimension_numbers<[1], [0], [0], [1], [0, 0, 1, 1], [], []>} : vector<2x128xf32>, vector<128x128xf32>, vector<2x128xf32> -> vector<2x128xf32>
    %50 = vector.extract_strided_slice %49 {offsets = [0, 0], sizes = [1, 128], strides = [1, 1]} : vector<2x128xf32> to vector<1x128xf32>
    %51 = vector.extract_strided_slice %49 {offsets = [1, 0], sizes = [1, 128], strides = [1, 1]} : vector<2x128xf32> to vector<1x128xf32>
    %52 = arith.mulf %50, %50 : vector<1x128xf32>
    %53 = arith.subf %51, %52 : vector<1x128xf32>
    %cst_24 = arith.constant 0.000000e+00 : f32
    %54 = vector.broadcast %cst_24 : f32 to vector<1x128xf32>
    %55 = arith.maximumf %53, %54 : vector<1x128xf32>
    %56 = vector.broadcast %50 : vector<1x128xf32> to vector<16x128xf32>
    %57 = arith.subf %40, %56 : vector<16x128xf32>
    %cst_25 = arith.constant 9.99999974E-6 : f32
    %58 = vector.broadcast %cst_25 : f32 to vector<1x128xf32>
    %59 = arith.addf %55, %58 : vector<1x128xf32>
    %60 = math.rsqrt %59 : vector<1x128xf32>
    %61 = vector.broadcast %60 : vector<1x128xf32> to vector<16x128xf32>
    %62 = arith.mulf %57, %61 : vector<16x128xf32>
    %63 = vector.broadcast %6 : vector<1x128xf32> to vector<16x128xf32>
    %64 = arith.mulf %62, %63 : vector<16x128xf32>
    %65 = vector.broadcast %7 : vector<1x128xf32> to vector<16x128xf32>
    %66 = arith.addf %64, %65 : vector<16x128xf32>
    %cst_26 = arith.constant 0.000000e+00 : f32
    %67 = vector.broadcast %cst_26 : f32 to vector<16x128xf32>
    %68 = arith.maximumf %66, %67 : vector<16x128xf32>
    %69 = arith.truncf %68 : vector<16x128xf32> to vector<16x128xbf16>
    %c16 = arith.constant 16 : index
    %c0_27 = arith.constant 0 : index
    %70 = vector.load %arg7[%c16, %c0_27] : memref<32x128xbf16, #tpu.memory_space<vmem>>, vector<16x128xbf16>
    tpu.vector_store %arg7[%c16, %c0_27], %69 {strides = array<i32>} : memref<32x128xbf16, #tpu.memory_space<vmem>>, vector<16x128xbf16>,
    return
  }
  func.func @transform_0(%arg0: i32) -> (i32, i32) {
    %c0_i32 = arith.constant 0 : i32
    %c0_i32_0 = arith.constant 0 : i32
    %c0_i32_1 = arith.constant 0 : i32
    return %c0_i32, %c0_i32_0 : i32, i32
  }
  func.func @transform_1(%arg0: i32) -> (i32, i32) {
    %c0_i32 = arith.constant 0 : i32
    %c0_i32_0 = arith.constant 0 : i32
    %c0_i32_1 = arith.constant 0 : i32
    return %c0_i32, %c0_i32_0 : i32, i32
  }
  func.func @transform_2(%arg0: i32) -> (i32, i32) {
    %c0_i32 = arith.constant 0 : i32
    %c0_i32_0 = arith.constant 0 : i32
    %c0_i32_1 = arith.constant 0 : i32
    return %c0_i32, %c0_i32_0 : i32, i32
  }
  func.func @transform_3(%arg0: i32) -> (i32, i32) {
    %c0_i32 = arith.constant 0 : i32
    %c0_i32_0 = arith.constant 0 : i32
    %c0_i32_1 = arith.constant 0 : i32
    return %c0_i32, %c0_i32_0 : i32, i32
  }
  func.func @transform_4(%arg0: i32) -> (i32, i32) {
    %c0_i32 = arith.constant 0 : i32
    %c0_i32_0 = arith.constant 0 : i32
    %c0_i32_1 = arith.constant 0 : i32
    return %c0_i32, %c0_i32_0 : i32, i32
  }
  func.func @transform_5(%arg0: i32) -> (i32, i32) {
    %c0_i32 = arith.constant 0 : i32
    %c0_i32_0 = arith.constant 0 : i32
    %c0_i32_1 = arith.constant 0 : i32
    return %c0_i32, %c0_i32_0 : i32, i32
  }
  func.func @transform_6(%arg0: i32) -> (i32, i32) {
    %c0_i32 = arith.constant 0 : i32
    %c0_i32_0 = arith.constant 0 : i32
    %c0_i32_1 = arith.constant 0 : i32
    return %c0_i32, %c0_i32_0 : i32, i32
  }
}

module attributes {stable_mosaic.version = 11 : i64} {
  func.func @_conv_gn_kernel(%arg0: i32, %arg1: memref<32x128xbf16, #tpu.memory_space<vmem>>, %arg2: memref<128x128xbf16, #tpu.memory_space<vmem>>, %arg3: memref<1x128xf32, #tpu.memory_space<vmem>>, %arg4: memref<1x128xf32, #tpu.memory_space<vmem>>, %arg5: memref<1x128xf32, #tpu.memory_space<vmem>>, %arg6: memref<128x128xf32, #tpu.memory_space<vmem>>, %arg7: memref<32x128xbf16, #tpu.memory_space<vmem>>, %arg8: memref<32x128xbf16, #tpu.memory_space<vmem>>) attributes {dimension_semantics = [#tpu.dimension_semantics<arbitrary>], iteration_bounds = array<i64: 1>, scalar_prefetch = 0 : i64, scratch_operands = 0 : i64, tpu.core_type = #tpu.core_type<tc>, window_params = [{pipeline_mode = #tpu.pipeline_mode<synchronous>, transform_indices = @transform_0, window_bounds = array<i64: 32, 128>}, {pipeline_mode = #tpu.pipeline_mode<synchronous>, transform_indices = @transform_1, window_bounds = array<i64: 128, 128>}, {pipeline_mode = #tpu.pipeline_mode<synchronous>, transform_indices = @transform_2, window_bounds = array<i64: 1, 128>}, {pipeline_mode = #tpu.pipeline_mode<synchronous>, transform_indices = @transform_3, window_bounds = array<i64: 1, 128>}, {pipeline_mode = #tpu.pipeline_mode<synchronous>, transform_indices = @transform_4, window_bounds = array<i64: 1, 128>}, {pipeline_mode = #tpu.pipeline_mode<synchronous>, transform_indices = @transform_5, window_bounds = array<i64: 128, 128>}, {pipeline_mode = #tpu.pipeline_mode<synchronous>, transform_indices = @transform_6, window_bounds = array<i64: 32, 128>}, {pipeline_mode = #tpu.pipeline_mode<synchronous>, transform_indices = @transform_7, window_bounds = array<i64: 32, 128>}]} {
    %c0 = arith.constant 0 : index
    %c0_0 = arith.constant 0 : index
    %0 = vector.load %arg1[%c0, %c0_0] : memref<32x128xbf16, #tpu.memory_space<vmem>>, vector<32x128xbf16>
    %c0_1 = arith.constant 0 : index
    %c0_2 = arith.constant 0 : index
    %1 = vector.load %arg2[%c0_1, %c0_2] : memref<128x128xbf16, #tpu.memory_space<vmem>>, vector<128x128xbf16>
    %cst = arith.constant dense<0.000000e+00> : vector<32x128xf32>
    %2 = tpu.matmul %0, %1, %cst {dimension_numbers = #tpu.dot_dimension_numbers<[1], [0], [0], [1], [0, 0, 1, 1], [], []>} : vector<32x128xbf16>, vector<128x128xbf16>, vector<32x128xf32> -> vector<32x128xf32>
    %c0_3 = arith.constant 0 : index
    %c0_4 = arith.constant 0 : index
    %3 = vector.load %arg3[%c0_3, %c0_4] : memref<1x128xf32, #tpu.memory_space<vmem>>, vector<1x128xf32>
    %4 = vector.broadcast %3 : vector<1x128xf32> to vector<32x128xf32>
    %5 = arith.addf %2, %4 : vector<32x128xf32>
    %c0_5 = arith.constant 0 : index
    %c0_6 = arith.constant 0 : index
    %6 = vector.load %arg4[%c0_5, %c0_6] : memref<1x128xf32, #tpu.memory_space<vmem>>, vector<1x128xf32>
    %c0_7 = arith.constant 0 : index
    %c0_8 = arith.constant 0 : index
    %7 = vector.load %arg5[%c0_7, %c0_8] : memref<1x128xf32, #tpu.memory_space<vmem>>, vector<1x128xf32>
    %c0_9 = arith.constant 0 : index
    %c0_10 = arith.constant 0 : index
    %8 = vector.load %arg6[%c0_9, %c0_10] : memref<128x128xf32, #tpu.memory_space<vmem>>, vector<128x128xf32>
    %9 = vector.extract_strided_slice %5 {offsets = [0, 0], sizes = [16, 128], strides = [1, 1]} : vector<32x128xf32> to vector<16x128xf32>
    %cst_11 = arith.constant dense<0.000000e+00> : vector<128xf32>
    %10 = vector.multi_reduction <add>, %9, %cst_11 [0] : vector<16x128xf32> to vector<128xf32>
    %11 = vector.shape_cast %10 : vector<128xf32> to vector<1x128xf32>
    %12 = arith.mulf %9, %9 : vector<16x128xf32>
    %cst_12 = arith.constant dense<0.000000e+00> : vector<128xf32>
    %13 = vector.multi_reduction <add>, %12, %cst_12 [0] : vector<16x128xf32> to vector<128xf32>
    %14 = vector.shape_cast %13 : vector<128xf32> to vector<1x128xf32>
    %15 = tpu.concatenate %11, %14 in 0 : vector<1x128xf32>, vector<1x128xf32> -> vector<2x128xf32>
    %cst_13 = arith.constant 6.250000e-02 : f32
    %16 = vector.broadcast %cst_13 : f32 to vector<2x128xf32>
    %17 = arith.mulf %15, %16 : vector<2x128xf32>
    %cst_14 = arith.constant dense<0.000000e+00> : vector<2x128xf32>
    %18 = tpu.matmul %17, %8, %cst_14 {dimension_numbers = #tpu.dot_dimension_numbers<[1], [0], [0], [1], [0, 0, 1, 1], [], []>} : vector<2x128xf32>, vector<128x128xf32>, vector<2x128xf32> -> vector<2x128xf32>
    %19 = vector.extract_strided_slice %18 {offsets = [0, 0], sizes = [1, 128], strides = [1, 1]} : vector<2x128xf32> to vector<1x128xf32>
    %20 = vector.extract_strided_slice %18 {offsets = [1, 0], sizes = [1, 128], strides = [1, 1]} : vector<2x128xf32> to vector<1x128xf32>
    %21 = arith.mulf %19, %19 : vector<1x128xf32>
    %22 = arith.subf %20, %21 : vector<1x128xf32>
    %cst_15 = arith.constant 0.000000e+00 : f32
    %23 = vector.broadcast %cst_15 : f32 to vector<1x128xf32>
    %24 = arith.maximumf %22, %23 : vector<1x128xf32>
    %25 = vector.broadcast %19 : vector<1x128xf32> to vector<16x128xf32>
    %26 = arith.subf %9, %25 : vector<16x128xf32>
    %cst_16 = arith.constant 9.99999974E-6 : f32
    %27 = vector.broadcast %cst_16 : f32 to vector<1x128xf32>
    %28 = arith.addf %24, %27 : vector<1x128xf32>
    %29 = math.rsqrt %28 : vector<1x128xf32>
    %30 = vector.broadcast %29 : vector<1x128xf32> to vector<16x128xf32>
    %31 = arith.mulf %26, %30 : vector<16x128xf32>
    %32 = vector.broadcast %6 : vector<1x128xf32> to vector<16x128xf32>
    %33 = arith.mulf %31, %32 : vector<16x128xf32>
    %34 = vector.broadcast %7 : vector<1x128xf32> to vector<16x128xf32>
    %35 = arith.addf %33, %34 : vector<16x128xf32>
    %c0_17 = arith.constant 0 : index
    %c0_18 = arith.constant 0 : index
    %36 = vector.load %arg7[%c0_17, %c0_18] : memref<32x128xbf16, #tpu.memory_space<vmem>>, vector<16x128xbf16>
    %37 = arith.extf %36 : vector<16x128xbf16> to vector<16x128xf32>
    %38 = arith.addf %35, %37 : vector<16x128xf32>
    %39 = arith.truncf %38 : vector<16x128xf32> to vector<16x128xbf16>
    %c0_19 = arith.constant 0 : index
    %c0_20 = arith.constant 0 : index
    %40 = vector.load %arg8[%c0_19, %c0_20] : memref<32x128xbf16, #tpu.memory_space<vmem>>, vector<16x128xbf16>
    tpu.vector_store %arg8[%c0_19, %c0_20], %39 {strides = array<i32>} : memref<32x128xbf16, #tpu.memory_space<vmem>>, vector<16x128xbf16>,
    %41 = vector.extract_strided_slice %5 {offsets = [16, 0], sizes = [16, 128], strides = [1, 1]} : vector<32x128xf32> to vector<16x128xf32>
    %cst_21 = arith.constant dense<0.000000e+00> : vector<128xf32>
    %42 = vector.multi_reduction <add>, %41, %cst_21 [0] : vector<16x128xf32> to vector<128xf32>
    %43 = vector.shape_cast %42 : vector<128xf32> to vector<1x128xf32>
    %44 = arith.mulf %41, %41 : vector<16x128xf32>
    %cst_22 = arith.constant dense<0.000000e+00> : vector<128xf32>
    %45 = vector.multi_reduction <add>, %44, %cst_22 [0] : vector<16x128xf32> to vector<128xf32>
    %46 = vector.shape_cast %45 : vector<128xf32> to vector<1x128xf32>
    %47 = tpu.concatenate %43, %46 in 0 : vector<1x128xf32>, vector<1x128xf32> -> vector<2x128xf32>
    %cst_23 = arith.constant 6.250000e-02 : f32
    %48 = vector.broadcast %cst_23 : f32 to vector<2x128xf32>
    %49 = arith.mulf %47, %48 : vector<2x128xf32>
    %cst_24 = arith.constant dense<0.000000e+00> : vector<2x128xf32>
    %50 = tpu.matmul %49, %8, %cst_24 {dimension_numbers = #tpu.dot_dimension_numbers<[1], [0], [0], [1], [0, 0, 1, 1], [], []>} : vector<2x128xf32>, vector<128x128xf32>, vector<2x128xf32> -> vector<2x128xf32>
    %51 = vector.extract_strided_slice %50 {offsets = [0, 0], sizes = [1, 128], strides = [1, 1]} : vector<2x128xf32> to vector<1x128xf32>
    %52 = vector.extract_strided_slice %50 {offsets = [1, 0], sizes = [1, 128], strides = [1, 1]} : vector<2x128xf32> to vector<1x128xf32>
    %53 = arith.mulf %51, %51 : vector<1x128xf32>
    %54 = arith.subf %52, %53 : vector<1x128xf32>
    %cst_25 = arith.constant 0.000000e+00 : f32
    %55 = vector.broadcast %cst_25 : f32 to vector<1x128xf32>
    %56 = arith.maximumf %54, %55 : vector<1x128xf32>
    %57 = vector.broadcast %51 : vector<1x128xf32> to vector<16x128xf32>
    %58 = arith.subf %41, %57 : vector<16x128xf32>
    %cst_26 = arith.constant 9.99999974E-6 : f32
    %59 = vector.broadcast %cst_26 : f32 to vector<1x128xf32>
    %60 = arith.addf %56, %59 : vector<1x128xf32>
    %61 = math.rsqrt %60 : vector<1x128xf32>
    %62 = vector.broadcast %61 : vector<1x128xf32> to vector<16x128xf32>
    %63 = arith.mulf %58, %62 : vector<16x128xf32>
    %64 = vector.broadcast %6 : vector<1x128xf32> to vector<16x128xf32>
    %65 = arith.mulf %63, %64 : vector<16x128xf32>
    %66 = vector.broadcast %7 : vector<1x128xf32> to vector<16x128xf32>
    %67 = arith.addf %65, %66 : vector<16x128xf32>
    %c16 = arith.constant 16 : index
    %c0_27 = arith.constant 0 : index
    %68 = vector.load %arg7[%c16, %c0_27] : memref<32x128xbf16, #tpu.memory_space<vmem>>, vector<16x128xbf16>
    %69 = arith.extf %68 : vector<16x128xbf16> to vector<16x128xf32>
    %70 = arith.addf %67, %69 : vector<16x128xf32>
    %71 = arith.truncf %70 : vector<16x128xf32> to vector<16x128xbf16>
    %c16_28 = arith.constant 16 : index
    %c0_29 = arith.constant 0 : index
    %72 = vector.load %arg8[%c16_28, %c0_29] : memref<32x128xbf16, #tpu.memory_space<vmem>>, vector<16x128xbf16>
    tpu.vector_store %arg8[%c16_28, %c0_29], %71 {strides = array<i32>} : memref<32x128xbf16, #tpu.memory_space<vmem>>, vector<16x128xbf16>,
    return
  }
  func.func @transform_0(%arg0: i32) -> (i32, i32) {
    %c0_i32 = arith.constant 0 : i32
    %c0_i32_0 = arith.constant 0 : i32
    %c0_i32_1 = arith.constant 0 : i32
    return %c0_i32, %c0_i32_0 : i32, i32
  }
  func.func @transform_1(%arg0: i32) -> (i32, i32) {
    %c0_i32 = arith.constant 0 : i32
    %c0_i32_0 = arith.constant 0 : i32
    %c0_i32_1 = arith.constant 0 : i32
    return %c0_i32, %c0_i32_0 : i32, i32
  }
  func.func @transform_2(%arg0: i32) -> (i32, i32) {
    %c0_i32 = arith.constant 0 : i32
    %c0_i32_0 = arith.constant 0 : i32
    %c0_i32_1 = arith.constant 0 : i32
    return %c0_i32, %c0_i32_0 : i32, i32
  }
  func.func @transform_3(%arg0: i32) -> (i32, i32) {
    %c0_i32 = arith.constant 0 : i32
    %c0_i32_0 = arith.constant 0 : i32
    %c0_i32_1 = arith.constant 0 : i32
    return %c0_i32, %c0_i32_0 : i32, i32
  }
  func.func @transform_4(%arg0: i32) -> (i32, i32) {
    %c0_i32 = arith.constant 0 : i32
    %c0_i32_0 = arith.constant 0 : i32
    %c0_i32_1 = arith.constant 0 : i32
    return %c0_i32, %c0_i32_0 : i32, i32
  }
  func.func @transform_5(%arg0: i32) -> (i32, i32) {
    %c0_i32 = arith.constant 0 : i32
    %c0_i32_0 = arith.constant 0 : i32
    %c0_i32_1 = arith.constant 0 : i32
    return %c0_i32, %c0_i32_0 : i32, i32
  }
  func.func @transform_6(%arg0: i32) -> (i32, i32) {
    %c0_i32 = arith.constant 0 : i32
    %c0_i32_0 = arith.constant 0 : i32
    %c0_i32_1 = arith.constant 0 : i32
    return %c0_i32, %c0_i32_0 : i32, i32
  }
  func.func @transform_7(%arg0: i32) -> (i32, i32) {
    %c0_i32 = arith.constant 0 : i32
    %c0_i32_0 = arith.constant 0 : i32
    %c0_i32_1 = arith.constant 0 : i32
    return %c0_i32, %c0_i32_0 : i32, i32
  }
}

module attributes {stable_mosaic.version = 11 : i64} {
  func.func @_conv_gn_kernel(%arg0: i32, %arg1: memref<8x1152xbf16, #tpu.memory_space<vmem>>, %arg2: memref<1152x128xbf16, #tpu.memory_space<vmem>>, %arg3: memref<1x128xf32, #tpu.memory_space<vmem>>, %arg4: memref<1x128xf32, #tpu.memory_space<vmem>>, %arg5: memref<1x128xf32, #tpu.memory_space<vmem>>, %arg6: memref<128x128xf32, #tpu.memory_space<vmem>>, %arg7: memref<8x128xbf16, #tpu.memory_space<vmem>>) attributes {dimension_semantics = [#tpu.dimension_semantics<arbitrary>], iteration_bounds = array<i64: 1>, scalar_prefetch = 0 : i64, scratch_operands = 0 : i64, tpu.core_type = #tpu.core_type<tc>, window_params = [{pipeline_mode = #tpu.pipeline_mode<synchronous>, transform_indices = @transform_0, window_bounds = array<i64: 8, 1152>}, {pipeline_mode = #tpu.pipeline_mode<synchronous>, transform_indices = @transform_1, window_bounds = array<i64: 1152, 128>}, {pipeline_mode = #tpu.pipeline_mode<synchronous>, transform_indices = @transform_2, window_bounds = array<i64: 1, 128>}, {pipeline_mode = #tpu.pipeline_mode<synchronous>, transform_indices = @transform_3, window_bounds = array<i64: 1, 128>}, {pipeline_mode = #tpu.pipeline_mode<synchronous>, transform_indices = @transform_4, window_bounds = array<i64: 1, 128>}, {pipeline_mode = #tpu.pipeline_mode<synchronous>, transform_indices = @transform_5, window_bounds = array<i64: 128, 128>}, {pipeline_mode = #tpu.pipeline_mode<synchronous>, transform_indices = @transform_6, window_bounds = array<i64: 8, 128>}]} {
    %c0 = arith.constant 0 : index
    %c0_0 = arith.constant 0 : index
    %0 = vector.load %arg1[%c0, %c0_0] : memref<8x1152xbf16, #tpu.memory_space<vmem>>, vector<8x1152xbf16>
    %c0_1 = arith.constant 0 : index
    %c0_2 = arith.constant 0 : index
    %1 = vector.load %arg2[%c0_1, %c0_2] : memref<1152x128xbf16, #tpu.memory_space<vmem>>, vector<1152x128xbf16>
    %cst = arith.constant dense<0.000000e+00> : vector<8x128xf32>
    %2 = tpu.matmul %0, %1, %cst {dimension_numbers = #tpu.dot_dimension_numbers<[1], [0], [0], [1], [0, 0, 1, 1], [], []>} : vector<8x1152xbf16>, vector<1152x128xbf16>, vector<8x128xf32> -> vector<8x128xf32>
    %c0_3 = arith.constant 0 : index
    %c0_4 = arith.constant 0 : index
    %3 = vector.load %arg3[%c0_3, %c0_4] : memref<1x128xf32, #tpu.memory_space<vmem>>, vector<1x128xf32>
    %4 = vector.broadcast %3 : vector<1x128xf32> to vector<8x128xf32>
    %5 = arith.addf %2, %4 : vector<8x128xf32>
    %c0_5 = arith.constant 0 : index
    %c0_6 = arith.constant 0 : index
    %6 = vector.load %arg4[%c0_5, %c0_6] : memref<1x128xf32, #tpu.memory_space<vmem>>, vector<1x128xf32>
    %c0_7 = arith.constant 0 : index
    %c0_8 = arith.constant 0 : index
    %7 = vector.load %arg5[%c0_7, %c0_8] : memref<1x128xf32, #tpu.memory_space<vmem>>, vector<1x128xf32>
    %c0_9 = arith.constant 0 : index
    %c0_10 = arith.constant 0 : index
    %8 = vector.load %arg6[%c0_9, %c0_10] : memref<128x128xf32, #tpu.memory_space<vmem>>, vector<128x128xf32>
    %9 = vector.extract_strided_slice %5 {offsets = [0, 0], sizes = [4, 128], strides = [1, 1]} : vector<8x128xf32> to vector<4x128xf32>
    %cst_11 = arith.constant dense<0.000000e+00> : vector<128xf32>
    %10 = vector.multi_reduction <add>, %9, %cst_11 [0] : vector<4x128xf32> to vector<128xf32>
    %11 = vector.shape_cast %10 : vector<128xf32> to vector<1x128xf32>
    %12 = arith.mulf %9, %9 : vector<4x128xf32>
    %cst_12 = arith.constant dense<0.000000e+00> : vector<128xf32>
    %13 = vector.multi_reduction <add>, %12, %cst_12 [0] : vector<4x128xf32> to vector<128xf32>
    %14 = vector.shape_cast %13 : vector<128xf32> to vector<1x128xf32>
    %15 = tpu.concatenate %11, %14 in 0 : vector<1x128xf32>, vector<1x128xf32> -> vector<2x128xf32>
    %cst_13 = arith.constant 2.500000e-01 : f32
    %16 = vector.broadcast %cst_13 : f32 to vector<2x128xf32>
    %17 = arith.mulf %15, %16 : vector<2x128xf32>
    %cst_14 = arith.constant dense<0.000000e+00> : vector<2x128xf32>
    %18 = tpu.matmul %17, %8, %cst_14 {dimension_numbers = #tpu.dot_dimension_numbers<[1], [0], [0], [1], [0, 0, 1, 1], [], []>} : vector<2x128xf32>, vector<128x128xf32>, vector<2x128xf32> -> vector<2x128xf32>
    %19 = vector.extract_strided_slice %18 {offsets = [0, 0], sizes = [1, 128], strides = [1, 1]} : vector<2x128xf32> to vector<1x128xf32>
    %20 = vector.extract_strided_slice %18 {offsets = [1, 0], sizes = [1, 128], strides = [1, 1]} : vector<2x128xf32> to vector<1x128xf32>
    %21 = arith.mulf %19, %19 : vector<1x128xf32>
    %22 = arith.subf %20, %21 : vector<1x128xf32>
    %cst_15 = arith.constant 0.000000e+00 : f32
    %23 = vector.broadcast %cst_15 : f32 to vector<1x128xf32>
    %24 = arith.maximumf %22, %23 : vector<1x128xf32>
    %25 = vector.broadcast %19 : vector<1x128xf32> to vector<4x128xf32>
    %26 = arith.subf %9, %25 : vector<4x128xf32>
    %cst_16 = arith.constant 9.99999974E-6 : f32
    %27 = vector.broadcast %cst_16 : f32 to vector<1x128xf32>
    %28 = arith.addf %24, %27 : vector<1x128xf32>
    %29 = math.rsqrt %28 : vector<1x128xf32>
    %30 = vector.broadcast %29 : vector<1x128xf32> to vector<4x128xf32>
    %31 = arith.mulf %26, %30 : vector<4x128xf32>
    %32 = vector.broadcast %6 : vector<1x128xf32> to vector<4x128xf32>
    %33 = arith.mulf %31, %32 : vector<4x128xf32>
    %34 = vector.broadcast %7 : vector<1x128xf32> to vector<4x128xf32>
    %35 = arith.addf %33, %34 : vector<4x128xf32>
    %cst_17 = arith.constant 0.000000e+00 : f32
    %36 = vector.broadcast %cst_17 : f32 to vector<4x128xf32>
    %37 = arith.maximumf %35, %36 : vector<4x128xf32>
    %38 = arith.truncf %37 : vector<4x128xf32> to vector<4x128xbf16>
    %c0_18 = arith.constant 0 : index
    %c0_19 = arith.constant 0 : index
    %39 = vector.load %arg7[%c0_18, %c0_19] : memref<8x128xbf16, #tpu.memory_space<vmem>>, vector<4x128xbf16>
    tpu.vector_store %arg7[%c0_18, %c0_19], %38 {strides = array<i32>} : memref<8x128xbf16, #tpu.memory_space<vmem>>, vector<4x128xbf16>,
    %40 = vector.extract_strided_slice %5 {offsets = [4, 0], sizes = [4, 128], strides = [1, 1]} : vector<8x128xf32> to vector<4x128xf32>
    %cst_20 = arith.constant dense<0.000000e+00> : vector<128xf32>
    %41 = vector.multi_reduction <add>, %40, %cst_20 [0] : vector<4x128xf32> to vector<128xf32>
    %42 = vector.shape_cast %41 : vector<128xf32> to vector<1x128xf32>
    %43 = arith.mulf %40, %40 : vector<4x128xf32>
    %cst_21 = arith.constant dense<0.000000e+00> : vector<128xf32>
    %44 = vector.multi_reduction <add>, %43, %cst_21 [0] : vector<4x128xf32> to vector<128xf32>
    %45 = vector.shape_cast %44 : vector<128xf32> to vector<1x128xf32>
    %46 = tpu.concatenate %42, %45 in 0 : vector<1x128xf32>, vector<1x128xf32> -> vector<2x128xf32>
    %cst_22 = arith.constant 2.500000e-01 : f32
    %47 = vector.broadcast %cst_22 : f32 to vector<2x128xf32>
    %48 = arith.mulf %46, %47 : vector<2x128xf32>
    %cst_23 = arith.constant dense<0.000000e+00> : vector<2x128xf32>
    %49 = tpu.matmul %48, %8, %cst_23 {dimension_numbers = #tpu.dot_dimension_numbers<[1], [0], [0], [1], [0, 0, 1, 1], [], []>} : vector<2x128xf32>, vector<128x128xf32>, vector<2x128xf32> -> vector<2x128xf32>
    %50 = vector.extract_strided_slice %49 {offsets = [0, 0], sizes = [1, 128], strides = [1, 1]} : vector<2x128xf32> to vector<1x128xf32>
    %51 = vector.extract_strided_slice %49 {offsets = [1, 0], sizes = [1, 128], strides = [1, 1]} : vector<2x128xf32> to vector<1x128xf32>
    %52 = arith.mulf %50, %50 : vector<1x128xf32>
    %53 = arith.subf %51, %52 : vector<1x128xf32>
    %cst_24 = arith.constant 0.000000e+00 : f32
    %54 = vector.broadcast %cst_24 : f32 to vector<1x128xf32>
    %55 = arith.maximumf %53, %54 : vector<1x128xf32>
    %56 = vector.broadcast %50 : vector<1x128xf32> to vector<4x128xf32>
    %57 = arith.subf %40, %56 : vector<4x128xf32>
    %cst_25 = arith.constant 9.99999974E-6 : f32
    %58 = vector.broadcast %cst_25 : f32 to vector<1x128xf32>
    %59 = arith.addf %55, %58 : vector<1x128xf32>
    %60 = math.rsqrt %59 : vector<1x128xf32>
    %61 = vector.broadcast %60 : vector<1x128xf32> to vector<4x128xf32>
    %62 = arith.mulf %57, %61 : vector<4x128xf32>
    %63 = vector.broadcast %6 : vector<1x128xf32> to vector<4x128xf32>
    %64 = arith.mulf %62, %63 : vector<4x128xf32>
    %65 = vector.broadcast %7 : vector<1x128xf32> to vector<4x128xf32>
    %66 = arith.addf %64, %65 : vector<4x128xf32>
    %cst_26 = arith.constant 0.000000e+00 : f32
    %67 = vector.broadcast %cst_26 : f32 to vector<4x128xf32>
    %68 = arith.maximumf %66, %67 : vector<4x128xf32>
    %69 = arith.truncf %68 : vector<4x128xf32> to vector<4x128xbf16>
    %c4 = arith.constant 4 : index
    %c0_27 = arith.constant 0 : index
    %70 = vector.load %arg7[%c4, %c0_27] : memref<8x128xbf16, #tpu.memory_space<vmem>>, vector<4x128xbf16>
    tpu.vector_store %arg7[%c4, %c0_27], %69 {strides = array<i32>} : memref<8x128xbf16, #tpu.memory_space<vmem>>, vector<4x128xbf16>,
    return
  }
  func.func @transform_0(%arg0: i32) -> (i32, i32) {
    %c0_i32 = arith.constant 0 : i32
    %c0_i32_0 = arith.constant 0 : i32
    %c0_i32_1 = arith.constant 0 : i32
    return %c0_i32, %c0_i32_0 : i32, i32
  }
  func.func @transform_1(%arg0: i32) -> (i32, i32) {
    %c0_i32 = arith.constant 0 : i32
    %c0_i32_0 = arith.constant 0 : i32
    %c0_i32_1 = arith.constant 0 : i32
    return %c0_i32, %c0_i32_0 : i32, i32
  }
  func.func @transform_2(%arg0: i32) -> (i32, i32) {
    %c0_i32 = arith.constant 0 : i32
    %c0_i32_0 = arith.constant 0 : i32
    %c0_i32_1 = arith.constant 0 : i32
    return %c0_i32, %c0_i32_0 : i32, i32
  }
  func.func @transform_3(%arg0: i32) -> (i32, i32) {
    %c0_i32 = arith.constant 0 : i32
    %c0_i32_0 = arith.constant 0 : i32
    %c0_i32_1 = arith.constant 0 : i32
    return %c0_i32, %c0_i32_0 : i32, i32
  }
  func.func @transform_4(%arg0: i32) -> (i32, i32) {
    %c0_i32 = arith.constant 0 : i32
    %c0_i32_0 = arith.constant 0 : i32
    %c0_i32_1 = arith.constant 0 : i32
    return %c0_i32, %c0_i32_0 : i32, i32
  }
  func.func @transform_5(%arg0: i32) -> (i32, i32) {
    %c0_i32 = arith.constant 0 : i32
    %c0_i32_0 = arith.constant 0 : i32
    %c0_i32_1 = arith.constant 0 : i32
    return %c0_i32, %c0_i32_0 : i32, i32
  }
  func.func @transform_6(%arg0: i32) -> (i32, i32) {
    %c0_i32 = arith.constant 0 : i32
    %c0_i32_0 = arith.constant 0 : i32
    %c0_i32_1 = arith.constant 0 : i32
    return %c0_i32, %c0_i32_0 : i32, i32
  }
}

module attributes {stable_mosaic.version = 11 : i64} {
  func.func @_head_kernel(%arg0: i32, %arg1: memref<2x4x128xbf16, #tpu.memory_space<vmem>>, %arg2: memref<128x128xbf16, #tpu.memory_space<vmem>>, %arg3: memref<1x128xf32, #tpu.memory_space<vmem>>, %arg4: memref<2x128xf32, #tpu.memory_space<vmem>>) attributes {dimension_semantics = [#tpu.dimension_semantics<arbitrary>], iteration_bounds = array<i64: 1>, scalar_prefetch = 0 : i64, scratch_operands = 0 : i64, tpu.core_type = #tpu.core_type<tc>, window_params = [{pipeline_mode = #tpu.pipeline_mode<synchronous>, transform_indices = @transform_0, window_bounds = array<i64: 2, 4, 128>}, {pipeline_mode = #tpu.pipeline_mode<synchronous>, transform_indices = @transform_1, window_bounds = array<i64: 128, 128>}, {pipeline_mode = #tpu.pipeline_mode<synchronous>, transform_indices = @transform_2, window_bounds = array<i64: 1, 128>}, {pipeline_mode = #tpu.pipeline_mode<synchronous>, transform_indices = @transform_3, window_bounds = array<i64: 2, 128>}]} {
    %c0 = arith.constant 0 : index
    %c0_0 = arith.constant 0 : index
    %c0_1 = arith.constant 0 : index
    %0 = vector.load %arg1[%c0, %c0_0, %c0_1] : memref<2x4x128xbf16, #tpu.memory_space<vmem>>, vector<2x4x128xbf16>
    %1 = arith.extf %0 : vector<2x4x128xbf16> to vector<2x4x128xf32>
    %cst = arith.constant dense<0.000000e+00> : vector<2x128xf32>
    %2 = vector.multi_reduction <add>, %1, %cst [1] : vector<2x4x128xf32> to vector<2x128xf32>
    %cst_2 = arith.constant 4.000000e+00 : f32
    %3 = vector.broadcast %cst_2 : f32 to vector<2x128xf32>
    %4 = arith.divf %2, %3 : vector<2x128xf32>
    %5 = arith.truncf %4 : vector<2x128xf32> to vector<2x128xbf16>
    %c0_3 = arith.constant 0 : index
    %c0_4 = arith.constant 0 : index
    %6 = vector.load %arg2[%c0_3, %c0_4] : memref<128x128xbf16, #tpu.memory_space<vmem>>, vector<128x128xbf16>
    %cst_5 = arith.constant dense<0.000000e+00> : vector<2x128xf32>
    %7 = tpu.matmul %5, %6, %cst_5 {dimension_numbers = #tpu.dot_dimension_numbers<[1], [0], [0], [1], [0, 0, 1, 1], [], []>} : vector<2x128xbf16>, vector<128x128xbf16>, vector<2x128xf32> -> vector<2x128xf32>
    %c0_6 = arith.constant 0 : index
    %c0_7 = arith.constant 0 : index
    %8 = vector.load %arg3[%c0_6, %c0_7] : memref<1x128xf32, #tpu.memory_space<vmem>>, vector<1x128xf32>
    %9 = vector.broadcast %8 : vector<1x128xf32> to vector<2x128xf32>
    %10 = arith.addf %7, %9 : vector<2x128xf32>
    %c0_8 = arith.constant 0 : index
    %c0_9 = arith.constant 0 : index
    %11 = vector.load %arg4[%c0_8, %c0_9] : memref<2x128xf32, #tpu.memory_space<vmem>>, vector<2x128xf32>
    tpu.vector_store %arg4[%c0_8, %c0_9], %10 {strides = array<i32>} : memref<2x128xf32, #tpu.memory_space<vmem>>, vector<2x128xf32>,
    return
  }
  func.func @transform_0(%arg0: i32) -> (i32, i32, i32) {
    %c0_i32 = arith.constant 0 : i32
    %c0_i32_0 = arith.constant 0 : i32
    %c0_i32_1 = arith.constant 0 : i32
    %c0_i32_2 = arith.constant 0 : i32
    return %c0_i32, %c0_i32_0, %c0_i32_1 : i32, i32, i32
  }
  func.func @transform_1(%arg0: i32) -> (i32, i32) {
    %c0_i32 = arith.constant 0 : i32
    %c0_i32_0 = arith.constant 0 : i32
    %c0_i32_1 = arith.constant 0 : i32
    return %c0_i32, %c0_i32_0 : i32, i32
  }
  func.func @transform_2(%arg0: i32) -> (i32, i32) {
    %c0_i32 = arith.constant 0 : i32
    %c0_i32_0 = arith.constant 0 : i32
    %c0_i32_1 = arith.constant 0 : i32
    return %c0_i32, %c0_i32_0 : i32, i32
  }
  func.func @transform_3(%arg0: i32) -> (i32, i32) {
    %c0_i32 = arith.constant 0 : i32
    %c0_i32_0 = arith.constant 0 : i32
    %c0_i32_1 = arith.constant 0 : i32
    return %c0_i32, %c0_i32_0 : i32, i32
  }
}

module attributes {stable_mosaic.version = 11 : i64} {
  func.func @_conv_gn_kernel(%arg0: i32, %arg1: memref<8x128xbf16, #tpu.memory_space<vmem>>, %arg2: memref<128x128xbf16, #tpu.memory_space<vmem>>, %arg3: memref<1x128xf32, #tpu.memory_space<vmem>>, %arg4: memref<1x128xf32, #tpu.memory_space<vmem>>, %arg5: memref<1x128xf32, #tpu.memory_space<vmem>>, %arg6: memref<128x128xf32, #tpu.memory_space<vmem>>, %arg7: memref<8x128xbf16, #tpu.memory_space<vmem>>, %arg8: memref<8x128xbf16, #tpu.memory_space<vmem>>) attributes {dimension_semantics = [#tpu.dimension_semantics<arbitrary>], iteration_bounds = array<i64: 1>, scalar_prefetch = 0 : i64, scratch_operands = 0 : i64, tpu.core_type = #tpu.core_type<tc>, window_params = [{pipeline_mode = #tpu.pipeline_mode<synchronous>, transform_indices = @transform_0, window_bounds = array<i64: 8, 128>}, {pipeline_mode = #tpu.pipeline_mode<synchronous>, transform_indices = @transform_1, window_bounds = array<i64: 128, 128>}, {pipeline_mode = #tpu.pipeline_mode<synchronous>, transform_indices = @transform_2, window_bounds = array<i64: 1, 128>}, {pipeline_mode = #tpu.pipeline_mode<synchronous>, transform_indices = @transform_3, window_bounds = array<i64: 1, 128>}, {pipeline_mode = #tpu.pipeline_mode<synchronous>, transform_indices = @transform_4, window_bounds = array<i64: 1, 128>}, {pipeline_mode = #tpu.pipeline_mode<synchronous>, transform_indices = @transform_5, window_bounds = array<i64: 128, 128>}, {pipeline_mode = #tpu.pipeline_mode<synchronous>, transform_indices = @transform_6, window_bounds = array<i64: 8, 128>}, {pipeline_mode = #tpu.pipeline_mode<synchronous>, transform_indices = @transform_7, window_bounds = array<i64: 8, 128>}]} {
    %c0 = arith.constant 0 : index
    %c0_0 = arith.constant 0 : index
    %0 = vector.load %arg1[%c0, %c0_0] : memref<8x128xbf16, #tpu.memory_space<vmem>>, vector<8x128xbf16>
    %c0_1 = arith.constant 0 : index
    %c0_2 = arith.constant 0 : index
    %1 = vector.load %arg2[%c0_1, %c0_2] : memref<128x128xbf16, #tpu.memory_space<vmem>>, vector<128x128xbf16>
    %cst = arith.constant dense<0.000000e+00> : vector<8x128xf32>
    %2 = tpu.matmul %0, %1, %cst {dimension_numbers = #tpu.dot_dimension_numbers<[1], [0], [0], [1], [0, 0, 1, 1], [], []>} : vector<8x128xbf16>, vector<128x128xbf16>, vector<8x128xf32> -> vector<8x128xf32>
    %c0_3 = arith.constant 0 : index
    %c0_4 = arith.constant 0 : index
    %3 = vector.load %arg3[%c0_3, %c0_4] : memref<1x128xf32, #tpu.memory_space<vmem>>, vector<1x128xf32>
    %4 = vector.broadcast %3 : vector<1x128xf32> to vector<8x128xf32>
    %5 = arith.addf %2, %4 : vector<8x128xf32>
    %c0_5 = arith.constant 0 : index
    %c0_6 = arith.constant 0 : index
    %6 = vector.load %arg4[%c0_5, %c0_6] : memref<1x128xf32, #tpu.memory_space<vmem>>, vector<1x128xf32>
    %c0_7 = arith.constant 0 : index
    %c0_8 = arith.constant 0 : index
    %7 = vector.load %arg5[%c0_7, %c0_8] : memref<1x128xf32, #tpu.memory_space<vmem>>, vector<1x128xf32>
    %c0_9 = arith.constant 0 : index
    %c0_10 = arith.constant 0 : index
    %8 = vector.load %arg6[%c0_9, %c0_10] : memref<128x128xf32, #tpu.memory_space<vmem>>, vector<128x128xf32>
    %9 = vector.extract_strided_slice %5 {offsets = [0, 0], sizes = [4, 128], strides = [1, 1]} : vector<8x128xf32> to vector<4x128xf32>
    %cst_11 = arith.constant dense<0.000000e+00> : vector<128xf32>
    %10 = vector.multi_reduction <add>, %9, %cst_11 [0] : vector<4x128xf32> to vector<128xf32>
    %11 = vector.shape_cast %10 : vector<128xf32> to vector<1x128xf32>
    %12 = arith.mulf %9, %9 : vector<4x128xf32>
    %cst_12 = arith.constant dense<0.000000e+00> : vector<128xf32>
    %13 = vector.multi_reduction <add>, %12, %cst_12 [0] : vector<4x128xf32> to vector<128xf32>
    %14 = vector.shape_cast %13 : vector<128xf32> to vector<1x128xf32>
    %15 = tpu.concatenate %11, %14 in 0 : vector<1x128xf32>, vector<1x128xf32> -> vector<2x128xf32>
    %cst_13 = arith.constant 2.500000e-01 : f32
    %16 = vector.broadcast %cst_13 : f32 to vector<2x128xf32>
    %17 = arith.mulf %15, %16 : vector<2x128xf32>
    %cst_14 = arith.constant dense<0.000000e+00> : vector<2x128xf32>
    %18 = tpu.matmul %17, %8, %cst_14 {dimension_numbers = #tpu.dot_dimension_numbers<[1], [0], [0], [1], [0, 0, 1, 1], [], []>} : vector<2x128xf32>, vector<128x128xf32>, vector<2x128xf32> -> vector<2x128xf32>
    %19 = vector.extract_strided_slice %18 {offsets = [0, 0], sizes = [1, 128], strides = [1, 1]} : vector<2x128xf32> to vector<1x128xf32>
    %20 = vector.extract_strided_slice %18 {offsets = [1, 0], sizes = [1, 128], strides = [1, 1]} : vector<2x128xf32> to vector<1x128xf32>
    %21 = arith.mulf %19, %19 : vector<1x128xf32>
    %22 = arith.subf %20, %21 : vector<1x128xf32>
    %cst_15 = arith.constant 0.000000e+00 : f32
    %23 = vector.broadcast %cst_15 : f32 to vector<1x128xf32>
    %24 = arith.maximumf %22, %23 : vector<1x128xf32>
    %25 = vector.broadcast %19 : vector<1x128xf32> to vector<4x128xf32>
    %26 = arith.subf %9, %25 : vector<4x128xf32>
    %cst_16 = arith.constant 9.99999974E-6 : f32
    %27 = vector.broadcast %cst_16 : f32 to vector<1x128xf32>
    %28 = arith.addf %24, %27 : vector<1x128xf32>
    %29 = math.rsqrt %28 : vector<1x128xf32>
    %30 = vector.broadcast %29 : vector<1x128xf32> to vector<4x128xf32>
    %31 = arith.mulf %26, %30 : vector<4x128xf32>
    %32 = vector.broadcast %6 : vector<1x128xf32> to vector<4x128xf32>
    %33 = arith.mulf %31, %32 : vector<4x128xf32>
    %34 = vector.broadcast %7 : vector<1x128xf32> to vector<4x128xf32>
    %35 = arith.addf %33, %34 : vector<4x128xf32>
    %c0_17 = arith.constant 0 : index
    %c0_18 = arith.constant 0 : index
    %36 = vector.load %arg7[%c0_17, %c0_18] : memref<8x128xbf16, #tpu.memory_space<vmem>>, vector<4x128xbf16>
    %37 = arith.extf %36 : vector<4x128xbf16> to vector<4x128xf32>
    %38 = arith.addf %35, %37 : vector<4x128xf32>
    %39 = arith.truncf %38 : vector<4x128xf32> to vector<4x128xbf16>
    %c0_19 = arith.constant 0 : index
    %c0_20 = arith.constant 0 : index
    %40 = vector.load %arg8[%c0_19, %c0_20] : memref<8x128xbf16, #tpu.memory_space<vmem>>, vector<4x128xbf16>
    tpu.vector_store %arg8[%c0_19, %c0_20], %39 {strides = array<i32>} : memref<8x128xbf16, #tpu.memory_space<vmem>>, vector<4x128xbf16>,
    %41 = vector.extract_strided_slice %5 {offsets = [4, 0], sizes = [4, 128], strides = [1, 1]} : vector<8x128xf32> to vector<4x128xf32>
    %cst_21 = arith.constant dense<0.000000e+00> : vector<128xf32>
    %42 = vector.multi_reduction <add>, %41, %cst_21 [0] : vector<4x128xf32> to vector<128xf32>
    %43 = vector.shape_cast %42 : vector<128xf32> to vector<1x128xf32>
    %44 = arith.mulf %41, %41 : vector<4x128xf32>
    %cst_22 = arith.constant dense<0.000000e+00> : vector<128xf32>
    %45 = vector.multi_reduction <add>, %44, %cst_22 [0] : vector<4x128xf32> to vector<128xf32>
    %46 = vector.shape_cast %45 : vector<128xf32> to vector<1x128xf32>
    %47 = tpu.concatenate %43, %46 in 0 : vector<1x128xf32>, vector<1x128xf32> -> vector<2x128xf32>
    %cst_23 = arith.constant 2.500000e-01 : f32
    %48 = vector.broadcast %cst_23 : f32 to vector<2x128xf32>
    %49 = arith.mulf %47, %48 : vector<2x128xf32>
    %cst_24 = arith.constant dense<0.000000e+00> : vector<2x128xf32>
    %50 = tpu.matmul %49, %8, %cst_24 {dimension_numbers = #tpu.dot_dimension_numbers<[1], [0], [0], [1], [0, 0, 1, 1], [], []>} : vector<2x128xf32>, vector<128x128xf32>, vector<2x128xf32> -> vector<2x128xf32>
    %51 = vector.extract_strided_slice %50 {offsets = [0, 0], sizes = [1, 128], strides = [1, 1]} : vector<2x128xf32> to vector<1x128xf32>
    %52 = vector.extract_strided_slice %50 {offsets = [1, 0], sizes = [1, 128], strides = [1, 1]} : vector<2x128xf32> to vector<1x128xf32>
    %53 = arith.mulf %51, %51 : vector<1x128xf32>
    %54 = arith.subf %52, %53 : vector<1x128xf32>
    %cst_25 = arith.constant 0.000000e+00 : f32
    %55 = vector.broadcast %cst_25 : f32 to vector<1x128xf32>
    %56 = arith.maximumf %54, %55 : vector<1x128xf32>
    %57 = vector.broadcast %51 : vector<1x128xf32> to vector<4x128xf32>
    %58 = arith.subf %41, %57 : vector<4x128xf32>
    %cst_26 = arith.constant 9.99999974E-6 : f32
    %59 = vector.broadcast %cst_26 : f32 to vector<1x128xf32>
    %60 = arith.addf %56, %59 : vector<1x128xf32>
    %61 = math.rsqrt %60 : vector<1x128xf32>
    %62 = vector.broadcast %61 : vector<1x128xf32> to vector<4x128xf32>
    %63 = arith.mulf %58, %62 : vector<4x128xf32>
    %64 = vector.broadcast %6 : vector<1x128xf32> to vector<4x128xf32>
    %65 = arith.mulf %63, %64 : vector<4x128xf32>
    %66 = vector.broadcast %7 : vector<1x128xf32> to vector<4x128xf32>
    %67 = arith.addf %65, %66 : vector<4x128xf32>
    %c4 = arith.constant 4 : index
    %c0_27 = arith.constant 0 : index
    %68 = vector.load %arg7[%c4, %c0_27] : memref<8x128xbf16, #tpu.memory_space<vmem>>, vector<4x128xbf16>
    %69 = arith.extf %68 : vector<4x128xbf16> to vector<4x128xf32>
    %70 = arith.addf %67, %69 : vector<4x128xf32>
    %71 = arith.truncf %70 : vector<4x128xf32> to vector<4x128xbf16>
    %c4_28 = arith.constant 4 : index
    %c0_29 = arith.constant 0 : index
    %72 = vector.load %arg8[%c4_28, %c0_29] : memref<8x128xbf16, #tpu.memory_space<vmem>>, vector<4x128xbf16>
    tpu.vector_store %arg8[%c4_28, %c0_29], %71 {strides = array<i32>} : memref<8x128xbf16, #tpu.memory_space<vmem>>, vector<4x128xbf16>,
    return
  }
  func.func @transform_0(%arg0: i32) -> (i32, i32) {
    %c0_i32 = arith.constant 0 : i32
    %c0_i32_0 = arith.constant 0 : i32
    %c0_i32_1 = arith.constant 0 : i32
    return %c0_i32, %c0_i32_0 : i32, i32
  }
  func.func @transform_1(%arg0: i32) -> (i32, i32) {
    %c0_i32 = arith.constant 0 : i32
    %c0_i32_0 = arith.constant 0 : i32
    %c0_i32_1 = arith.constant 0 : i32
    return %c0_i32, %c0_i32_0 : i32, i32
  }
  func.func @transform_2(%arg0: i32) -> (i32, i32) {
    %c0_i32 = arith.constant 0 : i32
    %c0_i32_0 = arith.constant 0 : i32
    %c0_i32_1 = arith.constant 0 : i32
    return %c0_i32, %c0_i32_0 : i32, i32
  }
  func.func @transform_3(%arg0: i32) -> (i32, i32) {
    %c0_i32 = arith.constant 0 : i32
    %c0_i32_0 = arith.constant 0 : i32
    %c0_i32_1 = arith.constant 0 : i32
    return %c0_i32, %c0_i32_0 : i32, i32
  }
  func.func @transform_4(%arg0: i32) -> (i32, i32) {
    %c0_i32 = arith.constant 0 : i32
    %c0_i32_0 = arith.constant 0 : i32
    %c0_i32_1 = arith.constant 0 : i32
    return %c0_i32, %c0_i32_0 : i32, i32
  }
  func.func @transform_5(%arg0: i32) -> (i32, i32) {
    %c0_i32 = arith.constant 0 : i32
    %c0_i32_0 = arith.constant 0 : i32
    %c0_i32_1 = arith.constant 0 : i32
    return %c0_i32, %c0_i32_0 : i32, i32
  }
  func.func @transform_6(%arg0: i32) -> (i32, i32) {
    %c0_i32 = arith.constant 0 : i32
    %c0_i32_0 = arith.constant 0 : i32
    %c0_i32_1 = arith.constant 0 : i32
    return %c0_i32, %c0_i32_0 : i32, i32
  }
  func.func @transform_7(%arg0: i32) -> (i32, i32) {
    %c0_i32 = arith.constant 0 : i32
    %c0_i32_0 = arith.constant 0 : i32
    %c0_i32_1 = arith.constant 0 : i32
    return %c0_i32, %c0_i32_0 : i32, i32
  }
}

</mosaic_0001>

<bundles_post_ra>
// kernel: cnn_classifier_forward.12
= control target key start
LH: loop header
LB: loop body
LE: loop exit
PB: predicated region body
PF: predicated region fallthrough
CT: control target
= control target key end

     0   :  { %s2051_s12 = smov 0   ;;  %s2303_s0 = inlined_call_operand.vmem [shape: bf16[2048,147], index: 0, kind: input, shape index: {}]   ;;  %s2304_s1 = inlined_call_operand.vmem [shape: bf16[147,128], index: 1, kind: input, shape index: {}]   ;;  %s2305_s2 = inlined_call_operand.vmem [shape: f32[1,128], index: 2, kind: input, shape index: {}]   ;;  %s2306_s3 = inlined_call_operand.vmem [shape: bf16[2048,128], index: 3, kind: output, shape index: {}]  }
   0x1 LB: > { %s1446_s13 = sadd.s32 4294967295, %s2027_s12   ;;  %p1450_p0 = scmp.ge.s32.totalorder %s2027_s12, 1  ;;  %s2027_s12 = sphi %s2051_s12, %s13_s12  }
   0x2   : > { %p139_p1 = scmp.lt.s32.totalorder %s2027_s12, 5 }
   0x4   : > { %p140_p2 = pnand %p1450_p0, %p139_p1 }
   0x5   : > { %s1451_s20 = sshll.u32 (!%p140_p2), %s1446_s13, 6 }
   0x6   : > { %143 = sbr.rel (%p140_p2) target bundleno = 376 (0x178), region = 32  ;;  %p165_p3 = scmp.lt.s32.totalorder (!%p140_p2), %s1451_s20, 255 }
   0xb   : > { %v1915_v0 = vld [vmem:[%s2304_s1 + $0x38] sm:$0xff]   ;;  %v2029_v1 = vmov 0   ;;  %v1916_v2 = vld [vmem:[%s2304_s1 + $0x30] sm:$0xff]   ;;  %v1917_v3 = vld [vmem:[%s2304_s1 + $0x28] sm:$0xff]   ;;  %s2308_s20 = smov (!%p165_p3, %s1451_s20), 255  ;;  %vm613_vm0 = vcmask 154624  }
   0xc   : > { %717 = vmatprep.subr.bf16.mxu0 %v2029_v1  ;;  %1885 = vmatprep.subr.bf16.mxu1 %v2029_v1  ;;  %v1918_v4 = vld [vmem:[%s2304_s1 + $0x20] sm:$0xff]   ;;  %s1629_s23 = sshll.u32 %s2308_s20, 3  ;;  %v1919_v5 = vld [vmem:[%s2304_s1 + $0x18] sm:$0xff]   ;;  %v1920_v8 = vld [vmem:[%s2304_s1 + $0x10] sm:$0xff]   ;;  %vm710_vm1 = vcmask 1040384   ;;  %vm711_vm2 = vcmask 1041408  }
   0xd   : > { %718 = vmatpush1.bf16.msra.mxu0 %v1915_v0  ;;  %1895 = vmatpush1.bf16.msra.mxu1 %v1915_v0  ;;  %s2077_s26 = scalar_lea.vmem %s2303_s0, %s1629_s23  ;;  %v1921_v9 = vld [vmem:[%s2304_s1 + $0x8] sm:$0xff]   ;;  %v2030_v10 = vmov 65535   ;;  %v1922_v12 = vld [vmem:[%s2304_s1] sm:$0xff]   ;;  %s1455_s15 = sshll.u32 %s2308_s20, 2 }
   0xe   : > { %719 = vmatprep.subr.bf16.mxu0 %v2029_v1  ;;  %1886 = vmatprep.subr.bf16.mxu1 %v2029_v1  ;;  %v1927_v6 = vld [vmem:[%s2077_s26 + $0x4] ss:$8 sps:$4 sm:$0xff]   ;;  %v712_v11 = vsel %vm710_vm1, 4294967295, %v2030_v10  ;;  %v1923_v13 = vld [vmem:[%s2304_s1 + $0x48] ss:$0 sps:$4 sm:$0x33]   ;;  %s2206_s18 = scalar_lea.vmem %s2306_s3, %s1455_s15 }
   0xf   : > { %v1930_v7 = vld [vmem:[%s2077_s26 + $0x104] ss:$8 sps:$4 sm:$0xff]   ;;  %1531 = vmatprep.mubr.msk.bf16.mxu0 %vm613_vm0, %v1927_v6  ;;  %v713_v14 = vsel %vm711_vm2, %v712_v11, 0  ;;  %v1925_v17 = vld [vmem:[%s2077_s26] ss:$8 sps:$4 sm:$0xff]  }
  0x10   : > { %1547 = vmatprep.mubr.msk.bf16.mxu1 %vm613_vm0, %v1930_v7  ;;  %v715_v15 = vand.u32 %v1923_v13, %v713_v14  ;;  %v1924_v16 = vld [vmem:[%s2304_s1 + $0x40] sm:$0xff]   ;;  %v1931_v19 = vld [vmem:[%s2077_s26 + $0x14] ss:$8 sps:$4 sm:$0xff]   ;;  %v1935_v21 = vld [vmem:[%s2077_s26 + $0x10] ss:$8 sps:$4 sm:$0xff]  }
  0x11   : > { %720 = vmatpush1.bf16.msra.mxu0 %v1916_v2  ;;  %1896 = vmatpush1.bf16.msra.mxu1 %v1916_v2  ;;  %v1928_v18 = vld [vmem:[%s2077_s26 + $0x100] ss:$8 sps:$4 sm:$0xff]   ;;  %v1933_v20 = vld [vmem:[%s2077_s26 + $0x114] ss:$8 sps:$4 sm:$0xff]   ;;  %v1936_v22 = vld [vmem:[%s2077_s26 + $0x110] ss:$8 sps:$4 sm:$0xff]  }
  0x12   : > { %721 = vmatprep.subr.bf16.mxu0 %v2029_v1  ;;  %1887 = vmatprep.subr.bf16.mxu1 %v2029_v1  ;;  %v1937_v23 = vld [vmem:[%s2077_s26 + $0x24] ss:$8 sps:$4 sm:$0xff]   ;;  %v1941_v25 = vld [vmem:[%s2077_s26 + $0x20] ss:$8 sps:$4 sm:$0xff]   ;;  %v1943_v27 = vld [vmem:[%s2077_s26 + $0x34] ss:$8 sps:$4 sm:$0xff]  }
  0x13   : > { %v1939_v24 = vld [vmem:[%s2077_s26 + $0x124] ss:$8 sps:$4 sm:$0xff]   ;;  %v1942_v26 = vld [vmem:[%s2077_s26 + $0x120] ss:$8 sps:$4 sm:$0xff]   ;;  %v1945_v28 = vld [vmem:[%s2077_s26 + $0x134] ss:$8 sps:$4 sm:$0xff]  }
  0x14   : > { %v1947_v29 = vld [vmem:[%s2077_s26 + $0x30] ss:$8 sps:$4 sm:$0xff]   ;;  %v1949_v31 = vld [vmem:[%s2077_s26 + $0x44] ss:$8 sps:$4 sm:$0xff]   ;;  %v1953_v33 = vld [vmem:[%s2077_s26 + $0x40] ss:$8 sps:$4 sm:$0xff]  }
  0x15   : > { %722 = vmatpush1.bf16.msra.mxu0 %v1917_v3  ;;  %1897 = vmatpush1.bf16.msra.mxu1 %v1917_v3  ;;  %v1948_v30 = vld [vmem:[%s2077_s26 + $0x130] ss:$8 sps:$4 sm:$0xff]   ;;  %v1951_v32 = vld [vmem:[%s2077_s26 + $0x144] ss:$8 sps:$4 sm:$0xff]   ;;  %v1954_v34 = vld [vmem:[%s2077_s26 + $0x140] ss:$8 sps:$4 sm:$0xff]  }
  0x16   : > { %723 = vmatprep.subr.bf16.mxu0 %v2029_v1  ;;  %1888 = vmatprep.subr.bf16.mxu1 %v2029_v1  ;;  %v1955_v35 = vld [vmem:[%s2077_s26 + $0x54] ss:$8 sps:$4 sm:$0xff]   ;;  %v1959_v37 = vld [vmem:[%s2077_s26 + $0x50] ss:$8 sps:$4 sm:$0xff]   ;;  %v1961_v39 = vld [vmem:[%s2077_s26 + $0x64] ss:$8 sps:$4 sm:$0xff]  }
  0x17   : > { %v1957_v36 = vld [vmem:[%s2077_s26 + $0x154] ss:$8 sps:$4 sm:$0xff]   ;;  %v1960_v38 = vld [vmem:[%s2077_s26 + $0x150] ss:$8 sps:$4 sm:$0xff]   ;;  %v1963_v40 = vld [vmem:[%s2077_s26 + $0x164] ss:$8 sps:$4 sm:$0xff]  }
  0x18   : > { %v1965_v41 = vld [vmem:[%s2077_s26 + $0x60] ss:$8 sps:$4 sm:$0xff]   ;;  %v1967_v43 = vld [vmem:[%s2077_s26 + $0x74] ss:$8 sps:$4 sm:$0xff]   ;;  %v1971_v45 = vld [vmem:[%s2077_s26 + $0x70] ss:$8 sps:$4 sm:$0xff]  }
  0x19   : > { %724 = vmatpush1.bf16.msra.mxu0 %v1918_v4  ;;  %1898 = vmatpush1.bf16.msra.mxu1 %v1918_v4  ;;  %v1966_v42 = vld [vmem:[%s2077_s26 + $0x160] ss:$8 sps:$4 sm:$0xff]   ;;  %v1969_v44 = vld [vmem:[%s2077_s26 + $0x174] ss:$8 sps:$4 sm:$0xff]   ;;  %v1972_v46 = vld [vmem:[%s2077_s26 + $0x170] ss:$8 sps:$4 sm:$0xff]  }
  0x1a   : > { %725 = vmatprep.subr.bf16.mxu0 %v2029_v1  ;;  %1889 = vmatprep.subr.bf16.mxu1 %v2029_v1  ;;  %v1973_v47 = vld [vmem:[%s2077_s26 + $0x84] ss:$8 sps:$4 sm:$0xff]   ;;  %v1977_v49 = vld [vmem:[%s2077_s26 + $0x80] ss:$8 sps:$4 sm:$0xff]   ;;  %v1979_v51 = vld [vmem:[%s2077_s26 + $0x94] ss:$8 sps:$4 sm:$0xff]  }
  0x1b   : > { %v1975_v48 = vld [vmem:[%s2077_s26 + $0x184] ss:$8 sps:$4 sm:$0xff]   ;;  %v1978_v50 = vld [vmem:[%s2077_s26 + $0x180] ss:$8 sps:$4 sm:$0xff]   ;;  %v1981_v52 = vld [vmem:[%s2077_s26 + $0x194] ss:$8 sps:$4 sm:$0xff]  }
  0x1c   : > { %v1983_v53 = vld [vmem:[%s2077_s26 + $0x90] ss:$8 sps:$4 sm:$0xff]   ;;  %v1985_v55 = vld [vmem:[%s2077_s26 + $0xa4] ss:$8 sps:$4 sm:$0xff]   ;;  %v1989_v57 = vld [vmem:[%s2077_s26 + $0xa0] ss:$8 sps:$4 sm:$0xff]  }
  0x1d   : > { %726 = vmatpush1.bf16.msra.mxu0 %v1919_v5  ;;  %1899 = vmatpush1.bf16.msra.mxu1 %v1919_v5  ;;  %v1984_v54 = vld [vmem:[%s2077_s26 + $0x190] ss:$8 sps:$4 sm:$0xff]   ;;  %v1987_v56 = vld [vmem:[%s2077_s26 + $0x1a4] ss:$8 sps:$4 sm:$0xff]   ;;  %v1990_v58 = vld [vmem:[%s2077_s26 + $0x1a0] ss:$8 sps:$4 sm:$0xff]  }
  0x1e   : > { %727 = vmatprep.subr.bf16.mxu0 %v2029_v1  ;;  %1890 = vmatprep.subr.bf16.mxu1 %v2029_v1  ;;  %v1991_v59 = vld [vmem:[%s2077_s26 + $0xb4] ss:$8 sps:$4 sm:$0xff]   ;;  %v1995_v61 = vld [vmem:[%s2077_s26 + $0xb0] ss:$8 sps:$4 sm:$0xff]   ;;  %v1997_v63 = vld [vmem:[%s2077_s26 + $0xc4] ss:$8 sps:$4 sm:$0xff]  }
  0x1f   : > { %v1993_v60 = vld [vmem:[%s2077_s26 + $0x1b4] ss:$8 sps:$4 sm:$0xff]   ;;  %v1996_v62 = vld [vmem:[%s2077_s26 + $0x1b0] ss:$8 sps:$4 sm:$0xff]   ;;  %v1999_v0 = vld [vmem:[%s2077_s26 + $0x1c4] ss:$8 sps:$4 sm:$0xff]  }
  0x20   : > { %v2002_v2 = vld [vmem:[%s2077_s26 + $0x1c0] ss:$8 sps:$4 sm:$0xff]   ;;  %v2003_v3 = vld [vmem:[%s2077_s26 + $0xd4] ss:$8 sps:$4 sm:$0xff]   ;;  %v2007_v5 = vld [vmem:[%s2077_s26 + $0xd0] ss:$8 sps:$4 sm:$0xff]  }
  0x21   : > { %728 = vmatpush1.bf16.msra.mxu0 %v1920_v8  ;;  %1900 = vmatpush1.bf16.msra.mxu1 %v1920_v8  ;;  %v2005_v4 = vld [vmem:[%s2077_s26 + $0x1d4] ss:$8 sps:$4 sm:$0xff]   ;;  %v2008_v6 = vld [vmem:[%s2077_s26 + $0x1d0] ss:$8 sps:$4 sm:$0xff]   ;;  %v2009_v7 = vld [vmem:[%s2077_s26 + $0xe4] ss:$8 sps:$4 sm:$0xff]  }
  0x22   : > { %729 = vmatprep.subr.bf16.mxu0 %v2029_v1  ;;  %1891 = vmatprep.subr.bf16.mxu1 %v2029_v1  ;;  %v2011_v8 = vld [vmem:[%s2077_s26 + $0x1e4] ss:$8 sps:$4 sm:$0xff]   ;;  %v2014_v10 = vld [vmem:[%s2077_s26 + $0x1e0] ss:$8 sps:$4 sm:$0xff]   ;;  %v2015_v11 = vld [vmem:[%s2077_s26 + $0xf4] ss:$8 sps:$4 sm:$0xff]  }
  0x23   : > { %v2019_v13 = vld [vmem:[%s2077_s26 + $0xf0] ss:$8 sps:$4 sm:$0xff]  }
  0x24   : > { %v2020_v14 = vld [vmem:[%s2077_s26 + $0x1f0] ss:$8 sps:$4 sm:$0xff]  }
  0x25   : > { %730 = vmatpush1.bf16.msra.mxu0 %v1921_v9  ;;  %1901 = vmatpush1.bf16.msra.mxu1 %v1921_v9  ;;  %v2013_v9 = vld [vmem:[%s2077_s26 + $0xe0] ss:$8 sps:$4 sm:$0xff]  }
  0x26   : > { %731 = vmatprep.subr.bf16.mxu0 %v2029_v1  ;;  %1892 = vmatprep.subr.bf16.mxu1 %v2029_v1 }
  0x29   : > { %732 = vmatpush1.bf16.msra.mxu0 %v1922_v12  ;;  %1902 = vmatpush1.bf16.msra.mxu1 %v1922_v12  ;;  %v2017_v12 = vld [vmem:[%s2077_s26 + $0x1f4] ss:$8 sps:$4 sm:$0xff]  }
  0x2a   : > { %745 = vmatprep.subr.bf16.mxu0 %v2029_v1  ;;  %1893 = vmatprep.subr.bf16.mxu1 %v2029_v1 }
  0x2d   : > { %746 = vmatpush2.bf16.msra.mxu0 %v715_v15  ;;  %1903 = vmatpush2.bf16.msra.mxu1 %v715_v15  ;;  %v2196_v15 = vld [vmem:[%s2305_s2] ss:$0 sm:$0xff] }
  0x2e   : > { %747 = vmatprep.subr.bf16.mxu0 %v2029_v1  ;;  %1894 = vmatprep.subr.bf16.mxu1 %v2029_v1  ;;  %v2001_v1 = vld [vmem:[%s2077_s26 + $0xc0] ss:$8 sps:$4 sm:$0xff]  }
  0x31   : > { %748 = vmatpush2.bf16.msra.mxu0 %v1924_v16  ;;  %1904 = vmatpush2.bf16.msra.mxu1 %v1924_v16 }
  0x34   : > { %750 = vmatmul.mubr.bf16.vlgmr.msra.gmra.mxu0 %v1925_v17  ;;  %878 = vmatmul.mubr.bf16.vlgmr.msra.gmra.mxu1 %v1928_v18 }
  0x35   : > { %1532 = vmatprep.mubr.msk.bf16.mxu0 %vm613_vm0, %v1931_v19  ;;  %1548 = vmatprep.mubr.msk.bf16.mxu1 %vm613_vm0, %v1933_v20 }
  0x3c   : > { %758 = vmatmul.mubr.bf16.gmra.mxu0 %v1935_v21  ;;  %886 = vmatmul.mubr.bf16.gmra.mxu1 %v1936_v22 }
  0x3d   : > { %1533 = vmatprep.mubr.msk.bf16.mxu0 %vm613_vm0, %v1937_v23  ;;  %1549 = vmatprep.mubr.msk.bf16.mxu1 %vm613_vm0, %v1939_v24 }
  0x44   : > { %766 = vmatmul.mubr.bf16.gmra.mxu0 %v1941_v25  ;;  %894 = vmatmul.mubr.bf16.gmra.mxu1 %v1942_v26 }
  0x45   : > { %1534 = vmatprep.mubr.msk.bf16.mxu0 %vm613_vm0, %v1943_v27  ;;  %1550 = vmatprep.mubr.msk.bf16.mxu1 %vm613_vm0, %v1945_v28 }
  0x4c   : > { %774 = vmatmul.mubr.bf16.gmra.mxu0 %v1947_v29  ;;  %902 = vmatmul.mubr.bf16.gmra.mxu1 %v1948_v30 }
  0x4d   : > { %1535 = vmatprep.mubr.msk.bf16.mxu0 %vm613_vm0, %v1949_v31  ;;  %1551 = vmatprep.mubr.msk.bf16.mxu1 %vm613_vm0, %v1951_v32 }
  0x54   : > { %782 = vmatmul.mubr.bf16.gmra.mxu0 %v1953_v33  ;;  %910 = vmatmul.mubr.bf16.gmra.mxu1 %v1954_v34 }
  0x55   : > { %1536 = vmatprep.mubr.msk.bf16.mxu0 %vm613_vm0, %v1955_v35  ;;  %1552 = vmatprep.mubr.msk.bf16.mxu1 %vm613_vm0, %v1957_v36 }
  0x5c   : > { %790 = vmatmul.mubr.bf16.gmra.mxu0 %v1959_v37  ;;  %918 = vmatmul.mubr.bf16.gmra.mxu1 %v1960_v38 }
  0x5d   : > { %1537 = vmatprep.mubr.msk.bf16.mxu0 %vm613_vm0, %v1961_v39  ;;  %1553 = vmatprep.mubr.msk.bf16.mxu1 %vm613_vm0, %v1963_v40 }
  0x64   : > { %798 = vmatmul.mubr.bf16.gmra.mxu0 %v1965_v41  ;;  %926 = vmatmul.mubr.bf16.gmra.mxu1 %v1966_v42 }
  0x65   : > { %1538 = vmatprep.mubr.msk.bf16.mxu0 %vm613_vm0, %v1967_v43  ;;  %1554 = vmatprep.mubr.msk.bf16.mxu1 %vm613_vm0, %v1969_v44 }
  0x6c   : > { %806 = vmatmul.mubr.bf16.gmra.mxu0 %v1971_v45  ;;  %934 = vmatmul.mubr.bf16.gmra.mxu1 %v1972_v46 }
  0x6d   : > { %1539 = vmatprep.mubr.msk.bf16.mxu0 %vm613_vm0, %v1973_v47  ;;  %1555 = vmatprep.mubr.msk.bf16.mxu1 %vm613_vm0, %v1975_v48 }
  0x74   : > { %814 = vmatmul.mubr.bf16.gmra.mxu0 %v1977_v49  ;;  %942 = vmatmul.mubr.bf16.gmra.mxu1 %v1978_v50 }
  0x75   : > { %1540 = vmatprep.mubr.msk.bf16.mxu0 %vm613_vm0, %v1979_v51  ;;  %1556 = vmatprep.mubr.msk.bf16.mxu1 %vm613_vm0, %v1981_v52 }
  0x7c   : > { %822 = vmatmul.mubr.bf16.gmra.mxu0 %v1983_v53  ;;  %950 = vmatmul.mubr.bf16.gmra.mxu1 %v1984_v54 }
  0x7d   : > { %1541 = vmatprep.mubr.msk.bf16.mxu0 %vm613_vm0, %v1985_v55  ;;  %1557 = vmatprep.mubr.msk.bf16.mxu1 %vm613_vm0, %v1987_v56 }
  0x84   : > { %830 = vmatmul.mubr.bf16.gmra.mxu0 %v1989_v57  ;;  %958 = vmatmul.mubr.bf16.gmra.mxu1 %v1990_v58 }
  0x85   : > { %1542 = vmatprep.mubr.msk.bf16.mxu0 %vm613_vm0, %v1991_v59  ;;  %1558 = vmatprep.mubr.msk.bf16.mxu1 %vm613_vm0, %v1993_v60 }
  0x8c   : > { %838 = vmatmul.mubr.bf16.gmra.mxu0 %v1995_v61  ;;  %966 = vmatmul.mubr.bf16.gmra.mxu1 %v1996_v62 }
  0x8d   : > { %1543 = vmatprep.mubr.msk.bf16.mxu0 %vm613_vm0, %v1997_v63  ;;  %1559 = vmatprep.mubr.msk.bf16.mxu1 %vm613_vm0, %v1999_v0 }
  0x94   : > { %846 = vmatmul.mubr.bf16.gmra.mxu0 %v2001_v1  ;;  %974 = vmatmul.mubr.bf16.gmra.mxu1 %v2002_v2 }
  0x95   : > { %1544 = vmatprep.mubr.msk.bf16.mxu0 %vm613_vm0, %v2003_v3  ;;  %1560 = vmatprep.mubr.msk.bf16.mxu1 %vm613_vm0, %v2005_v4 }
  0x9c   : > { %854 = vmatmul.mubr.bf16.gmra.mxu0 %v2007_v5  ;;  %982 = vmatmul.mubr.bf16.gmra.mxu1 %v2008_v6 }
  0x9d   : > { %1545 = vmatprep.mubr.msk.bf16.mxu0 %vm613_vm0, %v2009_v7  ;;  %1561 = vmatprep.mubr.msk.bf16.mxu1 %vm613_vm0, %v2011_v8 }
  0xa4   : > { %862 = vmatmul.mubr.bf16.gmra.mxu0 %v2013_v9  ;;  %990 = vmatmul.mubr.bf16.gmra.mxu1 %v2014_v10 }
  0xa5   : > { %1546 = vmatprep.mubr.msk.bf16.mxu0 %vm613_vm0, %v2015_v11  ;;  %1562 = vmatprep.mubr.msk.bf16.mxu1 %vm613_vm0, %v2017_v12 }
  0xac   : > { %870 = vmatmul.mubr.bf16.gmra.mxu0 %v2019_v13  ;;  %998 = vmatmul.mubr.bf16.gmra.mxu1 %v2020_v14 }
  0xf4   : > { %v751_v16 = vpop.f32.mrf.mxu0  ;;  %v879_v17 = vpop.f32.mrf.mxu1 }
  0xf5   : > { %v752_v20 = vadd.f32 %v2196_v15, %v751_v16  ;;  %v880_v21 = vadd.f32 %v2196_v15, %v879_v17 }
  0xf6   : > { %v753_v18 = vpop.f32.mrf.mxu0  ;;  %v881_v19 = vpop.f32.mrf.mxu1 }
  0xf7   : > { %v1006_v28 = vmax.f32 %v752_v20, 0.0  ;;  %v1038_v29 = vmax.f32 %v880_v21, 0.0 }
  0xf8   : > { %v754_v22 = vpop.f32.mrf.mxu0  ;;  %v882_v23 = vpop.f32.mrf.mxu1 }
  0xf9   : > { %v755_v24 = vadd.f32 %v2196_v15, %v754_v22  ;;  %v883_v25 = vadd.f32 %v2196_v15, %v882_v23 }
  0xfa   : > { %v756_v26 = vpop.f32.mrf.mxu0  ;;  %v884_v27 = vpop.f32.mrf.mxu1 }
  0xfb   : > { %v1007_v30 = vmax.f32 %v755_v24, 0.0  ;;  %v1039_v31 = vmax.f32 %v883_v25, 0.0 }
  0xfc   : > { %v759_v32 = vpop.f32.mrf.mxu0  ;;  %v887_v33 = vpop.f32.mrf.mxu1 }
  0xfd   : > { %v1697_v34 = vpack.c.bf16 %v1007_v30, %v1006_v28  ;;  %v1777_v35 = vpack.c.bf16 %v1039_v31, %v1038_v29  ;;  %v760_v38 = vadd.f32 %v2196_v15, %v759_v32  ;;  %v888_v39 = vadd.f32 %v2196_v15, %v887_v33 }
  0xfe   : > { %v761_v36 = vpop.f32.mrf.mxu0  ;;  %v889_v37 = vpop.f32.mrf.mxu1 }
  0xff   : > { %1698 = vst [vmem:[%s2206_s18] sm:$0xff] %v1697_v34   ;;  %1869 = vst [vmem:[%s2206_s18 + $0x80] sm:$0xff] %v1777_v35   ;;  %v1008_v46 = vmax.f32 %v760_v38, 0.0  ;;  %v1040_v47 = vmax.f32 %v888_v39, 0.0 }
 0x100   : > { %v762_v40 = vpop.f32.mrf.mxu0  ;;  %v890_v41 = vpop.f32.mrf.mxu1 }
 0x101   : > { %v763_v42 = vadd.f32 %v2196_v15, %v762_v40  ;;  %v891_v43 = vadd.f32 %v2196_v15, %v890_v41 }
 0x102   : > { %v764_v44 = vpop.f32.mrf.mxu0  ;;  %v892_v45 = vpop.f32.mrf.mxu1 }
 0x103   : > { %v1009_v48 = vmax.f32 %v763_v42, 0.0  ;;  %v1041_v49 = vmax.f32 %v891_v43, 0.0 }
 0x104   : > { %v767_v50 = vpop.f32.mrf.mxu0  ;;  %v895_v51 = vpop.f32.mrf.mxu1 }
 0x105   : > { %v1702_v52 = vpack.c.bf16 %v1009_v48, %v1008_v46  ;;  %v1782_v53 = vpack.c.bf16 %v1041_v49, %v1040_v47  ;;  %v768_v56 = vadd.f32 %v2196_v15, %v767_v50  ;;  %v896_v57 = vadd.f32 %v2196_v15, %v895_v51 }
 0x106   : > { %v769_v54 = vpop.f32.mrf.mxu0  ;;  %v897_v55 = vpop.f32.mrf.mxu1 }
 0x107   : > { %1854 = vst [vmem:[%s2206_s18 + $0x8] sm:$0xff] %v1702_v52   ;;  %1870 = vst [vmem:[%s2206_s18 + $0x88] sm:$0xff] %v1782_v53   ;;  %v1010_v0 = vmax.f32 %v768_v56, 0.0  ;;  %v1042_v1 = vmax.f32 %v896_v57, 0.0 }
 0x108   : > { %v770_v58 = vpop.f32.mrf.mxu0  ;;  %v898_v59 = vpop.f32.mrf.mxu1 }
 0x109   : > { %v771_v60 = vadd.f32 %v2196_v15, %v770_v58  ;;  %v899_v61 = vadd.f32 %v2196_v15, %v898_v59 }
 0x10a   : > { %v772_v62 = vpop.f32.mrf.mxu0  ;;  %v900_v63 = vpop.f32.mrf.mxu1 }
 0x10b   : > { %v1011_v2 = vmax.f32 %v771_v60, 0.0  ;;  %v1043_v3 = vmax.f32 %v899_v61, 0.0 }
 0x10c   : > { %v775_v4 = vpop.f32.mrf.mxu0  ;;  %v903_v5 = vpop.f32.mrf.mxu1 }
 0x10d   : > { %v1707_v6 = vpack.c.bf16 %v1011_v2, %v1010_v0  ;;  %v1787_v7 = vpack.c.bf16 %v1043_v3, %v1042_v1  ;;  %v776_v10 = vadd.f32 %v2196_v15, %v775_v4  ;;  %v904_v11 = vadd.f32 %v2196_v15, %v903_v5 }
 0x10e   : > { %v777_v8 = vpop.f32.mrf.mxu0  ;;  %v905_v9 = vpop.f32.mrf.mxu1 }
 0x10f   : > { %1855 = vst [vmem:[%s2206_s18 + $0x10] sm:$0xff] %v1707_v6   ;;  %1871 = vst [vmem:[%s2206_s18 + $0x90] sm:$0xff] %v1787_v7   ;;  %v1012_v19 = vmax.f32 %v776_v10, 0.0  ;;  %v1044_v20 = vmax.f32 %v904_v11, 0.0 }
 0x110   : > { %v778_v12 = vpop.f32.mrf.mxu0  ;;  %v906_v13 = vpop.f32.mrf.mxu1 }
 0x111   : > { %v779_v14 = vadd.f32 %v2196_v15, %v778_v12  ;;  %v907_v16 = vadd.f32 %v2196_v15, %v906_v13 }
 0x112   : > { %v780_v17 = vpop.f32.mrf.mxu0  ;;  %v908_v18 = vpop.f32.mrf.mxu1 }
 0x113   : > { %v1013_v21 = vmax.f32 %v779_v14, 0.0  ;;  %v1045_v22 = vmax.f32 %v907_v16, 0.0 }
 0x114   : > { %v783_v23 = vpop.f32.mrf.mxu0  ;;  %v911_v24 = vpop.f32.mrf.mxu1 }
 0x115   : > { %v1712_v25 = vpack.c.bf16 %v1013_v21, %v1012_v19  ;;  %v1792_v26 = vpack.c.bf16 %v1045_v22, %v1044_v20  ;;  %v784_v29 = vadd.f32 %v2196_v15, %v783_v23  ;;  %v912_v30 = vadd.f32 %v2196_v15, %v911_v24 }
 0x116   : > { %v785_v27 = vpop.f32.mrf.mxu0  ;;  %v913_v28 = vpop.f32.mrf.mxu1 }
 0x117   : > { %1856 = vst [vmem:[%s2206_s18 + $0x18] sm:$0xff] %v1712_v25   ;;  %1872 = vst [vmem:[%s2206_s18 + $0x98] sm:$0xff] %v1792_v26   ;;  %v1014_v37 = vmax.f32 %v784_v29, 0.0  ;;  %v1046_v38 = vmax.f32 %v912_v30, 0.0 }
 0x118   : > { %v786_v31 = vpop.f32.mrf.mxu0  ;;  %v914_v32 = vpop.f32.mrf.mxu1 }
 0x119   : > { %v787_v33 = vadd.f32 %v2196_v15, %v786_v31  ;;  %v915_v34 = vadd.f32 %v2196_v15, %v914_v32 }
 0x11a   : > { %v788_v35 = vpop.f32.mrf.mxu0  ;;  %v916_v36 = vpop.f32.mrf.mxu1 }
 0x11b   : > { %v1015_v39 = vmax.f32 %v787_v33, 0.0  ;;  %v1047_v40 = vmax.f32 %v915_v34, 0.0 }
 0x11c   : > { %v791_v41 = vpop.f32.mrf.mxu0  ;;  %v919_v42 = vpop.f32.mrf.mxu1 }
 0x11d   : > { %v1717_v43 = vpack.c.bf16 %v1015_v39, %v1014_v37  ;;  %v1797_v44 = vpack.c.bf16 %v1047_v40, %v1046_v38  ;;  %v792_v47 = vadd.f32 %v2196_v15, %v791_v41  ;;  %v920_v48 = vadd.f32 %v2196_v15, %v919_v42 }
 0x11e   : > { %v793_v45 = vpop.f32.mrf.mxu0  ;;  %v921_v46 = vpop.f32.mrf.mxu1 }
 0x11f   : > { %1857 = vst [vmem:[%s2206_s18 + $0x20] sm:$0xff] %v1717_v43   ;;  %1873 = vst [vmem:[%s2206_s18 + $0xa0] sm:$0xff] %v1797_v44   ;;  %v1016_v55 = vmax.f32 %v792_v47, 0.0  ;;  %v1048_v56 = vmax.f32 %v920_v48, 0.0 }
 0x120   : > { %v794_v49 = vpop.f32.mrf.mxu0  ;;  %v922_v50 = vpop.f32.mrf.mxu1 }
 0x121   : > { %v795_v51 = vadd.f32 %v2196_v15, %v794_v49  ;;  %v923_v52 = vadd.f32 %v2196_v15, %v922_v50 }
 0x122   : > { %v796_v53 = vpop.f32.mrf.mxu0  ;;  %v924_v54 = vpop.f32.mrf.mxu1 }
 0x123   : > { %v1017_v57 = vmax.f32 %v795_v51, 0.0  ;;  %v1049_v58 = vmax.f32 %v923_v52, 0.0 }
 0x124   : > { %v799_v59 = vpop.f32.mrf.mxu0  ;;  %v927_v60 = vpop.f32.mrf.mxu1 }
 0x125   : > { %v1722_v61 = vpack.c.bf16 %v1017_v57, %v1016_v55  ;;  %v1802_v62 = vpack.c.bf16 %v1049_v58, %v1048_v56  ;;  %v800_v1 = vadd.f32 %v2196_v15, %v799_v59  ;;  %v928_v2 = vadd.f32 %v2196_v15, %v927_v60 }
 0x126   : > { %v801_v63 = vpop.f32.mrf.mxu0  ;;  %v929_v0 = vpop.f32.mrf.mxu1 }
 0x127   : > { %1858 = vst [vmem:[%s2206_s18 + $0x28] sm:$0xff] %v1722_v61   ;;  %1874 = vst [vmem:[%s2206_s18 + $0xa8] sm:$0xff] %v1802_v62   ;;  %v1018_v9 = vmax.f32 %v800_v1, 0.0  ;;  %v1050_v10 = vmax.f32 %v928_v2, 0.0 }
 0x128   : > { %v802_v3 = vpop.f32.mrf.mxu0  ;;  %v930_v4 = vpop.f32.mrf.mxu1 }
 0x129   : > { %v803_v5 = vadd.f32 %v2196_v15, %v802_v3  ;;  %v931_v6 = vadd.f32 %v2196_v15, %v930_v4 }
 0x12a   : > { %v804_v7 = vpop.f32.mrf.mxu0  ;;  %v932_v8 = vpop.f32.mrf.mxu1 }
 0x12b   : > { %v1019_v11 = vmax.f32 %v803_v5, 0.0  ;;  %v1051_v12 = vmax.f32 %v931_v6, 0.0 }
 0x12c   : > { %v807_v13 = vpop.f32.mrf.mxu0  ;;  %v935_v14 = vpop.f32.mrf.mxu1 }
 0x12d   : > { %v1727_v16 = vpack.c.bf16 %v1019_v11, %v1018_v9  ;;  %v1807_v17 = vpack.c.bf16 %v1051_v12, %v1050_v10  ;;  %v808_v20 = vadd.f32 %v2196_v15, %v807_v13  ;;  %v936_v21 = vadd.f32 %v2196_v15, %v935_v14 }
 0x12e   : > { %v809_v18 = vpop.f32.mrf.mxu0  ;;  %v937_v19 = vpop.f32.mrf.mxu1 }
 0x12f   : > { %1859 = vst [vmem:[%s2206_s18 + $0x30] sm:$0xff] %v1727_v16   ;;  %1875 = vst [vmem:[%s2206_s18 + $0xb0] sm:$0xff] %v1807_v17   ;;  %v1020_v28 = vmax.f32 %v808_v20, 0.0  ;;  %v1052_v29 = vmax.f32 %v936_v21, 0.0 }
 0x130   : > { %v810_v22 = vpop.f32.mrf.mxu0  ;;  %v938_v23 = vpop.f32.mrf.mxu1 }
 0x131   : > { %v811_v24 = vadd.f32 %v2196_v15, %v810_v22  ;;  %v939_v25 = vadd.f32 %v2196_v15, %v938_v23 }
 0x132   : > { %v812_v26 = vpop.f32.mrf.mxu0  ;;  %v940_v27 = vpop.f32.mrf.mxu1 }
 0x133   : > { %v1021_v30 = vmax.f32 %v811_v24, 0.0  ;;  %v1053_v31 = vmax.f32 %v939_v25, 0.0 }
 0x134   : > { %v815_v32 = vpop.f32.mrf.mxu0  ;;  %v943_v33 = vpop.f32.mrf.mxu1 }
 0x135   : > { %v1732_v34 = vpack.c.bf16 %v1021_v30, %v1020_v28  ;;  %v1812_v35 = vpack.c.bf16 %v1053_v31, %v1052_v29  ;;  %v816_v38 = vadd.f32 %v2196_v15, %v815_v32  ;;  %v944_v39 = vadd.f32 %v2196_v15, %v943_v33 }
 0x136   : > { %v817_v36 = vpop.f32.mrf.mxu0  ;;  %v945_v37 = vpop.f32.mrf.mxu1 }
 0x137   : > { %1860 = vst [vmem:[%s2206_s18 + $0x38] sm:$0xff] %v1732_v34   ;;  %1876 = vst [vmem:[%s2206_s18 + $0xb8] sm:$0xff] %v1812_v35   ;;  %v1022_v46 = vmax.f32 %v816_v38, 0.0  ;;  %v1054_v47 = vmax.f32 %v944_v39, 0.0 }
 0x138   : > { %v818_v40 = vpop.f32.mrf.mxu0  ;;  %v946_v41 = vpop.f32.mrf.mxu1 }
 0x139   : > { %v819_v42 = vadd.f32 %v2196_v15, %v818_v40  ;;  %v947_v43 = vadd.f32 %v2196_v15, %v946_v41 }
 0x13a   : > { %v820_v44 = vpop.f32.mrf.mxu0  ;;  %v948_v45 = vpop.f32.mrf.mxu1 }
 0x13b   : > { %v1023_v48 = vmax.f32 %v819_v42, 0.0  ;;  %v1055_v49 = vmax.f32 %v947_v43, 0.0 }
 0x13c   : > { %v823_v50 = vpop.f32.mrf.mxu0  ;;  %v951_v51 = vpop.f32.mrf.mxu1 }
 0x13d   : > { %v1737_v52 = vpack.c.bf16 %v1023_v48, %v1022_v46  ;;  %v1817_v53 = vpack.c.bf16 %v1055_v49, %v1054_v47  ;;  %v824_v56 = vadd.f32 %v2196_v15, %v823_v50  ;;  %v952_v57 = vadd.f32 %v2196_v15, %v951_v51 }
 0x13e   : > { %v825_v54 = vpop.f32.mrf.mxu0  ;;  %v953_v55 = vpop.f32.mrf.mxu1 }
 0x13f   : > { %1861 = vst [vmem:[%s2206_s18 + $0x40] sm:$0xff] %v1737_v52   ;;  %1877 = vst [vmem:[%s2206_s18 + $0xc0] sm:$0xff] %v1817_v53   ;;  %v1024_v0 = vmax.f32 %v824_v56, 0.0  ;;  %v1056_v1 = vmax.f32 %v952_v57, 0.0 }
 0x140   : > { %v826_v58 = vpop.f32.mrf.mxu0  ;;  %v954_v59 = vpop.f32.mrf.mxu1 }
 0x141   : > { %v827_v60 = vadd.f32 %v2196_v15, %v826_v58  ;;  %v955_v61 = vadd.f32 %v2196_v15, %v954_v59 }
 0x142   : > { %v828_v62 = vpop.f32.mrf.mxu0  ;;  %v956_v63 = vpop.f32.mrf.mxu1 }
 0x143   : > { %v1025_v2 = vmax.f32 %v827_v60, 0.0  ;;  %v1057_v3 = vmax.f32 %v955_v61, 0.0 }
 0x144   : > { %v831_v4 = vpop.f32.mrf.mxu0  ;;  %v959_v5 = vpop.f32.mrf.mxu1 }
 0x145   : > { %v1742_v6 = vpack.c.bf16 %v1025_v2, %v1024_v0  ;;  %v1822_v7 = vpack.c.bf16 %v1057_v3, %v1056_v1  ;;  %v832_v10 = vadd.f32 %v2196_v15, %v831_v4  ;;  %v960_v11 = vadd.f32 %v2196_v15, %v959_v5 }
 0x146   : > { %v833_v8 = vpop.f32.mrf.mxu0  ;;  %v961_v9 = vpop.f32.mrf.mxu1 }
 0x147   : > { %1862 = vst [vmem:[%s2206_s18 + $0x48] sm:$0xff] %v1742_v6   ;;  %1878 = vst [vmem:[%s2206_s18 + $0xc8] sm:$0xff] %v1822_v7   ;;  %v1026_v19 = vmax.f32 %v832_v10, 0.0  ;;  %v1058_v20 = vmax.f32 %v960_v11, 0.0 }
 0x148   : > { %v834_v12 = vpop.f32.mrf.mxu0  ;;  %v962_v13 = vpop.f32.mrf.mxu1 }
 0x149   : > { %v835_v14 = vadd.f32 %v2196_v15, %v834_v12  ;;  %v963_v16 = vadd.f32 %v2196_v15, %v962_v13 }
 0x14a   : > { %v836_v17 = vpop.f32.mrf.mxu0  ;;  %v964_v18 = vpop.f32.mrf.mxu1 }
 0x14b   : > { %v1027_v21 = vmax.f32 %v835_v14, 0.0  ;;  %v1059_v22 = vmax.f32 %v963_v16, 0.0 }
 0x14c   : > { %v839_v23 = vpop.f32.mrf.mxu0  ;;  %v967_v24 = vpop.f32.mrf.mxu1 }
 0x14d   : > { %v1747_v25 = vpack.c.bf16 %v1027_v21, %v1026_v19  ;;  %v1827_v26 = vpack.c.bf16 %v1059_v22, %v1058_v20  ;;  %v840_v29 = vadd.f32 %v2196_v15, %v839_v23  ;;  %v968_v30 = vadd.f32 %v2196_v15, %v967_v24 }
 0x14e   : > { %v841_v27 = vpop.f32.mrf.mxu0  ;;  %v969_v28 = vpop.f32.mrf.mxu1 }
 0x14f   : > { %1863 = vst [vmem:[%s2206_s18 + $0x50] sm:$0xff] %v1747_v25   ;;  %1879 = vst [vmem:[%s2206_s18 + $0xd0] sm:$0xff] %v1827_v26   ;;  %v1028_v37 = vmax.f32 %v840_v29, 0.0  ;;  %v1060_v38 = vmax.f32 %v968_v30, 0.0 }
 0x150   : > { %v842_v31 = vpop.f32.mrf.mxu0  ;;  %v970_v32 = vpop.f32.mrf.mxu1 }
 0x151   : > { %v843_v33 = vadd.f32 %v2196_v15, %v842_v31  ;;  %v971_v34 = vadd.f32 %v2196_v15, %v970_v32 }
 0x152   : > { %v844_v35 = vpop.f32.mrf.mxu0  ;;  %v972_v36 = vpop.f32.mrf.mxu1 }
 0x153   : > { %v1029_v39 = vmax.f32 %v843_v33, 0.0  ;;  %v1061_v40 = vmax.f32 %v971_v34, 0.0 }
 0x154   : > { %v847_v41 = vpop.f32.mrf.mxu0  ;;  %v975_v42 = vpop.f32.mrf.mxu1 }
 0x155   : > { %v1752_v43 = vpack.c.bf16 %v1029_v39, %v1028_v37  ;;  %v1832_v44 = vpack.c.bf16 %v1061_v40, %v1060_v38  ;;  %v848_v47 = vadd.f32 %v2196_v15, %v847_v41  ;;  %v976_v48 = vadd.f32 %v2196_v15, %v975_v42 }
 0x156   : > { %v849_v45 = vpop.f32.mrf.mxu0  ;;  %v977_v46 = vpop.f32.mrf.mxu1 }
 0x157   : > { %1864 = vst [vmem:[%s2206_s18 + $0x58] sm:$0xff] %v1752_v43   ;;  %1880 = vst [vmem:[%s2206_s18 + $0xd8] sm:$0xff] %v1832_v44   ;;  %v1030_v55 = vmax.f32 %v848_v47, 0.0  ;;  %v1062_v56 = vmax.f32 %v976_v48, 0.0 }
 0x158   : > { %v850_v49 = vpop.f32.mrf.mxu0  ;;  %v978_v50 = vpop.f32.mrf.mxu1 }
 0x159   : > { %v851_v51 = vadd.f32 %v2196_v15, %v850_v49  ;;  %v979_v52 = vadd.f32 %v2196_v15, %v978_v50 }
 0x15a   : > { %v852_v53 = vpop.f32.mrf.mxu0  ;;  %v980_v54 = vpop.f32.mrf.mxu1 }
 0x15b   : > { %v1031_v57 = vmax.f32 %v851_v51, 0.0  ;;  %v1063_v58 = vmax.f32 %v979_v52, 0.0 }
 0x15c   : > { %v855_v59 = vpop.f32.mrf.mxu0  ;;  %v983_v60 = vpop.f32.mrf.mxu1 }
 0x15d   : > { %v1757_v61 = vpack.c.bf16 %v1031_v57, %v1030_v55  ;;  %v1837_v62 = vpack.c.bf16 %v1063_v58, %v1062_v56  ;;  %v856_v1 = vadd.f32 %v2196_v15, %v855_v59  ;;  %v984_v2 = vadd.f32 %v2196_v15, %v983_v60 }
 0x15e   : > { %v857_v63 = vpop.f32.mrf.mxu0  ;;  %v985_v0 = vpop.f32.mrf.mxu1 }
 0x15f   : > { %1865 = vst [vmem:[%s2206_s18 + $0x60] sm:$0xff] %v1757_v61   ;;  %1881 = vst [vmem:[%s2206_s18 + $0xe0] sm:$0xff] %v1837_v62   ;;  %v1032_v9 = vmax.f32 %v856_v1, 0.0  ;;  %v1064_v10 = vmax.f32 %v984_v2, 0.0 }
 0x160   : > { %v858_v3 = vpop.f32.mrf.mxu0  ;;  %v986_v4 = vpop.f32.mrf.mxu1 }
 0x161   : > { %v859_v5 = vadd.f32 %v2196_v15, %v858_v3  ;;  %v987_v6 = vadd.f32 %v2196_v15, %v986_v4 }
 0x162   : > { %v860_v7 = vpop.f32.mrf.mxu0  ;;  %v988_v8 = vpop.f32.mrf.mxu1 }
 0x163   : > { %v1033_v11 = vmax.f32 %v859_v5, 0.0  ;;  %v1065_v12 = vmax.f32 %v987_v6, 0.0 }
 0x164   : > { %v863_v13 = vpop.f32.mrf.mxu0  ;;  %v991_v14 = vpop.f32.mrf.mxu1 }
 0x165   : > { %v1762_v16 = vpack.c.bf16 %v1033_v11, %v1032_v9  ;;  %v1842_v17 = vpack.c.bf16 %v1065_v12, %v1064_v10  ;;  %v864_v20 = vadd.f32 %v2196_v15, %v863_v13  ;;  %v992_v21 = vadd.f32 %v2196_v15, %v991_v14 }
 0x166   : > { %v865_v18 = vpop.f32.mrf.mxu0  ;;  %v993_v19 = vpop.f32.mrf.mxu1 }
 0x167   : > { %1866 = vst [vmem:[%s2206_s18 + $0x68] sm:$0xff] %v1762_v16   ;;  %1882 = vst [vmem:[%s2206_s18 + $0xe8] sm:$0xff] %v1842_v17   ;;  %v1034_v28 = vmax.f32 %v864_v20, 0.0  ;;  %v1066_v29 = vmax.f32 %v992_v21, 0.0 }
 0x168   : > { %v866_v22 = vpop.f32.mrf.mxu0  ;;  %v994_v23 = vpop.f32.mrf.mxu1 }
 0x169   : > { %v867_v24 = vadd.f32 %v2196_v15, %v866_v22  ;;  %v995_v25 = vadd.f32 %v2196_v15, %v994_v23 }
 0x16a   : > { %v868_v26 = vpop.f32.mrf.mxu0  ;;  %v996_v27 = vpop.f32.mrf.mxu1 }
 0x16b   : > { %v1035_v30 = vmax.f32 %v867_v24, 0.0  ;;  %v1067_v31 = vmax.f32 %v995_v25, 0.0 }
 0x16c   : > { %v871_v32 = vpop.f32.mrf.mxu0  ;;  %v999_v33 = vpop.f32.mrf.mxu1 }
 0x16d   : > { %v1767_v34 = vpack.c.bf16 %v1035_v30, %v1034_v28  ;;  %v1847_v35 = vpack.c.bf16 %v1067_v31, %v1066_v29  ;;  %v872_v38 = vadd.f32 %v2196_v15, %v871_v32  ;;  %v1000_v39 = vadd.f32 %v2196_v15, %v999_v33 }
 0x16e   : > { %v873_v36 = vpop.f32.mrf.mxu0  ;;  %v1001_v37 = vpop.f32.mrf.mxu1 }
 0x16f   : > { %1867 = vst [vmem:[%s2206_s18 + $0x70] sm:$0xff] %v1767_v34   ;;  %1883 = vst [vmem:[%s2206_s18 + $0xf0] sm:$0xff] %v1847_v35   ;;  %v1036_v46 = vmax.f32 %v872_v38, 0.0  ;;  %v1068_v47 = vmax.f32 %v1000_v39, 0.0 }
 0x170   : > { %v874_v40 = vpop.f32.mrf.mxu0  ;;  %v1002_v41 = vpop.f32.mrf.mxu1 }
 0x171   : > { %v875_v42 = vadd.f32 %v2196_v15, %v874_v40  ;;  %v1003_v43 = vadd.f32 %v2196_v15, %v1002_v41 }
 0x172   : > { %v876_v44 = vpop.f32.mrf.mxu0  ;;  %v1004_v45 = vpop.f32.mrf.mxu1 }
 0x173   : > { %v1037_v48 = vmax.f32 %v875_v42, 0.0  ;;  %v1069_v49 = vmax.f32 %v1003_v43, 0.0 }
 0x175   : > { %v1772_v50 = vpack.c.bf16 %v1037_v48, %v1036_v46  ;;  %v1852_v51 = vpack.c.bf16 %v1069_v49, %v1068_v47 }
 0x177   : > { %1868 = vst [vmem:[%s2206_s18 + $0x78] sm:$0xff] %v1772_v50   ;;  %1884 = vst [vmem:[%s2206_s18 + $0xf8] sm:$0xff] %v1852_v51  }
 0x178 PF: > { %s13_s12 = sadd.s32 1, %s2027_s12  }
 0x179   : > { %p10_p4 = scmp.ge.s32.totalorder %s13_s12, 6  }
 0x17b   :  { %12 = sbr.rel (!%p10_p4) target bundleno = 1 (0x1), region = 62 }

// kernel: cnn_classifier_forward.13
= control target key start
LH: loop header
LB: loop body
LE: loop exit
PB: predicated region body
PF: predicated region fallthrough
CT: control target
= control target key end

     0   :  { %s1380_s6 = smov 0   ;;  %s1740_s0 = inlined_call_operand.vmem [shape: bf16[2,17,2,17,256], index: 0, kind: input, shape index: {}]   ;;  %s1741_s1 = inlined_call_operand.vmem [shape: bf16[2,16,16,128], index: 1, kind: output, shape index: {}]  }
   0x1 LB: > { %s1183_s7 = sadd.s32 4294967295, %s1368_s6   ;;  %p1187_p0 = scmp.ge.s32.totalorder %s1368_s6, 1  ;;  %s1368_s6 = sphi %s1380_s6, %s11_s6  }
   0x2   : > { %p87_p1 = scmp.lt.s32.totalorder %s1368_s6, 3 }
   0x4   : > { %p88_p2 = pnand %p1187_p0, %p87_p1 }
   0x5   : > { %p107_p3 = scmp.lt.s32.totalorder (!%p88_p2), %s1183_s7, 1 }
   0x6   : > { %91 = sbr.rel (%p88_p2) target bundleno = 174 (0xae), region = 24 }
   0xb   : > { %s1743_s7 = smov (!%p107_p3, %s1183_s7), 1  ;;  %vm461_vm0 = vcmask 1046528  }
   0xc   : > { %s1353_s8 = smul.u32 816, %s1743_s7  ;;  %s1225_s12 = sshll.u32 %s1743_s7, 7 }
   0xd   : > { %s1485_s15 = scalar_lea.vmem %s1741_s1, %s1225_s12 }
   0xe   : > { %s1394_s11 = scalar_lea.vmem %s1740_s0, %s1353_s8 }
   0xf   : > { %v117_v0 = vld [vmem:[%s1394_s11] sm:$0xff]  ;;  %v118_v1 = vld [vmem:[%s1394_s11 + $0x8] sm:$0xff]  ;;  %v119_v2 = vld [vmem:[%s1394_s11 + $0x10] sm:$0x1] }
  0x10   : > { %v1400_v3 = vld [vmem:[%s1394_s11 + $0x18] sm:$0xff]  ;;  %v1403_v4 = vld [vmem:[%s1394_s11 + $0x20] sm:$0xff]  ;;  %v122_v5 = vld [vmem:[%s1394_s11 + $0x28] sm:$0x1]  ;;  %v216_v6 = vunpack.c.l.bf16 %v117_v0  ;;  %v217_v7 = vunpack.c.h.bf16 %v117_v0  ;;  %v218_v8 = vunpack.c.l.bf16 %v118_v1  ;;  %v219_v9 = vunpack.c.h.bf16 %v118_v1 }
  0x11   : > { %v1407_v10 = vld [vmem:[%s1394_s11 + $0x30] sm:$0xff]  ;;  %v1410_v11 = vld [vmem:[%s1394_s11 + $0x38] sm:$0xff]  ;;  %v125_v12 = vld [vmem:[%s1394_s11 + $0x40] sm:$0x1]  ;;  %v220_v13 = vunpack.c.l.bf16 %v119_v2  ;;  %v221_v14 = vunpack.c.l.bf16 %v1400_v3  ;;  %v222_v15 = vunpack.c.h.bf16 %v1400_v3  ;;  %v223_v16 = vunpack.c.l.bf16 %v1403_v4 }
  0x12   : > { %v126_v17 = vld [vmem:[%s1394_s11 + $0x48] sm:$0xff]  ;;  %v127_v18 = vld [vmem:[%s1394_s11 + $0x50] sm:$0xff]  ;;  %v224_v19 = vunpack.c.h.bf16 %v1403_v4  ;;  %v225_v20 = vunpack.c.l.bf16 %v122_v5  ;;  %v1420_v21 = vunpack.c.l.bf16 %v1407_v10  ;;  %v227_v22 = vunpack.c.h.bf16 %v1407_v10  ;;  %v128_v47 = vld [vmem:[%s1394_s11 + $0x58] sm:$0x1] }
  0x13   : > { %v1424_v23 = vunpack.c.l.bf16 %v1410_v11  ;;  %v229_v24 = vunpack.c.h.bf16 %v1410_v11  ;;  %v230_v25 = vunpack.c.l.bf16 %v125_v12  ;;  %v231_v26 = vunpack.c.l.bf16 %v126_v17  ;;  %v1446_v52 = vld [vmem:[%s1394_s11 + $0x60] sm:$0xff]  ;;  %v1449_v53 = vld [vmem:[%s1394_s11 + $0x68] sm:$0xff]  ;;  %v131_v61 = vld [vmem:[%s1394_s11 + $0x70] sm:$0x1] }
  0x14   : > { %v232_v27 = vunpack.c.h.bf16 %v126_v17  ;;  %v233_v28 = vunpack.c.l.bf16 %v127_v18  ;;  %v234_v29 = vunpack.c.h.bf16 %v127_v18  ;;  %v381_v30 = vmax.f32 %v216_v6, %v217_v7  ;;  %v132_v62 = vld [vmem:[%s1394_s11 + $0x78] sm:$0xff]  ;;  %v133_v1 = vld [vmem:[%s1394_s11 + $0x80] sm:$0xff] }
  0x15   : > { %v382_v31 = vmax.f32 %v218_v8, %v219_v9  ;;  %v383_v32 = vmax.f32 %v1420_v21, %v227_v22  ;;  %v384_v33 = vmax.f32 %v1424_v23, %v229_v24  ;;  %v462_v34 = vrot.slane %v216_v6, 1 }
  0x16   : > { %v463_v35 = vrot.slane %v218_v8, 1  ;;  %v465_v36 = vrot.slane %v220_v13, 1  ;;  %v467_v37 = vrot.slane %v1420_v21, 1  ;;  %v468_v38 = vrot.slane %v1424_v23, 1 }
  0x17   : > { %v470_v39 = vrot.slane %v230_v25, 1  ;;  %v718_v40 = vrot.slane %v221_v14, 1  ;;  %v719_v41 = vrot.slane %v223_v16, 1  ;;  %v721_v42 = vrot.slane %v225_v20, 1 }
  0x18   : > { %v464_v43 = vsel %vm461_vm0, %v462_v34, %v463_v35  ;;  %v466_v44 = vsel %vm461_vm0, %v463_v35, %v465_v36  ;;  %v1438_v45 = vsel %vm461_vm0, %v467_v37, %v468_v38  ;;  %v723_v46 = vrot.slane %v231_v26, 1 }
  0x19   : > { %v1442_v48 = vsel %vm461_vm0, %v468_v38, %v470_v39  ;;  %v574_v49 = vmax.f32 %v381_v30, %v464_v43  ;;  %v575_v50 = vmax.f32 %v382_v31, %v466_v44  ;;  %v576_v51 = vmax.f32 %v383_v32, %v1438_v45  ;;  %v134_v31 = vld [vmem:[%s1394_s11 + $0x88] sm:$0x1]  ;;  %v1473_v38 = vld [vmem:[%s1394_s11 + $0x90] sm:$0xff]  ;;  %v137_v44 = vld [vmem:[%s1394_s11 + $0xa0] sm:$0x1] }
  0x1a   : > { %v577_v54 = vmax.f32 %v384_v33, %v1442_v48  ;;  %v720_v55 = vsel %vm461_vm0, %v718_v40, %v719_v41  ;;  %v722_v56 = vsel %vm461_vm0, %v719_v41, %v721_v42  ;;  %v724_v57 = vrot.slane %v233_v28, 1  ;;  %v1477_v42 = vld [vmem:[%s1394_s11 + $0x98] sm:$0xff] }
  0x1b   : > { %v606_v58 = vmax.f32 %v574_v49, %v221_v14  ;;  %v607_v59 = vmax.f32 %v575_v50, %v223_v16  ;;  %v608_v60 = vmax.f32 %v576_v51, %v231_v26  ;;  %v235_v63 = vunpack.c.l.bf16 %v128_v47  ;;  %v138_v49 = vld [vmem:[%s1394_s11 + $0xa8] sm:$0xff]  ;;  %v139_v50 = vld [vmem:[%s1394_s11 + $0xb0] sm:$0xff] }
  0x1c   : > { %v609_v0 = vmax.f32 %v577_v54, %v233_v28  ;;  %v236_v2 = vunpack.c.l.bf16 %v1446_v52  ;;  %v237_v3 = vunpack.c.h.bf16 %v1446_v52  ;;  %v238_v4 = vunpack.c.l.bf16 %v1449_v53 }
  0x1d   : > { %v638_v5 = vmax.f32 %v606_v58, %v222_v15  ;;  %v639_v6 = vmax.f32 %v607_v59, %v224_v19  ;;  %v640_v7 = vmax.f32 %v608_v60, %v232_v27  ;;  %v239_v8 = vunpack.c.h.bf16 %v1449_v53 }
  0x1e   : > { %v641_v9 = vmax.f32 %v609_v0, %v234_v29  ;;  %v240_v12 = vunpack.c.l.bf16 %v131_v61  ;;  %v241_v13 = vunpack.c.l.bf16 %v132_v62  ;;  %v242_v14 = vunpack.c.h.bf16 %v132_v62 }
  0x1f   : > { %v830_v16 = vmax.f32 %v638_v5, %v720_v55  ;;  %v831_v17 = vmax.f32 %v639_v6, %v722_v56  ;;  %v243_v18 = vunpack.c.l.bf16 %v133_v1  ;;  %v244_v20 = vunpack.c.h.bf16 %v133_v1 }
  0x20   : > { %v385_v25 = vmax.f32 %v236_v2, %v237_v3  ;;  %v386_v26 = vmax.f32 %v238_v4, %v239_v8  ;;  %v472_v28 = vrot.slane %v236_v2, 1  ;;  %v473_v30 = vrot.slane %v238_v4, 1 }
  0x21   : > { %v862_v15 = vmax.f32 %v830_v16, %v1420_v21  ;;  %v863_v19 = vmax.f32 %v831_v17, %v1424_v23  ;;  %v475_v27 = vrot.slane %v240_v12, 1  ;;  %v725_v29 = vsel %vm461_vm0, %v723_v46, %v724_v57 }
  0x22   : > { %v474_v32 = vsel %vm461_vm0, %v472_v28, %v473_v30  ;;  %v726_v33 = vrot.slane %v235_v63, 1  ;;  %v728_v34 = vrot.slane %v241_v13, 1  ;;  %v729_v35 = vrot.slane %v243_v18, 1 }
  0x23   : > { %v894_v36 = vmax.f32 %v862_v15, %v227_v22  ;;  %v895_v21 = vmax.f32 %v863_v19, %v229_v24  ;;  %v476_v23 = vsel %vm461_vm0, %v473_v30, %v475_v27  ;;  %v578_v37 = vmax.f32 %v385_v25, %v474_v32  ;;  %v1502_v25 = vld [vmem:[%s1394_s11 + $0xc8] sm:$0xff]  ;;  %v143_v15 = vld [vmem:[%s1394_s11 + $0xd0] sm:$0x1]  ;;  %v144_v19 = vld [vmem:[%s1394_s11 + $0xd8] sm:$0xff] }
  0x24   : > { %v579_v39 = vmax.f32 %v386_v26, %v476_v23  ;;  %v727_v40 = vsel %vm461_vm0, %v724_v57, %v726_v33  ;;  %v832_v41 = vmax.f32 %v640_v7, %v725_v29  ;;  %v245_v43 = vunpack.c.l.bf16 %v134_v31  ;;  %v140_v7 = vld [vmem:[%s1394_s11 + $0xb8] sm:$0x1] }
  0x25   : > { %v936_v10 = vmax.f32 %v894_v36, %v1438_v45  ;;  %v937_v22 = vmax.f32 %v895_v21, %v1442_v48  ;;  %v610_v11 = vmax.f32 %v578_v37, %v241_v13  ;;  %v833_v24 = vmax.f32 %v641_v9, %v727_v40 }
  0x26   : > { %v611_v46 = vmax.f32 %v579_v39, %v243_v18  ;;  %v864_v47 = vmax.f32 %v832_v41, %v236_v2  ;;  %v246_v51 = vunpack.c.l.bf16 %v1473_v38  ;;  %v247_v52 = vunpack.c.h.bf16 %v1473_v38 }
  0x27   : > { %v1261_v45 = vpack.c.bf16 %v937_v22, %v936_v10  ;;  %v642_v53 = vmax.f32 %v610_v11, %v242_v14  ;;  %v865_v48 = vmax.f32 %v833_v24, %v238_v4  ;;  %v248_v54 = vunpack.c.l.bf16 %v1477_v42  ;;  %v1497_v14 = vld [vmem:[%s1394_s11 + $0xc0] sm:$0xff] }
  0x28   : > { %v643_v55 = vmax.f32 %v611_v46, %v244_v20  ;;  %v896_v56 = vmax.f32 %v864_v47, %v237_v3  ;;  %v249_v57 = vunpack.c.h.bf16 %v1477_v42  ;;  %v250_v58 = vunpack.c.l.bf16 %v137_v44 }
  0x29   : > { %1262 = vst [vmem:[%s1485_s15] sm:$0xff] %v1261_v45   ;;  %v897_v59 = vmax.f32 %v865_v48, %v239_v8  ;;  %v251_v60 = vunpack.c.l.bf16 %v138_v49  ;;  %v252_v61 = vunpack.c.h.bf16 %v138_v49  ;;  %v253_v62 = vunpack.c.l.bf16 %v139_v50  ;;  %v146_v48 = vld [vmem:[%s1394_s11 + $0xe8] sm:$0x1] }
  0x2a   : > { %v938_v63 = vmax.f32 %v896_v56, %v474_v32  ;;  %v254_v0 = vunpack.c.h.bf16 %v139_v50  ;;  %v387_v1 = vmax.f32 %v246_v51, %v247_v52  ;;  %v388_v2 = vmax.f32 %v248_v54, %v249_v57  ;;  %v145_v32 = vld [vmem:[%s1394_s11 + $0xe0] sm:$0xff] }
  0x2b   : > { %v939_v4 = vmax.f32 %v897_v59, %v476_v23  ;;  %v477_v5 = vrot.slane %v246_v51, 1  ;;  %v478_v6 = vrot.slane %v248_v54, 1  ;;  %v480_v3 = vrot.slane %v250_v58, 1  ;;  %v1521_v59 = vld [vmem:[%s1394_s11 + $0xf8] sm:$0xff] }
  0x2c   : > { %v730_v9 = vsel %vm461_vm0, %v728_v34, %v729_v35  ;;  %v731_v8 = vrot.slane %v245_v43, 1  ;;  %v733_v12 = vrot.slane %v251_v60, 1  ;;  %v734_v13 = vrot.slane %v253_v62, 1 }
  0x2d   : > { %v1266_v16 = vpack.c.bf16 %v939_v4, %v938_v63  ;;  %v479_v17 = vsel %vm461_vm0, %v477_v5, %v478_v6  ;;  %v481_v18 = vsel %vm461_vm0, %v478_v6, %v480_v3  ;;  %v834_v20 = vmax.f32 %v642_v53, %v730_v9  ;;  %v150_v4 = vld [vmem:[%s1394_s11 + $0x108] sm:$0xff]  ;;  %v151_v9 = vld [vmem:[%s1394_s11 + $0x110] sm:$0xff] }
  0x2e   : > { %v580_v26 = vmax.f32 %v387_v1, %v479_v17  ;;  %v581_v28 = vmax.f32 %v388_v2, %v481_v18  ;;  %v732_v30 = vsel %vm461_vm0, %v729_v35, %v731_v8  ;;  %v255_v27 = vunpack.c.l.bf16 %v140_v7 }
  0x2f   : > { %1338 = vst [vmem:[%s1485_s15 + $0x8] sm:$0xff] %v1266_v16   ;;  %v835_v29 = vmax.f32 %v643_v55, %v732_v30  ;;  %v866_v31 = vmax.f32 %v834_v20, %v246_v51  ;;  %v256_v33 = vunpack.c.l.bf16 %v1497_v14  ;;  %v257_v34 = vunpack.c.h.bf16 %v1497_v14 }
  0x30   : > { %v612_v36 = vmax.f32 %v580_v26, %v251_v60  ;;  %v613_v21 = vmax.f32 %v581_v28, %v253_v62  ;;  %v258_v23 = vunpack.c.l.bf16 %v1502_v25  ;;  %v259_v37 = vunpack.c.h.bf16 %v1502_v25 }
  0x31   : > { %v867_v38 = vmax.f32 %v835_v29, %v248_v54  ;;  %v898_v39 = vmax.f32 %v866_v31, %v247_v52  ;;  %v260_v35 = vunpack.c.l.bf16 %v143_v15  ;;  %v261_v40 = vunpack.c.l.bf16 %v144_v19  ;;  %v1516_v54 = vld [vmem:[%s1394_s11 + $0xf0] sm:$0xff] }
  0x32   : > { %v644_v41 = vmax.f32 %v612_v36, %v252_v61  ;;  %v645_v42 = vmax.f32 %v613_v21, %v254_v0  ;;  %v262_v43 = vunpack.c.h.bf16 %v144_v19  ;;  %v263_v10 = vunpack.c.l.bf16 %v145_v32  ;;  %v149_v0 = vld [vmem:[%s1394_s11 + $0x100] sm:$0x1] }
  0x33   : > { %v899_v22 = vmax.f32 %v867_v38, %v249_v57  ;;  %v940_v11 = vmax.f32 %v898_v39, %v479_v17  ;;  %v264_v24 = vunpack.c.h.bf16 %v145_v32  ;;  %v389_v44 = vmax.f32 %v256_v33, %v257_v34 }
  0x34   : > { %v390_v46 = vmax.f32 %v258_v23, %v259_v37  ;;  %v482_v47 = vrot.slane %v256_v33, 1  ;;  %v483_v49 = vrot.slane %v258_v23, 1  ;;  %v485_v50 = vrot.slane %v260_v35, 1 }
  0x35   : > { %v941_v51 = vmax.f32 %v899_v22, %v481_v18  ;;  %v735_v52 = vsel %vm461_vm0, %v733_v12, %v734_v13  ;;  %v736_v45 = vrot.slane %v255_v27, 1  ;;  %v738_v53 = vrot.slane %v261_v40, 1 }
  0x36   : > { %v484_v55 = vsel %vm461_vm0, %v482_v47, %v483_v49  ;;  %v486_v56 = vsel %vm461_vm0, %v483_v49, %v485_v50  ;;  %v739_v57 = vrot.slane %v263_v10, 1  ;;  %v836_v58 = vmax.f32 %v644_v41, %v735_v52  ;;  %v1539_v41 = vld [vmem:[%s1394_s11 + $0x128] sm:$0xff]  ;;  %v156_v47 = vld [vmem:[%s1394_s11 + $0x138] sm:$0xff] }
  0x37   : > { %v1271_v60 = vpack.c.bf16 %v941_v51, %v940_v11  ;;  %v582_v61 = vmax.f32 %v389_v44, %v484_v55  ;;  %v583_v62 = vmax.f32 %v390_v46, %v486_v56  ;;  %v737_v63 = vsel %vm461_vm0, %v734_v13, %v736_v45  ;;  %v155_v46 = vld [vmem:[%s1394_s11 + $0x130] sm:$0x1]  ;;  %v157_v51 = vld [vmem:[%s1394_s11 + $0x140] sm:$0xff] }
  0x38   : > { %v837_v1 = vmax.f32 %v645_v42, %v737_v63  ;;  %v868_v2 = vmax.f32 %v836_v58, %v256_v33  ;;  %v265_v5 = vunpack.c.l.bf16 %v146_v48  ;;  %v266_v6 = vunpack.c.l.bf16 %v1516_v54 }
  0x39   : > { %1339 = vst [vmem:[%s1485_s15 + $0x10] sm:$0xff] %v1271_v60   ;;  %v614_v3 = vmax.f32 %v582_v61, %v261_v40  ;;  %v615_v7 = vmax.f32 %v583_v62, %v263_v10  ;;  %v267_v8 = vunpack.c.h.bf16 %v1516_v54  ;;  %v268_v12 = vunpack.c.l.bf16 %v1521_v59  ;;  %v1536_v40 = vld [vmem:[%s1394_s11 + $0x120] sm:$0xff] }
  0x3a   : > { %v869_v14 = vmax.f32 %v837_v1, %v258_v23  ;;  %v900_v16 = vmax.f32 %v868_v2, %v257_v34  ;;  %v269_v17 = vunpack.c.h.bf16 %v1521_v59  ;;  %v270_v13 = vunpack.c.l.bf16 %v149_v0  ;;  %v152_v23 = vld [vmem:[%s1394_s11 + $0x118] sm:$0x1] }
  0x3b   : > { %v646_v18 = vmax.f32 %v614_v3, %v262_v43  ;;  %v647_v20 = vmax.f32 %v615_v7, %v264_v24  ;;  %v271_v25 = vunpack.c.l.bf16 %v150_v4  ;;  %v272_v26 = vunpack.c.h.bf16 %v150_v4 }
  0x3c   : > { %v901_v28 = vmax.f32 %v869_v14, %v259_v37  ;;  %v942_v30 = vmax.f32 %v900_v16, %v484_v55  ;;  %v273_v15 = vunpack.c.l.bf16 %v151_v9  ;;  %v274_v19 = vunpack.c.h.bf16 %v151_v9 }
  0x3d   : > { %v391_v27 = vmax.f32 %v266_v6, %v267_v8  ;;  %v392_v29 = vmax.f32 %v268_v12, %v269_v17  ;;  %v487_v31 = vrot.slane %v266_v6, 1  ;;  %v488_v32 = vrot.slane %v268_v12, 1 }
  0x3e   : > { %v943_v33 = vmax.f32 %v901_v28, %v486_v56  ;;  %v490_v34 = vrot.slane %v270_v13, 1  ;;  %v740_v36 = vsel %vm461_vm0, %v738_v53, %v739_v57  ;;  %v741_v21 = vrot.slane %v265_v5, 1  ;;  %v1554_v13 = vld [vmem:[%s1394_s11 + $0x150] sm:$0xff] }
  0x3f   : > { %v489_v38 = vsel %vm461_vm0, %v487_v31, %v488_v32  ;;  %v743_v37 = vrot.slane %v271_v25, 1  ;;  %v744_v39 = vrot.slane %v273_v15, 1  ;;  %v838_v35 = vmax.f32 %v646_v18, %v740_v36  ;;  %v1557_v18 = vld [vmem:[%s1394_s11 + $0x158] sm:$0xff]  ;;  %v162_v31 = vld [vmem:[%s1394_s11 + $0x168] sm:$0xff] }
  0x40   : > { %v1276_v42 = vpack.c.bf16 %v943_v33, %v942_v30  ;;  %v491_v43 = vsel %vm461_vm0, %v488_v32, %v490_v34  ;;  %v584_v10 = vmax.f32 %v391_v27, %v489_v38  ;;  %v742_v22 = vsel %vm461_vm0, %v739_v57, %v741_v21  ;;  %v163_v33 = vld [vmem:[%s1394_s11 + $0x170] sm:$0xff] }
  0x41   : > { %v585_v11 = vmax.f32 %v392_v29, %v491_v43  ;;  %v839_v24 = vmax.f32 %v647_v20, %v742_v22  ;;  %v870_v44 = vmax.f32 %v838_v35, %v266_v6  ;;  %v275_v49 = vunpack.c.l.bf16 %v152_v23  ;;  %v158_v6 = vld [vmem:[%s1394_s11 + $0x148] sm:$0x1]  ;;  %v161_v29 = vld [vmem:[%s1394_s11 + $0x160] sm:$0x1] }
  0x42   : > { %1340 = vst [vmem:[%s1485_s15 + $0x18] sm:$0xff] %v1276_v42   ;;  %v616_v50 = vmax.f32 %v584_v10, %v271_v25  ;;  %v276_v52 = vunpack.c.l.bf16 %v1536_v40  ;;  %v277_v45 = vunpack.c.h.bf16 %v1536_v40  ;;  %v278_v53 = vunpack.c.l.bf16 %v1539_v41 }
  0x43   : > { %v617_v48 = vmax.f32 %v585_v11, %v273_v15  ;;  %v871_v54 = vmax.f32 %v839_v24, %v268_v12  ;;  %v902_v55 = vmax.f32 %v870_v44, %v267_v8  ;;  %v279_v56 = vunpack.c.h.bf16 %v1539_v41 }
  0x44   : > { %v648_v57 = vmax.f32 %v616_v50, %v272_v26  ;;  %v280_v58 = vunpack.c.l.bf16 %v155_v46  ;;  %v281_v59 = vunpack.c.l.bf16 %v156_v47  ;;  %v282_v60 = vunpack.c.h.bf16 %v156_v47 }
  0x45   : > { %v649_v61 = vmax.f32 %v617_v48, %v274_v19  ;;  %v903_v62 = vmax.f32 %v871_v54, %v269_v17  ;;  %v944_v63 = vmax.f32 %v902_v55, %v489_v38  ;;  %v283_v0 = vunpack.c.l.bf16 %v157_v51 }
  0x46   : > { %v284_v1 = vunpack.c.h.bf16 %v157_v51  ;;  %v393_v2 = vmax.f32 %v276_v52, %v277_v45  ;;  %v394_v4 = vmax.f32 %v278_v53, %v279_v56  ;;  %v492_v5 = vrot.slane %v276_v52, 1 }
  0x47   : > { %v945_v3 = vmax.f32 %v903_v62, %v491_v43  ;;  %v493_v7 = vrot.slane %v278_v53, 1  ;;  %v495_v9 = vrot.slane %v280_v58, 1  ;;  %v745_v8 = vsel %vm461_vm0, %v743_v37, %v744_v39 }
  0x48   : > { %v746_v12 = vrot.slane %v275_v49, 1  ;;  %v748_v14 = vrot.slane %v281_v59, 1  ;;  %v749_v16 = vrot.slane %v283_v0, 1  ;;  %v840_v17 = vmax.f32 %v648_v57, %v745_v8  ;;  %v164_v49 = vld [vmem:[%s1394_s11 + $0x178] sm:$0x1]  ;;  %v1573_v57 = vld [vmem:[%s1394_s11 + $0x180] sm:$0xff] }
  0x49   : > { %v1281_v20 = vpack.c.bf16 %v945_v3, %v944_v63  ;;  %v494_v25 = vsel %vm461_vm0, %v492_v5, %v493_v7  ;;  %v496_v26 = vsel %vm461_vm0, %v493_v7, %v495_v9  ;;  %v285_v28 = vunpack.c.l.bf16 %v158_v6  ;;  %v169_v3 = vld [vmem:[%s1394_s11 + $0x1a0] sm:$0xff] }
  0x4a   : > { %v586_v30 = vmax.f32 %v393_v2, %v494_v25  ;;  %v587_v15 = vmax.f32 %v394_v4, %v496_v26  ;;  %v747_v19 = vsel %vm461_vm0, %v744_v39, %v746_v12  ;;  %v872_v27 = vmax.f32 %v840_v17, %v276_v52  ;;  %v167_v2 = vld [vmem:[%s1394_s11 + $0x190] sm:$0x1]  ;;  %v168_v4 = vld [vmem:[%s1394_s11 + $0x198] sm:$0xff] }
  0x4b   : > { %1341 = vst [vmem:[%s1485_s15 + $0x20] sm:$0xff] %v1281_v20   ;;  %v841_v32 = vmax.f32 %v649_v61, %v747_v19  ;;  %v286_v34 = vunpack.c.l.bf16 %v1554_v13  ;;  %v287_v36 = vunpack.c.h.bf16 %v1554_v13  ;;  %v288_v21 = vunpack.c.l.bf16 %v1557_v18 }
  0x4c   : > { %v618_v23 = vmax.f32 %v586_v30, %v281_v59  ;;  %v619_v38 = vmax.f32 %v587_v15, %v283_v0  ;;  %v904_v37 = vmax.f32 %v872_v27, %v277_v45  ;;  %v289_v35 = vunpack.c.h.bf16 %v1557_v18 }
  0x4d   : > { %v873_v40 = vmax.f32 %v841_v32, %v278_v53  ;;  %v290_v39 = vunpack.c.l.bf16 %v161_v29  ;;  %v291_v41 = vunpack.c.l.bf16 %v162_v31  ;;  %v292_v42 = vunpack.c.h.bf16 %v162_v31 }
  0x4e   : > { %v650_v43 = vmax.f32 %v618_v23, %v282_v60  ;;  %v651_v10 = vmax.f32 %v619_v38, %v284_v1  ;;  %v946_v22 = vmax.f32 %v904_v37, %v494_v25  ;;  %v293_v11 = vunpack.c.l.bf16 %v163_v33  ;;  %v1578_v60 = vld [vmem:[%s1394_s11 + $0x188] sm:$0xff] }
  0x4f   : > { %v905_v24 = vmax.f32 %v873_v40, %v279_v56  ;;  %v294_v44 = vunpack.c.h.bf16 %v163_v33  ;;  %v395_v46 = vmax.f32 %v286_v34, %v287_v36  ;;  %v396_v47 = vmax.f32 %v288_v21, %v289_v35  ;;  %v170_v37 = vld [vmem:[%s1394_s11 + $0x1a8] sm:$0x1]  ;;  %v1592_v40 = vld [vmem:[%s1394_s11 + $0x1b0] sm:$0xff] }
  0x50   : > { %v497_v50 = vrot.slane %v286_v34, 1  ;;  %v498_v51 = vrot.slane %v288_v21, 1  ;;  %v500_v52 = vrot.slane %v290_v39, 1  ;;  %v750_v45 = vsel %vm461_vm0, %v748_v14, %v749_v16 }
  0x51   : > { %v947_v53 = vmax.f32 %v905_v24, %v496_v26  ;;  %v751_v48 = vrot.slane %v285_v28, 1  ;;  %v753_v54 = vrot.slane %v291_v41, 1  ;;  %v754_v55 = vrot.slane %v293_v11, 1 }
  0x52   : > { %v499_v56 = vsel %vm461_vm0, %v497_v50, %v498_v51  ;;  %v501_v58 = vsel %vm461_vm0, %v498_v51, %v500_v52  ;;  %v842_v59 = vmax.f32 %v650_v43, %v750_v45  ;;  %v295_v61 = vunpack.c.l.bf16 %v164_v49  ;;  %v1597_v43 = vld [vmem:[%s1394_s11 + $0x1b8] sm:$0xff]  ;;  %v174_v49 = vld [vmem:[%s1394_s11 + $0x1c8] sm:$0xff] }
  0x53   : > { %v1286_v62 = vpack.c.bf16 %v947_v53, %v946_v22  ;;  %v588_v63 = vmax.f32 %v395_v46, %v499_v56  ;;  %v589_v0 = vmax.f32 %v396_v47, %v501_v58  ;;  %v752_v1 = vsel %vm461_vm0, %v749_v16, %v751_v48  ;;  %v175_v53 = vld [vmem:[%s1394_s11 + $0x1d0] sm:$0xff] }
  0x54   : > { %v843_v5 = vmax.f32 %v651_v10, %v752_v1  ;;  %v874_v6 = vmax.f32 %v842_v59, %v286_v34  ;;  %v296_v7 = vunpack.c.l.bf16 %v1573_v57  ;;  %v297_v9 = vunpack.c.h.bf16 %v1573_v57 }
  0x55   : > { %1342 = vst [vmem:[%s1485_s15 + $0x28] sm:$0xff] %v1286_v62   ;;  %v620_v8 = vmax.f32 %v588_v63, %v291_v41  ;;  %v621_v12 = vmax.f32 %v589_v0, %v293_v11  ;;  %v298_v14 = vunpack.c.l.bf16 %v1578_v60  ;;  %v299_v17 = vunpack.c.h.bf16 %v1578_v60 }
  0x56   : > { %v875_v13 = vmax.f32 %v843_v5, %v288_v21  ;;  %v906_v18 = vmax.f32 %v874_v6, %v287_v36  ;;  %v300_v20 = vunpack.c.l.bf16 %v167_v2  ;;  %v301_v16 = vunpack.c.l.bf16 %v168_v4 }
  0x57   : > { %v652_v25 = vmax.f32 %v620_v8, %v292_v42  ;;  %v653_v26 = vmax.f32 %v621_v12, %v294_v44  ;;  %v302_v28 = vunpack.c.h.bf16 %v168_v4  ;;  %v303_v30 = vunpack.c.l.bf16 %v169_v3  ;;  %v173_v44 = vld [vmem:[%s1394_s11 + $0x1c0] sm:$0x1] }
  0x58   : > { %v907_v15 = vmax.f32 %v875_v13, %v289_v35  ;;  %v948_v19 = vmax.f32 %v906_v18, %v499_v56  ;;  %v304_v27 = vunpack.c.h.bf16 %v169_v3  ;;  %v397_v29 = vmax.f32 %v296_v7, %v297_v9 }
  0x59   : > { %v398_v31 = vmax.f32 %v298_v14, %v299_v17  ;;  %v502_v32 = vrot.slane %v296_v7, 1  ;;  %v503_v33 = vrot.slane %v298_v14, 1  ;;  %v505_v34 = vrot.slane %v300_v20, 1 }
  0x5a   : > { %v949_v21 = vmax.f32 %v907_v15, %v501_v58  ;;  %v755_v36 = vsel %vm461_vm0, %v753_v54, %v754_v55  ;;  %v756_v23 = vrot.slane %v295_v61, 1  ;;  %v758_v38 = vrot.slane %v301_v16, 1 }
  0x5b   : > { %v504_v35 = vsel %vm461_vm0, %v502_v32, %v503_v33  ;;  %v506_v39 = vsel %vm461_vm0, %v503_v33, %v505_v34  ;;  %v759_v41 = vrot.slane %v303_v30, 1  ;;  %v844_v42 = vmax.f32 %v652_v25, %v755_v36  ;;  %v1615_v25 = vld [vmem:[%s1394_s11 + $0x1e8] sm:$0xff]  ;;  %v180_v32 = vld [vmem:[%s1394_s11 + $0x1f8] sm:$0xff] }
  0x5c   : > { %v1291_v10 = vpack.c.bf16 %v949_v21, %v948_v19  ;;  %v590_v22 = vmax.f32 %v397_v29, %v504_v35  ;;  %v591_v11 = vmax.f32 %v398_v31, %v506_v39  ;;  %v757_v24 = vsel %vm461_vm0, %v754_v55, %v756_v23  ;;  %v179_v31 = vld [vmem:[%s1394_s11 + $0x1f0] sm:$0x1]  ;;  %v181_v21 = vld [vmem:[%s1394_s11 + $0x200] sm:$0xff] }
  0x5d   : > { %v845_v46 = vmax.f32 %v653_v26, %v757_v24  ;;  %v876_v47 = vmax.f32 %v844_v42, %v296_v7  ;;  %v305_v50 = vunpack.c.l.bf16 %v170_v37  ;;  %v306_v51 = vunpack.c.l.bf16 %v1592_v40 }
  0x5e   : > { %1343 = vst [vmem:[%s1485_s15 + $0x30] sm:$0xff] %v1291_v10   ;;  %v622_v52 = vmax.f32 %v590_v22, %v301_v16  ;;  %v623_v45 = vmax.f32 %v591_v11, %v303_v30  ;;  %v307_v48 = vunpack.c.h.bf16 %v1592_v40  ;;  %v308_v54 = vunpack.c.l.bf16 %v1597_v43  ;;  %v1612_v16 = vld [vmem:[%s1394_s11 + $0x1e0] sm:$0xff] }
  0x5f   : > { %v877_v57 = vmax.f32 %v845_v46, %v298_v14  ;;  %v908_v56 = vmax.f32 %v876_v47, %v297_v9  ;;  %v309_v58 = vunpack.c.h.bf16 %v1597_v43  ;;  %v310_v55 = vunpack.c.l.bf16 %v173_v44  ;;  %v176_v14 = vld [vmem:[%s1394_s11 + $0x1d8] sm:$0x1] }
  0x60   : > { %v654_v59 = vmax.f32 %v622_v52, %v302_v28  ;;  %v655_v60 = vmax.f32 %v623_v45, %v304_v27  ;;  %v311_v61 = vunpack.c.l.bf16 %v174_v49  ;;  %v312_v62 = vunpack.c.h.bf16 %v174_v49 }
  0x61   : > { %v909_v63 = vmax.f32 %v877_v57, %v299_v17  ;;  %v950_v0 = vmax.f32 %v908_v56, %v504_v35  ;;  %v313_v1 = vunpack.c.l.bf16 %v175_v53  ;;  %v314_v2 = vunpack.c.h.bf16 %v175_v53 }
  0x62   : > { %v399_v4 = vmax.f32 %v306_v51, %v307_v48  ;;  %v400_v5 = vmax.f32 %v308_v54, %v309_v58  ;;  %v507_v6 = vrot.slane %v306_v51, 1  ;;  %v508_v3 = vrot.slane %v308_v54, 1 }
  0x63   : > { %v951_v7 = vmax.f32 %v909_v63, %v506_v39  ;;  %v510_v9 = vrot.slane %v310_v55, 1  ;;  %v760_v8 = vsel %vm461_vm0, %v758_v38, %v759_v41  ;;  %v761_v12 = vrot.slane %v305_v50, 1  ;;  %v1630_v55 = vld [vmem:[%s1394_s11 + $0x210] sm:$0xff] }
  0x64   : > { %v509_v13 = vsel %vm461_vm0, %v507_v6, %v508_v3  ;;  %v763_v17 = vrot.slane %v311_v61, 1  ;;  %v764_v18 = vrot.slane %v313_v1, 1  ;;  %v846_v20 = vmax.f32 %v654_v59, %v760_v8  ;;  %v1633_v59 = vld [vmem:[%s1394_s11 + $0x218] sm:$0xff]  ;;  %v186_v6 = vld [vmem:[%s1394_s11 + $0x228] sm:$0xff] }
  0x65   : > { %v1296_v26 = vpack.c.bf16 %v951_v7, %v950_v0  ;;  %v511_v28 = vsel %vm461_vm0, %v508_v3, %v510_v9  ;;  %v592_v30 = vmax.f32 %v399_v4, %v509_v13  ;;  %v762_v15 = vsel %vm461_vm0, %v759_v41, %v761_v12  ;;  %v187_v7 = vld [vmem:[%s1394_s11 + $0x230] sm:$0xff] }
  0x66   : > { %v593_v19 = vmax.f32 %v400_v5, %v511_v28  ;;  %v847_v27 = vmax.f32 %v655_v60, %v762_v15  ;;  %v878_v29 = vmax.f32 %v846_v20, %v306_v51  ;;  %v315_v33 = vunpack.c.l.bf16 %v176_v14  ;;  %v182_v51 = vld [vmem:[%s1394_s11 + $0x208] sm:$0x1]  ;;  %v185_v5 = vld [vmem:[%s1394_s11 + $0x220] sm:$0x1] }
  0x67   : > { %1344 = vst [vmem:[%s1485_s15 + $0x38] sm:$0xff] %v1296_v26   ;;  %v624_v34 = vmax.f32 %v592_v30, %v311_v61  ;;  %v316_v36 = vunpack.c.l.bf16 %v1612_v16  ;;  %v317_v23 = vunpack.c.h.bf16 %v1612_v16  ;;  %v318_v38 = vunpack.c.l.bf16 %v1615_v25 }
  0x68   : > { %v625_v37 = vmax.f32 %v593_v19, %v313_v1  ;;  %v879_v40 = vmax.f32 %v847_v27, %v308_v54  ;;  %v910_v35 = vmax.f32 %v878_v29, %v307_v48  ;;  %v319_v39 = vunpack.c.h.bf16 %v1615_v25 }
  0x69   : > { %v656_v41 = vmax.f32 %v624_v34, %v312_v62  ;;  %v320_v42 = vunpack.c.l.bf16 %v179_v31  ;;  %v321_v43 = vunpack.c.l.bf16 %v180_v32  ;;  %v322_v10 = vunpack.c.h.bf16 %v180_v32 }
  0x6a   : > { %v657_v22 = vmax.f32 %v625_v37, %v314_v2  ;;  %v911_v11 = vmax.f32 %v879_v40, %v309_v58  ;;  %v952_v24 = vmax.f32 %v910_v35, %v509_v13  ;;  %v323_v44 = vunpack.c.l.bf16 %v181_v21 }
  0x6b   : > { %v324_v46 = vunpack.c.h.bf16 %v181_v21  ;;  %v401_v47 = vmax.f32 %v316_v36, %v317_v23  ;;  %v402_v49 = vmax.f32 %v318_v38, %v319_v39  ;;  %v512_v50 = vrot.slane %v316_v36, 1 }
  0x6c   : > { %v953_v52 = vmax.f32 %v911_v11, %v511_v28  ;;  %v513_v45 = vrot.slane %v318_v38, 1  ;;  %v515_v53 = vrot.slane %v320_v42, 1  ;;  %v765_v48 = vsel %vm461_vm0, %v763_v17, %v764_v18 }
  0x6d   : > { %v766_v54 = vrot.slane %v315_v33, 1  ;;  %v768_v57 = vrot.slane %v321_v43, 1  ;;  %v769_v56 = vrot.slane %v323_v44, 1  ;;  %v848_v58 = vmax.f32 %v656_v41, %v765_v48  ;;  %v188_v33 = vld [vmem:[%s1394_s11 + $0x238] sm:$0x1]  ;;  %v1649_v41 = vld [vmem:[%s1394_s11 + $0x240] sm:$0xff] }
  0x6e   : > { %v1301_v60 = vpack.c.bf16 %v953_v52, %v952_v24  ;;  %v514_v61 = vsel %vm461_vm0, %v512_v50, %v513_v45  ;;  %v516_v62 = vsel %vm461_vm0, %v513_v45, %v515_v53  ;;  %v325_v63 = vunpack.c.l.bf16 %v182_v51  ;;  %v193_v52 = vld [vmem:[%s1394_s11 + $0x260] sm:$0xff] }
  0x6f   : > { %v594_v0 = vmax.f32 %v401_v47, %v514_v61  ;;  %v595_v1 = vmax.f32 %v402_v49, %v516_v62  ;;  %v767_v2 = vsel %vm461_vm0, %v764_v18, %v766_v54  ;;  %v880_v4 = vmax.f32 %v848_v58, %v316_v36  ;;  %v191_v47 = vld [vmem:[%s1394_s11 + $0x250] sm:$0x1]  ;;  %v192_v49 = vld [vmem:[%s1394_s11 + $0x258] sm:$0xff] }
  0x70   : > { %1345 = vst [vmem:[%s1485_s15 + $0x40] sm:$0xff] %v1301_v60   ;;  %v849_v3 = vmax.f32 %v657_v22, %v767_v2  ;;  %v326_v9 = vunpack.c.l.bf16 %v1630_v55  ;;  %v327_v8 = vunpack.c.h.bf16 %v1630_v55  ;;  %v328_v12 = vunpack.c.l.bf16 %v1633_v59 }
  0x71   : > { %v626_v14 = vmax.f32 %v594_v0, %v321_v43  ;;  %v627_v13 = vmax.f32 %v595_v1, %v323_v44  ;;  %v912_v17 = vmax.f32 %v880_v4, %v317_v23  ;;  %v329_v20 = vunpack.c.h.bf16 %v1633_v59 }
  0x72   : > { %v881_v16 = vmax.f32 %v849_v3, %v318_v38  ;;  %v330_v18 = vunpack.c.l.bf16 %v185_v5  ;;  %v331_v25 = vunpack.c.l.bf16 %v186_v6  ;;  %v332_v26 = vunpack.c.h.bf16 %v186_v6 }
  0x73   : > { %v658_v28 = vmax.f32 %v626_v14, %v322_v10  ;;  %v659_v30 = vmax.f32 %v627_v13, %v324_v46  ;;  %v954_v15 = vmax.f32 %v912_v17, %v514_v61  ;;  %v333_v19 = vunpack.c.l.bf16 %v187_v7  ;;  %v1654_v10 = vld [vmem:[%s1394_s11 + $0x248] sm:$0xff] }
  0x74   : > { %v913_v27 = vmax.f32 %v881_v16, %v319_v39  ;;  %v334_v29 = vunpack.c.h.bf16 %v187_v7  ;;  %v403_v31 = vmax.f32 %v326_v9, %v327_v8  ;;  %v404_v32 = vmax.f32 %v328_v12, %v329_v20  ;;  %v194_v17 = vld [vmem:[%s1394_s11 + $0x268] sm:$0x1]  ;;  %v1668_v16 = vld [vmem:[%s1394_s11 + $0x270] sm:$0xff] }
  0x75   : > { %v517_v34 = vrot.slane %v326_v9, 1  ;;  %v518_v21 = vrot.slane %v328_v12, 1  ;;  %v520_v36 = vrot.slane %v330_v18, 1  ;;  %v770_v23 = vsel %vm461_vm0, %v768_v57, %v769_v56 }
  0x76   : > { %v955_v38 = vmax.f32 %v913_v27, %v516_v62  ;;  %v771_v37 = vrot.slane %v325_v63, 1  ;;  %v773_v40 = vrot.slane %v331_v25, 1  ;;  %v774_v35 = vrot.slane %v333_v19, 1 }
  0x77   : > { %v519_v39 = vsel %vm461_vm0, %v517_v34, %v518_v21  ;;  %v521_v42 = vsel %vm461_vm0, %v518_v21, %v520_v36  ;;  %v850_v43 = vmax.f32 %v658_v28, %v770_v23  ;;  %v335_v22 = vunpack.c.l.bf16 %v188_v33  ;;  %v1673_v28 = vld [vmem:[%s1394_s11 + $0x278] sm:$0xff]  ;;  %v198_v33 = vld [vmem:[%s1394_s11 + $0x288] sm:$0xff] }
  0x78   : > { %v1306_v11 = vpack.c.bf16 %v955_v38, %v954_v15  ;;  %v596_v24 = vmax.f32 %v403_v31, %v519_v39  ;;  %v597_v44 = vmax.f32 %v404_v32, %v521_v42  ;;  %v772_v46 = vsel %vm461_vm0, %v769_v56, %v771_v37  ;;  %v199_v38 = vld [vmem:[%s1394_s11 + $0x290] sm:$0xff] }
  0x79   : > { %v851_v50 = vmax.f32 %v659_v30, %v772_v46  ;;  %v882_v51 = vmax.f32 %v850_v43, %v326_v9  ;;  %v336_v45 = vunpack.c.l.bf16 %v1649_v41  ;;  %v337_v53 = vunpack.c.h.bf16 %v1649_v41 }
  0x7a   : > { %1346 = vst [vmem:[%s1485_s15 + $0x48] sm:$0xff] %v1306_v11   ;;  %v628_v48 = vmax.f32 %v596_v24, %v331_v25  ;;  %v629_v54 = vmax.f32 %v597_v44, %v333_v19  ;;  %v338_v57 = vunpack.c.l.bf16 %v1654_v10  ;;  %v339_v58 = vunpack.c.h.bf16 %v1654_v10 }
  0x7b   : > { %v883_v55 = vmax.f32 %v851_v50, %v328_v12  ;;  %v914_v59 = vmax.f32 %v882_v51, %v327_v8  ;;  %v340_v60 = vunpack.c.l.bf16 %v191_v47  ;;  %v341_v56 = vunpack.c.l.bf16 %v192_v49 }
  0x7c   : > { %v660_v61 = vmax.f32 %v628_v48, %v332_v26  ;;  %v661_v62 = vmax.f32 %v629_v54, %v334_v29  ;;  %v342_v63 = vunpack.c.h.bf16 %v192_v49  ;;  %v343_v0 = vunpack.c.l.bf16 %v193_v52  ;;  %v197_v29 = vld [vmem:[%s1394_s11 + $0x280] sm:$0x1] }
  0x7d   : > { %v915_v1 = vmax.f32 %v883_v55, %v329_v20  ;;  %v956_v2 = vmax.f32 %v914_v59, %v519_v39  ;;  %v344_v4 = vunpack.c.h.bf16 %v193_v52  ;;  %v405_v5 = vmax.f32 %v336_v45, %v337_v53 }
  0x7e   : > { %v406_v6 = vmax.f32 %v338_v57, %v339_v58  ;;  %v522_v3 = vrot.slane %v336_v45, 1  ;;  %v523_v7 = vrot.slane %v338_v57, 1  ;;  %v525_v9 = vrot.slane %v340_v60, 1 }
  0x7f   : > { %v957_v12 = vmax.f32 %v915_v1, %v521_v42  ;;  %v775_v8 = vsel %vm461_vm0, %v773_v40, %v774_v35  ;;  %v776_v14 = vrot.slane %v335_v22, 1  ;;  %v778_v13 = vrot.slane %v341_v56, 1 }
  0x80   : > { %v524_v20 = vsel %vm461_vm0, %v522_v3, %v523_v7  ;;  %v526_v18 = vsel %vm461_vm0, %v523_v7, %v525_v9  ;;  %v779_v25 = vrot.slane %v343_v0, 1  ;;  %v852_v26 = vmax.f32 %v660_v61, %v775_v8  ;;  %v1691_v61 = vld [vmem:[%s1394_s11 + $0x2a8] sm:$0xff]  ;;  %v204_v3 = vld [vmem:[%s1394_s11 + $0x2b8] sm:$0xff] }
  0x81   : > { %v1311_v30 = vpack.c.bf16 %v957_v12, %v956_v2  ;;  %v598_v15 = vmax.f32 %v405_v5, %v524_v20  ;;  %v599_v19 = vmax.f32 %v406_v6, %v526_v18  ;;  %v777_v27 = vsel %vm461_vm0, %v774_v35, %v776_v14  ;;  %v203_v6 = vld [vmem:[%s1394_s11 + $0x2b0] sm:$0x1]  ;;  %v205_v12 = vld [vmem:[%s1394_s11 + $0x2c0] sm:$0xff] }
  0x82   : > { %v853_v31 = vmax.f32 %v661_v62, %v777_v27  ;;  %v884_v32 = vmax.f32 %v852_v26, %v336_v45  ;;  %v345_v34 = vunpack.c.l.bf16 %v194_v17  ;;  %v346_v21 = vunpack.c.l.bf16 %v1668_v16 }
  0x83   : > { %1347 = vst [vmem:[%s1485_s15 + $0x50] sm:$0xff] %v1311_v30   ;;  %v630_v36 = vmax.f32 %v598_v15, %v341_v56  ;;  %v631_v23 = vmax.f32 %v599_v19, %v343_v0  ;;  %v347_v37 = vunpack.c.h.bf16 %v1668_v16  ;;  %v348_v40 = vunpack.c.l.bf16 %v1673_v28  ;;  %v1688_v56 = vld [vmem:[%s1394_s11 + $0x2a0] sm:$0xff] }
  0x84   : > { %v885_v41 = vmax.f32 %v853_v31, %v338_v57  ;;  %v916_v39 = vmax.f32 %v884_v32, %v337_v53  ;;  %v349_v42 = vunpack.c.h.bf16 %v1673_v28  ;;  %v350_v35 = vunpack.c.l.bf16 %v197_v29  ;;  %v200_v57 = vld [vmem:[%s1394_s11 + $0x298] sm:$0x1] }
  0x85   : > { %v662_v43 = vmax.f32 %v630_v36, %v342_v63  ;;  %v663_v10 = vmax.f32 %v631_v23, %v344_v4  ;;  %v351_v22 = vunpack.c.l.bf16 %v198_v33  ;;  %v352_v11 = vunpack.c.h.bf16 %v198_v33 }
  0x86   : > { %v917_v24 = vmax.f32 %v885_v41, %v339_v58  ;;  %v958_v44 = vmax.f32 %v916_v39, %v524_v20  ;;  %v353_v46 = vunpack.c.l.bf16 %v199_v38  ;;  %v354_v47 = vunpack.c.h.bf16 %v199_v38 }
  0x87   : > { %v407_v49 = vmax.f32 %v346_v21, %v347_v37  ;;  %v408_v50 = vmax.f32 %v348_v40, %v349_v42  ;;  %v527_v51 = vrot.slane %v346_v21, 1  ;;  %v528_v52 = vrot.slane %v348_v40, 1 }
  0x88   : > { %v959_v45 = vmax.f32 %v917_v24, %v526_v18  ;;  %v530_v53 = vrot.slane %v350_v35, 1  ;;  %v780_v48 = vsel %vm461_vm0, %v778_v13, %v779_v25  ;;  %v781_v54 = vrot.slane %v345_v34, 1  ;;  %v1706_v35 = vld [vmem:[%s1394_s11 + $0x2d0] sm:$0xff] }
  0x89   : > { %v529_v55 = vsel %vm461_vm0, %v527_v51, %v528_v52  ;;  %v783_v58 = vrot.slane %v351_v22, 1  ;;  %v784_v59 = vrot.slane %v353_v46, 1  ;;  %v854_v60 = vmax.f32 %v662_v43, %v780_v48  ;;  %v1709_v43 = vld [vmem:[%s1394_s11 + $0x2d8] sm:$0xff]  ;;  %v210_v51 = vld [vmem:[%s1394_s11 + $0x2e8] sm:$0xff] }
  0x8a   : > { %v1316_v62 = vpack.c.bf16 %v959_v45, %v958_v44  ;;  %v531_v63 = vsel %vm461_vm0, %v528_v52, %v530_v53  ;;  %v600_v0 = vmax.f32 %v407_v49, %v529_v55  ;;  %v782_v1 = vsel %vm461_vm0, %v779_v25, %v781_v54  ;;  %v211_v45 = vld [vmem:[%s1394_s11 + $0x2f0] sm:$0xff] }
  0x8b   : > { %v601_v2 = vmax.f32 %v408_v50, %v531_v63  ;;  %v855_v4 = vmax.f32 %v663_v10, %v782_v1  ;;  %v886_v5 = vmax.f32 %v854_v60, %v346_v21  ;;  %v355_v7 = vunpack.c.l.bf16 %v200_v57  ;;  %v206_v21 = vld [vmem:[%s1394_s11 + $0x2c8] sm:$0x1]  ;;  %v209_v50 = vld [vmem:[%s1394_s11 + $0x2e0] sm:$0x1] }
  0x8c   : > { %1348 = vst [vmem:[%s1485_s15 + $0x58] sm:$0xff] %v1316_v62   ;;  %v632_v9 = vmax.f32 %v600_v0, %v351_v22  ;;  %v356_v8 = vunpack.c.l.bf16 %v1688_v56  ;;  %v357_v14 = vunpack.c.h.bf16 %v1688_v56  ;;  %v358_v13 = vunpack.c.l.bf16 %v1691_v61 }
  0x8d   : > { %v633_v17 = vmax.f32 %v601_v2, %v353_v46  ;;  %v887_v16 = vmax.f32 %v855_v4, %v348_v40  ;;  %v918_v20 = vmax.f32 %v886_v5, %v347_v37  ;;  %v359_v18 = vunpack.c.h.bf16 %v1691_v61 }
  0x8e   : > { %v664_v25 = vmax.f32 %v632_v9, %v352_v11  ;;  %v360_v26 = vunpack.c.l.bf16 %v203_v6  ;;  %v361_v28 = vunpack.c.l.bf16 %v204_v3  ;;  %v362_v30 = vunpack.c.h.bf16 %v204_v3 }
  0x8f   : > { %v665_v15 = vmax.f32 %v633_v17, %v354_v47  ;;  %v919_v19 = vmax.f32 %v887_v16, %v349_v42  ;;  %v960_v27 = vmax.f32 %v918_v20, %v529_v55  ;;  %v363_v29 = vunpack.c.l.bf16 %v205_v12 }
  0x90   : > { %v364_v31 = vunpack.c.h.bf16 %v205_v12  ;;  %v409_v32 = vmax.f32 %v356_v8, %v357_v14  ;;  %v410_v33 = vmax.f32 %v358_v13, %v359_v18  ;;  %v532_v34 = vrot.slane %v356_v8, 1 }
  0x91   : > { %v961_v36 = vmax.f32 %v919_v19, %v531_v63  ;;  %v533_v23 = vrot.slane %v358_v13, 1  ;;  %v535_v38 = vrot.slane %v360_v26, 1  ;;  %v785_v37 = vsel %vm461_vm0, %v783_v58, %v784_v59 }
  0x92   : > { %v786_v40 = vrot.slane %v355_v7, 1  ;;  %v788_v41 = vrot.slane %v361_v28, 1  ;;  %v789_v39 = vrot.slane %v363_v29, 1  ;;  %v856_v42 = vmax.f32 %v664_v25, %v785_v37  ;;  %v212_v7 = vld [vmem:[%s1394_s11 + $0x2f8] sm:$0x1]  ;;  %v213_v25 = vld [vmem:[%s1394_s11 + $0x300] sm:$0xff] }
  0x93   : > { %v1321_v10 = vpack.c.bf16 %v961_v36, %v960_v27  ;;  %v534_v22 = vsel %vm461_vm0, %v532_v34, %v533_v23  ;;  %v536_v11 = vsel %vm461_vm0, %v533_v23, %v535_v38  ;;  %v365_v24 = vunpack.c.l.bf16 %v206_v21 }
  0x94   : > { %v602_v44 = vmax.f32 %v409_v32, %v534_v22  ;;  %v603_v46 = vmax.f32 %v410_v33, %v536_v11  ;;  %v787_v47 = vsel %vm461_vm0, %v784_v59, %v786_v40  ;;  %v888_v49 = vmax.f32 %v856_v42, %v356_v8  ;;  %v215_v32 = vld [vmem:[%s1394_s11 + $0x310] sm:$0x1] }
  0x95   : > { %1349 = vst [vmem:[%s1485_s15 + $0x60] sm:$0xff] %v1321_v10   ;;  %v857_v52 = vmax.f32 %v665_v15, %v787_v47  ;;  %v366_v53 = vunpack.c.l.bf16 %v1706_v35  ;;  %v367_v48 = vunpack.c.h.bf16 %v1706_v35  ;;  %v368_v54 = vunpack.c.l.bf16 %v1709_v43 }
  0x96   : > { %v634_v57 = vmax.f32 %v602_v44, %v361_v28  ;;  %v635_v55 = vmax.f32 %v603_v46, %v363_v29  ;;  %v920_v58 = vmax.f32 %v888_v49, %v357_v14  ;;  %v369_v60 = vunpack.c.h.bf16 %v1709_v43 }
  0x97   : > { %v889_v56 = vmax.f32 %v857_v52, %v358_v13  ;;  %v370_v59 = vunpack.c.l.bf16 %v209_v50  ;;  %v371_v61 = vunpack.c.l.bf16 %v210_v51  ;;  %v372_v62 = vunpack.c.h.bf16 %v210_v51 }
  0x98   : > { %v666_v63 = vmax.f32 %v634_v57, %v362_v30  ;;  %v667_v0 = vmax.f32 %v635_v55, %v364_v31  ;;  %v962_v1 = vmax.f32 %v920_v58, %v534_v22  ;;  %v373_v2 = vunpack.c.l.bf16 %v211_v45  ;;  %v214_v30 = vld [vmem:[%s1394_s11 + $0x308] sm:$0xff] }
  0x99   : > { %v921_v4 = vmax.f32 %v889_v56, %v359_v18  ;;  %v374_v5 = vunpack.c.h.bf16 %v211_v45  ;;  %v411_v6 = vmax.f32 %v366_v53, %v367_v48  ;;  %v412_v3 = vmax.f32 %v368_v54, %v369_v60 }
  0x9a   : > { %v537_v9 = vrot.slane %v366_v53, 1  ;;  %v538_v12 = vrot.slane %v368_v54, 1  ;;  %v540_v8 = vrot.slane %v370_v59, 1  ;;  %v790_v14 = vsel %vm461_vm0, %v788_v41, %v789_v39 }
  0x9b   : > { %v963_v13 = vmax.f32 %v921_v4, %v536_v11  ;;  %v791_v17 = vrot.slane %v365_v24, 1  ;;  %v793_v16 = vrot.slane %v371_v61, 1  ;;  %v794_v20 = vrot.slane %v373_v2, 1 }
  0x9c   : > { %v539_v26 = vsel %vm461_vm0, %v537_v9, %v538_v12  ;;  %v541_v18 = vsel %vm461_vm0, %v538_v12, %v540_v8  ;;  %v858_v28 = vmax.f32 %v666_v63, %v790_v14  ;;  %v375_v15 = vunpack.c.l.bf16 %v212_v7 }
  0x9d   : > { %v1326_v19 = vpack.c.bf16 %v963_v13, %v962_v1  ;;  %v604_v27 = vmax.f32 %v411_v6, %v539_v26  ;;  %v605_v29 = vmax.f32 %v412_v3, %v541_v18  ;;  %v792_v31 = vsel %vm461_vm0, %v789_v39, %v791_v17 }
  0x9e   : > { %v859_v33 = vmax.f32 %v667_v0, %v792_v31  ;;  %v890_v34 = vmax.f32 %v858_v28, %v366_v53  ;;  %v376_v21 = vunpack.c.l.bf16 %v213_v25  ;;  %v378_v38 = vunpack.c.l.bf16 %v214_v30 }
  0x9f   : > { %1350 = vst [vmem:[%s1485_s15 + $0x68] sm:$0xff] %v1326_v19   ;;  %v636_v36 = vmax.f32 %v604_v27, %v371_v61  ;;  %v637_v23 = vmax.f32 %v605_v29, %v373_v2  ;;  %v380_v41 = vunpack.c.l.bf16 %v215_v32  ;;  %v795_v42 = vsel %vm461_vm0, %v793_v16, %v794_v20 }
  0xa0   : > { %v891_v37 = vmax.f32 %v859_v33, %v368_v54  ;;  %v922_v40 = vmax.f32 %v890_v34, %v367_v48  ;;  %v796_v10 = vrot.slane %v375_v15, 1  ;;  %v929_v39 = vrot.slane %v376_v21, 1 }
  0xa1   : > { %v668_v35 = vmax.f32 %v636_v36, %v372_v62  ;;  %v669_v43 = vmax.f32 %v637_v23, %v374_v5  ;;  %v930_v24 = vrot.slane %v378_v38, 1  ;;  %v377_v44 = vunpack.c.h.bf16 %v213_v25 }
  0xa2   : > { %v923_v22 = vmax.f32 %v891_v37, %v369_v60  ;;  %v964_v11 = vmax.f32 %v922_v40, %v539_v26  ;;  %v797_v46 = vsel %vm461_vm0, %v794_v20, %v796_v10  ;;  %v932_v49 = vrot.slane %v380_v41, 1 }
  0xa3   : > { %v860_v47 = vmax.f32 %v668_v35, %v795_v42  ;;  %v379_v51 = vunpack.c.h.bf16 %v214_v30  ;;  %v861_v52 = vmax.f32 %v669_v43, %v797_v46  ;;  %v931_v54 = vsel %vm461_vm0, %v929_v39, %v930_v24 }
  0xa4   : > { %v965_v50 = vmax.f32 %v923_v22, %v541_v18  ;;  %v933_v55 = vsel %vm461_vm0, %v930_v24, %v932_v49 }
  0xa5   : > { %v892_v45 = vmax.f32 %v860_v47, %v376_v21  ;;  %v893_v48 = vmax.f32 %v861_v52, %v378_v38 }
  0xa6   : > { %v1331_v53 = vpack.c.bf16 %v965_v50, %v964_v11 }
  0xa7   : > { %v924_v57 = vmax.f32 %v892_v45, %v377_v44  ;;  %v925_v58 = vmax.f32 %v893_v48, %v379_v51 }
  0xa8   : > { %1351 = vst [vmem:[%s1485_s15 + $0x70] sm:$0xff] %v1331_v53  }
  0xa9   : > { %v966_v60 = vmax.f32 %v924_v57, %v931_v54  ;;  %v967_v56 = vmax.f32 %v925_v58, %v933_v55 }
  0xab   : > { %v1336_v59 = vpack.c.bf16 %v967_v56, %v966_v60 }
  0xad   : > { %1352 = vst [vmem:[%s1485_s15 + $0x78] sm:$0xff] %v1336_v59  }
  0xae PF: > { %s11_s6 = sadd.s32 1, %s1368_s6  }
  0xaf   : > { %p8_p4 = scmp.ge.s32.totalorder %s11_s6, 4  }
  0xb1   :  { %10 = sbr.rel (!%p8_p4) target bundleno = 1 (0x1), region = 54 }

// kernel: cnn_classifier_forward.14
= control target key start
LH: loop header
LB: loop body
LE: loop exit
PB: predicated region body
PF: predicated region fallthrough
CT: control target
= control target key end

     0   :  { %vm2796_vm0 = vmmov 0   ;;  %vm1592_vm1 = vcmask 1040384   ;;  %s3687_s1 = inlined_call_operand.vmem [shape: bf16[1152,128], index: 1, kind: input, shape index: {}]   ;;  %s3688_s0 = inlined_call_operand.vmem [shape: bf16[128,1152], index: 0, kind: input, shape index: {}]   ;;  %s3689_s5 = inlined_call_operand.vmem [shape: f32[128,128], index: 5, kind: input, shape index: {}]   ;;  %s3690_s2 = inlined_call_operand.vmem [shape: f32[1,128], index: 2, kind: input, shape index: {}]   ;;  %s3691_s3 = inlined_call_operand.vmem [shape: f32[1,128], index: 3, kind: input, shape index: {}]   ;;  %s3692_s4 = inlined_call_operand.vmem [shape: f32[1,128], index: 4, kind: input, shape index: {}]   ;;  %s3693_s6 = inlined_call_operand.vmem [shape: bf16[128,128], index: 6, kind: output, shape index: {}]  }
   0x1   :  { %v2615_v0 = vld [vmem:[%s3687_s1 + $0x78] sm:$0xff]   ;;  %v2619_v4 = vld [vmem:[%s3687_s1 + $0x70] sm:$0xff]   ;;  %v2623_v8 = vld [vmem:[%s3687_s1 + $0x68] sm:$0xff]  }
   0x2   :  { %v2616_v1 = vld [vmem:[%s3687_s1 + $0x38] sm:$0xff]   ;;  %2205 = vmatprep.subr.bf16.mxu0 %v2615_v0  ;;  %v2620_v5 = vld [vmem:[%s3687_s1 + $0x30] sm:$0xff]   ;;  %v2624_v9 = vld [vmem:[%s3687_s1 + $0x28] sm:$0xff]  }
   0x3   :  { %v2617_v2 = vld [vmem:[%s3687_s1 + $0xf8] sm:$0xff]   ;;  %2206 = vmatpush3.bf16.msra.mxu0 %v2616_v1  ;;  %v2621_v6 = vld [vmem:[%s3687_s1 + $0xf0] sm:$0xff]   ;;  %v2625_v10 = vld [vmem:[%s3687_s1 + $0xe8] sm:$0xff]  }
   0x4   :  { %v2618_v3 = vld [vmem:[%s3687_s1 + $0xb8] sm:$0xff]   ;;  %2269 = vmatprep.subr.bf16.mxu1 %v2617_v2  ;;  %2207 = vmatprep.subr.bf16.mxu0 %v2619_v4  ;;  %v2622_v7 = vld [vmem:[%s3687_s1 + $0xb0] sm:$0xff]   ;;  %v2626_v11 = vld [vmem:[%s3687_s1 + $0xa8] sm:$0xff]  }
   0x5   :  { %2270 = vmatpush3.bf16.msra.mxu1 %v2618_v3  ;;  %v2627_v12 = vld [vmem:[%s3687_s1 + $0x60] sm:$0xff]   ;;  %v2631_v16 = vld [vmem:[%s3687_s1 + $0x58] sm:$0xff]   ;;  %v2635_v20 = vld [vmem:[%s3687_s1 + $0x50] sm:$0xff]  }
   0x6   :  { %2271 = vmatprep.subr.bf16.mxu1 %v2621_v6  ;;  %v2628_v13 = vld [vmem:[%s3687_s1 + $0x20] sm:$0xff]   ;;  %v2632_v17 = vld [vmem:[%s3687_s1 + $0x18] sm:$0xff]   ;;  %v2636_v21 = vld [vmem:[%s3687_s1 + $0x10] sm:$0xff]  }
   0x7   :  { %2208 = vmatpush3.bf16.msra.mxu0 %v2620_v5  ;;  %v2629_v14 = vld [vmem:[%s3687_s1 + $0xe0] sm:$0xff]   ;;  %v2633_v18 = vld [vmem:[%s3687_s1 + $0xd8] sm:$0xff]   ;;  %v2637_v22 = vld [vmem:[%s3687_s1 + $0xd0] sm:$0xff]  }
   0x8   :  { %2209 = vmatprep.subr.bf16.mxu0 %v2623_v8  ;;  %v2630_v15 = vld [vmem:[%s3687_s1 + $0xa0] sm:$0xff]   ;;  %v2634_v19 = vld [vmem:[%s3687_s1 + $0x98] sm:$0xff]   ;;  %v2638_v23 = vld [vmem:[%s3687_s1 + $0x90] sm:$0xff]  }
   0x9   :  { %2272 = vmatpush3.bf16.msra.mxu1 %v2622_v7  ;;  %v2639_v24 = vld [vmem:[%s3687_s1 + $0x48] sm:$0xff]   ;;  %v2643_v28 = vld [vmem:[%s3687_s1 + $0x40] sm:$0xff]   ;;  %v2650_v34 = vld [vmem:[%s3687_s1 + $0x178] sm:$0xff]  }
   0xa   :  { %2273 = vmatprep.subr.bf16.mxu1 %v2625_v10  ;;  %v2640_v25 = vld [vmem:[%s3687_s1 + $0x8] sm:$0xff]   ;;  %v2644_v29 = vld [vmem:[%s3687_s1] sm:$0xff]   ;;  %v2654_v37 = vld [vmem:[%s3687_s1 + $0x138] sm:$0xff]  }
   0xb   :  { %2210 = vmatpush3.bf16.msra.mxu0 %v2624_v9  ;;  %v2641_v26 = vld [vmem:[%s3687_s1 + $0xc8] sm:$0xff]   ;;  %v2645_v30 = vld [vmem:[%s3687_s1 + $0xc0] sm:$0xff]   ;;  %v2658_v40 = vld [vmem:[%s3687_s1 + $0x170] sm:$0xff]  }
   0xc   :  { %2211 = vmatprep.subr.bf16.mxu0 %v2627_v12  ;;  %v2642_v27 = vld [vmem:[%s3687_s1 + $0x88] sm:$0xff]   ;;  %v2646_v31 = vld [vmem:[%s3688_s0] ss:$36 sps:$4 sm:$0xff]   ;;  %v2659_v41 = vld [vmem:[%s3688_s0 + $0x54] ss:$36 sps:$4 sm:$0xff]  }
   0xd   :  { %2274 = vmatpush3.bf16.msra.mxu1 %v2626_v11  ;;  %v2648_v32 = vld [vmem:[%s3688_s0 + $0x4] ss:$36 sps:$4 sm:$0xff]   ;;  %v2653_v36 = vld [vmem:[%s3688_s0 + $0xc] ss:$36 sps:$4 sm:$0xff]   ;;  %v2663_v44 = vld [vmem:[%s3688_s0 + $0x94] ss:$36 sps:$4 sm:$0xff]  }
   0xe   :  { %2275 = vmatprep.subr.bf16.mxu1 %v2629_v14  ;;  %v2649_v33 = vld [vmem:[%s3687_s1 + $0x80] sm:$0xff]   ;;  %1087 = vmatprep.mubr.bf16.mxu0 %v2648_v32  ;;  %v2651_v35 = vld [vmem:[%s3688_s0 + $0x8] ss:$36 sps:$4 sm:$0xff]   ;;  %v2661_v42 = vld [vmem:[%s3687_s1 + $0x130] sm:$0xff]  }
   0xf   :  { %2212 = vmatpush3.bf16.msra.mxu0 %v2628_v13  ;;  %1184 = vmatprep.mubr.bf16.mxu1 %v2653_v36  ;;  %v2655_v38 = vld [vmem:[%s3688_s0 + $0x4c] ss:$36 sps:$4 sm:$0xff]   ;;  %v2667_v46 = vld [vmem:[%s3688_s0 + $0x9c] ss:$36 sps:$4 sm:$0xff]   ;;  %v2675_v53 = vld [vmem:[%s3688_s0 + $0xe4] ss:$36 sps:$4 sm:$0xff]  }
  0x10   :  { %2213 = vmatprep.subr.bf16.mxu0 %v2631_v16  ;;  %v2657_v39 = vld [vmem:[%s3688_s0 + $0x48] ss:$36 sps:$4 sm:$0xff]   ;;  %v2662_v43 = vld [vmem:[%s3688_s0 + $0x50] ss:$36 sps:$4 sm:$0xff]   ;;  %v2671_v49 = vld [vmem:[%s3688_s0 + $0xdc] ss:$36 sps:$4 sm:$0xff]  }
  0x11   :  { %2276 = vmatpush3.bf16.msra.mxu1 %v2630_v15  ;;  %v2666_v45 = vld [vmem:[%s3687_s1 + $0x168] sm:$0xff]   ;;  %v2665_v48 = vld [vmem:[%s3688_s0 + $0x90] ss:$36 sps:$4 sm:$0xff]   ;;  %v2674_v50 = vld [vmem:[%s3687_s1 + $0x160] sm:$0xff]  }
  0x12   :  { %2277 = vmatprep.subr.bf16.mxu1 %v2633_v18  ;;  %v2669_v47 = vld [vmem:[%s3687_s1 + $0x128] sm:$0xff]   ;;  %v2670_v51 = vld [vmem:[%s3688_s0 + $0x98] ss:$36 sps:$4 sm:$0xff]   ;;  %v2677_v52 = vld [vmem:[%s3687_s1 + $0x120] sm:$0xff]  }
  0x13   :  { %2214 = vmatpush3.bf16.msra.mxu0 %v2632_v17  ;;  %v2682_v54 = vld [vmem:[%s3687_s1 + $0x158] sm:$0xff]   ;;  %v2679_v57 = vld [vmem:[%s3688_s0 + $0x124] ss:$36 sps:$4 sm:$0xff]   ;;  %v2689_v61 = vld [vmem:[%s3687_s1 + $0x1f0] sm:$0xff]  }
  0x14   :  { %2215 = vmatprep.subr.bf16.mxu0 %v2635_v20  ;;  %v2673_v55 = vld [vmem:[%s3688_s0 + $0xd8] ss:$36 sps:$4 sm:$0xff]   ;;  %v2678_v60 = vld [vmem:[%s3688_s0 + $0xe0] ss:$36 sps:$4 sm:$0xff]   ;;  %v2684_v62 = vld [vmem:[%s3688_s0 + $0x12c] ss:$36 sps:$4 sm:$0xff]  }
  0x15   :  { %2278 = vmatpush3.bf16.msra.mxu1 %v2634_v19  ;;  %v2683_v56 = vld [vmem:[%s3687_s1 + $0x1f8] sm:$0xff]   ;;  %v2692_v63 = vld [vmem:[%s3687_s1 + $0x1b0] sm:$0xff]   ;;  %v2681_v1 = vld [vmem:[%s3688_s0 + $0x120] ss:$36 sps:$4 sm:$0xff]  }
  0x16   :  { %2279 = vmatprep.subr.bf16.mxu1 %v2637_v22  ;;  %v2686_v58 = vld [vmem:[%s3687_s1 + $0x118] sm:$0xff]   ;;  %v2694_v0 = vld [vmem:[%s3687_s1 + $0x150] sm:$0xff]   ;;  %v2688_v4 = vld [vmem:[%s3688_s0 + $0x128] ss:$36 sps:$4 sm:$0xff]  }
  0x17   :  { %2216 = vmatpush3.bf16.msra.mxu0 %v2636_v21  ;;  %v2687_v59 = vld [vmem:[%s3687_s1 + $0x1b8] sm:$0xff]   ;;  %v2690_v2 = vld [vmem:[%s3688_s0 + $0x16c] ss:$36 sps:$4 sm:$0xff]   ;;  %v2701_v7 = vld [vmem:[%s3687_s1 + $0x1e0] sm:$0xff]  }
  0x18   :  { %2217 = vmatprep.subr.bf16.mxu0 %v2639_v24  ;;  %v2697_v3 = vld [vmem:[%s3687_s1 + $0x110] sm:$0xff]   ;;  %v2699_v5 = vld [vmem:[%s3687_s1 + $0x1e8] sm:$0xff]   ;;  %v2704_v9 = vld [vmem:[%s3687_s1 + $0x1a0] sm:$0xff]  }
  0x19   :  { %2280 = vmatpush3.bf16.msra.mxu1 %v2638_v23  ;;  %v2700_v6 = vld [vmem:[%s3687_s1 + $0x1a8] sm:$0xff]   ;;  %v2695_v8 = vld [vmem:[%s3688_s0 + $0x174] ss:$36 sps:$4 sm:$0xff]   ;;  %v2707_v15 = vld [vmem:[%s3688_s0 + $0x1bc] ss:$36 sps:$4 sm:$0xff]  }
  0x1a   :  { %2281 = vmatprep.subr.bf16.mxu1 %v2641_v26  ;;  %v2706_v10 = vld [vmem:[%s3687_s1 + $0x148] sm:$0xff]   ;;  %v2698_v12 = vld [vmem:[%s3688_s0 + $0x170] ss:$36 sps:$4 sm:$0xff]   ;;  %v2711_v16 = vld [vmem:[%s3687_s1 + $0x1d8] sm:$0xff]  }
  0x1b   :  { %2218 = vmatpush3.bf16.msra.mxu0 %v2640_v25  ;;  %v2693_v11 = vld [vmem:[%s3688_s0 + $0x168] ss:$36 sps:$4 sm:$0xff]   ;;  %v2702_v13 = vld [vmem:[%s3688_s0 + $0x1b4] ss:$36 sps:$4 sm:$0xff]   ;;  %v2718_v21 = vld [vmem:[%s3687_s1 + $0x140] sm:$0xff]  }
  0x1c   :  { %2219 = vmatprep.subr.bf16.mxu0 %v2643_v28  ;;  %v2709_v14 = vld [vmem:[%s3687_s1 + $0x108] sm:$0xff]   ;;  %v2712_v17 = vld [vmem:[%s3687_s1 + $0x198] sm:$0xff]   ;;  %v2713_v18 = vld [vmem:[%s3687_s1 + $0x1d0] sm:$0xff]  }
  0x1d   :  { %2282 = vmatpush3.bf16.msra.mxu1 %v2642_v27  ;;  %v2705_v19 = vld [vmem:[%s3688_s0 + $0x1b0] ss:$36 sps:$4 sm:$0xff]   ;;  %v2714_v22 = vld [vmem:[%s3688_s0 + $0x1fc] ss:$36 sps:$4 sm:$0xff]   ;;  %v2719_v25 = vld [vmem:[%s3688_s0 + $0x204] ss:$36 sps:$4 sm:$0xff]  }
  0x1e   :  { %2283 = vmatprep.subr.bf16.mxu1 %v2645_v30  ;;  %v2716_v20 = vld [vmem:[%s3687_s1 + $0x190] sm:$0xff]   ;;  %v2710_v23 = vld [vmem:[%s3688_s0 + $0x1b8] ss:$36 sps:$4 sm:$0xff]   ;;  %v2721_v24 = vld [vmem:[%s3687_s1 + $0x100] sm:$0xff]  }
  0x1f   :  { %2220 = vmatpush3.bf16.msra.mxu0 %v2644_v29  ;;  %v2723_v26 = vld [vmem:[%s3687_s1 + $0x1c8] sm:$0xff]   ;;  %v2725_v28 = vld [vmem:[%s3687_s1 + $0x1c0] sm:$0xff]   ;;  %v2717_v29 = vld [vmem:[%s3688_s0 + $0x1f8] ss:$36 sps:$4 sm:$0xff]  }
  0x20   :  { %2333 = vmatprep.subr.bf16.mxu0 %v2650_v34  ;;  %v2724_v27 = vld [vmem:[%s3687_s1 + $0x188] sm:$0xff]   ;;  %v2729_v30 = vld [vmem:[%s3687_s1 + $0x180] sm:$0xff]   ;;  %v2728_v32 = vld [vmem:[%s3688_s0 + $0x14] ss:$36 sps:$4 sm:$0xff]  }
  0x21   :  { %2284 = vmatpush3.bf16.msra.mxu1 %v2649_v33  ;;  %v2722_v33 = vld [vmem:[%s3688_s0 + $0x200] ss:$36 sps:$4 sm:$0xff]  }
  0x22   :  { %1088 = vmatmul.mubr.bf16.vlgmr.msra.gmra.mxu0 %v2646_v31  ;;  %2397 = vmatprep.subr.bf16.mxu1 %v2683_v56  ;;  %v2730_v31 = vld [vmem:[%s3687_s1 + $0x238] sm:$0xff]   ;;  %v2754_v56 = vld [vmem:[%s3688_s0 + $0xf0] ss:$36 sps:$4 sm:$0xff]  }
  0x23   :  { %2334 = vmatpush3.bf16.msra.mxu0 %v2654_v37  ;;  %1095 = vmatprep.mubr.bf16.mxu0 %v2655_v38  ;;  %v2733_v34 = vld [vmem:[%s3688_s0 + $0x1c] ss:$36 sps:$4 sm:$0xff]   ;;  %v2737_v37 = vld [vmem:[%s3687_s1 + $0x230] sm:$0xff]  }
  0x24   :  { %1185 = vmatmul.mubr.bf16.vlgmr.msra.gmra.mxu1 %v2651_v35  ;;  %2335 = vmatprep.subr.bf16.mxu0 %v2658_v40  ;;  %v2726_v35 = vld [vmem:[%s3688_s0 + $0x10] ss:$36 sps:$4 sm:$0xff]   ;;  %v2734_v36 = vld [vmem:[%s3688_s0 + $0x5c] ss:$36 sps:$4 sm:$0xff]   ;;  %v2744_v40 = vld [vmem:[%s3687_s1 + $0x228] sm:$0xff]  }
  0x25   :  { %1192 = vmatprep.mubr.bf16.mxu1 %v2659_v41  ;;  %2398 = vmatpush3.bf16.msra.mxu1 %v2687_v59  ;;  %v2731_v38 = vld [vmem:[%s3688_s0 + $0x18] ss:$36 sps:$4 sm:$0xff]  }
  0x26   :  { %2399 = vmatprep.subr.bf16.mxu1 %v2689_v61  ;;  %v2736_v41 = vld [vmem:[%s3688_s0 + $0x58] ss:$36 sps:$4 sm:$0xff]   ;;  %v2766_v61 = vld [vmem:[%s3688_s0 + $0x184] ss:$36 sps:$4 sm:$0xff]  }
  0x27   :  { %2336 = vmatpush3.bf16.msra.mxu0 %v2661_v42  ;;  %v2741_v42 = vld [vmem:[%s3688_s0 + $0xa4] ss:$36 sps:$4 sm:$0xff]   ;;  %v2762_v59 = vld [vmem:[%s3688_s0 + $0x17c] ss:$36 sps:$4 sm:$0xff]  }
  0x28   :  { %2337 = vmatprep.subr.bf16.mxu0 %v2666_v45  ;;  %v2745_v45 = vld [vmem:[%s3688_s0 + $0xac] ss:$36 sps:$4 sm:$0xff]  }
  0x29   :  { %2400 = vmatpush3.bf16.msra.mxu1 %v2692_v63  ;;  %v2769_v63 = vld [vmem:[%s3688_s0 + $0x1c4] ss:$36 sps:$4 sm:$0xff]  }
  0x2a   :  { %1096 = vmatmul.mubr.bf16.gmra.mxu0 %v2657_v39  ;;  %2401 = vmatprep.subr.bf16.mxu1 %v2699_v5  ;;  %v2738_v39 = vld [vmem:[%s3688_s0 + $0x64] ss:$36 sps:$4 sm:$0xff]   ;;  %v2780_v5 = vld [vmem:[%s3688_s0 + $0x214] ss:$36 sps:$4 sm:$0xff]  }
  0x2b   :  { %1103 = vmatprep.mubr.bf16.mxu0 %v2663_v44  ;;  %2338 = vmatpush3.bf16.msra.mxu0 %v2669_v47  ;;  %v2740_v44 = vld [vmem:[%s3688_s0 + $0x60] ss:$36 sps:$4 sm:$0xff]  }
  0x2c   :  { %1193 = vmatmul.mubr.bf16.gmra.mxu1 %v2662_v43  ;;  %2339 = vmatprep.subr.bf16.mxu0 %v2674_v50  ;;  %v2751_v43 = vld [vmem:[%s3687_s1 + $0x220] sm:$0xff]   ;;  %v2747_v50 = vld [vmem:[%s3688_s0 + $0xa8] ss:$36 sps:$4 sm:$0xff]  }
  0x2d   :  { %1200 = vmatprep.mubr.bf16.mxu1 %v2667_v46  ;;  %2402 = vmatpush3.bf16.msra.mxu1 %v2700_v6  ;;  %v2758_v46 = vld [vmem:[%s3687_s1 + $0x218] sm:$0xff]   ;;  %v2743_v47 = vld [vmem:[%s3688_s0 + $0xa0] ss:$36 sps:$4 sm:$0xff]   ;;  %v2778_v6 = vld [vmem:[%s3688_s0 + $0x208] ss:$36 sps:$4 sm:$0xff]  }
  0x2e   :  { %2403 = vmatprep.subr.bf16.mxu1 %v2701_v7  ;;  %v2783_v7 = vld [vmem:[%s3688_s0 + $0x20] ss:$36 sps:$4 sm:$0xff]  }
  0x2f   :  { %2340 = vmatpush3.bf16.msra.mxu0 %v2677_v52  ;;  %v2772_v52 = vld [vmem:[%s3687_s1 + $0x208] sm:$0xff]  }
  0x30   :  { %2341 = vmatprep.subr.bf16.mxu0 %v2682_v54  ;;  %v2755_v54 = vld [vmem:[%s3688_s0 + $0x134] ss:$36 sps:$4 sm:$0xff]  }
  0x31   :  { %2404 = vmatpush3.bf16.msra.mxu1 %v2704_v9  ;;  %v2784_v9 = vld [vmem:[%s3688_s0 + $0x68] ss:$36 sps:$4 sm:$0xff]  }
  0x32   :  { %1104 = vmatmul.mubr.bf16.gmra.mxu0 %v2665_v48  ;;  %2405 = vmatprep.subr.bf16.mxu1 %v2711_v16  ;;  %v2748_v48 = vld [vmem:[%s3688_s0 + $0xec] ss:$36 sps:$4 sm:$0xff]   ;;  %v2795_v16 = vmov 0.0  }
  0x33   :  { %1111 = vmatprep.mubr.bf16.mxu0 %v2671_v49  ;;  %2342 = vmatpush3.bf16.msra.mxu0 %v2686_v58  ;;  %v2765_v49 = vld [vmem:[%s3687_s1 + $0x210] sm:$0xff]  }
  0x34   :  { %1201 = vmatmul.mubr.bf16.gmra.mxu1 %v2670_v51  ;;  %2343 = vmatprep.subr.bf16.mxu0 %v2694_v0  ;;  %v2752_v51 = vld [vmem:[%s3688_s0 + $0xf4] ss:$36 sps:$4 sm:$0xff]   ;;  %v2768_v0 = vld [vmem:[%s3688_s0 + $0x180] ss:$36 sps:$4 sm:$0xff]  }
  0x35   :  { %1208 = vmatprep.mubr.bf16.mxu1 %v2675_v53  ;;  %2406 = vmatpush3.bf16.msra.mxu1 %v2712_v17  ;;  %v2750_v53 = vld [vmem:[%s3688_s0 + $0xe8] ss:$36 sps:$4 sm:$0xff]   ;;  %v2757_v58 = vld [vmem:[%s3688_s0 + $0x130] ss:$36 sps:$4 sm:$0xff]   ;;  %v1557_v17 = vld [vmem:[%s3689_s5 + $0x78] sm:$0xff] }
  0x36   :  { %2407 = vmatprep.subr.bf16.mxu1 %v2713_v18  ;;  %v1556_v18 = vld [vmem:[%s3689_s5 + $0x70] sm:$0xff] }
  0x37   :  { %2344 = vmatpush3.bf16.msra.mxu0 %v2697_v3  ;;  %v2776_v3 = vld [vmem:[%s3688_s0 + $0x20c] ss:$36 sps:$4 sm:$0xff]  }
  0x38   :  { %2345 = vmatprep.subr.bf16.mxu0 %v2706_v10  ;;  %v2785_v10 = vld [vmem:[%s3688_s0 + $0xb0] ss:$36 sps:$4 sm:$0xff]  }
  0x39   :  { %2408 = vmatpush3.bf16.msra.mxu1 %v2716_v20  ;;  %v3279_v20 = vld [vmem:[%s3690_s2] ss:$0 sm:$0xff] }
  0x3a   :  { %1112 = vmatmul.mubr.bf16.gmra.mxu0 %v2673_v55  ;;  %2409 = vmatprep.subr.bf16.mxu1 %v2723_v26  ;;  %v2779_v55 = vld [vmem:[%s3687_s1 + $0x200] sm:$0xff]  }
  0x3b   :  { %1119 = vmatprep.mubr.bf16.mxu0 %v2679_v57  ;;  %2346 = vmatpush3.bf16.msra.mxu0 %v2709_v14  ;;  %v2759_v57 = vld [vmem:[%s3688_s0 + $0x13c] ss:$36 sps:$4 sm:$0xff]   ;;  %v2789_v14 = vld [vmem:[%s3688_s0 + $0x1d0] ss:$36 sps:$4 sm:$0xff]  }
  0x3c   :  { %1209 = vmatmul.mubr.bf16.gmra.mxu1 %v2678_v60  ;;  %2347 = vmatprep.subr.bf16.mxu0 %v2718_v21  ;;  %v2761_v60 = vld [vmem:[%s3688_s0 + $0x138] ss:$36 sps:$4 sm:$0xff]  }
  0x3d   :  { %1216 = vmatprep.mubr.bf16.mxu1 %v2684_v62  ;;  %2410 = vmatpush3.bf16.msra.mxu1 %v2724_v27  ;;  %v2764_v62 = vld [vmem:[%s3688_s0 + $0x178] ss:$36 sps:$4 sm:$0xff]  }
  0x3e   :  { %2411 = vmatprep.subr.bf16.mxu1 %v2725_v28 }
  0x3f   :  { %2348 = vmatpush3.bf16.msra.mxu0 %v2721_v24  ;;  %v1555_v24 = vld [vmem:[%s3689_s5 + $0x68] sm:$0xff] }
  0x40   :  { %2511 = vmatprep.subr.bf16.mxu0 %v2730_v31 }
  0x41   :  { %2412 = vmatpush3.bf16.msra.mxu1 %v2729_v30 }
  0x42   :  { %1120 = vmatmul.mubr.bf16.gmra.mxu0 %v2681_v1  ;;  %v2773_v1 = vld [vmem:[%s3688_s0 + $0x1cc] ss:$36 sps:$4 sm:$0xff]   ;;  %2543 = vmatprep.subr.mxu1 %v2795_v16 }
  0x43   :  { %1127 = vmatprep.mubr.bf16.mxu0 %v2690_v2  ;;  %v2771_v2 = vld [vmem:[%s3688_s0 + $0x1c0] ss:$36 sps:$4 sm:$0xff]  }
  0x44   :  { %1217 = vmatmul.mubr.bf16.gmra.mxu1 %v2688_v4  ;;  %v2775_v4 = vld [vmem:[%s3688_s0 + $0x1c8] ss:$36 sps:$4 sm:$0xff]  }
  0x45   :  { %1224 = vmatprep.mubr.bf16.mxu1 %v2695_v8  ;;  %v2782_v8 = vld [vmem:[%s3688_s0 + $0x210] ss:$36 sps:$4 sm:$0xff]  }
  0x4a   :  { %1128 = vmatmul.mubr.bf16.gmra.mxu0 %v2693_v11  ;;  %v2786_v11 = vld [vmem:[%s3688_s0 + $0xf8] ss:$36 sps:$4 sm:$0xff]  }
  0x4b   :  { %1135 = vmatprep.mubr.bf16.mxu0 %v2702_v13  ;;  %v2788_v13 = vld [vmem:[%s3688_s0 + $0x188] ss:$36 sps:$4 sm:$0xff]  }
  0x4c   :  { %1225 = vmatmul.mubr.bf16.gmra.mxu1 %v2698_v12  ;;  %v2787_v12 = vld [vmem:[%s3688_s0 + $0x140] ss:$36 sps:$4 sm:$0xff]  }
  0x4d   :  { %1232 = vmatprep.mubr.bf16.mxu1 %v2707_v15  ;;  %v2790_v15 = vld [vmem:[%s3688_s0 + $0x218] ss:$36 sps:$4 sm:$0xff]  }
  0x52   :  { %1136 = vmatmul.mubr.bf16.gmra.mxu0 %v2705_v19 }
  0x53   :  { %1143 = vmatprep.mubr.bf16.mxu0 %v2714_v22 }
  0x54   :  { %1233 = vmatmul.mubr.bf16.gmra.mxu1 %v2710_v23 }
  0x55   :  { %1240 = vmatprep.mubr.bf16.mxu1 %v2719_v25 }
  0x5a   :  { %1144 = vmatmul.mubr.bf16.gmra.mxu0 %v2717_v29 }
  0x5b   :  { %1281 = vmatprep.mubr.bf16.mxu0 %v2728_v32  ;;  %v1554_v32 = vld [vmem:[%s3689_s5 + $0x60] sm:$0xff] }
  0x5c   :  { %1241 = vmatmul.mubr.bf16.gmra.mxu1 %v2722_v33 }
  0x5d   :  { %1378 = vmatprep.mubr.bf16.mxu1 %v2733_v34 }
  0x62   :  { %1282 = vmatmul.mubr.bf16.vlgmr.msra.gmra.mxu0 %v2726_v35 }
  0x63   :  { %2512 = vmatpush3.bf16.msra.mxu0 %v2730_v31  ;;  %1289 = vmatprep.mubr.bf16.mxu0 %v2734_v36 }
  0x64   :  { %2513 = vmatprep.subr.bf16.mxu0 %v2737_v37  ;;  %1379 = vmatmul.mubr.bf16.vlgmr.msra.gmra.mxu1 %v2731_v38 }
  0x65   :  { %1386 = vmatprep.mubr.bf16.mxu1 %v2738_v39  ;;  %2544 = vmatpush3.msra.mxu1 %v1557_v17 }
  0x66   :  { %2545 = vmatprep.subr.mxu1 %v2795_v16 }
  0x67   :  { %2514 = vmatpush3.bf16.msra.mxu0 %v2737_v37  ;;  %2546 = vmatpush3.msra.mxu1 %v1556_v18 }
  0x68   :  { %2515 = vmatprep.subr.bf16.mxu0 %v2744_v40  ;;  %2547 = vmatprep.subr.mxu1 %v2795_v16 }
  0x69   :  { %2548 = vmatpush3.msra.mxu1 %v1555_v24 }
  0x6a   :  { %1290 = vmatmul.mubr.bf16.gmra.mxu0 %v2736_v41  ;;  %2549 = vmatprep.subr.mxu1 %v2795_v16 }
  0x6b   :  { %1297 = vmatprep.mubr.bf16.mxu0 %v2741_v42  ;;  %2516 = vmatpush3.bf16.msra.mxu0 %v2744_v40 }
  0x6c   :  { %2517 = vmatprep.subr.bf16.mxu0 %v2751_v43  ;;  %1387 = vmatmul.mubr.bf16.gmra.mxu1 %v2740_v44 }
  0x6d   :  { %1394 = vmatprep.mubr.bf16.mxu1 %v2745_v45  ;;  %2550 = vmatpush3.msra.mxu1 %v1554_v32  ;;  %v1553_v45 = vld [vmem:[%s3689_s5 + $0x58] sm:$0xff] }
  0x6e   :  { %2551 = vmatprep.subr.mxu1 %v2795_v16 }
  0x6f   :  { %2518 = vmatpush3.bf16.msra.mxu0 %v2751_v43  ;;  %2552 = vmatpush3.msra.mxu1 %v1553_v45 }
  0x70   :  { %2519 = vmatprep.subr.bf16.mxu0 %v2758_v46  ;;  %2553 = vmatprep.subr.mxu1 %v2795_v16 }
  0x72   :  { %1298 = vmatmul.mubr.bf16.gmra.mxu0 %v2743_v47 }
  0x73   :  { %1305 = vmatprep.mubr.bf16.mxu0 %v2748_v48  ;;  %2520 = vmatpush3.bf16.msra.mxu0 %v2758_v46 }
  0x74   :  { %2521 = vmatprep.subr.bf16.mxu0 %v2765_v49  ;;  %1395 = vmatmul.mubr.bf16.gmra.mxu1 %v2747_v50 }
  0x75   :  { %1402 = vmatprep.mubr.bf16.mxu1 %v2752_v51 }
  0x77   :  { %2522 = vmatpush3.bf16.msra.mxu0 %v2765_v49 }
  0x78   :  { %2523 = vmatprep.subr.bf16.mxu0 %v2772_v52 }
  0x7a   :  { %1306 = vmatmul.mubr.bf16.gmra.mxu0 %v2750_v53 }
  0x7b   :  { %1313 = vmatprep.mubr.bf16.mxu0 %v2755_v54  ;;  %2524 = vmatpush3.bf16.msra.mxu0 %v2772_v52  ;;  %v1552_v54 = vld [vmem:[%s3689_s5 + $0x50] sm:$0xff] }
  0x7c   :  { %2525 = vmatprep.subr.bf16.mxu0 %v2779_v55  ;;  %1403 = vmatmul.mubr.bf16.gmra.mxu1 %v2754_v56 }
  0x7d   :  { %1410 = vmatprep.mubr.bf16.mxu1 %v2759_v57  ;;  %2554 = vmatpush3.msra.mxu1 %v1552_v54 }
  0x7e   :  { %2555 = vmatprep.subr.mxu1 %v2795_v16 }
  0x7f   :  { %2526 = vmatpush3.bf16.msra.mxu0 %v2779_v55 }
  0x80   :  { %2578 = vmatprep.subr.mxu0 %v2795_v16 }
  0x82   :  { %1314 = vmatmul.mubr.bf16.gmra.mxu0 %v2757_v58 }
  0x83   :  { %1321 = vmatprep.mubr.bf16.mxu0 %v2762_v59 }
  0x84   :  { %1411 = vmatmul.mubr.bf16.gmra.mxu1 %v2761_v60 }
  0x85   :  { %1418 = vmatprep.mubr.bf16.mxu1 %v2766_v61 }
  0x8a   :  { %1322 = vmatmul.mubr.bf16.gmra.mxu0 %v2764_v62 }
  0x8b   :  { %1329 = vmatprep.mubr.bf16.mxu0 %v2769_v63  ;;  %v1551_v63 = vld [vmem:[%s3689_s5 + $0x48] sm:$0xff] }
  0x8c   :  { %1419 = vmatmul.mubr.bf16.gmra.mxu1 %v2768_v0 }
  0x8d   :  { %1426 = vmatprep.mubr.bf16.mxu1 %v2773_v1  ;;  %2556 = vmatpush3.msra.mxu1 %v1551_v63 }
  0x8e   :  { %2557 = vmatprep.subr.mxu1 %v2795_v16 }
  0x92   :  { %1330 = vmatmul.mubr.bf16.gmra.mxu0 %v2771_v2 }
  0x93   :  { %1337 = vmatprep.mubr.bf16.mxu0 %v2776_v3 }
  0x94   :  { %1427 = vmatmul.mubr.bf16.gmra.mxu1 %v2775_v4  ;;  %v1550_v4 = vld [vmem:[%s3689_s5 + $0x40] sm:$0xff] }
  0x95   :  { %1434 = vmatprep.mubr.bf16.mxu1 %v2780_v5  ;;  %2558 = vmatpush3.msra.mxu1 %v1550_v4 }
  0x96   :  { %2559 = vmatprep.subr.mxu1 %v2795_v16 }
  0x9a   :  { %1338 = vmatmul.mubr.bf16.gmra.mxu0 %v2778_v6 }
  0x9b   :  { %2527 = vmatprep.mubr.bf16.mxu0 %v2783_v7 }
  0x9c   :  { %1435 = vmatmul.mubr.bf16.gmra.mxu1 %v2782_v8 }
  0x9d   :  { %2575 = vmatprep.mubr.msk.f32.mxu1 %vm2796_vm0, %v2795_v16 }
  0xa2   :  { %2528 = vmatmul.mubr.bf16.vlgmr.msra.gmra.mxu0 %v2784_v9  ;;  %v1549_v9 = vld [vmem:[%s3689_s5 + $0x38] sm:$0xff] }
  0xa3   :  { %2531 = vmatprep.mubr.bf16.mxu0 %v2785_v10  ;;  %2579 = vmatpush3.msra.mxu0 %v1557_v17 }
  0xa4   :  { %2580 = vmatprep.subr.mxu0 %v2795_v16  ;;  %2560 = vmatpush3.msra.mxu1 %v1549_v9 }
  0xa5   :  { %2581 = vmatpush3.msra.mxu0 %v1556_v18  ;;  %2561 = vmatprep.subr.mxu1 %v2795_v16 }
  0xa6   :  { %2582 = vmatprep.subr.mxu0 %v2795_v16 }
  0xa7   :  { %2583 = vmatpush3.msra.mxu0 %v1555_v24 }
  0xa8   :  { %2584 = vmatprep.subr.mxu0 %v2795_v16 }
  0xa9   :  { %2585 = vmatpush3.msra.mxu0 %v1554_v32 }
  0xaa   :  { %2532 = vmatmul.mubr.bf16.gmra.mxu0 %v2786_v11  ;;  %2586 = vmatprep.subr.mxu0 %v2795_v16 }
  0xab   :  { %2535 = vmatprep.mubr.bf16.mxu0 %v2787_v12  ;;  %2587 = vmatpush3.msra.mxu0 %v1553_v45 }
  0xac   :  { %2588 = vmatprep.subr.mxu0 %v2795_v16 }
  0xad   :  { %2589 = vmatpush3.msra.mxu0 %v1552_v54 }
  0xae   :  { %2590 = vmatprep.subr.mxu0 %v2795_v16 }
  0xaf   :  { %2591 = vmatpush3.msra.mxu0 %v1551_v63 }
  0xb0   :  { %2592 = vmatprep.subr.mxu0 %v2795_v16 }
  0xb1   :  { %2593 = vmatpush3.msra.mxu0 %v1550_v4 }
  0xb2   :  { %2536 = vmatmul.mubr.bf16.gmra.mxu0 %v2788_v13  ;;  %2594 = vmatprep.subr.mxu0 %v2795_v16 }
  0xb3   :  { %2539 = vmatprep.mubr.bf16.mxu0 %v2789_v14  ;;  %2595 = vmatpush3.msra.mxu0 %v1549_v9  ;;  %v1548_v14 = vld [vmem:[%s3689_s5 + $0x30] sm:$0xff] }
  0xb4   :  { %2596 = vmatprep.subr.mxu0 %v2795_v16  ;;  %2562 = vmatpush3.msra.mxu1 %v1548_v14 }
  0xb5   :  { %2597 = vmatpush3.msra.mxu0 %v1548_v14  ;;  %2563 = vmatprep.subr.mxu1 %v2795_v16 }
  0xb6   :  { %2598 = vmatprep.subr.mxu0 %v2795_v16 }
  0xba   :  { %2540 = vmatmul.mubr.bf16.gmra.mxu0 %v2790_v15 }
  0xbb   :  { %2610 = vmatprep.mubr.msk.f32.mxu0 %vm2796_vm0, %v2795_v16 }
  0xe2   :  { %v2221_v19 = vpop.f32.mrf.mxu0 }
  0xe4   :  { %v2222_v21 = vpop.f32.mrf.mxu0  ;;  %v2285_v23 = vpop.f32.mrf.mxu1 }
  0xe5   :  { %v2223_v22 = vadd.f32 %v2222_v21, %v2221_v19  ;;  %v1547_v21 = vld [vmem:[%s3689_s5 + $0x28] sm:$0xff] }
  0xe6   :  { %v2224_v25 = vpop.f32.mrf.mxu0  ;;  %v2286_v27 = vpop.f32.mrf.mxu1  ;;  %2564 = vmatpush3.msra.mxu1 %v1547_v21  ;;  %2599 = vmatpush3.msra.mxu0 %v1547_v21 }
  0xe7   :  { %v1090_v26 = vadd.f32 %v2223_v22, %v3279_v20  ;;  %v2287_v28 = vadd.f32 %v2286_v27, %v2285_v23  ;;  %2565 = vmatprep.subr.mxu1 %v2795_v16  ;;  %2600 = vmatprep.subr.mxu0 %v2795_v16 }
  0xe8   :  { %v2225_v29 = vpop.f32.mrf.mxu0  ;;  %v2288_v31 = vpop.f32.mrf.mxu1 }
  0xe9   :  { %v2226_v30 = vadd.f32 %v2225_v29, %v2224_v25  ;;  %v3290_v33 = vadd.f32 %v2287_v28, %v1090_v26  ;;  %v1546_v26 = vld [vmem:[%s3689_s5 + $0x20] sm:$0xff] }
  0xea   :  { %v2227_v34 = vpop.f32.mrf.mxu0  ;;  %v2289_v36 = vpop.f32.mrf.mxu1  ;;  %2566 = vmatpush3.msra.mxu1 %v1546_v26  ;;  %2601 = vmatpush3.msra.mxu0 %v1546_v26 }
  0xeb   :  { %v1093_v35 = vadd.f32 %v2226_v30, %v3279_v20  ;;  %v2290_v37 = vadd.f32 %v2289_v36, %v2288_v31  ;;  %2567 = vmatprep.subr.mxu1 %v2795_v16  ;;  %v1545_v31 = vld [vmem:[%s3689_s5 + $0x18] sm:$0xff]  ;;  %2602 = vmatprep.subr.mxu0 %v2795_v16 }
  0xec   :  { %v2228_v38 = vpop.f32.mrf.mxu0  ;;  %v2291_v40 = vpop.f32.mrf.mxu1  ;;  %2568 = vmatpush3.msra.mxu1 %v1545_v31  ;;  %2603 = vmatpush3.msra.mxu0 %v1545_v31 }
  0xed   :  { %v2229_v39 = vadd.f32 %v2228_v38, %v2227_v34  ;;  %v3295_v41 = vadd.f32 %v2290_v37, %v1093_v35  ;;  %2569 = vmatprep.subr.mxu1 %v2795_v16  ;;  %v1544_v37 = vld [vmem:[%s3689_s5 + $0x10] sm:$0xff]  ;;  %2604 = vmatprep.subr.mxu0 %v2795_v16 }
  0xee   :  { %v2230_v42 = vpop.f32.mrf.mxu0  ;;  %v2292_v44 = vpop.f32.mrf.mxu1  ;;  %2570 = vmatpush3.msra.mxu1 %v1544_v37  ;;  %2605 = vmatpush3.msra.mxu0 %v1544_v37 }
  0xef   :  { %v1098_v43 = vadd.f32 %v2229_v39, %v3279_v20  ;;  %v2293_v46 = vadd.f32 %v2292_v44, %v2291_v40  ;;  %2571 = vmatprep.subr.mxu1 %v2795_v16  ;;  %2606 = vmatprep.subr.mxu0 %v2795_v16 }
  0xf0   :  { %v2231_v47 = vpop.f32.mrf.mxu0  ;;  %v2294_v49 = vpop.f32.mrf.mxu1 }
  0xf1   :  { %v2232_v48 = vadd.f32 %v2231_v47, %v2230_v42  ;;  %v3303_v50 = vadd.f32 %v2293_v46, %v1098_v43  ;;  %v1543_v43 = vld [vmem:[%s3689_s5 + $0x8] sm:$0xff] }
  0xf2   :  { %v2233_v51 = vpop.f32.mrf.mxu0  ;;  %v2295_v53 = vpop.f32.mrf.mxu1  ;;  %2572 = vmatpush3.msra.mxu1 %v1543_v43  ;;  %2607 = vmatpush3.msra.mxu0 %v1543_v43 }
  0xf3   :  { %v1101_v52 = vadd.f32 %v2232_v48, %v3279_v20  ;;  %v2296_v55 = vadd.f32 %v2295_v53, %v2294_v49  ;;  %2573 = vmatprep.subr.mxu1 %v2795_v16  ;;  %v1542_v48 = vld [vmem:[%s3689_s5] sm:$0xff]  ;;  %2608 = vmatprep.subr.mxu0 %v2795_v16 }
  0xf4   :  { %v2234_v56 = vpop.f32.mrf.mxu0  ;;  %v2297_v58 = vpop.f32.mrf.mxu1  ;;  %2574 = vmatpush3.msra.mxu1 %v1542_v48  ;;  %2609 = vmatpush3.msra.mxu0 %v1542_v48 }
  0xf5   :  { %v2235_v57 = vadd.f32 %v2234_v56, %v2233_v51  ;;  %v3311_v59 = vadd.f32 %v2296_v55, %v1101_v52 }
  0xf6   :  { %v2236_v60 = vpop.f32.mrf.mxu0  ;;  %v2298_v62 = vpop.f32.mrf.mxu1 }
  0xf7   :  { %v1106_v61 = vadd.f32 %v2235_v57, %v3279_v20  ;;  %v2299_v0 = vadd.f32 %v2298_v62, %v2297_v58 }
  0xf8   :  { %v2237_v1 = vpop.f32.mrf.mxu0  ;;  %v2300_v3 = vpop.f32.mrf.mxu1 }
  0xf9   :  { %v2238_v2 = vadd.f32 %v2237_v1, %v2236_v60  ;;  %v3322_v5 = vadd.f32 %v2299_v0, %v1106_v61 }
  0xfa   :  { %v2239_v6 = vpop.f32.mrf.mxu0  ;;  %v2301_v8 = vpop.f32.mrf.mxu1 }
  0xfb   :  { %v1109_v7 = vadd.f32 %v2238_v2, %v3279_v20  ;;  %v2302_v10 = vadd.f32 %v2301_v8, %v2300_v3 }
  0xfc   :  { %v2240_v11 = vpop.f32.mrf.mxu0  ;;  %v2303_v13 = vpop.f32.mrf.mxu1 }
  0xfd   :  { %v2241_v12 = vadd.f32 %v2240_v11, %v2239_v6  ;;  %v3335_v15 = vadd.f32 %v2302_v10, %v1109_v7 }
  0xfe   :  { %v2242_v17 = vpop.f32.mrf.mxu0  ;;  %v2304_v19 = vpop.f32.mrf.mxu1 }
  0xff   :  { %v1114_v18 = vadd.f32 %v2241_v12, %v3279_v20  ;;  %v2305_v22 = vadd.f32 %v2304_v19, %v2303_v13 }
 0x100   :  { %v2243_v23 = vpop.f32.mrf.mxu0  ;;  %v2306_v25 = vpop.f32.mrf.mxu1 }
 0x101   :  { %v2244_v24 = vadd.f32 %v2243_v23, %v2242_v17  ;;  %v3348_v27 = vadd.f32 %v2305_v22, %v1114_v18 }
 0x102   :  { %v2245_v28 = vpop.f32.mrf.mxu0  ;;  %v2307_v30 = vpop.f32.mrf.mxu1 }
 0x103   :  { %v1117_v29 = vadd.f32 %v2244_v24, %v3279_v20  ;;  %v2308_v32 = vadd.f32 %v2307_v30, %v2306_v25 }
 0x104   :  { %v2246_v34 = vpop.f32.mrf.mxu0  ;;  %v2309_v36 = vpop.f32.mrf.mxu1 }
 0x105   :  { %v2247_v35 = vadd.f32 %v2246_v34, %v2245_v28  ;;  %v3361_v38 = vadd.f32 %v2308_v32, %v1117_v29 }
 0x106   :  { %v2248_v39 = vpop.f32.mrf.mxu0  ;;  %v2310_v42 = vpop.f32.mrf.mxu1 }
 0x107   :  { %v1122_v40 = vadd.f32 %v2247_v35, %v3279_v20  ;;  %v2311_v44 = vadd.f32 %v2310_v42, %v2309_v36 }
 0x108   :  { %v2249_v45 = vpop.f32.mrf.mxu0  ;;  %v2312_v47 = vpop.f32.mrf.mxu1 }
 0x109   :  { %v2250_v46 = vadd.f32 %v2249_v45, %v2248_v39  ;;  %v3374_v49 = vadd.f32 %v2311_v44, %v1122_v40 }
 0x10a   :  { %v2251_v51 = vpop.f32.mrf.mxu0  ;;  %v2313_v53 = vpop.f32.mrf.mxu1 }
 0x10b   :  { %v1125_v52 = vadd.f32 %v2250_v46, %v3279_v20  ;;  %v2314_v54 = vadd.f32 %v2313_v53, %v2312_v47 }
 0x10c   :  { %v2252_v55 = vpop.f32.mrf.mxu0  ;;  %v2315_v57 = vpop.f32.mrf.mxu1 }
 0x10d   :  { %v2253_v56 = vadd.f32 %v2252_v55, %v2251_v51  ;;  %v3379_v58 = vadd.f32 %v2314_v54, %v1125_v52 }
 0x10e   :  { %v2254_v60 = vpop.f32.mrf.mxu0  ;;  %v2316_v62 = vpop.f32.mrf.mxu1 }
 0x10f   :  { %3694 = vst [vmem:[#allocation2_spill] sm:$0xff] %v3379_v58  ;;  %v1130_v61 = vadd.f32 %v2253_v56, %v3279_v20  ;;  %v2317_v63 = vadd.f32 %v2316_v62, %v2315_v57 }
 0x110   :  { %v2255_v0 = vpop.f32.mrf.mxu0  ;;  %v2318_v2 = vpop.f32.mrf.mxu1 }
 0x111   :  { %v2256_v1 = vadd.f32 %v2255_v0, %v2254_v60  ;;  %v3382_v3 = vadd.f32 %v2317_v63, %v1130_v61 }
 0x112   :  { %v2257_v4 = vpop.f32.mrf.mxu0  ;;  %v2319_v16 = vpop.f32.mrf.mxu1 }
 0x113   :  { %3695 = vst [vmem:[#allocation3_spill] sm:$0xff] %v3382_v3  ;;  %v1133_v6 = vadd.f32 %v2256_v1, %v3279_v20  ;;  %v2320_v7 = vadd.f32 %v2319_v16, %v2318_v2 }
 0x114   :  { %v2258_v8 = vpop.f32.mrf.mxu0  ;;  %v2321_v10 = vpop.f32.mrf.mxu1 }
 0x115   :  { %v2259_v9 = vadd.f32 %v2258_v8, %v2257_v4  ;;  %v3385_v11 = vadd.f32 %v2320_v7, %v1133_v6 }
 0x116   :  { %v2260_v12 = vpop.f32.mrf.mxu0  ;;  %v2322_v14 = vpop.f32.mrf.mxu1 }
 0x117   :  { %3696 = vst [vmem:[#allocation4_spill] sm:$0xff] %v3385_v11  ;;  %v1138_v13 = vadd.f32 %v2259_v9, %v3279_v20  ;;  %v2323_v17 = vadd.f32 %v2322_v14, %v2321_v10 }
 0x118   :  { %v2261_v18 = vpop.f32.mrf.mxu0  ;;  %v2324_v21 = vpop.f32.mrf.mxu1 }
 0x119   :  { %v2262_v19 = vadd.f32 %v2261_v18, %v2260_v12  ;;  %v3388_v22 = vadd.f32 %v2323_v17, %v1138_v13 }
 0x11a   :  { %v2263_v23 = vpop.f32.mrf.mxu0  ;;  %v2325_v25 = vpop.f32.mrf.mxu1 }
 0x11b   :  { %3697 = vst [vmem:[#allocation5_spill] sm:$0xff] %v3388_v22  ;;  %v1141_v24 = vadd.f32 %v2262_v19, %v3279_v20  ;;  %v2326_v26 = vadd.f32 %v2325_v25, %v2324_v21 }
 0x11c   :  { %v2264_v28 = vpop.f32.mrf.mxu0  ;;  %v2327_v30 = vpop.f32.mrf.mxu1 }
 0x11d   :  { %v2265_v29 = vadd.f32 %v2264_v28, %v2263_v23  ;;  %v3391_v31 = vadd.f32 %v2326_v26, %v1141_v24 }
 0x11e   :  { %v2266_v32 = vpop.f32.mrf.mxu0  ;;  %v2328_v35 = vpop.f32.mrf.mxu1 }
 0x11f   :  { %3698 = vst [vmem:[#allocation6_spill] sm:$0xff] %v3391_v31  ;;  %v1146_v34 = vadd.f32 %v2265_v29, %v3279_v20  ;;  %v2329_v36 = vadd.f32 %v2328_v35, %v2327_v30 }
 0x120   :  { %v2267_v37 = vpop.f32.mrf.mxu0  ;;  %v3396_v40 = vpop.f32.mrf.mxu1 }
 0x121   :  { %v3394_v39 = vadd.f32 %v2267_v37, %v2266_v32  ;;  %v3398_v42 = vadd.f32 %v2329_v36, %v1146_v34 }
 0x122   :  { %v2349_v43 = vpop.f32.mrf.mxu0  ;;  %v3400_v44 = vpop.f32.mrf.mxu1 }
 0x123   :  { %3699 = vst [vmem:[#allocation7_spill] sm:$0xff] %v3398_v42 }
 0x124   :  { %v2350_v45 = vpop.f32.mrf.mxu0  ;;  %v2413_v47 = vpop.f32.mrf.mxu1 }
 0x125   :  { %v2351_v46 = vadd.f32 %v2350_v45, %v2349_v43 }
 0x126   :  { %v2352_v48 = vpop.f32.mrf.mxu0  ;;  %v2414_v52 = vpop.f32.mrf.mxu1 }
 0x127   :  { %v3403_v51 = vadd.f32 %v2351_v46, %v3290_v33 }
 0x128   :  { %v2353_v53 = vpop.f32.mrf.mxu0  ;;  %v2416_v54 = vpop.f32.mrf.mxu1 }
 0x129   :  { %v2354_v58 = vadd.f32 %v2353_v53, %v2352_v48 }
 0x12a   :  { %v2355_v55 = vpop.f32.mrf.mxu0  ;;  %v2417_v56 = vpop.f32.mrf.mxu1 }
 0x12c   :  { %v2356_v57 = vpop.f32.mrf.mxu0  ;;  %v2419_v60 = vpop.f32.mrf.mxu1 }
 0x12e   :  { %v2358_v61 = vpop.f32.mrf.mxu0  ;;  %v2420_v62 = vpop.f32.mrf.mxu1 }
 0x130   :  { %v2359_v63 = vpop.f32.mrf.mxu0  ;;  %v2422_v0 = vpop.f32.mrf.mxu1 }
 0x132   :  { %v2361_v1 = vpop.f32.mrf.mxu0  ;;  %v2423_v2 = vpop.f32.mrf.mxu1 }
 0x133   :  { %v2424_v48 = vadd.f32 %v2423_v2, %v2422_v0 }
 0x134   :  { %v2362_v4 = vpop.f32.mrf.mxu0  ;;  %v2425_v6 = vpop.f32.mrf.mxu1 }
 0x136   :  { %v2364_v16 = vpop.f32.mrf.mxu0  ;;  %v2426_v7 = vpop.f32.mrf.mxu1 }
 0x138   :  { %v2365_v8 = vpop.f32.mrf.mxu0  ;;  %v2428_v33 = vpop.f32.mrf.mxu1 }
 0x139   :  { %v2366_v53 = vadd.f32 %v2365_v8, %v2364_v16  ;;  %v1149_v8 = vadd.f32 %v3394_v39, %v3279_v20 }
 0x13a   :  { %v2367_v9 = vpop.f32.mrf.mxu0  ;;  %v2429_v10 = vpop.f32.mrf.mxu1 }
 0x13c   :  { %v2368_v12 = vpop.f32.mrf.mxu0  ;;  %v3405_v13 = vpop.f32.mrf.mxu1 }
 0x13e   :  { %v2370_v14 = vpop.f32.mrf.mxu0  ;;  %v2432_v17 = vpop.f32.mrf.mxu1 }
 0x140   :  { %v2371_v18 = vpop.f32.mrf.mxu0  ;;  %v2434_v19 = vpop.f32.mrf.mxu1 }
 0x142   :  { %v2373_v21 = vpop.f32.mrf.mxu0  ;;  %v2435_v23 = vpop.f32.mrf.mxu1 }
 0x144   :  { %v2374_v24 = vpop.f32.mrf.mxu0  ;;  %v3407_v25 = vpop.f32.mrf.mxu1 }
 0x145   :  { %3700 = vst [vmem:[#allocation8_spill] sm:$0xff] %v3407_v25 }
 0x146   :  { %v3409_v26 = vpop.f32.mrf.mxu0  ;;  %v3411_v28 = vpop.f32.mrf.mxu1 }
 0x147   :  { %3701 = vst [vmem:[#allocation9_spill] sm:$0xff] %v3411_v28  ;;  %v2418_v28 = vadd.f32 %v2417_v56, %v2416_v54  ;;  %v1303_v56 = vadd.f32 %v2366_v53, %v3335_v15 }
 0x148   :  { %v3413_v29 = vpop.f32.mrf.mxu0  ;;  %v3415_v30 = vpop.f32.mrf.mxu1 }
 0x149   :  { %3702 = vst [vmem:[#allocation10_spill] sm:$0xff] %v3415_v30 }
 0x14a   :  { %v3417_v32 = vpop.f32.mrf.mxu0  ;;  %v3419_v34 = vpop.f32.mrf.mxu1 }
 0x14b   :  { %3703 = vst [vmem:[#allocation11_spill] sm:$0xff] %v3419_v34 }
 0x14c   :  { %v3421_v35 = vpop.f32.mrf.mxu0  ;;  %v3425_v37 = vpop.f32.mrf.mxu1 }
 0x14d   :  { %3705 = vst [vmem:[#allocation13_spill] sm:$0xff] %v3425_v37 }
 0x14e   :  { %v3423_v36 = vpop.f32.mrf.mxu0  ;;  %v3431_v46 = vpop.f32.mrf.mxu1 }
 0x14f   :  { %3704 = vst [vmem:[#allocation12_spill] sm:$0xff] %v3423_v36  ;;  %3708 = vst [vmem:[#allocation16_spill] sm:$0xff] %v3431_v46  ;;  %v2360_v46 = vadd.f32 %v2359_v63, %v2358_v61  ;;  %v2363_v36 = vadd.f32 %v2362_v4, %v2361_v1  ;;  %v2427_v61 = vadd.f32 %v2426_v7, %v2425_v6 }
 0x150   :  { %v3427_v43 = vpop.f32.mrf.mxu0  ;;  %v3437_v22 = vpop.f32.mrf.mxu1  ;;  %v2369_v63 = vadd.f32 %v2368_v12, %v2367_v9  ;;  %v2375_v6 = vadd.f32 %v2374_v24, %v2373_v21 }
 0x151   :  { %3706 = vst [vmem:[#allocation14_spill] sm:$0xff] %v3427_v43  ;;  %3711 = vst [vmem:[#allocation19_spill] sm:$0xff] %v3437_v22 }
 0x152   :  { %v3429_v45 = vpop.f32.mrf.mxu0  ;;  %v3443_v34 = vpop.f32.mrf.mxu1  ;;  %v1308_v0 = vadd.f32 %v2369_v63, %v3348_v27 }
 0x153   :  { %3707 = vst [vmem:[#allocation15_spill] sm:$0xff] %v3429_v45  ;;  %3714 = vst [vmem:[#allocation22_spill] sm:$0xff] %v3443_v34  ;;  %v2357_v45 = vadd.f32 %v2356_v57, %v2355_v55  ;;  %v2421_v34 = vadd.f32 %v2420_v62, %v2419_v60  ;;  %v1300_v57 = vadd.f32 %v2363_v36, %v3322_v5 }
 0x154   :  { %v3433_v42 = vpop.f32.mrf.mxu0  ;;  %v3449_v43 = vpop.f32.mrf.mxu1 }
 0x155   :  { %3709 = vst [vmem:[#allocation17_spill] sm:$0xff] %v3433_v42 }
 0x156   :  { %v3435_v31 = vpop.f32.mrf.mxu0  ;;  %v3455_v25 = vpop.f32.mrf.mxu1 }
 0x157   :  { %3710 = vst [vmem:[#allocation18_spill] sm:$0xff] %v3435_v31  ;;  %v2415_v31 = vadd.f32 %v2414_v52, %v2413_v47  ;;  %v2372_v52 = vadd.f32 %v2371_v18, %v2370_v14  ;;  %v2381_v18 = vadd.f32 %v3421_v35, %v3417_v32 }
 0x158   :  { %v3439_v11 = vpop.f32.mrf.mxu0 }
 0x159   :  { %3712 = vst [vmem:[#allocation20_spill] sm:$0xff] %v3439_v11  ;;  %v1287_v11 = vadd.f32 %v2354_v58, %v3295_v41  ;;  %v1381_v47 = vadd.f32 %v2415_v31, %v3403_v51  ;;  %v3460_v41 = vpop.f32.mrf.mxu1  ;;  %v1397_v31 = vadd.f32 %v2427_v61, %v1300_v57  ;;  %v2433_v51 = vadd.f32 %v2432_v17, %v3405_v13  ;;  %v3722_v61 = vld [vmem:[#allocation2_spill] sm:$0xff] }
 0x15a   :  { %v3441_v3 = vpop.f32.mrf.mxu0  ;;  %v1311_v4 = vadd.f32 %v2372_v52, %v3361_v38  ;;  %v2332_v38 = vadd.f32 %v3400_v44, %v3396_v40  ;;  %v2378_v17 = vadd.f32 %v3413_v29, %v3409_v26  ;;  %v1316_v40 = vadd.f32 %v2375_v6, %v3374_v49  ;;  %v3719_v26 = vld [vmem:[#allocation14_spill] sm:$0xff]  ;;  %v3724_v52 = vld [vmem:[#allocation11_spill] sm:$0xff]  ;;  %v3728_v6 = vld [vmem:[#allocation4_spill] sm:$0xff] }
 0x15b   :  { %3713 = vst [vmem:[#allocation21_spill] sm:$0xff] %v3441_v3  ;;  %v1292_v3 = vadd.f32 %v2357_v45, %v3303_v50  ;;  %v1384_v54 = vadd.f32 %v2418_v28, %v1287_v11  ;;  %v3472_v11 = vpop.f32.mrf.mxu1  ;;  %v1405_v20 = vadd.f32 %v2433_v51, %v1308_v0  ;;  %v3716_v28 = vld [vmem:[#allocation8_spill] sm:$0xff]  ;;  %v3720_v45 = vld [vmem:[#allocation15_spill] sm:$0xff] }
 0x15c   :  { %v3445_v30 = vpop.f32.mrf.mxu0  ;;  %v3721_v32 = vld [vmem:[#allocation17_spill] sm:$0xff]  ;;  %v1319_v63 = vadd.f32 %v2378_v17, %v3722_v61  ;;  %v3735_v61 = vld [vmem:[#allocation6_spill] sm:$0xff] }
 0x15d   :  { %v1389_v58 = vadd.f32 %v2421_v34, %v1292_v3  ;;  %v2436_v3 = vadd.f32 %v2435_v23, %v2434_v19  ;;  %v2455_v44 = vpop.f32.mrf.mxu1  ;;  %v3717_v34 = vld [vmem:[#allocation9_spill] sm:$0xff]  ;;  %v2387_v35 = vadd.f32 %v3721_v32, %v3720_v45 }
 0x15e   :  { %v3447_v37 = vpop.f32.mrf.mxu0  ;;  %v2439_v36 = vadd.f32 %v3717_v34, %v3716_v28 }
 0x15f   :  { %3715 = vst [vmem:[#allocation23_spill] sm:$0xff] %v3447_v37  ;;  %v1295_v37 = vadd.f32 %v2360_v46, %v3311_v59  ;;  %v2430_v59 = vadd.f32 %v2429_v10, %v2428_v33  ;;  %v1408_v39 = vadd.f32 %v2436_v3, %v1311_v4  ;;  %v2456_v0 = vpop.f32.mrf.mxu1 }
 0x160   :  { %v3451_v42 = vpop.f32.mrf.mxu0 }
 0x161   :  { %v1392_v60 = vadd.f32 %v2424_v48, %v1295_v37  ;;  %v1400_v9 = vadd.f32 %v2430_v59, %v1303_v56  ;;  %v3718_v37 = vld [vmem:[#allocation12_spill] sm:$0xff]  ;;  %v3726_v56 = vld [vmem:[#allocation13_spill] sm:$0xff]  ;;  %v2458_v34 = vpop.f32.mrf.mxu1 }
 0x162   :  { %v2529_v22 = vpop.f32.mrf.mxu0  ;;  %v2384_v29 = vadd.f32 %v3719_v26, %v3718_v37  ;;  %v3727_v59 = vld [vmem:[#allocation16_spill] sm:$0xff]  ;;  %v1246_v37 = vadd.f32 %v2332_v38, %v1149_v8  ;;  %v3734_v26 = vld [vmem:[#allocation21_spill] sm:$0xff] }
 0x163   :  { %v3466_v5 = vadd.f32 %v2529_v22, %v1389_v58  ;;  %v3725_v58 = vld [vmem:[#allocation3_spill] sm:$0xff] }
 0x164   :  { %v1477_v55 = vpop.f32.mrf.mxu0 }
 0x165   :  { %v3462_v50 = vadd.f32 %v1477_v55, %v1381_v47  ;;  %v1573_v10 = vmul.f32 %v3466_v5, %v3466_v5  ;;  %v3723_v47 = vld [vmem:[#allocation10_spill] sm:$0xff] }
 0x166   :  { %v2530_v1 = vpop.f32.mrf.mxu0 }
 0x167   :  { %v1571_v15 = vmul.f32 %v3462_v50, %v3462_v50  ;;  %v3476_v7 = vadd.f32 %v2530_v1, %v1392_v60  ;;  %v2442_v1 = vadd.f32 %v3724_v52, %v3723_v47  ;;  %v2445_v60 = vadd.f32 %v3727_v59, %v3726_v56  ;;  %v3736_v52 = vld [vmem:[#allocation23_spill] sm:$0xff] }
 0x168   :  { %v1480_v62 = vpop.f32.mrf.mxu0 }
 0x169   :  { %v3468_v2 = vadd.f32 %v1480_v62, %v1384_v54  ;;  %v1574_v21 = vmul.f32 %v3476_v7, %v3476_v7  ;;  %v1324_v54 = vadd.f32 %v2381_v18, %v3725_v58  ;;  %v2396_v58 = vadd.f32 %v3451_v42, %v3736_v52 }
 0x16a   :  { %v2533_v16 = vpop.f32.mrf.mxu0 }
 0x16b   :  { %v1558_v27 = vadd.f32 %v3468_v2, %v3462_v50  ;;  %v1572_v22 = vmul.f32 %v3468_v2, %v3468_v2  ;;  %v3505_v46 = vadd.f32 %v2533_v16, %v1405_v20  ;;  %v1327_v16 = vadd.f32 %v2384_v29, %v3728_v6 }
 0x16c   :  { %v1493_v33 = vpop.f32.mrf.mxu0  ;;  %v2393_v29 = vadd.f32 %v3445_v30, %v3734_v26 }
 0x16d   :  { %v1559_v12 = vadd.f32 %v1558_v27, %v3466_v5  ;;  %v1579_v13 = vadd.f32 %v1572_v22, %v1571_v15  ;;  %v3489_v14 = vadd.f32 %v1493_v33, %v1397_v31  ;;  %v3729_v15 = vld [vmem:[#allocation19_spill] sm:$0xff]  ;;  %v3730_v27 = vld [vmem:[#allocation22_spill] sm:$0xff]  ;;  %v3731_v33 = vld [vmem:[#allocation5_spill] sm:$0xff]  ;;  %v1577_v17 = vmul.f32 %v3505_v46, %v3505_v46 }
 0x16e   :  { %v2534_v19 = vpop.f32.mrf.mxu0  ;;  %v2448_v22 = vadd.f32 %v3730_v27, %v3729_v15 }
 0x16f   :  { %v1580_v23 = vadd.f32 %v1579_v13, %v1573_v10  ;;  %v1560_v24 = vadd.f32 %v1559_v12, %v3476_v7  ;;  %v1575_v53 = vmul.f32 %v3489_v14, %v3489_v14  ;;  %v3518_v51 = vadd.f32 %v2534_v19, %v1408_v39  ;;  %v3732_v39 = vld [vmem:[#allocation18_spill] sm:$0xff]  ;;  %v3733_v19 = vld [vmem:[#allocation20_spill] sm:$0xff] }
 0x170   :  { %v1496_v48 = vpop.f32.mrf.mxu0  ;;  %v1413_v10 = vadd.f32 %v2439_v36, %v1316_v40  ;;  %v2451_v13 = vadd.f32 %v3455_v25, %v3449_v43  ;;  %v1416_v43 = vadd.f32 %v2442_v1, %v1319_v63  ;;  %v1424_v32 = vadd.f32 %v2448_v22, %v1327_v16  ;;  %v2459_v63 = vpop.f32.mrf.mxu1 }
 0x171   :  { %v1561_v49 = vadd.f32 %v1560_v24, %v3489_v14  ;;  %v1581_v55 = vadd.f32 %v1580_v23, %v1574_v21  ;;  %v3510_v57 = vadd.f32 %v1496_v48, %v1400_v9  ;;  %v1332_v9 = vadd.f32 %v2387_v35, %v3731_v33 }
 0x172   :  { %v2537_v62 = vpop.f32.mrf.mxu0  ;;  %v2390_v21 = vadd.f32 %v3733_v19, %v3732_v39  ;;  %v1421_v23 = vadd.f32 %v2445_v60, %v1324_v54  ;;  %v1578_v40 = vmul.f32 %v3518_v51, %v3518_v51  ;;  %v2454_v60 = vadd.f32 %v3472_v11, %v3460_v41 }
 0x173   :  { %v1582_v31 = vadd.f32 %v1581_v55, %v1575_v53  ;;  %v1562_v4 = vadd.f32 %v1561_v49, %v3510_v57  ;;  %v1576_v3 = vmul.f32 %v3510_v57, %v3510_v57  ;;  %v1429_v55 = vadd.f32 %v2451_v13, %v1332_v9 }
 0x174   :  { %v1509_v12 = vpop.f32.mrf.mxu0  ;;  %v3541_v45 = vadd.f32 %v2537_v62, %v1421_v23  ;;  %v1335_v47 = vadd.f32 %v2390_v21, %v3735_v61  ;;  %v3737_v62 = vld [vmem:[#allocation7_spill] sm:$0xff]  ;;  %v1343_v22 = vadd.f32 %v2396_v58, %v1246_v37  ;;  %v2460_v33 = vadd.f32 %v2459_v63, %v2458_v34 }
 0x175   :  { %v1563_v18 = vadd.f32 %v1562_v4, %v3505_v46  ;;  %v1583_v20 = vadd.f32 %v1582_v31, %v1576_v3  ;;  %v3534_v24 = vadd.f32 %v1509_v12, %v1413_v10  ;;  %v1340_v42 = vadd.f32 %v2393_v29, %v3737_v62 }
 0x176   :  { %v2538_v28 = vpop.f32.mrf.mxu0  ;;  %v2457_v31 = vadd.f32 %v2456_v0, %v2455_v44  ;;  %v1788_v4 = vmul.f32 %v3541_v45, %v3541_v45  ;;  %v1440_v34 = vadd.f32 %v2460_v33, %v1343_v22 }
 0x177   :  { %v1564_v36 = vadd.f32 %v1563_v18, %v3518_v51  ;;  %v1584_v25 = vadd.f32 %v1583_v20, %v1577_v17  ;;  %v1786_v8 = vmul.f32 %v3534_v24, %v3534_v24  ;;  %v3550_v38 = vadd.f32 %v2538_v28, %v1424_v32 }
 0x178   :  { %v1512_v35 = vpop.f32.mrf.mxu0  ;;  %v1437_v13 = vadd.f32 %v2457_v31, %v1340_v42  ;;  %v1432_v18 = vadd.f32 %v2454_v60, %v1335_v47 }
 0x179   :  { %v1565_v48 = vrot.slane %v1564_v36, 4  ;;  %v1585_v49 = vadd.f32 %v1584_v25, %v1578_v40  ;;  %v3543_v53 = vadd.f32 %v1512_v35, %v1416_v43  ;;  %v1789_v9 = vmul.f32 %v3550_v38, %v3550_v38 }
 0x17a   :  { %v2541_v30 = vpop.f32.mrf.mxu0 }
 0x17b   :  { %v1566_v1 = vadd.f32 %v1565_v48, %v1564_v36  ;;  %v1586_v54 = vrot.slane %v1585_v49, 4  ;;  %v1773_v56 = vadd.f32 %v3543_v53, %v3534_v24  ;;  %v1787_v59 = vmul.f32 %v3543_v53, %v3543_v53 }
 0x17c   :  { %v1525_v3 = vpop.f32.mrf.mxu0  ;;  %v3570_v28 = vadd.f32 %v2541_v30, %v1437_v13 }
 0x17d   :  { %v1567_v6 = vrot.slane %v1566_v1, 2  ;;  %v1587_v16 = vadd.f32 %v1586_v54, %v1585_v49  ;;  %v1774_v15 = vadd.f32 %v1773_v56, %v3541_v45  ;;  %v1794_v27 = vadd.f32 %v1787_v59, %v1786_v8 }
 0x17e   :  { %v3564_v10 = vadd.f32 %v1525_v3, %v1429_v55  ;;  %v2542_v41 = vpop.f32.mrf.mxu0  ;;  %v1792_v35 = vmul.f32 %v3570_v28, %v3570_v28 }
 0x17f   :  { %v1568_v11 = vadd.f32 %v1567_v6, %v1566_v1  ;;  %v1588_v12 = vrot.slane %v1587_v16, 2  ;;  %v1795_v44 = vadd.f32 %v1794_v27, %v1788_v4  ;;  %v1775_v0 = vadd.f32 %v1774_v15, %v3550_v38 }
 0x180   :  { %v1790_v17 = vmul.f32 %v3564_v10, %v3564_v10  ;;  %v1528_v20 = vpop.f32.mrf.mxu0  ;;  %v3574_v43 = vadd.f32 %v2542_v41, %v1440_v34 }
 0x181   :  { %v1569_v39 = vrot.slane %v1568_v11, 1  ;;  %v1589_v19 = vadd.f32 %v1588_v12, %v1587_v16  ;;  %v1776_v21 = vadd.f32 %v1775_v0, %v3564_v10  ;;  %v1796_v23 = vadd.f32 %v1795_v44, %v1789_v9 }
 0x182   :  { %v3572_v40 = vadd.f32 %v1528_v20, %v1432_v18  ;;  %v1793_v61 = vmul.f32 %v3574_v43, %v3574_v43 }
 0x183   :  { %v1590_v36 = vrot.slane %v1589_v19, 1  ;;  %v1797_v25 = vadd.f32 %v1796_v23, %v1790_v17  ;;  %v1570_v29 = vadd.f32 %v1569_v39, %v1568_v11  ;;  %v1671_v11 = vlaneseq }
 0x184   :  { %v1777_v37 = vadd.f32 %v1776_v21, %v3572_v40  ;;  %v1791_v26 = vmul.f32 %v3572_v40, %v3572_v40 }
 0x185   :  { %v1591_v32 = vadd.f32 %v1590_v36, %v1589_v19  ;;  %v3587_v44 = vshrl.u32 %v1671_v11, 7 }
 0x186   :  { %v1778_v48 = vadd.f32 %v1777_v37, %v3570_v28  ;;  %v1798_v49 = vadd.f32 %v1797_v25, %v1791_v26 }
 0x187   :  { %v1593_v55 = vsel %vm1592_vm1, %v1570_v29, %v1591_v32  ;;  %v1673_v0 = vsub.s32 0, %v3587_v44  ;;  %v1687_v19 = vsub.s32 1, %v3587_v44 }
 0x188   :  { %v1779_v47 = vadd.f32 %v1778_v48, %v3574_v43  ;;  %v1799_v52 = vadd.f32 %v1798_v49, %v1792_v35  ;;  %v1594_v58 = vmul.f32 0.015625, %v1593_v55  ;;  %v3608_v35 = vld [vmem:[%s3691_s3] ss:$0 sm:$0xff] }
 0x18a   :  { %v1780_v8 = vrot.slane %v1779_v47, 4  ;;  %v1800_v30 = vadd.f32 %v1799_v52, %v1793_v61  ;;  %2576 = vmatmul.mubr.f32.vlgmr.msra.gmra.mxu1 %v1594_v58 }
 0x18c   :  { %v1781_v63 = vadd.f32 %v1780_v8, %v1779_v47  ;;  %v1801_v1 = vrot.slane %v1800_v30, 4 }
 0x18e   :  { %v1782_v54 = vrot.slane %v1781_v63, 2  ;;  %v1802_v56 = vadd.f32 %v1801_v1, %v1800_v30 }
 0x190   :  { %v1783_v59 = vadd.f32 %v1782_v54, %v1781_v63  ;;  %v1803_v60 = vrot.slane %v1802_v56, 2 }
 0x192   :  { %v1784_v62 = vrot.slane %v1783_v59, 1  ;;  %v1804_v42 = vadd.f32 %v1803_v60, %v1802_v56 }
 0x194   :  { %v1805_v31 = vrot.slane %v1804_v42, 1  ;;  %v1785_v4 = vadd.f32 %v1784_v62, %v1783_v59 }
 0x196   :  { %v1806_v3 = vadd.f32 %v1805_v31, %v1804_v42 }
 0x198   :  { %v1807_v6 = vsel %vm1592_vm1, %v1785_v4, %v1806_v3 }
 0x199   :  { %v1808_v16 = vmul.f32 0.015625, %v1807_v6 }
 0x19b   :  { %2611 = vmatmul.mubr.f32.vlgmr.msra.gmra.mxu0 %v1808_v16 }
 0x24a   :  { %v1661_v15 = vpop.f32.mrf.mxu1 }
 0x24b   :  { %v1665_v27 = vmul.f32 %v1661_v15, %v1661_v15  ;;  %v1674_v20 = vrot.slane %v1661_v15, %v1673_v0 }
 0x24c   :  { %v2577_v22 = vpop.f32.mrf.mxu1 }
 0x24d   :  { %v1667_v33 = vrot.slane %v1665_v27, 7  ;;  %v1675_v34 = vsub.f32 %v3462_v50, %v1674_v20  ;;  %v1676_v36 = vsub.f32 %v3468_v2, %v1674_v20  ;;  %v1677_v37 = vsub.f32 %v3466_v5, %v1674_v20 }
 0x24e   :  { %v1678_v26 = vsub.f32 %v3476_v7, %v1674_v20  ;;  %v1679_v29 = vsub.f32 %v3489_v14, %v1674_v20  ;;  %v1680_v48 = vsub.f32 %v3510_v57, %v1674_v20  ;;  %v1681_v50 = vsub.f32 %v3505_v46, %v1674_v20  ;;  %v3616_v14 = vld [vmem:[%s3692_s4] ss:$0 sm:$0xff] }
 0x24f   :  { %v1669_v9 = vsub.f32 %v1661_v15, %v1667_v33  ;;  %v1682_v2 = vsub.f32 %v3518_v51, %v1674_v20 }
 0x251   :  { %v1670_v41 = vmax.f32 %v1669_v9, 0.0 }
 0x253   :  { %v1683_v12 = vadd.f32 1e-05, %v1670_v41 }
 0x255   :  { %2791 = vrsqrt.f32 %v1683_v12 }
 0x25b   :  { %v3590_v13 = vpop.f32.mrf.mxu0 }
 0x25c   :  { %v1879_v17 = vmul.f32 %v3590_v13, %v3590_v13 }
 0x25d   :  { %v2612_v18 = vpop.f32.mrf.mxu0 }
 0x25e   :  { %v1881_v39 = vrot.slane %v1879_v17, 7 }
 0x260   :  { %v1883_v21 = vsub.f32 %v3590_v13, %v1881_v39  ;;  %v1888_v39 = vrot.slane %v3590_v13, %v1673_v0 }
 0x262   :  { %v2792_v23 = vpop.eup %2791  ;;  %v1884_v25 = vmax.f32 %v1883_v21, 0.0  ;;  %v1896_v0 = vsub.f32 %v3574_v43, %v1888_v39 }
 0x263   :  { %v1688_v32 = vrot.slane %v2792_v23, %v1687_v19  ;;  %v1889_v23 = vsub.f32 %v3534_v24, %v1888_v39 }
 0x264   :  { %v1897_v49 = vadd.f32 1e-05, %v1884_v25  ;;  %v1892_v25 = vsub.f32 %v3550_v38, %v1888_v39 }
 0x265   :  { %v1689_v5 = vmul.f32 %v1688_v32, %v1675_v34  ;;  %v1690_v55 = vmul.f32 %v1688_v32, %v1676_v36  ;;  %v1691_v7 = vmul.f32 %v1688_v32, %v1677_v37  ;;  %v1692_v61 = vmul.f32 %v1688_v32, %v1678_v26 }
 0x266   :  { %v1693_v47 = vmul.f32 %v1688_v32, %v1679_v29  ;;  %v1694_v52 = vmul.f32 %v1688_v32, %v1680_v48  ;;  %v1695_v58 = vmul.f32 %v1688_v32, %v1681_v50  ;;  %v1696_v8 = vmul.f32 %v1688_v32, %v1682_v2 }
 0x267   :  { %v1703_v57 = vmul.f32 %v3608_v35, %v1689_v5  ;;  %v1704_v46 = vmul.f32 %v3608_v35, %v1690_v55  ;;  %v1705_v51 = vmul.f32 %v3608_v35, %v1691_v7  ;;  %v1706_v30 = vmul.f32 %v3608_v35, %v1692_v61 }
 0x268   :  { %v1707_v63 = vmul.f32 %v3608_v35, %v1693_v47  ;;  %v1708_v1 = vmul.f32 %v3608_v35, %v1694_v52  ;;  %v1709_v54 = vmul.f32 %v3608_v35, %v1695_v58  ;;  %v1710_v56 = vmul.f32 %v3608_v35, %v1696_v8 }
 0x269   :  { %v1717_v59 = vadd.f32 %v3616_v14, %v1703_v57  ;;  %v1718_v60 = vadd.f32 %v3616_v14, %v1704_v46  ;;  %v1719_v62 = vadd.f32 %v3616_v14, %v1705_v51  ;;  %v1720_v42 = vadd.f32 %v3616_v14, %v1706_v30 }
 0x26a   :  { %v1721_v31 = vadd.f32 %v3616_v14, %v1707_v63  ;;  %v1722_v4 = vadd.f32 %v3616_v14, %v1708_v1  ;;  %v1723_v3 = vadd.f32 %v3616_v14, %v1709_v54  ;;  %v1724_v6 = vadd.f32 %v3616_v14, %v1710_v56 }
 0x26b   :  { %v1725_v16 = vmax.f32 %v1717_v59, 0.0  ;;  %v1726_v15 = vmax.f32 %v1718_v60, 0.0  ;;  %v1727_v27 = vmax.f32 %v1719_v62, 0.0  ;;  %v1728_v22 = vmax.f32 %v1720_v42, 0.0 }
 0x26c   :  { %v1729_v33 = vmax.f32 %v1721_v31, 0.0  ;;  %v1730_v9 = vmax.f32 %v1722_v4, 0.0  ;;  %v1731_v41 = vmax.f32 %v1723_v3, 0.0  ;;  %v1732_v11 = vmax.f32 %v1724_v6, 0.0 }
 0x26d   :  { %v2161_v12 = vpack.c.bf16 %v1726_v15, %v1725_v16  ;;  %v2166_v17 = vpack.c.bf16 %v1728_v22, %v1727_v27  ;;  %2793 = vrsqrt.f32 %v1897_v49  ;;  %v1890_v34 = vsub.f32 %v3543_v53, %v1888_v39 }
 0x26e   :  { %v2171_v18 = vpack.c.bf16 %v1730_v9, %v1729_v33  ;;  %v2176_v20 = vpack.c.bf16 %v1732_v11, %v1731_v41  ;;  %v1891_v36 = vsub.f32 %v3541_v45, %v1888_v39  ;;  %v1893_v26 = vsub.f32 %v3564_v10, %v1888_v39 }
 0x26f   :  { %2162 = vst [vmem:[%s3693_s6] sm:$0xff] %v2161_v12   ;;  %2198 = vst [vmem:[%s3693_s6 + $0x8] sm:$0xff] %v2166_v17   ;;  %v1894_v29 = vsub.f32 %v3572_v40, %v1888_v39  ;;  %v1895_v32 = vsub.f32 %v3570_v28, %v1888_v39 }
 0x270   :  { %2199 = vst [vmem:[%s3693_s6 + $0x10] sm:$0xff] %v2171_v18   ;;  %2200 = vst [vmem:[%s3693_s6 + $0x18] sm:$0xff] %v2176_v20  }
 0x27a   :  { %v2794_v21 = vpop.eup %2793 }
 0x27b   :  { %v1902_v37 = vrot.slane %v2794_v21, %v1687_v19 }
 0x27d   :  { %v1903_v13 = vmul.f32 %v1902_v37, %v1889_v23  ;;  %v1904_v48 = vmul.f32 %v1902_v37, %v1890_v34  ;;  %v1905_v24 = vmul.f32 %v1902_v37, %v1891_v36  ;;  %v1906_v50 = vmul.f32 %v1902_v37, %v1892_v25 }
 0x27e   :  { %v1907_v53 = vmul.f32 %v1902_v37, %v1893_v26  ;;  %v1908_v2 = vmul.f32 %v1902_v37, %v1894_v29  ;;  %v1909_v45 = vmul.f32 %v1902_v37, %v1895_v32  ;;  %v1910_v49 = vmul.f32 %v1902_v37, %v1896_v0 }
 0x27f   :  { %v1911_v38 = vmul.f32 %v3608_v35, %v1903_v13  ;;  %v1912_v44 = vmul.f32 %v3608_v35, %v1904_v48  ;;  %v1913_v10 = vmul.f32 %v3608_v35, %v1905_v24  ;;  %v1914_v40 = vmul.f32 %v3608_v35, %v1906_v50 }
 0x280   :  { %v1915_v28 = vmul.f32 %v3608_v35, %v1907_v53  ;;  %v1916_v43 = vmul.f32 %v3608_v35, %v1908_v2  ;;  %v1917_v19 = vmul.f32 %v3608_v35, %v1909_v45  ;;  %v1918_v5 = vmul.f32 %v3608_v35, %v1910_v49 }
 0x281   :  { %v1919_v55 = vadd.f32 %v3616_v14, %v1911_v38  ;;  %v1920_v7 = vadd.f32 %v3616_v14, %v1912_v44  ;;  %v1921_v61 = vadd.f32 %v3616_v14, %v1913_v10  ;;  %v1922_v47 = vadd.f32 %v3616_v14, %v1914_v40 }
 0x282   :  { %v1923_v52 = vadd.f32 %v3616_v14, %v1915_v28  ;;  %v1924_v58 = vadd.f32 %v3616_v14, %v1916_v43  ;;  %v1925_v8 = vadd.f32 %v3616_v14, %v1917_v19  ;;  %v1926_v57 = vadd.f32 %v3616_v14, %v1918_v5 }
 0x283   :  { %v1927_v46 = vmax.f32 %v1919_v55, 0.0  ;;  %v1928_v51 = vmax.f32 %v1920_v7, 0.0  ;;  %v1929_v30 = vmax.f32 %v1921_v61, 0.0  ;;  %v1930_v35 = vmax.f32 %v1922_v47, 0.0 }
 0x284   :  { %v1931_v63 = vmax.f32 %v1923_v52, 0.0  ;;  %v1932_v1 = vmax.f32 %v1924_v58, 0.0  ;;  %v1933_v54 = vmax.f32 %v1925_v8, 0.0  ;;  %v1934_v56 = vmax.f32 %v1926_v57, 0.0 }
 0x285   :  { %v2181_v59 = vpack.c.bf16 %v1928_v51, %v1927_v46  ;;  %v2186_v60 = vpack.c.bf16 %v1930_v35, %v1929_v30 }
 0x286   :  { %v2191_v62 = vpack.c.bf16 %v1932_v1, %v1931_v63  ;;  %v2196_v42 = vpack.c.bf16 %v1934_v56, %v1933_v54 }
 0x287   :  { %2201 = vst [vmem:[%s3693_s6 + $0x20] sm:$0xff] %v2181_v59   ;;  %2202 = vst [vmem:[%s3693_s6 + $0x28] sm:$0xff] %v2186_v60  }
 0x288   :  { %2203 = vst [vmem:[%s3693_s6 + $0x30] sm:$0xff] %v2191_v62   ;;  %2204 = vst [vmem:[%s3693_s6 + $0x38] sm:$0xff] %v2196_v42  }

// kernel: cnn_classifier_forward.16
= control target key start
LH: loop header
LB: loop body
LE: loop exit
PB: predicated region body
PF: predicated region fallthrough
CT: control target
= control target key end

     0   :  { %v1041_v16 = vmov 0.0   ;;  %vm1042_vm0 = vmmov 0   ;;  %vm311_vm1 = vcmask 1040384   ;;  %s1440_s1 = inlined_call_operand.vmem [shape: bf16[128,128], index: 1, kind: input, shape index: {}]   ;;  %s1441_s0 = inlined_call_operand.vmem [shape: bf16[128,128], index: 0, kind: input, shape index: {}]   ;;  %s1442_s5 = inlined_call_operand.vmem [shape: f32[128,128], index: 5, kind: input, shape index: {}]   ;;  %s1443_s2 = inlined_call_operand.vmem [shape: f32[1,128], index: 2, kind: input, shape index: {}]   ;;  %s1444_s6 = inlined_call_operand.vmem [shape: bf16[128,128], index: 6, kind: input, shape index: {}]   ;;  %s1445_s3 = inlined_call_operand.vmem [shape: f32[1,128], index: 3, kind: input, shape index: {}]   ;;  %s1446_s4 = inlined_call_operand.vmem [shape: f32[1,128], index: 4, kind: input, shape index: {}]   ;;  %s1447_s7 = inlined_call_operand.vmem [shape: bf16[128,128], index: 7, kind: output, shape index: {}]  }
   0x1   :  { %v1021_v0 = vld [vmem:[%s1440_s1 + $0x38] sm:$0xff]   ;;  %v1022_v1 = vld [vmem:[%s1440_s1 + $0x30] sm:$0xff]   ;;  %v1023_v2 = vld [vmem:[%s1440_s1 + $0x28] sm:$0xff]   ;;  %949 = vmatprep.subr.mxu1 %v1041_v16  ;;  %981 = vmatprep.mubr.msk.f32.mxu1 %vm1042_vm0, %v1041_v16 }
   0x2   :  { %917 = vmatprep.subr.bf16.mxu0 %v1021_v0  ;;  %v1024_v3 = vld [vmem:[%s1440_s1 + $0x20] sm:$0xff]   ;;  %v1025_v5 = vld [vmem:[%s1440_s1 + $0x18] sm:$0xff]   ;;  %v1026_v6 = vld [vmem:[%s1440_s1 + $0x10] sm:$0xff]  }
   0x3   :  { %918 = vmatpush3.bf16.msra.mxu0 %v1021_v0  ;;  %v1029_v4 = vld [vmem:[%s1441_s0] sm:$0xff]   ;;  %v1027_v7 = vld [vmem:[%s1440_s1 + $0x8] sm:$0xff]   ;;  %v1031_v10 = vld [vmem:[%s1441_s0 + $0x10] sm:$0xff]  }
   0x4   :  { %919 = vmatprep.subr.bf16.mxu0 %v1022_v1  ;;  %933 = vmatprep.mubr.bf16.mxu0 %v1029_v4  ;;  %v1028_v8 = vld [vmem:[%s1440_s1] sm:$0xff]   ;;  %v1030_v9 = vld [vmem:[%s1441_s0 + $0x8] sm:$0xff]   ;;  %v1032_v11 = vld [vmem:[%s1441_s0 + $0x18] sm:$0xff]  }
   0x5   :  { %v1033_v12 = vld [vmem:[%s1441_s0 + $0x20] sm:$0xff]   ;;  %v1034_v13 = vld [vmem:[%s1441_s0 + $0x28] sm:$0xff]   ;;  %v1035_v14 = vld [vmem:[%s1441_s0 + $0x30] sm:$0xff]  }
   0x6   :  { %v1036_v15 = vld [vmem:[%s1441_s0 + $0x38] sm:$0xff]   ;;  %v275_v18 = vld [vmem:[%s1442_s5 + $0x70] sm:$0xff]  ;;  %v274_v19 = vld [vmem:[%s1442_s5 + $0x68] sm:$0xff] }
   0x7   :  { %920 = vmatpush3.bf16.msra.mxu0 %v1022_v1  ;;  %v276_v17 = vld [vmem:[%s1442_s5 + $0x78] sm:$0xff]  ;;  %v273_v20 = vld [vmem:[%s1442_s5 + $0x60] sm:$0xff]  ;;  %v271_v22 = vld [vmem:[%s1442_s5 + $0x50] sm:$0xff] }
   0x8   :  { %921 = vmatprep.subr.bf16.mxu0 %v1023_v2  ;;  %950 = vmatpush3.msra.mxu1 %v276_v17  ;;  %v272_v21 = vld [vmem:[%s1442_s5 + $0x58] sm:$0xff]  ;;  %v270_v23 = vld [vmem:[%s1442_s5 + $0x48] sm:$0xff]  ;;  %v269_v24 = vld [vmem:[%s1442_s5 + $0x40] sm:$0xff] }
   0x9   :  { %951 = vmatprep.subr.mxu1 %v1041_v16  ;;  %v268_v25 = vld [vmem:[%s1442_s5 + $0x38] sm:$0xff]  ;;  %v267_v26 = vld [vmem:[%s1442_s5 + $0x30] sm:$0xff]  ;;  %v266_v27 = vld [vmem:[%s1442_s5 + $0x28] sm:$0xff] }
   0xa   :  { %952 = vmatpush3.msra.mxu1 %v275_v18  ;;  %v265_v28 = vld [vmem:[%s1442_s5 + $0x20] sm:$0xff]  ;;  %v264_v29 = vld [vmem:[%s1442_s5 + $0x18] sm:$0xff]  ;;  %v263_v30 = vld [vmem:[%s1442_s5 + $0x10] sm:$0xff] }
   0xb   :  { %922 = vmatpush3.bf16.msra.mxu0 %v1023_v2  ;;  %953 = vmatprep.subr.mxu1 %v1041_v16  ;;  %v262_v31 = vld [vmem:[%s1442_s5 + $0x8] sm:$0xff]  ;;  %v261_v32 = vld [vmem:[%s1442_s5] sm:$0xff] }
   0xc   :  { %923 = vmatprep.subr.bf16.mxu0 %v1024_v3  ;;  %954 = vmatpush3.msra.mxu1 %v274_v19  ;;  %v1216_v35 = vld [vmem:[%s1443_s2] ss:$0 sm:$0xff] }
   0xd   :  { %955 = vmatprep.subr.mxu1 %v1041_v16 }
   0xe   :  { %956 = vmatpush3.msra.mxu1 %v273_v20 }
   0xf   :  { %924 = vmatpush3.bf16.msra.mxu0 %v1024_v3  ;;  %957 = vmatprep.subr.mxu1 %v1041_v16 }
  0x10   :  { %925 = vmatprep.subr.bf16.mxu0 %v1025_v5  ;;  %958 = vmatpush3.msra.mxu1 %v272_v21 }
  0x11   :  { %959 = vmatprep.subr.mxu1 %v1041_v16 }
  0x12   :  { %960 = vmatpush3.msra.mxu1 %v271_v22 }
  0x13   :  { %926 = vmatpush3.bf16.msra.mxu0 %v1025_v5  ;;  %961 = vmatprep.subr.mxu1 %v1041_v16 }
  0x14   :  { %927 = vmatprep.subr.bf16.mxu0 %v1026_v6  ;;  %962 = vmatpush3.msra.mxu1 %v270_v23 }
  0x15   :  { %963 = vmatprep.subr.mxu1 %v1041_v16 }
  0x16   :  { %964 = vmatpush3.msra.mxu1 %v269_v24 }
  0x17   :  { %928 = vmatpush3.bf16.msra.mxu0 %v1026_v6  ;;  %965 = vmatprep.subr.mxu1 %v1041_v16 }
  0x18   :  { %929 = vmatprep.subr.bf16.mxu0 %v1027_v7  ;;  %966 = vmatpush3.msra.mxu1 %v268_v25 }
  0x19   :  { %967 = vmatprep.subr.mxu1 %v1041_v16 }
  0x1a   :  { %968 = vmatpush3.msra.mxu1 %v267_v26 }
  0x1b   :  { %930 = vmatpush3.bf16.msra.mxu0 %v1027_v7  ;;  %969 = vmatprep.subr.mxu1 %v1041_v16 }
  0x1c   :  { %931 = vmatprep.subr.bf16.mxu0 %v1028_v8  ;;  %970 = vmatpush3.msra.mxu1 %v266_v27 }
  0x1d   :  { %971 = vmatprep.subr.mxu1 %v1041_v16 }
  0x1e   :  { %972 = vmatpush3.msra.mxu1 %v265_v28 }
  0x1f   :  { %932 = vmatpush3.bf16.msra.mxu0 %v1028_v8  ;;  %973 = vmatprep.subr.mxu1 %v1041_v16 }
  0x20   :  { %984 = vmatprep.subr.mxu0 %v1041_v16  ;;  %974 = vmatpush3.msra.mxu1 %v264_v29 }
  0x21   :  { %975 = vmatprep.subr.mxu1 %v1041_v16 }
  0x22   :  { %934 = vmatmul.mubr.bf16.vlgmr.msra.gmra.mxu0 %v1030_v9  ;;  %976 = vmatpush3.msra.mxu1 %v263_v30 }
  0x23   :  { %937 = vmatprep.mubr.bf16.mxu0 %v1031_v10  ;;  %985 = vmatpush3.msra.mxu0 %v276_v17 }
  0x24   :  { %986 = vmatprep.subr.mxu0 %v1041_v16  ;;  %977 = vmatprep.subr.mxu1 %v1041_v16 }
  0x25   :  { %987 = vmatpush3.msra.mxu0 %v275_v18  ;;  %978 = vmatpush3.msra.mxu1 %v262_v31 }
  0x26   :  { %988 = vmatprep.subr.mxu0 %v1041_v16  ;;  %979 = vmatprep.subr.mxu1 %v1041_v16 }
  0x27   :  { %989 = vmatpush3.msra.mxu0 %v274_v19  ;;  %980 = vmatpush3.msra.mxu1 %v261_v32 }
  0x28   :  { %990 = vmatprep.subr.mxu0 %v1041_v16 }
  0x29   :  { %991 = vmatpush3.msra.mxu0 %v273_v20 }
  0x2a   :  { %938 = vmatmul.mubr.bf16.gmra.mxu0 %v1032_v11  ;;  %992 = vmatprep.subr.mxu0 %v1041_v16 }
  0x2b   :  { %941 = vmatprep.mubr.bf16.mxu0 %v1033_v12  ;;  %993 = vmatpush3.msra.mxu0 %v272_v21 }
  0x2c   :  { %994 = vmatprep.subr.mxu0 %v1041_v16 }
  0x2d   :  { %995 = vmatpush3.msra.mxu0 %v271_v22 }
  0x2e   :  { %996 = vmatprep.subr.mxu0 %v1041_v16 }
  0x2f   :  { %997 = vmatpush3.msra.mxu0 %v270_v23 }
  0x30   :  { %998 = vmatprep.subr.mxu0 %v1041_v16 }
  0x31   :  { %999 = vmatpush3.msra.mxu0 %v269_v24 }
  0x32   :  { %942 = vmatmul.mubr.bf16.gmra.mxu0 %v1034_v13  ;;  %1000 = vmatprep.subr.mxu0 %v1041_v16 }
  0x33   :  { %945 = vmatprep.mubr.bf16.mxu0 %v1035_v14  ;;  %1001 = vmatpush3.msra.mxu0 %v268_v25 }
  0x34   :  { %1002 = vmatprep.subr.mxu0 %v1041_v16 }
  0x35   :  { %1003 = vmatpush3.msra.mxu0 %v267_v26 }
  0x36   :  { %1004 = vmatprep.subr.mxu0 %v1041_v16 }
  0x37   :  { %1005 = vmatpush3.msra.mxu0 %v266_v27 }
  0x38   :  { %1006 = vmatprep.subr.mxu0 %v1041_v16 }
  0x39   :  { %1007 = vmatpush3.msra.mxu0 %v265_v28 }
  0x3a   :  { %946 = vmatmul.mubr.bf16.gmra.mxu0 %v1036_v15  ;;  %1008 = vmatprep.subr.mxu0 %v1041_v16 }
  0x3b   :  { %1009 = vmatpush3.msra.mxu0 %v264_v29  ;;  %1016 = vmatprep.mubr.msk.f32.mxu0 %vm1042_vm0, %v1041_v16 }
  0x3c   :  { %1010 = vmatprep.subr.mxu0 %v1041_v16 }
  0x3d   :  { %1011 = vmatpush3.msra.mxu0 %v263_v30 }
  0x3e   :  { %1012 = vmatprep.subr.mxu0 %v1041_v16 }
  0x3f   :  { %1013 = vmatpush3.msra.mxu0 %v262_v31 }
  0x40   :  { %1014 = vmatprep.subr.mxu0 %v1041_v16 }
  0x41   :  { %1015 = vmatpush3.msra.mxu0 %v261_v32 }
  0xe2   :  { %v935_v33 = vpop.f32.mrf.mxu0 }
  0xe3   :  { %v1222_v39 = vadd.f32 %v935_v33, %v1216_v35 }
  0xe4   :  { %v196_v34 = vpop.f32.mrf.mxu0 }
  0xe5   :  { %v1219_v37 = vadd.f32 %v1216_v35, %v196_v34  ;;  %v292_v47 = vmul.f32 %v1222_v39, %v1222_v39 }
  0xe6   :  { %v936_v36 = vpop.f32.mrf.mxu0 }
  0xe7   :  { %v290_v42 = vmul.f32 %v1219_v37, %v1219_v37  ;;  %v1230_v43 = vadd.f32 %v936_v36, %v1216_v35 }
  0xe8   :  { %v199_v38 = vpop.f32.mrf.mxu0 }
  0xe9   :  { %v1225_v40 = vadd.f32 %v1216_v35, %v199_v38  ;;  %v293_v52 = vmul.f32 %v1230_v43, %v1230_v43 }
  0xea   :  { %v939_v41 = vpop.f32.mrf.mxu0 }
  0xeb   :  { %v277_v44 = vadd.f32 %v1225_v40, %v1219_v37  ;;  %v291_v45 = vmul.f32 %v1225_v40, %v1225_v40  ;;  %v1246_v55 = vadd.f32 %v939_v41, %v1216_v35 }
  0xec   :  { %v212_v46 = vpop.f32.mrf.mxu0 }
  0xed   :  { %v278_v48 = vadd.f32 %v277_v44, %v1222_v39  ;;  %v298_v49 = vadd.f32 %v291_v45, %v290_v42  ;;  %v1240_v50 = vadd.f32 %v1216_v35, %v212_v46  ;;  %v296_v3 = vmul.f32 %v1246_v55, %v1246_v55 }
  0xee   :  { %v940_v51 = vpop.f32.mrf.mxu0 }
  0xef   :  { %v299_v53 = vadd.f32 %v298_v49, %v292_v47  ;;  %v279_v54 = vadd.f32 %v278_v48, %v1230_v43  ;;  %v294_v58 = vmul.f32 %v1240_v50, %v1240_v50  ;;  %v1255_v63 = vadd.f32 %v940_v51, %v1216_v35 }
  0xf0   :  { %v215_v56 = vpop.f32.mrf.mxu0 }
  0xf1   :  { %v280_v57 = vadd.f32 %v279_v54, %v1240_v50  ;;  %v300_v59 = vadd.f32 %v299_v53, %v293_v52  ;;  %v1252_v60 = vadd.f32 %v1216_v35, %v215_v56  ;;  %v297_v8 = vmul.f32 %v1255_v63, %v1255_v63 }
  0xf2   :  { %v943_v61 = vpop.f32.mrf.mxu0 }
  0xf3   :  { %v301_v62 = vadd.f32 %v300_v59, %v294_v58  ;;  %v281_v0 = vadd.f32 %v280_v57, %v1252_v60  ;;  %v295_v1 = vmul.f32 %v1252_v60, %v1252_v60  ;;  %v1270_v11 = vadd.f32 %v943_v61, %v1216_v35 }
  0xf4   :  { %v228_v2 = vpop.f32.mrf.mxu0 }
  0xf5   :  { %v282_v4 = vadd.f32 %v281_v0, %v1246_v55  ;;  %v302_v5 = vadd.f32 %v301_v62, %v295_v1  ;;  %v1264_v6 = vadd.f32 %v1216_v35, %v228_v2  ;;  %v523_v23 = vmul.f32 %v1270_v11, %v1270_v11 }
  0xf6   :  { %v944_v7 = vpop.f32.mrf.mxu0 }
  0xf7   :  { %v283_v9 = vadd.f32 %v282_v4, %v1255_v63  ;;  %v303_v10 = vadd.f32 %v302_v5, %v296_v3  ;;  %v521_v16 = vmul.f32 %v1264_v6, %v1264_v6  ;;  %v1278_v17 = vadd.f32 %v944_v7, %v1216_v35 }
  0xf8   :  { %v231_v12 = vpop.f32.mrf.mxu0 }
  0xf9   :  { %v284_v13 = vrot.slane %v283_v9, 4  ;;  %v304_v14 = vadd.f32 %v303_v10, %v297_v8  ;;  %v1273_v15 = vadd.f32 %v1216_v35, %v231_v12  ;;  %v524_v31 = vmul.f32 %v1278_v17, %v1278_v17 }
  0xfa   :  { %v947_v18 = vpop.f32.mrf.mxu0 }
  0xfb   :  { %v285_v19 = vadd.f32 %v284_v13, %v283_v9  ;;  %v305_v20 = vrot.slane %v304_v14, 4  ;;  %v508_v21 = vadd.f32 %v1273_v15, %v1264_v6  ;;  %v522_v22 = vmul.f32 %v1273_v15, %v1273_v15 }
  0xfc   :  { %v244_v24 = vpop.f32.mrf.mxu0  ;;  %v1294_v34 = vadd.f32 %v947_v18, %v1216_v35 }
  0xfd   :  { %v509_v25 = vadd.f32 %v508_v21, %v1270_v11  ;;  %v529_v26 = vadd.f32 %v522_v22, %v521_v16  ;;  %v1288_v27 = vadd.f32 %v1216_v35, %v244_v24  ;;  %v286_v28 = vrot.slane %v285_v19, 2 }
  0xfe   :  { %v948_v29 = vpop.f32.mrf.mxu0  ;;  %v306_v30 = vadd.f32 %v305_v20, %v304_v14  ;;  %v527_v56 = vmul.f32 %v1294_v34, %v1294_v34 }
  0xff   :  { %v530_v32 = vadd.f32 %v529_v26, %v523_v23  ;;  %v510_v33 = vadd.f32 %v509_v25, %v1278_v17  ;;  %v287_v38 = vadd.f32 %v286_v28, %v285_v19  ;;  %v525_v44 = vmul.f32 %v1288_v27, %v1288_v27 }
 0x100   :  { %v247_v36 = vpop.f32.mrf.mxu0  ;;  %v307_v41 = vrot.slane %v306_v30, 2  ;;  %v1303_v51 = vadd.f32 %v948_v29, %v1216_v35  ;;  %v390_v29 = vlaneseq }
 0x101   :  { %v511_v42 = vadd.f32 %v510_v33, %v1288_v27  ;;  %v531_v45 = vadd.f32 %v530_v32, %v524_v31  ;;  %v1300_v46 = vadd.f32 %v1216_v35, %v247_v36  ;;  %v288_v47 = vrot.slane %v287_v38, 1 }
 0x102   :  { %v308_v48 = vadd.f32 %v307_v41, %v306_v30  ;;  %v528_v62 = vmul.f32 %v1303_v51, %v1303_v51  ;;  %v1316_v31 = vshrl.u32 %v390_v29, 7 }
 0x103   :  { %v532_v49 = vadd.f32 %v531_v45, %v525_v44  ;;  %v512_v52 = vadd.f32 %v511_v42, %v1300_v46  ;;  %v526_v53 = vmul.f32 %v1300_v46, %v1300_v46  ;;  %v289_v59 = vadd.f32 %v288_v47, %v287_v38  ;;  %v782_v42 = vld [vmem:[%s1444_s6] sm:$0xff]   ;;  %v853_v44 = vld [vmem:[%s1444_s6 + $0x8] sm:$0xff]   ;;  %v854_v47 = vld [vmem:[%s1444_s6 + $0x10] sm:$0xff]  }
 0x104   :  { %v309_v54 = vrot.slane %v308_v48, 1  ;;  %v392_v33 = vsub.s32 0, %v1316_v31 }
 0x105   :  { %v513_v57 = vadd.f32 %v512_v52, %v1294_v34  ;;  %v533_v58 = vadd.f32 %v532_v49, %v526_v53  ;;  %v406_v52 = vsub.s32 1, %v1316_v31  ;;  %v783_v53 = vunpack.c.l.bf16 %v782_v42 }
 0x106   :  { %v310_v61 = vadd.f32 %v309_v54, %v308_v48  ;;  %v855_v48 = vld [vmem:[%s1444_s6 + $0x18] sm:$0xff]   ;;  %v784_v54 = vunpack.c.h.bf16 %v782_v42 }
 0x107   :  { %v514_v35 = vadd.f32 %v513_v57, %v1303_v51  ;;  %v534_v0 = vadd.f32 %v533_v58, %v527_v56  ;;  %v787_v56 = vunpack.c.l.bf16 %v853_v44  ;;  %v788_v58 = vunpack.c.h.bf16 %v853_v44 }
 0x108   :  { %v312_v1 = vsel %vm311_vm1, %v289_v59, %v310_v61  ;;  %v791_v59 = vunpack.c.l.bf16 %v854_v47  ;;  %v792_v61 = vunpack.c.h.bf16 %v854_v47 }
 0x109   :  { %v515_v2 = vrot.slane %v514_v35, 4  ;;  %v535_v3 = vadd.f32 %v534_v0, %v528_v62  ;;  %v313_v4 = vmul.f32 0.015625, %v312_v1  ;;  %v795_v62 = vunpack.c.l.bf16 %v855_v48 }
 0x10b   :  { %v516_v5 = vadd.f32 %v515_v2, %v514_v35  ;;  %v536_v7 = vrot.slane %v535_v3, 4  ;;  %982 = vmatmul.mubr.f32.vlgmr.msra.gmra.mxu1 %v313_v4  ;;  %v796_v2 = vunpack.c.h.bf16 %v855_v48 }
 0x10d   :  { %v517_v8 = vrot.slane %v516_v5, 2  ;;  %v537_v9 = vadd.f32 %v536_v7, %v535_v3 }
 0x10f   :  { %v518_v10 = vadd.f32 %v517_v8, %v516_v5  ;;  %v538_v12 = vrot.slane %v537_v9, 2 }
 0x111   :  { %v519_v13 = vrot.slane %v518_v10, 1  ;;  %v539_v14 = vadd.f32 %v538_v12, %v537_v9  ;;  %v1349_v9 = vld [vmem:[%s1445_s3] ss:$0 sm:$0xff] }
 0x113   :  { %v540_v16 = vrot.slane %v539_v14, 1  ;;  %v520_v18 = vadd.f32 %v519_v13, %v518_v10 }
 0x115   :  { %v541_v19 = vadd.f32 %v540_v16, %v539_v14 }
 0x117   :  { %v542_v20 = vsel %vm311_vm1, %v520_v18, %v541_v19 }
 0x118   :  { %v543_v21 = vmul.f32 0.015625, %v542_v20 }
 0x11a   :  { %1017 = vmatmul.mubr.f32.vlgmr.msra.gmra.mxu0 %v543_v21 }
 0x1cb   :  { %v380_v22 = vpop.f32.mrf.mxu1 }
 0x1cc   :  { %v384_v23 = vmul.f32 %v380_v22, %v380_v22  ;;  %v393_v45 = vrot.slane %v380_v22, %v392_v33 }
 0x1cd   :  { %v983_v24 = vpop.f32.mrf.mxu1 }
 0x1ce   :  { %v386_v25 = vrot.slane %v384_v23, 7  ;;  %v394_v0 = vsub.f32 %v1219_v37, %v393_v45  ;;  %v395_v1 = vsub.f32 %v1225_v40, %v393_v45  ;;  %v396_v4 = vsub.f32 %v1222_v39, %v393_v45 }
 0x1cf   :  { %v397_v5 = vsub.f32 %v1230_v43, %v393_v45  ;;  %v398_v7 = vsub.f32 %v1240_v50, %v393_v45  ;;  %v399_v37 = vsub.f32 %v1252_v60, %v393_v45  ;;  %v400_v40 = vsub.f32 %v1246_v55, %v393_v45  ;;  %v1357_v50 = vld [vmem:[%s1446_s4] ss:$0 sm:$0xff] }
 0x1d0   :  { %v388_v26 = vsub.f32 %v380_v22, %v386_v25  ;;  %v401_v10 = vsub.f32 %v1255_v63, %v393_v45 }
 0x1d2   :  { %v389_v28 = vmax.f32 %v388_v26, 0.0 }
 0x1d4   :  { %v402_v30 = vadd.f32 1e-05, %v389_v28 }
 0x1d6   :  { %1037 = vrsqrt.f32 %v402_v30 }
 0x1da   :  { %v1318_v32 = vpop.f32.mrf.mxu0 }
 0x1db   :  { %v614_v36 = vmul.f32 %v1318_v32, %v1318_v32 }
 0x1dc   :  { %v1018_v38 = vpop.f32.mrf.mxu0 }
 0x1dd   :  { %v616_v41 = vrot.slane %v614_v36, 7 }
 0x1df   :  { %v618_v49 = vsub.f32 %v1318_v32, %v616_v41 }
 0x1e1   :  { %v619_v57 = vmax.f32 %v618_v49, 0.0 }
 0x1e3   :  { %v1038_v35 = vpop.eup %1037  ;;  %v632_v3 = vadd.f32 1e-05, %v619_v57 }
 0x1e4   :  { %v407_v8 = vrot.slane %v1038_v35, %v406_v52 }
 0x1e5   :  { %1039 = vrsqrt.f32 %v632_v3 }
 0x1e6   :  { %v408_v39 = vmul.f32 %v407_v8, %v394_v0  ;;  %v409_v12 = vmul.f32 %v407_v8, %v395_v1  ;;  %v410_v43 = vmul.f32 %v407_v8, %v396_v4  ;;  %v411_v13 = vmul.f32 %v407_v8, %v397_v5  ;;  %v859_v0 = vld [vmem:[%s1444_s6 + $0x20] sm:$0xff]  }
 0x1e7   :  { %v412_v14 = vmul.f32 %v407_v8, %v398_v7  ;;  %v413_v16 = vmul.f32 %v407_v8, %v399_v37  ;;  %v414_v18 = vmul.f32 %v407_v8, %v400_v40  ;;  %v415_v19 = vmul.f32 %v407_v8, %v401_v10 }
 0x1e8   :  { %v422_v60 = vmul.f32 %v1349_v9, %v408_v39  ;;  %v423_v55 = vmul.f32 %v1349_v9, %v409_v12  ;;  %v424_v63 = vmul.f32 %v1349_v9, %v410_v43  ;;  %v425_v20 = vmul.f32 %v1349_v9, %v411_v13 }
 0x1e9   :  { %v426_v21 = vmul.f32 %v1349_v9, %v412_v14  ;;  %v427_v22 = vmul.f32 %v1349_v9, %v413_v16  ;;  %v428_v23 = vmul.f32 %v1349_v9, %v414_v18  ;;  %v429_v24 = vmul.f32 %v1349_v9, %v415_v19 }
 0x1ea   :  { %v436_v25 = vadd.f32 %v1357_v50, %v422_v60  ;;  %v437_v26 = vadd.f32 %v1357_v50, %v423_v55  ;;  %v438_v28 = vadd.f32 %v1357_v50, %v424_v63  ;;  %v439_v29 = vadd.f32 %v1357_v50, %v425_v20 }
 0x1eb   :  { %v440_v30 = vadd.f32 %v1357_v50, %v426_v21  ;;  %v441_v36 = vadd.f32 %v1357_v50, %v427_v22  ;;  %v442_v38 = vadd.f32 %v1357_v50, %v428_v23  ;;  %v443_v41 = vadd.f32 %v1357_v50, %v429_v24 }
 0x1ec   :  { %v460_v42 = vadd.f32 %v783_v53, %v436_v25  ;;  %v461_v44 = vadd.f32 %v784_v54, %v437_v26  ;;  %v462_v45 = vadd.f32 %v787_v56, %v438_v28  ;;  %v463_v47 = vadd.f32 %v788_v58, %v439_v29  ;;  %v860_v53 = vld [vmem:[%s1444_s6 + $0x28] sm:$0xff]   ;;  %v861_v54 = vld [vmem:[%s1444_s6 + $0x30] sm:$0xff]  }
 0x1ed   :  { %v464_v48 = vadd.f32 %v791_v59, %v440_v30  ;;  %v465_v49 = vadd.f32 %v792_v61, %v441_v36  ;;  %v466_v57 = vadd.f32 %v795_v62, %v442_v38  ;;  %v467_v35 = vadd.f32 %v796_v2, %v443_v41  ;;  %v862_v59 = vld [vmem:[%s1444_s6 + $0x38] sm:$0xff]  }
 0x1ee   :  { %v800_v1 = vpack.c.bf16 %v461_v44, %v460_v42  ;;  %v805_v3 = vpack.c.bf16 %v463_v47, %v462_v45  ;;  %v623_v4 = vrot.slane %v1318_v32, %v392_v33  ;;  %v819_v32 = vunpack.c.l.bf16 %v859_v0 }
 0x1ef   :  { %v810_v56 = vpack.c.bf16 %v465_v49, %v464_v48  ;;  %v815_v58 = vpack.c.bf16 %v467_v35, %v466_v57  ;;  %v820_v33 = vunpack.c.h.bf16 %v859_v0  ;;  %v823_v61 = vunpack.c.l.bf16 %v860_v53 }
 0x1f0   :  { %801 = vst [vmem:[%s1447_s7] sm:$0xff] %v800_v1   ;;  %856 = vst [vmem:[%s1447_s7 + $0x8] sm:$0xff] %v805_v3   ;;  %v824_v62 = vunpack.c.h.bf16 %v860_v53  ;;  %v827_v2 = vunpack.c.l.bf16 %v861_v54  ;;  %v624_v7 = vsub.f32 %v1264_v6, %v623_v4  ;;  %v828_v8 = vunpack.c.h.bf16 %v861_v54 }
 0x1f1   :  { %857 = vst [vmem:[%s1447_s7 + $0x10] sm:$0xff] %v810_v56   ;;  %858 = vst [vmem:[%s1447_s7 + $0x18] sm:$0xff] %v815_v58   ;;  %v831_v37 = vunpack.c.l.bf16 %v862_v59  ;;  %v832_v40 = vunpack.c.h.bf16 %v862_v59  ;;  %v625_v10 = vsub.f32 %v1273_v15, %v623_v4  ;;  %v626_v39 = vsub.f32 %v1270_v11, %v623_v4 }
 0x1f2   :  { %v1040_v5 = vpop.eup %1039  ;;  %v627_v12 = vsub.f32 %v1278_v17, %v623_v4  ;;  %v628_v13 = vsub.f32 %v1288_v27, %v623_v4  ;;  %v629_v14 = vsub.f32 %v1300_v46, %v623_v4  ;;  %v630_v16 = vsub.f32 %v1294_v34, %v623_v4 }
 0x1f3   :  { %v637_v43 = vrot.slane %v1040_v5, %v406_v52  ;;  %v631_v6 = vsub.f32 %v1303_v51, %v623_v4 }
 0x1f5   :  { %v638_v18 = vmul.f32 %v637_v43, %v624_v7  ;;  %v639_v19 = vmul.f32 %v637_v43, %v625_v10  ;;  %v640_v60 = vmul.f32 %v637_v43, %v626_v39  ;;  %v641_v55 = vmul.f32 %v637_v43, %v627_v12 }
 0x1f6   :  { %v642_v15 = vmul.f32 %v637_v43, %v628_v13  ;;  %v643_v63 = vmul.f32 %v637_v43, %v629_v14  ;;  %v644_v11 = vmul.f32 %v637_v43, %v630_v16  ;;  %v645_v20 = vmul.f32 %v637_v43, %v631_v6 }
 0x1f7   :  { %v646_v17 = vmul.f32 %v1349_v9, %v638_v18  ;;  %v647_v31 = vmul.f32 %v1349_v9, %v639_v19  ;;  %v648_v27 = vmul.f32 %v1349_v9, %v640_v60  ;;  %v649_v46 = vmul.f32 %v1349_v9, %v641_v55 }
 0x1f8   :  { %v650_v34 = vmul.f32 %v1349_v9, %v642_v15  ;;  %v651_v51 = vmul.f32 %v1349_v9, %v643_v63  ;;  %v652_v52 = vmul.f32 %v1349_v9, %v644_v11  ;;  %v653_v21 = vmul.f32 %v1349_v9, %v645_v20 }
 0x1f9   :  { %v654_v22 = vadd.f32 %v1357_v50, %v646_v17  ;;  %v655_v23 = vadd.f32 %v1357_v50, %v647_v31  ;;  %v656_v24 = vadd.f32 %v1357_v50, %v648_v27  ;;  %v657_v25 = vadd.f32 %v1357_v50, %v649_v46 }
 0x1fa   :  { %v658_v26 = vadd.f32 %v1357_v50, %v650_v34  ;;  %v659_v28 = vadd.f32 %v1357_v50, %v651_v51  ;;  %v660_v29 = vadd.f32 %v1357_v50, %v652_v52  ;;  %v661_v30 = vadd.f32 %v1357_v50, %v653_v21 }
 0x1fb   :  { %v678_v36 = vadd.f32 %v819_v32, %v654_v22  ;;  %v679_v38 = vadd.f32 %v820_v33, %v655_v23  ;;  %v680_v41 = vadd.f32 %v823_v61, %v656_v24  ;;  %v681_v9 = vadd.f32 %v824_v62, %v657_v25 }
 0x1fc   :  { %v682_v42 = vadd.f32 %v827_v2, %v658_v26  ;;  %v683_v44 = vadd.f32 %v828_v8, %v659_v28  ;;  %v684_v45 = vadd.f32 %v831_v37, %v660_v29  ;;  %v685_v47 = vadd.f32 %v832_v40, %v661_v30 }
 0x1fd   :  { %v836_v48 = vpack.c.bf16 %v679_v38, %v678_v36  ;;  %v841_v49 = vpack.c.bf16 %v681_v9, %v680_v41 }
 0x1fe   :  { %v846_v57 = vpack.c.bf16 %v683_v44, %v682_v42  ;;  %v851_v35 = vpack.c.bf16 %v685_v47, %v684_v45 }
 0x1ff   :  { %863 = vst [vmem:[%s1447_s7 + $0x20] sm:$0xff] %v836_v48   ;;  %864 = vst [vmem:[%s1447_s7 + $0x28] sm:$0xff] %v841_v49  }
 0x200   :  { %865 = vst [vmem:[%s1447_s7 + $0x30] sm:$0xff] %v846_v57   ;;  %866 = vst [vmem:[%s1447_s7 + $0x38] sm:$0xff] %v851_v35  }

// kernel: cnn_classifier_forward.15
= control target key start
LH: loop header
LB: loop body
LE: loop exit
PB: predicated region body
PF: predicated region fallthrough
CT: control target
= control target key end

     0   :  { %11 = vsyncpa [#allocation3], 0  ;;  %s2831_s21 = smov [#allocation2]   ;;  %s3718_s0 = inlined_call_operand.vmem [shape: bf16[128,1152], index: 0, kind: input, shape index: {}]   ;;  %s3719_s1 = inlined_call_operand.vmem [shape: bf16[1152,128], index: 1, kind: input, shape index: {}]   ;;  %s3720_s2 = inlined_call_operand.vmem [shape: f32[1,128], index: 2, kind: input, shape index: {}]   ;;  %s3721_s3 = inlined_call_operand.vmem [shape: f32[1,128], index: 3, kind: input, shape index: {}]   ;;  %s3722_s4 = inlined_call_operand.hbm [shape: f32[1,128], index: 4, kind: input, shape index: {}]   ;;  %s3723_s5 = inlined_call_operand.vmem [shape: f32[128,128], index: 5, kind: input, shape index: {}]   ;;  %s3724_s6 = inlined_call_operand.vmem [shape: bf16[128,128], index: 6, kind: output, shape index: {}]  }
   0x1   :  { %s26_s22 = sshll.u32 %s2831_s21, 4  ;;  %s27_s22 = int_to_ptr.vmem [resolvable:$true] %s26_s22 }
   0x2   :  { %s2817_s23 = scalar_lea.vmem %s27_s22, 16  ;;  %s2821_s24 = scalar_lea.vmem %s27_s22, 32 }
   0x3   :  { %p2818_p0 = scmp.ne.s32.totalorder %s27_s22, %s2817_s23  ;;  %p2822_p1 = scmp.lt.s32.totalorder %s27_s22, %s27_s22 }
   0x4   :  { %p2823_p2 = scmp.lt.s32.totalorder %s2821_s24, %s2817_s23 }
   0x6   :  { %p2824_p3 = por %p2823_p2, %p2822_p1 }
   0x8   :  { %p2825_p4 = pnand %p2824_p3, %p2818_p0 }
   0xa   :  { %2828 = shalt.err (!%p2825_p4)
}
   0xb   :  { %29 = dma.hbm_to_vmem [thread:$0]  %s3722_s4, 16, %s27_s22, [#allocation3]  }
   0xc   :  { %2829 = dma.done.wait [#allocation3], 16  }
   0xd   :  { %2830 = vsyncadd [#allocation3], 4294967280  ;;  %v2629_v0 = vld [vmem:[%s3719_s1 + $0x78] sm:$0xff]   ;;  %v2633_v4 = vld [vmem:[%s3719_s1 + $0x70] sm:$0xff]   ;;  %vm2833_vm0 = vmmov 0   ;;  %vm1604_vm1 = vcmask 1040384  }
   0xe   :  { %v2630_v1 = vld [vmem:[%s3719_s1 + $0x38] sm:$0xff]   ;;  %2218 = vmatprep.subr.bf16.mxu0 %v2629_v0  ;;  %v2634_v5 = vld [vmem:[%s3719_s1 + $0x30] sm:$0xff]   ;;  %v2637_v8 = vld [vmem:[%s3719_s1 + $0x68] sm:$0xff]  }
   0xf   :  { %v2631_v2 = vld [vmem:[%s3719_s1 + $0xf8] sm:$0xff]   ;;  %2219 = vmatpush3.bf16.msra.mxu0 %v2630_v1  ;;  %v2635_v6 = vld [vmem:[%s3719_s1 + $0xf0] sm:$0xff]   ;;  %v2638_v9 = vld [vmem:[%s3719_s1 + $0x28] sm:$0xff]  }
  0x10   :  { %v2632_v3 = vld [vmem:[%s3719_s1 + $0xb8] sm:$0xff]   ;;  %2282 = vmatprep.subr.bf16.mxu1 %v2631_v2  ;;  %2220 = vmatprep.subr.bf16.mxu0 %v2633_v4  ;;  %v2636_v7 = vld [vmem:[%s3719_s1 + $0xb0] sm:$0xff]   ;;  %v2639_v10 = vld [vmem:[%s3719_s1 + $0xe8] sm:$0xff]  }
  0x11   :  { %2283 = vmatpush3.bf16.msra.mxu1 %v2632_v3  ;;  %v2640_v11 = vld [vmem:[%s3719_s1 + $0xa8] sm:$0xff]   ;;  %v2641_v12 = vld [vmem:[%s3719_s1 + $0x60] sm:$0xff]   ;;  %v2645_v16 = vld [vmem:[%s3719_s1 + $0x58] sm:$0xff]  }
  0x12   :  { %2284 = vmatprep.subr.bf16.mxu1 %v2635_v6  ;;  %v2642_v13 = vld [vmem:[%s3719_s1 + $0x20] sm:$0xff]   ;;  %v2646_v17 = vld [vmem:[%s3719_s1 + $0x18] sm:$0xff]   ;;  %v2649_v20 = vld [vmem:[%s3719_s1 + $0x50] sm:$0xff]  }
  0x13   :  { %2221 = vmatpush3.bf16.msra.mxu0 %v2634_v5  ;;  %v2643_v14 = vld [vmem:[%s3719_s1 + $0xe0] sm:$0xff]   ;;  %v2647_v18 = vld [vmem:[%s3719_s1 + $0xd8] sm:$0xff]   ;;  %v2650_v21 = vld [vmem:[%s3719_s1 + $0x10] sm:$0xff]  }
  0x14   :  { %2222 = vmatprep.subr.bf16.mxu0 %v2637_v8  ;;  %v2644_v15 = vld [vmem:[%s3719_s1 + $0xa0] sm:$0xff]   ;;  %v2648_v19 = vld [vmem:[%s3719_s1 + $0x98] sm:$0xff]   ;;  %v2651_v22 = vld [vmem:[%s3719_s1 + $0xd0] sm:$0xff]  }
  0x15   :  { %2285 = vmatpush3.bf16.msra.mxu1 %v2636_v7  ;;  %v2652_v23 = vld [vmem:[%s3719_s1 + $0x90] sm:$0xff]   ;;  %v2653_v24 = vld [vmem:[%s3719_s1 + $0x48] sm:$0xff]   ;;  %v2657_v28 = vld [vmem:[%s3719_s1 + $0x40] sm:$0xff]  }
  0x16   :  { %2286 = vmatprep.subr.bf16.mxu1 %v2639_v10  ;;  %v2654_v25 = vld [vmem:[%s3719_s1 + $0x8] sm:$0xff]   ;;  %v2658_v29 = vld [vmem:[%s3719_s1] sm:$0xff]   ;;  %v2664_v34 = vld [vmem:[%s3719_s1 + $0x178] sm:$0xff]  }
  0x17   :  { %2223 = vmatpush3.bf16.msra.mxu0 %v2638_v9  ;;  %v2655_v26 = vld [vmem:[%s3719_s1 + $0xc8] sm:$0xff]   ;;  %v2659_v30 = vld [vmem:[%s3719_s1 + $0xc0] sm:$0xff]   ;;  %v2668_v37 = vld [vmem:[%s3719_s1 + $0x138] sm:$0xff]  }
  0x18   :  { %2224 = vmatprep.subr.bf16.mxu0 %v2641_v12  ;;  %v2656_v27 = vld [vmem:[%s3719_s1 + $0x88] sm:$0xff]   ;;  %v2660_v31 = vld [vmem:[%s3718_s0] ss:$36 sps:$4 sm:$0xff]   ;;  %v2672_v40 = vld [vmem:[%s3719_s1 + $0x170] sm:$0xff]  }
  0x19   :  { %2287 = vmatpush3.bf16.msra.mxu1 %v2640_v11  ;;  %v2662_v32 = vld [vmem:[%s3718_s0 + $0x4] ss:$36 sps:$4 sm:$0xff]   ;;  %v2667_v36 = vld [vmem:[%s3718_s0 + $0xc] ss:$36 sps:$4 sm:$0xff]   ;;  %v2673_v41 = vld [vmem:[%s3718_s0 + $0x54] ss:$36 sps:$4 sm:$0xff]  }
  0x1a   :  { %2288 = vmatprep.subr.bf16.mxu1 %v2643_v14  ;;  %v2663_v33 = vld [vmem:[%s3719_s1 + $0x80] sm:$0xff]   ;;  %1099 = vmatprep.mubr.bf16.mxu0 %v2662_v32  ;;  %v2665_v35 = vld [vmem:[%s3718_s0 + $0x8] ss:$36 sps:$4 sm:$0xff]   ;;  %v2675_v42 = vld [vmem:[%s3719_s1 + $0x130] sm:$0xff]  }
  0x1b   :  { %2225 = vmatpush3.bf16.msra.mxu0 %v2642_v13  ;;  %1196 = vmatprep.mubr.bf16.mxu1 %v2667_v36  ;;  %v2669_v38 = vld [vmem:[%s3718_s0 + $0x4c] ss:$36 sps:$4 sm:$0xff]   ;;  %v2677_v44 = vld [vmem:[%s3718_s0 + $0x94] ss:$36 sps:$4 sm:$0xff]   ;;  %v2681_v46 = vld [vmem:[%s3718_s0 + $0x9c] ss:$36 sps:$4 sm:$0xff]  }
  0x1c   :  { %2226 = vmatprep.subr.bf16.mxu0 %v2645_v16  ;;  %v2671_v39 = vld [vmem:[%s3718_s0 + $0x48] ss:$36 sps:$4 sm:$0xff]   ;;  %v2676_v43 = vld [vmem:[%s3718_s0 + $0x50] ss:$36 sps:$4 sm:$0xff]   ;;  %v2685_v49 = vld [vmem:[%s3718_s0 + $0xdc] ss:$36 sps:$4 sm:$0xff]  }
  0x1d   :  { %2289 = vmatpush3.bf16.msra.mxu1 %v2644_v15  ;;  %v2680_v45 = vld [vmem:[%s3719_s1 + $0x168] sm:$0xff]   ;;  %v2679_v48 = vld [vmem:[%s3718_s0 + $0x90] ss:$36 sps:$4 sm:$0xff]   ;;  %v2688_v50 = vld [vmem:[%s3719_s1 + $0x160] sm:$0xff]  }
  0x1e   :  { %2290 = vmatprep.subr.bf16.mxu1 %v2647_v18  ;;  %v2683_v47 = vld [vmem:[%s3719_s1 + $0x128] sm:$0xff]   ;;  %v2684_v51 = vld [vmem:[%s3718_s0 + $0x98] ss:$36 sps:$4 sm:$0xff]   ;;  %v2691_v52 = vld [vmem:[%s3719_s1 + $0x120] sm:$0xff]  }
  0x1f   :  { %2227 = vmatpush3.bf16.msra.mxu0 %v2646_v17  ;;  %v2689_v53 = vld [vmem:[%s3718_s0 + $0xe4] ss:$36 sps:$4 sm:$0xff]   ;;  %v2696_v54 = vld [vmem:[%s3719_s1 + $0x158] sm:$0xff]   ;;  %v2703_v61 = vld [vmem:[%s3719_s1 + $0x1f0] sm:$0xff]  }
  0x20   :  { %2228 = vmatprep.subr.bf16.mxu0 %v2649_v20  ;;  %v2687_v55 = vld [vmem:[%s3718_s0 + $0xd8] ss:$36 sps:$4 sm:$0xff]   ;;  %v2693_v57 = vld [vmem:[%s3718_s0 + $0x124] ss:$36 sps:$4 sm:$0xff]   ;;  %v2698_v62 = vld [vmem:[%s3718_s0 + $0x12c] ss:$36 sps:$4 sm:$0xff]  }
  0x21   :  { %2291 = vmatpush3.bf16.msra.mxu1 %v2648_v19  ;;  %v2697_v56 = vld [vmem:[%s3719_s1 + $0x1f8] sm:$0xff]   ;;  %v2692_v60 = vld [vmem:[%s3718_s0 + $0xe0] ss:$36 sps:$4 sm:$0xff]   ;;  %v2706_v63 = vld [vmem:[%s3719_s1 + $0x1b0] sm:$0xff]  }
  0x22   :  { %2292 = vmatprep.subr.bf16.mxu1 %v2651_v22  ;;  %v2700_v58 = vld [vmem:[%s3719_s1 + $0x118] sm:$0xff]   ;;  %v2708_v0 = vld [vmem:[%s3719_s1 + $0x150] sm:$0xff]   ;;  %v2695_v1 = vld [vmem:[%s3718_s0 + $0x120] ss:$36 sps:$4 sm:$0xff]  }
  0x23   :  { %2229 = vmatpush3.bf16.msra.mxu0 %v2650_v21  ;;  %v2701_v59 = vld [vmem:[%s3719_s1 + $0x1b8] sm:$0xff]   ;;  %v2704_v2 = vld [vmem:[%s3718_s0 + $0x16c] ss:$36 sps:$4 sm:$0xff]   ;;  %v2715_v7 = vld [vmem:[%s3719_s1 + $0x1e0] sm:$0xff]  }
  0x24   :  { %2230 = vmatprep.subr.bf16.mxu0 %v2653_v24  ;;  %v2711_v3 = vld [vmem:[%s3719_s1 + $0x110] sm:$0xff]   ;;  %v2702_v4 = vld [vmem:[%s3718_s0 + $0x128] ss:$36 sps:$4 sm:$0xff]   ;;  %v2718_v9 = vld [vmem:[%s3719_s1 + $0x1a0] sm:$0xff]  }
  0x25   :  { %2293 = vmatpush3.bf16.msra.mxu1 %v2652_v23  ;;  %v2713_v5 = vld [vmem:[%s3719_s1 + $0x1e8] sm:$0xff]   ;;  %v2709_v8 = vld [vmem:[%s3718_s0 + $0x174] ss:$36 sps:$4 sm:$0xff]   ;;  %v2721_v15 = vld [vmem:[%s3718_s0 + $0x1bc] ss:$36 sps:$4 sm:$0xff]  }
  0x26   :  { %2294 = vmatprep.subr.bf16.mxu1 %v2655_v26  ;;  %v2714_v6 = vld [vmem:[%s3719_s1 + $0x1a8] sm:$0xff]   ;;  %v2712_v12 = vld [vmem:[%s3718_s0 + $0x170] ss:$36 sps:$4 sm:$0xff]   ;;  %v2725_v16 = vld [vmem:[%s3719_s1 + $0x1d8] sm:$0xff]  }
  0x27   :  { %2231 = vmatpush3.bf16.msra.mxu0 %v2654_v25  ;;  %v2720_v10 = vld [vmem:[%s3719_s1 + $0x148] sm:$0xff]   ;;  %v2716_v13 = vld [vmem:[%s3718_s0 + $0x1b4] ss:$36 sps:$4 sm:$0xff]   ;;  %v2732_v21 = vld [vmem:[%s3719_s1 + $0x140] sm:$0xff]  }
  0x28   :  { %2232 = vmatprep.subr.bf16.mxu0 %v2657_v28  ;;  %v2707_v11 = vld [vmem:[%s3718_s0 + $0x168] ss:$36 sps:$4 sm:$0xff]   ;;  %v2726_v17 = vld [vmem:[%s3719_s1 + $0x198] sm:$0xff]   ;;  %v2727_v18 = vld [vmem:[%s3719_s1 + $0x1d0] sm:$0xff]  }
  0x29   :  { %2295 = vmatpush3.bf16.msra.mxu1 %v2656_v27  ;;  %v2723_v14 = vld [vmem:[%s3719_s1 + $0x108] sm:$0xff]   ;;  %v2719_v19 = vld [vmem:[%s3718_s0 + $0x1b0] ss:$36 sps:$4 sm:$0xff]   ;;  %v2728_v22 = vld [vmem:[%s3718_s0 + $0x1fc] ss:$36 sps:$4 sm:$0xff]  }
  0x2a   :  { %2296 = vmatprep.subr.bf16.mxu1 %v2659_v30  ;;  %v2730_v20 = vld [vmem:[%s3719_s1 + $0x190] sm:$0xff]   ;;  %v2724_v23 = vld [vmem:[%s3718_s0 + $0x1b8] ss:$36 sps:$4 sm:$0xff]   ;;  %v2735_v24 = vld [vmem:[%s3719_s1 + $0x100] sm:$0xff]  }
  0x2b   :  { %2233 = vmatpush3.bf16.msra.mxu0 %v2658_v29  ;;  %v2733_v25 = vld [vmem:[%s3718_s0 + $0x204] ss:$36 sps:$4 sm:$0xff]   ;;  %v2731_v29 = vld [vmem:[%s3718_s0 + $0x1f8] ss:$36 sps:$4 sm:$0xff]  }
  0x2c   :  { %2346 = vmatprep.subr.bf16.mxu0 %v2664_v34  ;;  %v2737_v26 = vld [vmem:[%s3719_s1 + $0x1c8] sm:$0xff]   ;;  %v2739_v28 = vld [vmem:[%s3719_s1 + $0x1c0] sm:$0xff]   ;;  %v2742_v32 = vld [vmem:[%s3718_s0 + $0x14] ss:$36 sps:$4 sm:$0xff]  }
  0x2d   :  { %2297 = vmatpush3.bf16.msra.mxu1 %v2663_v33  ;;  %v2738_v27 = vld [vmem:[%s3719_s1 + $0x188] sm:$0xff]   ;;  %v2743_v30 = vld [vmem:[%s3719_s1 + $0x180] sm:$0xff]  }
  0x2e   :  { %1100 = vmatmul.mubr.bf16.vlgmr.msra.gmra.mxu0 %v2660_v31  ;;  %2410 = vmatprep.subr.bf16.mxu1 %v2697_v56  ;;  %v2744_v31 = vld [vmem:[%s3719_s1 + $0x238] sm:$0xff]   ;;  %v2736_v33 = vld [vmem:[%s3718_s0 + $0x200] ss:$36 sps:$4 sm:$0xff]   ;;  %v2768_v56 = vld [vmem:[%s3718_s0 + $0xf0] ss:$36 sps:$4 sm:$0xff]  }
  0x2f   :  { %2347 = vmatpush3.bf16.msra.mxu0 %v2668_v37  ;;  %1107 = vmatprep.mubr.bf16.mxu0 %v2669_v38  ;;  %v2747_v34 = vld [vmem:[%s3718_s0 + $0x1c] ss:$36 sps:$4 sm:$0xff]   ;;  %v2751_v37 = vld [vmem:[%s3719_s1 + $0x230] sm:$0xff]  }
  0x30   :  { %1197 = vmatmul.mubr.bf16.vlgmr.msra.gmra.mxu1 %v2665_v35  ;;  %2348 = vmatprep.subr.bf16.mxu0 %v2672_v40  ;;  %v2740_v35 = vld [vmem:[%s3718_s0 + $0x10] ss:$36 sps:$4 sm:$0xff]   ;;  %v2748_v36 = vld [vmem:[%s3718_s0 + $0x5c] ss:$36 sps:$4 sm:$0xff]   ;;  %v2758_v40 = vld [vmem:[%s3719_s1 + $0x228] sm:$0xff]  }
  0x31   :  { %1204 = vmatprep.mubr.bf16.mxu1 %v2673_v41  ;;  %2411 = vmatpush3.bf16.msra.mxu1 %v2701_v59  ;;  %v2745_v38 = vld [vmem:[%s3718_s0 + $0x18] ss:$36 sps:$4 sm:$0xff]  }
  0x32   :  { %2412 = vmatprep.subr.bf16.mxu1 %v2703_v61  ;;  %v2750_v41 = vld [vmem:[%s3718_s0 + $0x58] ss:$36 sps:$4 sm:$0xff]   ;;  %v2780_v61 = vld [vmem:[%s3718_s0 + $0x184] ss:$36 sps:$4 sm:$0xff]  }
  0x33   :  { %2349 = vmatpush3.bf16.msra.mxu0 %v2675_v42  ;;  %v2755_v42 = vld [vmem:[%s3718_s0 + $0xa4] ss:$36 sps:$4 sm:$0xff]   ;;  %v2776_v59 = vld [vmem:[%s3718_s0 + $0x17c] ss:$36 sps:$4 sm:$0xff]  }
  0x34   :  { %2350 = vmatprep.subr.bf16.mxu0 %v2680_v45  ;;  %v2759_v45 = vld [vmem:[%s3718_s0 + $0xac] ss:$36 sps:$4 sm:$0xff]  }
  0x35   :  { %2413 = vmatpush3.bf16.msra.mxu1 %v2706_v63  ;;  %v2783_v63 = vld [vmem:[%s3718_s0 + $0x1c4] ss:$36 sps:$4 sm:$0xff]  }
  0x36   :  { %1108 = vmatmul.mubr.bf16.gmra.mxu0 %v2671_v39  ;;  %2414 = vmatprep.subr.bf16.mxu1 %v2713_v5  ;;  %v2752_v39 = vld [vmem:[%s3718_s0 + $0x64] ss:$36 sps:$4 sm:$0xff]   ;;  %v2794_v5 = vld [vmem:[%s3718_s0 + $0x214] ss:$36 sps:$4 sm:$0xff]  }
  0x37   :  { %1115 = vmatprep.mubr.bf16.mxu0 %v2677_v44  ;;  %2351 = vmatpush3.bf16.msra.mxu0 %v2683_v47  ;;  %v2754_v44 = vld [vmem:[%s3718_s0 + $0x60] ss:$36 sps:$4 sm:$0xff]  }
  0x38   :  { %1205 = vmatmul.mubr.bf16.gmra.mxu1 %v2676_v43  ;;  %2352 = vmatprep.subr.bf16.mxu0 %v2688_v50  ;;  %v2765_v43 = vld [vmem:[%s3719_s1 + $0x220] sm:$0xff]   ;;  %v2761_v50 = vld [vmem:[%s3718_s0 + $0xa8] ss:$36 sps:$4 sm:$0xff]  }
  0x39   :  { %1212 = vmatprep.mubr.bf16.mxu1 %v2681_v46  ;;  %2415 = vmatpush3.bf16.msra.mxu1 %v2714_v6  ;;  %v2772_v46 = vld [vmem:[%s3719_s1 + $0x218] sm:$0xff]   ;;  %v2757_v47 = vld [vmem:[%s3718_s0 + $0xa0] ss:$36 sps:$4 sm:$0xff]   ;;  %v2792_v6 = vld [vmem:[%s3718_s0 + $0x208] ss:$36 sps:$4 sm:$0xff]  }
  0x3a   :  { %2416 = vmatprep.subr.bf16.mxu1 %v2715_v7  ;;  %v2797_v7 = vld [vmem:[%s3718_s0 + $0x20] ss:$36 sps:$4 sm:$0xff]  }
  0x3b   :  { %2353 = vmatpush3.bf16.msra.mxu0 %v2691_v52  ;;  %v2786_v52 = vld [vmem:[%s3719_s1 + $0x208] sm:$0xff]  }
  0x3c   :  { %2354 = vmatprep.subr.bf16.mxu0 %v2696_v54  ;;  %v2769_v54 = vld [vmem:[%s3718_s0 + $0x134] ss:$36 sps:$4 sm:$0xff]  }
  0x3d   :  { %2417 = vmatpush3.bf16.msra.mxu1 %v2718_v9  ;;  %v2798_v9 = vld [vmem:[%s3718_s0 + $0x68] ss:$36 sps:$4 sm:$0xff]  }
  0x3e   :  { %1116 = vmatmul.mubr.bf16.gmra.mxu0 %v2679_v48  ;;  %2418 = vmatprep.subr.bf16.mxu1 %v2725_v16  ;;  %v2762_v48 = vld [vmem:[%s3718_s0 + $0xec] ss:$36 sps:$4 sm:$0xff]   ;;  %v1569_v16 = vld [vmem:[%s3723_s5 + $0x78] sm:$0xff] }
  0x3f   :  { %1123 = vmatprep.mubr.bf16.mxu0 %v2685_v49  ;;  %2355 = vmatpush3.bf16.msra.mxu0 %v2700_v58  ;;  %v2779_v49 = vld [vmem:[%s3719_s1 + $0x210] sm:$0xff]  }
  0x40   :  { %1213 = vmatmul.mubr.bf16.gmra.mxu1 %v2684_v51  ;;  %2356 = vmatprep.subr.bf16.mxu0 %v2708_v0  ;;  %v2766_v51 = vld [vmem:[%s3718_s0 + $0xf4] ss:$36 sps:$4 sm:$0xff]   ;;  %v2782_v0 = vld [vmem:[%s3718_s0 + $0x180] ss:$36 sps:$4 sm:$0xff]  }
  0x41   :  { %1220 = vmatprep.mubr.bf16.mxu1 %v2689_v53  ;;  %2419 = vmatpush3.bf16.msra.mxu1 %v2726_v17  ;;  %v2764_v53 = vld [vmem:[%s3718_s0 + $0xe8] ss:$36 sps:$4 sm:$0xff]   ;;  %v2771_v58 = vld [vmem:[%s3718_s0 + $0x130] ss:$36 sps:$4 sm:$0xff]   ;;  %v2832_v17 = vmov 0.0  }
  0x42   :  { %2420 = vmatprep.subr.bf16.mxu1 %v2727_v18  ;;  %v1568_v18 = vld [vmem:[%s3723_s5 + $0x70] sm:$0xff] }
  0x43   :  { %2357 = vmatpush3.bf16.msra.mxu0 %v2711_v3  ;;  %v2790_v3 = vld [vmem:[%s3718_s0 + $0x20c] ss:$36 sps:$4 sm:$0xff]  }
  0x44   :  { %2358 = vmatprep.subr.bf16.mxu0 %v2720_v10  ;;  %v2799_v10 = vld [vmem:[%s3718_s0 + $0xb0] ss:$36 sps:$4 sm:$0xff]  }
  0x45   :  { %2421 = vmatpush3.bf16.msra.mxu1 %v2730_v20  ;;  %v3319_v20 = vld [vmem:[%s3720_s2] ss:$0 sm:$0xff] }
  0x46   :  { %1124 = vmatmul.mubr.bf16.gmra.mxu0 %v2687_v55  ;;  %2422 = vmatprep.subr.bf16.mxu1 %v2737_v26  ;;  %v2793_v55 = vld [vmem:[%s3719_s1 + $0x200] sm:$0xff]  }
  0x47   :  { %1131 = vmatprep.mubr.bf16.mxu0 %v2693_v57  ;;  %2359 = vmatpush3.bf16.msra.mxu0 %v2723_v14  ;;  %v2773_v57 = vld [vmem:[%s3718_s0 + $0x13c] ss:$36 sps:$4 sm:$0xff]   ;;  %v2803_v14 = vld [vmem:[%s3718_s0 + $0x1d0] ss:$36 sps:$4 sm:$0xff]  }
  0x48   :  { %1221 = vmatmul.mubr.bf16.gmra.mxu1 %v2692_v60  ;;  %2360 = vmatprep.subr.bf16.mxu0 %v2732_v21  ;;  %v2775_v60 = vld [vmem:[%s3718_s0 + $0x138] ss:$36 sps:$4 sm:$0xff]  }
  0x49   :  { %1228 = vmatprep.mubr.bf16.mxu1 %v2698_v62  ;;  %2423 = vmatpush3.bf16.msra.mxu1 %v2738_v27  ;;  %v2778_v62 = vld [vmem:[%s3718_s0 + $0x178] ss:$36 sps:$4 sm:$0xff]  }
  0x4a   :  { %2424 = vmatprep.subr.bf16.mxu1 %v2739_v28 }
  0x4b   :  { %2361 = vmatpush3.bf16.msra.mxu0 %v2735_v24  ;;  %v1567_v24 = vld [vmem:[%s3723_s5 + $0x68] sm:$0xff] }
  0x4c   :  { %2524 = vmatprep.subr.bf16.mxu0 %v2744_v31 }
  0x4d   :  { %2425 = vmatpush3.bf16.msra.mxu1 %v2743_v30 }
  0x4e   :  { %1132 = vmatmul.mubr.bf16.gmra.mxu0 %v2695_v1  ;;  %v2787_v1 = vld [vmem:[%s3718_s0 + $0x1cc] ss:$36 sps:$4 sm:$0xff]   ;;  %2556 = vmatprep.subr.mxu1 %v2832_v17 }
  0x4f   :  { %1139 = vmatprep.mubr.bf16.mxu0 %v2704_v2  ;;  %v2785_v2 = vld [vmem:[%s3718_s0 + $0x1c0] ss:$36 sps:$4 sm:$0xff]  }
  0x50   :  { %1229 = vmatmul.mubr.bf16.gmra.mxu1 %v2702_v4  ;;  %v2789_v4 = vld [vmem:[%s3718_s0 + $0x1c8] ss:$36 sps:$4 sm:$0xff]  }
  0x51   :  { %1236 = vmatprep.mubr.bf16.mxu1 %v2709_v8  ;;  %v2796_v8 = vld [vmem:[%s3718_s0 + $0x210] ss:$36 sps:$4 sm:$0xff]  }
  0x56   :  { %1140 = vmatmul.mubr.bf16.gmra.mxu0 %v2707_v11  ;;  %v2800_v11 = vld [vmem:[%s3718_s0 + $0xf8] ss:$36 sps:$4 sm:$0xff]  }
  0x57   :  { %1147 = vmatprep.mubr.bf16.mxu0 %v2716_v13  ;;  %v2802_v13 = vld [vmem:[%s3718_s0 + $0x188] ss:$36 sps:$4 sm:$0xff]  }
  0x58   :  { %1237 = vmatmul.mubr.bf16.gmra.mxu1 %v2712_v12  ;;  %v2801_v12 = vld [vmem:[%s3718_s0 + $0x140] ss:$36 sps:$4 sm:$0xff]  }
  0x59   :  { %1244 = vmatprep.mubr.bf16.mxu1 %v2721_v15  ;;  %v2804_v15 = vld [vmem:[%s3718_s0 + $0x218] ss:$36 sps:$4 sm:$0xff]  }
  0x5e   :  { %1148 = vmatmul.mubr.bf16.gmra.mxu0 %v2719_v19 }
  0x5f   :  { %1155 = vmatprep.mubr.bf16.mxu0 %v2728_v22 }
  0x60   :  { %1245 = vmatmul.mubr.bf16.gmra.mxu1 %v2724_v23 }
  0x61   :  { %1252 = vmatprep.mubr.bf16.mxu1 %v2733_v25 }
  0x66   :  { %1156 = vmatmul.mubr.bf16.gmra.mxu0 %v2731_v29 }
  0x67   :  { %1293 = vmatprep.mubr.bf16.mxu0 %v2742_v32  ;;  %v1566_v32 = vld [vmem:[%s3723_s5 + $0x60] sm:$0xff] }
  0x68   :  { %1253 = vmatmul.mubr.bf16.gmra.mxu1 %v2736_v33 }
  0x69   :  { %1390 = vmatprep.mubr.bf16.mxu1 %v2747_v34 }
  0x6e   :  { %1294 = vmatmul.mubr.bf16.vlgmr.msra.gmra.mxu0 %v2740_v35 }
  0x6f   :  { %2525 = vmatpush3.bf16.msra.mxu0 %v2744_v31  ;;  %1301 = vmatprep.mubr.bf16.mxu0 %v2748_v36 }
  0x70   :  { %2526 = vmatprep.subr.bf16.mxu0 %v2751_v37  ;;  %1391 = vmatmul.mubr.bf16.vlgmr.msra.gmra.mxu1 %v2745_v38 }
  0x71   :  { %1398 = vmatprep.mubr.bf16.mxu1 %v2752_v39  ;;  %2557 = vmatpush3.msra.mxu1 %v1569_v16 }
  0x72   :  { %2558 = vmatprep.subr.mxu1 %v2832_v17 }
  0x73   :  { %2527 = vmatpush3.bf16.msra.mxu0 %v2751_v37  ;;  %2559 = vmatpush3.msra.mxu1 %v1568_v18 }
  0x74   :  { %2528 = vmatprep.subr.bf16.mxu0 %v2758_v40  ;;  %2560 = vmatprep.subr.mxu1 %v2832_v17 }
  0x75   :  { %2561 = vmatpush3.msra.mxu1 %v1567_v24 }
  0x76   :  { %1302 = vmatmul.mubr.bf16.gmra.mxu0 %v2750_v41  ;;  %2562 = vmatprep.subr.mxu1 %v2832_v17 }
  0x77   :  { %1309 = vmatprep.mubr.bf16.mxu0 %v2755_v42  ;;  %2529 = vmatpush3.bf16.msra.mxu0 %v2758_v40 }
  0x78   :  { %2530 = vmatprep.subr.bf16.mxu0 %v2765_v43  ;;  %1399 = vmatmul.mubr.bf16.gmra.mxu1 %v2754_v44 }
  0x79   :  { %1406 = vmatprep.mubr.bf16.mxu1 %v2759_v45  ;;  %2563 = vmatpush3.msra.mxu1 %v1566_v32  ;;  %v1565_v45 = vld [vmem:[%s3723_s5 + $0x58] sm:$0xff] }
  0x7a   :  { %2564 = vmatprep.subr.mxu1 %v2832_v17 }
  0x7b   :  { %2531 = vmatpush3.bf16.msra.mxu0 %v2765_v43  ;;  %2565 = vmatpush3.msra.mxu1 %v1565_v45 }
  0x7c   :  { %2532 = vmatprep.subr.bf16.mxu0 %v2772_v46  ;;  %2566 = vmatprep.subr.mxu1 %v2832_v17 }
  0x7e   :  { %1310 = vmatmul.mubr.bf16.gmra.mxu0 %v2757_v47 }
  0x7f   :  { %1317 = vmatprep.mubr.bf16.mxu0 %v2762_v48  ;;  %2533 = vmatpush3.bf16.msra.mxu0 %v2772_v46 }
  0x80   :  { %2534 = vmatprep.subr.bf16.mxu0 %v2779_v49  ;;  %1407 = vmatmul.mubr.bf16.gmra.mxu1 %v2761_v50 }
  0x81   :  { %1414 = vmatprep.mubr.bf16.mxu1 %v2766_v51 }
  0x83   :  { %2535 = vmatpush3.bf16.msra.mxu0 %v2779_v49 }
  0x84   :  { %2536 = vmatprep.subr.bf16.mxu0 %v2786_v52 }
  0x86   :  { %1318 = vmatmul.mubr.bf16.gmra.mxu0 %v2764_v53 }
  0x87   :  { %1325 = vmatprep.mubr.bf16.mxu0 %v2769_v54  ;;  %2537 = vmatpush3.bf16.msra.mxu0 %v2786_v52  ;;  %v1564_v54 = vld [vmem:[%s3723_s5 + $0x50] sm:$0xff] }
  0x88   :  { %2538 = vmatprep.subr.bf16.mxu0 %v2793_v55  ;;  %1415 = vmatmul.mubr.bf16.gmra.mxu1 %v2768_v56 }
  0x89   :  { %1422 = vmatprep.mubr.bf16.mxu1 %v2773_v57  ;;  %2567 = vmatpush3.msra.mxu1 %v1564_v54 }
  0x8a   :  { %2568 = vmatprep.subr.mxu1 %v2832_v17 }
  0x8b   :  { %2539 = vmatpush3.bf16.msra.mxu0 %v2793_v55 }
  0x8c   :  { %2591 = vmatprep.subr.mxu0 %v2832_v17 }
  0x8e   :  { %1326 = vmatmul.mubr.bf16.gmra.mxu0 %v2771_v58 }
  0x8f   :  { %1333 = vmatprep.mubr.bf16.mxu0 %v2776_v59 }
  0x90   :  { %1423 = vmatmul.mubr.bf16.gmra.mxu1 %v2775_v60 }
  0x91   :  { %1430 = vmatprep.mubr.bf16.mxu1 %v2780_v61 }
  0x96   :  { %1334 = vmatmul.mubr.bf16.gmra.mxu0 %v2778_v62 }
  0x97   :  { %1341 = vmatprep.mubr.bf16.mxu0 %v2783_v63  ;;  %v1563_v63 = vld [vmem:[%s3723_s5 + $0x48] sm:$0xff] }
  0x98   :  { %1431 = vmatmul.mubr.bf16.gmra.mxu1 %v2782_v0 }
  0x99   :  { %1438 = vmatprep.mubr.bf16.mxu1 %v2787_v1  ;;  %2569 = vmatpush3.msra.mxu1 %v1563_v63 }
  0x9a   :  { %2570 = vmatprep.subr.mxu1 %v2832_v17 }
  0x9e   :  { %1342 = vmatmul.mubr.bf16.gmra.mxu0 %v2785_v2 }
  0x9f   :  { %1349 = vmatprep.mubr.bf16.mxu0 %v2790_v3 }
  0xa0   :  { %1439 = vmatmul.mubr.bf16.gmra.mxu1 %v2789_v4  ;;  %v1562_v4 = vld [vmem:[%s3723_s5 + $0x40] sm:$0xff] }
  0xa1   :  { %1446 = vmatprep.mubr.bf16.mxu1 %v2794_v5  ;;  %2571 = vmatpush3.msra.mxu1 %v1562_v4 }
  0xa2   :  { %2572 = vmatprep.subr.mxu1 %v2832_v17 }
  0xa6   :  { %1350 = vmatmul.mubr.bf16.gmra.mxu0 %v2792_v6 }
  0xa7   :  { %2540 = vmatprep.mubr.bf16.mxu0 %v2797_v7 }
  0xa8   :  { %1447 = vmatmul.mubr.bf16.gmra.mxu1 %v2796_v8 }
  0xa9   :  { %2588 = vmatprep.mubr.msk.f32.mxu1 %vm2833_vm0, %v2832_v17 }
  0xae   :  { %2541 = vmatmul.mubr.bf16.vlgmr.msra.gmra.mxu0 %v2798_v9  ;;  %v1561_v9 = vld [vmem:[%s3723_s5 + $0x38] sm:$0xff] }
  0xaf   :  { %2544 = vmatprep.mubr.bf16.mxu0 %v2799_v10  ;;  %2592 = vmatpush3.msra.mxu0 %v1569_v16 }
  0xb0   :  { %2593 = vmatprep.subr.mxu0 %v2832_v17  ;;  %2573 = vmatpush3.msra.mxu1 %v1561_v9 }
  0xb1   :  { %2594 = vmatpush3.msra.mxu0 %v1568_v18  ;;  %2574 = vmatprep.subr.mxu1 %v2832_v17 }
  0xb2   :  { %2595 = vmatprep.subr.mxu0 %v2832_v17 }
  0xb3   :  { %2596 = vmatpush3.msra.mxu0 %v1567_v24 }
  0xb4   :  { %2597 = vmatprep.subr.mxu0 %v2832_v17 }
  0xb5   :  { %2598 = vmatpush3.msra.mxu0 %v1566_v32 }
  0xb6   :  { %2545 = vmatmul.mubr.bf16.gmra.mxu0 %v2800_v11  ;;  %2599 = vmatprep.subr.mxu0 %v2832_v17 }
  0xb7   :  { %2548 = vmatprep.mubr.bf16.mxu0 %v2801_v12  ;;  %2600 = vmatpush3.msra.mxu0 %v1565_v45 }
  0xb8   :  { %2601 = vmatprep.subr.mxu0 %v2832_v17 }
  0xb9   :  { %2602 = vmatpush3.msra.mxu0 %v1564_v54 }
  0xba   :  { %2603 = vmatprep.subr.mxu0 %v2832_v17 }
  0xbb   :  { %2604 = vmatpush3.msra.mxu0 %v1563_v63 }
  0xbc   :  { %2605 = vmatprep.subr.mxu0 %v2832_v17 }
  0xbd   :  { %2606 = vmatpush3.msra.mxu0 %v1562_v4 }
  0xbe   :  { %2549 = vmatmul.mubr.bf16.gmra.mxu0 %v2802_v13  ;;  %2607 = vmatprep.subr.mxu0 %v2832_v17 }
  0xbf   :  { %2552 = vmatprep.mubr.bf16.mxu0 %v2803_v14  ;;  %2608 = vmatpush3.msra.mxu0 %v1561_v9  ;;  %v1560_v14 = vld [vmem:[%s3723_s5 + $0x30] sm:$0xff] }
  0xc0   :  { %2609 = vmatprep.subr.mxu0 %v2832_v17  ;;  %2575 = vmatpush3.msra.mxu1 %v1560_v14 }
  0xc1   :  { %2610 = vmatpush3.msra.mxu0 %v1560_v14  ;;  %2576 = vmatprep.subr.mxu1 %v2832_v17 }
  0xc2   :  { %2611 = vmatprep.subr.mxu0 %v2832_v17 }
  0xc6   :  { %2553 = vmatmul.mubr.bf16.gmra.mxu0 %v2804_v15 }
  0xc7   :  { %2623 = vmatprep.mubr.msk.f32.mxu0 %vm2833_vm0, %v2832_v17 }
  0xee   :  { %v2234_v19 = vpop.f32.mrf.mxu0 }
  0xf0   :  { %v2235_v21 = vpop.f32.mrf.mxu0  ;;  %v2298_v23 = vpop.f32.mrf.mxu1 }
  0xf1   :  { %v2236_v22 = vadd.f32 %v2235_v21, %v2234_v19  ;;  %v1559_v21 = vld [vmem:[%s3723_s5 + $0x28] sm:$0xff] }
  0xf2   :  { %v2237_v25 = vpop.f32.mrf.mxu0  ;;  %v2299_v27 = vpop.f32.mrf.mxu1  ;;  %2577 = vmatpush3.msra.mxu1 %v1559_v21  ;;  %2612 = vmatpush3.msra.mxu0 %v1559_v21 }
  0xf3   :  { %v1102_v26 = vadd.f32 %v2236_v22, %v3319_v20  ;;  %v2300_v28 = vadd.f32 %v2299_v27, %v2298_v23  ;;  %2578 = vmatprep.subr.mxu1 %v2832_v17  ;;  %2613 = vmatprep.subr.mxu0 %v2832_v17 }
  0xf4   :  { %v2238_v29 = vpop.f32.mrf.mxu0  ;;  %v2301_v31 = vpop.f32.mrf.mxu1 }
  0xf5   :  { %v2239_v30 = vadd.f32 %v2238_v29, %v2237_v25  ;;  %v3330_v33 = vadd.f32 %v2300_v28, %v1102_v26  ;;  %v1558_v26 = vld [vmem:[%s3723_s5 + $0x20] sm:$0xff] }
  0xf6   :  { %v2240_v34 = vpop.f32.mrf.mxu0  ;;  %v2302_v36 = vpop.f32.mrf.mxu1  ;;  %2579 = vmatpush3.msra.mxu1 %v1558_v26  ;;  %2614 = vmatpush3.msra.mxu0 %v1558_v26 }
  0xf7   :  { %v1105_v35 = vadd.f32 %v2239_v30, %v3319_v20  ;;  %v2303_v37 = vadd.f32 %v2302_v36, %v2301_v31  ;;  %2580 = vmatprep.subr.mxu1 %v2832_v17  ;;  %v1557_v31 = vld [vmem:[%s3723_s5 + $0x18] sm:$0xff]  ;;  %2615 = vmatprep.subr.mxu0 %v2832_v17 }
  0xf8   :  { %v2241_v38 = vpop.f32.mrf.mxu0  ;;  %v2304_v40 = vpop.f32.mrf.mxu1  ;;  %2581 = vmatpush3.msra.mxu1 %v1557_v31  ;;  %2616 = vmatpush3.msra.mxu0 %v1557_v31 }
  0xf9   :  { %v2242_v39 = vadd.f32 %v2241_v38, %v2240_v34  ;;  %v3335_v41 = vadd.f32 %v2303_v37, %v1105_v35  ;;  %2582 = vmatprep.subr.mxu1 %v2832_v17  ;;  %v1556_v37 = vld [vmem:[%s3723_s5 + $0x10] sm:$0xff]  ;;  %2617 = vmatprep.subr.mxu0 %v2832_v17 }
  0xfa   :  { %v2243_v42 = vpop.f32.mrf.mxu0  ;;  %v2305_v44 = vpop.f32.mrf.mxu1  ;;  %2583 = vmatpush3.msra.mxu1 %v1556_v37  ;;  %2618 = vmatpush3.msra.mxu0 %v1556_v37 }
  0xfb   :  { %v1110_v43 = vadd.f32 %v2242_v39, %v3319_v20  ;;  %v2306_v46 = vadd.f32 %v2305_v44, %v2304_v40  ;;  %2584 = vmatprep.subr.mxu1 %v2832_v17  ;;  %2619 = vmatprep.subr.mxu0 %v2832_v17 }
  0xfc   :  { %v2244_v47 = vpop.f32.mrf.mxu0  ;;  %v2307_v49 = vpop.f32.mrf.mxu1 }
  0xfd   :  { %v2245_v48 = vadd.f32 %v2244_v47, %v2243_v42  ;;  %v3343_v50 = vadd.f32 %v2306_v46, %v1110_v43  ;;  %v1555_v43 = vld [vmem:[%s3723_s5 + $0x8] sm:$0xff] }
  0xfe   :  { %v2246_v51 = vpop.f32.mrf.mxu0  ;;  %v2308_v53 = vpop.f32.mrf.mxu1  ;;  %2585 = vmatpush3.msra.mxu1 %v1555_v43  ;;  %2620 = vmatpush3.msra.mxu0 %v1555_v43 }
  0xff   :  { %v1113_v52 = vadd.f32 %v2245_v48, %v3319_v20  ;;  %v2309_v55 = vadd.f32 %v2308_v53, %v2307_v49  ;;  %2586 = vmatprep.subr.mxu1 %v2832_v17  ;;  %v1554_v48 = vld [vmem:[%s3723_s5] sm:$0xff]  ;;  %2621 = vmatprep.subr.mxu0 %v2832_v17 }
 0x100   :  { %v2247_v56 = vpop.f32.mrf.mxu0  ;;  %v2310_v58 = vpop.f32.mrf.mxu1  ;;  %2587 = vmatpush3.msra.mxu1 %v1554_v48  ;;  %2622 = vmatpush3.msra.mxu0 %v1554_v48 }
 0x101   :  { %v2248_v57 = vadd.f32 %v2247_v56, %v2246_v51  ;;  %v3351_v59 = vadd.f32 %v2309_v55, %v1113_v52 }
 0x102   :  { %v2249_v60 = vpop.f32.mrf.mxu0  ;;  %v2311_v62 = vpop.f32.mrf.mxu1 }
 0x103   :  { %v1118_v61 = vadd.f32 %v2248_v57, %v3319_v20  ;;  %v2312_v0 = vadd.f32 %v2311_v62, %v2310_v58 }
 0x104   :  { %v2250_v1 = vpop.f32.mrf.mxu0  ;;  %v2313_v3 = vpop.f32.mrf.mxu1 }
 0x105   :  { %v2251_v2 = vadd.f32 %v2250_v1, %v2249_v60  ;;  %v3362_v5 = vadd.f32 %v2312_v0, %v1118_v61 }
 0x106   :  { %v2252_v6 = vpop.f32.mrf.mxu0  ;;  %v2314_v8 = vpop.f32.mrf.mxu1 }
 0x107   :  { %v1121_v7 = vadd.f32 %v2251_v2, %v3319_v20  ;;  %v2315_v10 = vadd.f32 %v2314_v8, %v2313_v3 }
 0x108   :  { %v2253_v11 = vpop.f32.mrf.mxu0  ;;  %v2316_v13 = vpop.f32.mrf.mxu1 }
 0x109   :  { %v2254_v12 = vadd.f32 %v2253_v11, %v2252_v6  ;;  %v3375_v15 = vadd.f32 %v2315_v10, %v1121_v7 }
 0x10a   :  { %v2255_v16 = vpop.f32.mrf.mxu0  ;;  %v2317_v19 = vpop.f32.mrf.mxu1 }
 0x10b   :  { %v1126_v18 = vadd.f32 %v2254_v12, %v3319_v20  ;;  %v2318_v22 = vadd.f32 %v2317_v19, %v2316_v13 }
 0x10c   :  { %v2256_v23 = vpop.f32.mrf.mxu0  ;;  %v2319_v25 = vpop.f32.mrf.mxu1 }
 0x10d   :  { %v2257_v24 = vadd.f32 %v2256_v23, %v2255_v16  ;;  %v3388_v27 = vadd.f32 %v2318_v22, %v1126_v18 }
 0x10e   :  { %v2258_v28 = vpop.f32.mrf.mxu0  ;;  %v2320_v30 = vpop.f32.mrf.mxu1 }
 0x10f   :  { %v1129_v29 = vadd.f32 %v2257_v24, %v3319_v20  ;;  %v2321_v32 = vadd.f32 %v2320_v30, %v2319_v25 }
 0x110   :  { %v2259_v34 = vpop.f32.mrf.mxu0  ;;  %v2322_v36 = vpop.f32.mrf.mxu1 }
 0x111   :  { %v2260_v35 = vadd.f32 %v2259_v34, %v2258_v28  ;;  %v3401_v38 = vadd.f32 %v2321_v32, %v1129_v29 }
 0x112   :  { %v2261_v39 = vpop.f32.mrf.mxu0  ;;  %v2323_v42 = vpop.f32.mrf.mxu1 }
 0x113   :  { %v1134_v40 = vadd.f32 %v2260_v35, %v3319_v20  ;;  %v2324_v44 = vadd.f32 %v2323_v42, %v2322_v36 }
 0x114   :  { %v2262_v45 = vpop.f32.mrf.mxu0  ;;  %v2325_v47 = vpop.f32.mrf.mxu1 }
 0x115   :  { %v2263_v46 = vadd.f32 %v2262_v45, %v2261_v39  ;;  %v3414_v49 = vadd.f32 %v2324_v44, %v1134_v40 }
 0x116   :  { %v2264_v51 = vpop.f32.mrf.mxu0  ;;  %v2326_v53 = vpop.f32.mrf.mxu1 }
 0x117   :  { %v1137_v52 = vadd.f32 %v2263_v46, %v3319_v20  ;;  %v2327_v54 = vadd.f32 %v2326_v53, %v2325_v47 }
 0x118   :  { %v2265_v55 = vpop.f32.mrf.mxu0  ;;  %v2328_v57 = vpop.f32.mrf.mxu1 }
 0x119   :  { %v2266_v56 = vadd.f32 %v2265_v55, %v2264_v51  ;;  %v3419_v58 = vadd.f32 %v2327_v54, %v1137_v52 }
 0x11a   :  { %v2267_v60 = vpop.f32.mrf.mxu0  ;;  %v2329_v62 = vpop.f32.mrf.mxu1 }
 0x11b   :  { %3725 = vst [vmem:[#allocation5_spill] sm:$0xff] %v3419_v58  ;;  %v1142_v61 = vadd.f32 %v2266_v56, %v3319_v20  ;;  %v2330_v63 = vadd.f32 %v2329_v62, %v2328_v57 }
 0x11c   :  { %v2268_v0 = vpop.f32.mrf.mxu0  ;;  %v2331_v2 = vpop.f32.mrf.mxu1 }
 0x11d   :  { %v2269_v1 = vadd.f32 %v2268_v0, %v2267_v60  ;;  %v3422_v3 = vadd.f32 %v2330_v63, %v1142_v61 }
 0x11e   :  { %v2270_v4 = vpop.f32.mrf.mxu0  ;;  %v2332_v17 = vpop.f32.mrf.mxu1 }
 0x11f   :  { %3726 = vst [vmem:[#allocation6_spill] sm:$0xff] %v3422_v3  ;;  %v1145_v6 = vadd.f32 %v2269_v1, %v3319_v20  ;;  %v2333_v7 = vadd.f32 %v2332_v17, %v2331_v2 }
 0x120   :  { %v2271_v8 = vpop.f32.mrf.mxu0  ;;  %v2334_v10 = vpop.f32.mrf.mxu1 }
 0x121   :  { %v2272_v9 = vadd.f32 %v2271_v8, %v2270_v4  ;;  %v3425_v11 = vadd.f32 %v2333_v7, %v1145_v6 }
 0x122   :  { %v2273_v12 = vpop.f32.mrf.mxu0  ;;  %v2335_v14 = vpop.f32.mrf.mxu1 }
 0x123   :  { %3727 = vst [vmem:[#allocation7_spill] sm:$0xff] %v3425_v11  ;;  %v1150_v13 = vadd.f32 %v2272_v9, %v3319_v20  ;;  %v2336_v16 = vadd.f32 %v2335_v14, %v2334_v10 }
 0x124   :  { %v2274_v18 = vpop.f32.mrf.mxu0  ;;  %v2337_v21 = vpop.f32.mrf.mxu1 }
 0x125   :  { %v2275_v19 = vadd.f32 %v2274_v18, %v2273_v12  ;;  %v3428_v22 = vadd.f32 %v2336_v16, %v1150_v13 }
 0x126   :  { %v2276_v23 = vpop.f32.mrf.mxu0  ;;  %v2338_v25 = vpop.f32.mrf.mxu1 }
 0x127   :  { %3728 = vst [vmem:[#allocation8_spill] sm:$0xff] %v3428_v22  ;;  %v1153_v24 = vadd.f32 %v2275_v19, %v3319_v20  ;;  %v2339_v26 = vadd.f32 %v2338_v25, %v2337_v21 }
 0x128   :  { %v2277_v28 = vpop.f32.mrf.mxu0  ;;  %v2340_v30 = vpop.f32.mrf.mxu1 }
 0x129   :  { %v2278_v29 = vadd.f32 %v2277_v28, %v2276_v23  ;;  %v3431_v31 = vadd.f32 %v2339_v26, %v1153_v24 }
 0x12a   :  { %v2279_v32 = vpop.f32.mrf.mxu0  ;;  %v2341_v35 = vpop.f32.mrf.mxu1 }
 0x12b   :  { %3729 = vst [vmem:[#allocation9_spill] sm:$0xff] %v3431_v31  ;;  %v1158_v34 = vadd.f32 %v2278_v29, %v3319_v20  ;;  %v2342_v36 = vadd.f32 %v2341_v35, %v2340_v30 }
 0x12c   :  { %v2280_v37 = vpop.f32.mrf.mxu0  ;;  %v3436_v40 = vpop.f32.mrf.mxu1 }
 0x12d   :  { %v3434_v39 = vadd.f32 %v2280_v37, %v2279_v32  ;;  %v3438_v42 = vadd.f32 %v2342_v36, %v1158_v34 }
 0x12e   :  { %v2362_v43 = vpop.f32.mrf.mxu0  ;;  %v3440_v44 = vpop.f32.mrf.mxu1 }
 0x12f   :  { %3730 = vst [vmem:[#allocation10_spill] sm:$0xff] %v3438_v42 }
 0x130   :  { %v2363_v45 = vpop.f32.mrf.mxu0  ;;  %v2426_v47 = vpop.f32.mrf.mxu1 }
 0x131   :  { %v2364_v46 = vadd.f32 %v2363_v45, %v2362_v43 }
 0x132   :  { %v2365_v48 = vpop.f32.mrf.mxu0  ;;  %v2427_v52 = vpop.f32.mrf.mxu1 }
 0x133   :  { %v3443_v51 = vadd.f32 %v2364_v46, %v3330_v33 }
 0x134   :  { %v2366_v53 = vpop.f32.mrf.mxu0  ;;  %v2429_v54 = vpop.f32.mrf.mxu1 }
 0x135   :  { %v2367_v58 = vadd.f32 %v2366_v53, %v2365_v48 }
 0x136   :  { %v2368_v55 = vpop.f32.mrf.mxu0  ;;  %v2430_v56 = vpop.f32.mrf.mxu1 }
 0x138   :  { %v2369_v57 = vpop.f32.mrf.mxu0  ;;  %v2432_v60 = vpop.f32.mrf.mxu1 }
 0x13a   :  { %v2371_v61 = vpop.f32.mrf.mxu0  ;;  %v2433_v62 = vpop.f32.mrf.mxu1 }
 0x13c   :  { %v2372_v63 = vpop.f32.mrf.mxu0  ;;  %v2435_v0 = vpop.f32.mrf.mxu1 }
 0x13e   :  { %v2374_v1 = vpop.f32.mrf.mxu0  ;;  %v2436_v2 = vpop.f32.mrf.mxu1 }
 0x13f   :  { %v2437_v48 = vadd.f32 %v2436_v2, %v2435_v0 }
 0x140   :  { %v2375_v4 = vpop.f32.mrf.mxu0  ;;  %v2438_v6 = vpop.f32.mrf.mxu1 }
 0x142   :  { %v2377_v17 = vpop.f32.mrf.mxu0  ;;  %v2439_v7 = vpop.f32.mrf.mxu1 }
 0x144   :  { %v2378_v8 = vpop.f32.mrf.mxu0  ;;  %v2441_v33 = vpop.f32.mrf.mxu1 }
 0x145   :  { %v2379_v53 = vadd.f32 %v2378_v8, %v2377_v17  ;;  %v1161_v8 = vadd.f32 %v3434_v39, %v3319_v20 }
 0x146   :  { %v2380_v9 = vpop.f32.mrf.mxu0  ;;  %v2442_v10 = vpop.f32.mrf.mxu1 }
 0x148   :  { %v2381_v12 = vpop.f32.mrf.mxu0  ;;  %v3445_v13 = vpop.f32.mrf.mxu1 }
 0x14a   :  { %v2383_v14 = vpop.f32.mrf.mxu0  ;;  %v2445_v16 = vpop.f32.mrf.mxu1 }
 0x14c   :  { %v2384_v18 = vpop.f32.mrf.mxu0  ;;  %v2447_v19 = vpop.f32.mrf.mxu1 }
 0x14e   :  { %v2386_v21 = vpop.f32.mrf.mxu0  ;;  %v2448_v23 = vpop.f32.mrf.mxu1 }
 0x150   :  { %v2387_v24 = vpop.f32.mrf.mxu0  ;;  %v3447_v25 = vpop.f32.mrf.mxu1 }
 0x151   :  { %3731 = vst [vmem:[#allocation11_spill] sm:$0xff] %v3447_v25 }
 0x152   :  { %v3449_v26 = vpop.f32.mrf.mxu0  ;;  %v3451_v28 = vpop.f32.mrf.mxu1 }
 0x153   :  { %3732 = vst [vmem:[#allocation12_spill] sm:$0xff] %v3451_v28  ;;  %v2431_v28 = vadd.f32 %v2430_v56, %v2429_v54  ;;  %v1315_v56 = vadd.f32 %v2379_v53, %v3375_v15 }
 0x154   :  { %v3453_v29 = vpop.f32.mrf.mxu0  ;;  %v3455_v30 = vpop.f32.mrf.mxu1 }
 0x155   :  { %3733 = vst [vmem:[#allocation13_spill] sm:$0xff] %v3455_v30 }
 0x156   :  { %v3457_v32 = vpop.f32.mrf.mxu0  ;;  %v3459_v34 = vpop.f32.mrf.mxu1 }
 0x157   :  { %3734 = vst [vmem:[#allocation14_spill] sm:$0xff] %v3459_v34 }
 0x158   :  { %v3461_v35 = vpop.f32.mrf.mxu0  ;;  %v3465_v37 = vpop.f32.mrf.mxu1 }
 0x159   :  { %3736 = vst [vmem:[#allocation16_spill] sm:$0xff] %v3465_v37 }
 0x15a   :  { %v3463_v36 = vpop.f32.mrf.mxu0  ;;  %v3471_v46 = vpop.f32.mrf.mxu1 }
 0x15b   :  { %3735 = vst [vmem:[#allocation15_spill] sm:$0xff] %v3463_v36  ;;  %3739 = vst [vmem:[#allocation19_spill] sm:$0xff] %v3471_v46  ;;  %v2373_v46 = vadd.f32 %v2372_v63, %v2371_v61  ;;  %v2376_v36 = vadd.f32 %v2375_v4, %v2374_v1  ;;  %v2440_v61 = vadd.f32 %v2439_v7, %v2438_v6 }
 0x15c   :  { %v3467_v43 = vpop.f32.mrf.mxu0  ;;  %v3477_v22 = vpop.f32.mrf.mxu1  ;;  %v2382_v63 = vadd.f32 %v2381_v12, %v2380_v9  ;;  %v2388_v6 = vadd.f32 %v2387_v24, %v2386_v21 }
 0x15d   :  { %3737 = vst [vmem:[#allocation17_spill] sm:$0xff] %v3467_v43  ;;  %3742 = vst [vmem:[#allocation22_spill] sm:$0xff] %v3477_v22 }
 0x15e   :  { %v3469_v45 = vpop.f32.mrf.mxu0  ;;  %v3483_v34 = vpop.f32.mrf.mxu1  ;;  %v1320_v0 = vadd.f32 %v2382_v63, %v3388_v27 }
 0x15f   :  { %3738 = vst [vmem:[#allocation18_spill] sm:$0xff] %v3469_v45  ;;  %3745 = vst [vmem:[#allocation25_spill] sm:$0xff] %v3483_v34  ;;  %v2370_v45 = vadd.f32 %v2369_v57, %v2368_v55  ;;  %v2434_v34 = vadd.f32 %v2433_v62, %v2432_v60  ;;  %v1312_v57 = vadd.f32 %v2376_v36, %v3362_v5 }
 0x160   :  { %v3473_v42 = vpop.f32.mrf.mxu0  ;;  %v3489_v43 = vpop.f32.mrf.mxu1 }
 0x161   :  { %3740 = vst [vmem:[#allocation20_spill] sm:$0xff] %v3473_v42 }
 0x162   :  { %v3475_v31 = vpop.f32.mrf.mxu0  ;;  %v3495_v25 = vpop.f32.mrf.mxu1 }
 0x163   :  { %3741 = vst [vmem:[#allocation21_spill] sm:$0xff] %v3475_v31  ;;  %v2428_v31 = vadd.f32 %v2427_v52, %v2426_v47  ;;  %v2385_v52 = vadd.f32 %v2384_v18, %v2383_v14  ;;  %v2394_v18 = vadd.f32 %v3461_v35, %v3457_v32 }
 0x164   :  { %v3479_v11 = vpop.f32.mrf.mxu0 }
 0x165   :  { %3743 = vst [vmem:[#allocation23_spill] sm:$0xff] %v3479_v11  ;;  %v1299_v11 = vadd.f32 %v2367_v58, %v3335_v41  ;;  %v1393_v47 = vadd.f32 %v2428_v31, %v3443_v51  ;;  %v3500_v41 = vpop.f32.mrf.mxu1  ;;  %v1409_v31 = vadd.f32 %v2440_v61, %v1312_v57  ;;  %v2446_v51 = vadd.f32 %v2445_v16, %v3445_v13  ;;  %v3753_v61 = vld [vmem:[#allocation5_spill] sm:$0xff] }
 0x166   :  { %v3481_v3 = vpop.f32.mrf.mxu0  ;;  %v1323_v4 = vadd.f32 %v2385_v52, %v3401_v38  ;;  %v2345_v38 = vadd.f32 %v3440_v44, %v3436_v40  ;;  %v2391_v16 = vadd.f32 %v3453_v29, %v3449_v26  ;;  %v1328_v40 = vadd.f32 %v2388_v6, %v3414_v49  ;;  %v3750_v26 = vld [vmem:[#allocation17_spill] sm:$0xff]  ;;  %v3755_v52 = vld [vmem:[#allocation14_spill] sm:$0xff]  ;;  %v3759_v6 = vld [vmem:[#allocation7_spill] sm:$0xff] }
 0x167   :  { %3744 = vst [vmem:[#allocation24_spill] sm:$0xff] %v3481_v3  ;;  %v1304_v3 = vadd.f32 %v2370_v45, %v3343_v50  ;;  %v1396_v54 = vadd.f32 %v2431_v28, %v1299_v11  ;;  %v3512_v11 = vpop.f32.mrf.mxu1  ;;  %v1417_v20 = vadd.f32 %v2446_v51, %v1320_v0  ;;  %v3747_v28 = vld [vmem:[#allocation11_spill] sm:$0xff]  ;;  %v3751_v45 = vld [vmem:[#allocation18_spill] sm:$0xff] }
 0x168   :  { %v3485_v30 = vpop.f32.mrf.mxu0  ;;  %v3752_v32 = vld [vmem:[#allocation20_spill] sm:$0xff]  ;;  %v1331_v63 = vadd.f32 %v2391_v16, %v3753_v61  ;;  %v3766_v61 = vld [vmem:[#allocation9_spill] sm:$0xff] }
 0x169   :  { %v1401_v58 = vadd.f32 %v2434_v34, %v1304_v3  ;;  %v2449_v3 = vadd.f32 %v2448_v23, %v2447_v19  ;;  %v2468_v44 = vpop.f32.mrf.mxu1  ;;  %v3748_v34 = vld [vmem:[#allocation12_spill] sm:$0xff]  ;;  %v2400_v35 = vadd.f32 %v3752_v32, %v3751_v45 }
 0x16a   :  { %v3487_v37 = vpop.f32.mrf.mxu0  ;;  %v2452_v36 = vadd.f32 %v3748_v34, %v3747_v28 }
 0x16b   :  { %3746 = vst [vmem:[#allocation26_spill] sm:$0xff] %v3487_v37  ;;  %v1307_v37 = vadd.f32 %v2373_v46, %v3351_v59  ;;  %v2443_v59 = vadd.f32 %v2442_v10, %v2441_v33  ;;  %v1420_v39 = vadd.f32 %v2449_v3, %v1323_v4  ;;  %v2469_v0 = vpop.f32.mrf.mxu1 }
 0x16c   :  { %v3491_v42 = vpop.f32.mrf.mxu0 }
 0x16d   :  { %v1404_v60 = vadd.f32 %v2437_v48, %v1307_v37  ;;  %v1412_v9 = vadd.f32 %v2443_v59, %v1315_v56  ;;  %v3749_v37 = vld [vmem:[#allocation15_spill] sm:$0xff]  ;;  %v3757_v56 = vld [vmem:[#allocation16_spill] sm:$0xff]  ;;  %v2471_v34 = vpop.f32.mrf.mxu1 }
 0x16e   :  { %v2542_v22 = vpop.f32.mrf.mxu0  ;;  %v2397_v29 = vadd.f32 %v3750_v26, %v3749_v37  ;;  %v3758_v59 = vld [vmem:[#allocation19_spill] sm:$0xff]  ;;  %v1258_v37 = vadd.f32 %v2345_v38, %v1161_v8  ;;  %v3765_v26 = vld [vmem:[#allocation24_spill] sm:$0xff] }
 0x16f   :  { %v3506_v5 = vadd.f32 %v2542_v22, %v1401_v58  ;;  %v3756_v58 = vld [vmem:[#allocation6_spill] sm:$0xff] }
 0x170   :  { %v1489_v55 = vpop.f32.mrf.mxu0 }
 0x171   :  { %v3502_v50 = vadd.f32 %v1489_v55, %v1393_v47  ;;  %v1585_v10 = vmul.f32 %v3506_v5, %v3506_v5  ;;  %v3754_v47 = vld [vmem:[#allocation13_spill] sm:$0xff] }
 0x172   :  { %v2543_v1 = vpop.f32.mrf.mxu0 }
 0x173   :  { %v1583_v15 = vmul.f32 %v3502_v50, %v3502_v50  ;;  %v3516_v7 = vadd.f32 %v2543_v1, %v1404_v60  ;;  %v2455_v1 = vadd.f32 %v3755_v52, %v3754_v47  ;;  %v2458_v60 = vadd.f32 %v3758_v59, %v3757_v56  ;;  %v3767_v52 = vld [vmem:[#allocation26_spill] sm:$0xff] }
 0x174   :  { %v1492_v62 = vpop.f32.mrf.mxu0 }
 0x175   :  { %v3508_v2 = vadd.f32 %v1492_v62, %v1396_v54  ;;  %v1586_v21 = vmul.f32 %v3516_v7, %v3516_v7  ;;  %v1336_v54 = vadd.f32 %v2394_v18, %v3756_v58  ;;  %v2409_v58 = vadd.f32 %v3491_v42, %v3767_v52 }
 0x176   :  { %v2546_v17 = vpop.f32.mrf.mxu0 }
 0x177   :  { %v1570_v27 = vadd.f32 %v3508_v2, %v3502_v50  ;;  %v1584_v22 = vmul.f32 %v3508_v2, %v3508_v2  ;;  %v3545_v46 = vadd.f32 %v2546_v17, %v1417_v20  ;;  %v1339_v17 = vadd.f32 %v2397_v29, %v3759_v6 }
 0x178   :  { %v1505_v33 = vpop.f32.mrf.mxu0  ;;  %v2406_v29 = vadd.f32 %v3485_v30, %v3765_v26 }
 0x179   :  { %v1571_v12 = vadd.f32 %v1570_v27, %v3506_v5  ;;  %v1591_v13 = vadd.f32 %v1584_v22, %v1583_v15  ;;  %v3529_v14 = vadd.f32 %v1505_v33, %v1409_v31  ;;  %v3760_v15 = vld [vmem:[#allocation22_spill] sm:$0xff]  ;;  %v3761_v27 = vld [vmem:[#allocation25_spill] sm:$0xff]  ;;  %v3762_v33 = vld [vmem:[#allocation8_spill] sm:$0xff]  ;;  %v1589_v16 = vmul.f32 %v3545_v46, %v3545_v46 }
 0x17a   :  { %v2547_v19 = vpop.f32.mrf.mxu0  ;;  %v2461_v22 = vadd.f32 %v3761_v27, %v3760_v15 }
 0x17b   :  { %v1592_v23 = vadd.f32 %v1591_v13, %v1585_v10  ;;  %v1572_v24 = vadd.f32 %v1571_v12, %v3516_v7  ;;  %v1587_v53 = vmul.f32 %v3529_v14, %v3529_v14  ;;  %v3558_v51 = vadd.f32 %v2547_v19, %v1420_v39  ;;  %v3763_v39 = vld [vmem:[#allocation21_spill] sm:$0xff]  ;;  %v3764_v19 = vld [vmem:[#allocation23_spill] sm:$0xff] }
 0x17c   :  { %v1508_v48 = vpop.f32.mrf.mxu0  ;;  %v1425_v10 = vadd.f32 %v2452_v36, %v1328_v40  ;;  %v2464_v13 = vadd.f32 %v3495_v25, %v3489_v43  ;;  %v1428_v43 = vadd.f32 %v2455_v1, %v1331_v63  ;;  %v1436_v32 = vadd.f32 %v2461_v22, %v1339_v17  ;;  %v2472_v63 = vpop.f32.mrf.mxu1 }
 0x17d   :  { %v1573_v49 = vadd.f32 %v1572_v24, %v3529_v14  ;;  %v1593_v55 = vadd.f32 %v1592_v23, %v1586_v21  ;;  %v3550_v57 = vadd.f32 %v1508_v48, %v1412_v9  ;;  %v1344_v9 = vadd.f32 %v2400_v35, %v3762_v33 }
 0x17e   :  { %v2550_v62 = vpop.f32.mrf.mxu0  ;;  %v2403_v21 = vadd.f32 %v3764_v19, %v3763_v39  ;;  %v1433_v23 = vadd.f32 %v2458_v60, %v1336_v54  ;;  %v1590_v40 = vmul.f32 %v3558_v51, %v3558_v51  ;;  %v2467_v60 = vadd.f32 %v3512_v11, %v3500_v41 }
 0x17f   :  { %v1594_v31 = vadd.f32 %v1593_v55, %v1587_v53  ;;  %v1574_v4 = vadd.f32 %v1573_v49, %v3550_v57  ;;  %v1588_v3 = vmul.f32 %v3550_v57, %v3550_v57  ;;  %v1441_v55 = vadd.f32 %v2464_v13, %v1344_v9 }
 0x180   :  { %v1521_v12 = vpop.f32.mrf.mxu0  ;;  %v3581_v45 = vadd.f32 %v2550_v62, %v1433_v23  ;;  %v1347_v47 = vadd.f32 %v2403_v21, %v3766_v61  ;;  %v3768_v62 = vld [vmem:[#allocation10_spill] sm:$0xff]  ;;  %v1355_v22 = vadd.f32 %v2409_v58, %v1258_v37  ;;  %v2473_v33 = vadd.f32 %v2472_v63, %v2471_v34 }
 0x181   :  { %v1575_v18 = vadd.f32 %v1574_v4, %v3545_v46  ;;  %v1595_v20 = vadd.f32 %v1594_v31, %v1588_v3  ;;  %v3574_v24 = vadd.f32 %v1521_v12, %v1425_v10  ;;  %v1352_v42 = vadd.f32 %v2406_v29, %v3768_v62 }
 0x182   :  { %v2551_v28 = vpop.f32.mrf.mxu0  ;;  %v2470_v31 = vadd.f32 %v2469_v0, %v2468_v44  ;;  %v1800_v4 = vmul.f32 %v3581_v45, %v3581_v45  ;;  %v1452_v34 = vadd.f32 %v2473_v33, %v1355_v22 }
 0x183   :  { %v1576_v36 = vadd.f32 %v1575_v18, %v3558_v51  ;;  %v1596_v25 = vadd.f32 %v1595_v20, %v1589_v16  ;;  %v1798_v8 = vmul.f32 %v3574_v24, %v3574_v24  ;;  %v3590_v38 = vadd.f32 %v2551_v28, %v1436_v32 }
 0x184   :  { %v1524_v35 = vpop.f32.mrf.mxu0  ;;  %v1449_v13 = vadd.f32 %v2470_v31, %v1352_v42  ;;  %v1444_v18 = vadd.f32 %v2467_v60, %v1347_v47 }
 0x185   :  { %v1577_v48 = vrot.slane %v1576_v36, 4  ;;  %v1597_v49 = vadd.f32 %v1596_v25, %v1590_v40  ;;  %v3583_v53 = vadd.f32 %v1524_v35, %v1428_v43  ;;  %v1801_v9 = vmul.f32 %v3590_v38, %v3590_v38 }
 0x186   :  { %v2554_v30 = vpop.f32.mrf.mxu0 }
 0x187   :  { %v1578_v1 = vadd.f32 %v1577_v48, %v1576_v36  ;;  %v1598_v54 = vrot.slane %v1597_v49, 4  ;;  %v1785_v56 = vadd.f32 %v3583_v53, %v3574_v24  ;;  %v1799_v59 = vmul.f32 %v3583_v53, %v3583_v53 }
 0x188   :  { %v1537_v3 = vpop.f32.mrf.mxu0  ;;  %v3610_v28 = vadd.f32 %v2554_v30, %v1449_v13 }
 0x189   :  { %v1579_v6 = vrot.slane %v1578_v1, 2  ;;  %v1599_v17 = vadd.f32 %v1598_v54, %v1597_v49  ;;  %v1786_v15 = vadd.f32 %v1785_v56, %v3581_v45  ;;  %v1806_v27 = vadd.f32 %v1799_v59, %v1798_v8 }
 0x18a   :  { %v3604_v10 = vadd.f32 %v1537_v3, %v1441_v55  ;;  %v2555_v41 = vpop.f32.mrf.mxu0  ;;  %v1804_v35 = vmul.f32 %v3610_v28, %v3610_v28 }
 0x18b   :  { %v1580_v11 = vadd.f32 %v1579_v6, %v1578_v1  ;;  %v1600_v12 = vrot.slane %v1599_v17, 2  ;;  %v1807_v44 = vadd.f32 %v1806_v27, %v1800_v4  ;;  %v1787_v0 = vadd.f32 %v1786_v15, %v3590_v38 }
 0x18c   :  { %v1802_v16 = vmul.f32 %v3604_v10, %v3604_v10  ;;  %v1540_v20 = vpop.f32.mrf.mxu0  ;;  %v3614_v43 = vadd.f32 %v2555_v41, %v1452_v34 }
 0x18d   :  { %v1581_v39 = vrot.slane %v1580_v11, 1  ;;  %v1601_v19 = vadd.f32 %v1600_v12, %v1599_v17  ;;  %v1788_v21 = vadd.f32 %v1787_v0, %v3604_v10  ;;  %v1808_v23 = vadd.f32 %v1807_v44, %v1801_v9 }
 0x18e   :  { %v3612_v40 = vadd.f32 %v1540_v20, %v1444_v18  ;;  %v1805_v61 = vmul.f32 %v3614_v43, %v3614_v43 }
 0x18f   :  { %v1602_v36 = vrot.slane %v1601_v19, 1  ;;  %v1809_v25 = vadd.f32 %v1808_v23, %v1802_v16  ;;  %v1582_v29 = vadd.f32 %v1581_v39, %v1580_v11  ;;  %v1683_v11 = vlaneseq }
 0x190   :  { %v1789_v37 = vadd.f32 %v1788_v21, %v3612_v40  ;;  %v1803_v26 = vmul.f32 %v3612_v40, %v3612_v40 }
 0x191   :  { %v1603_v32 = vadd.f32 %v1602_v36, %v1601_v19  ;;  %v3627_v44 = vshrl.u32 %v1683_v11, 7 }
 0x192   :  { %v1790_v48 = vadd.f32 %v1789_v37, %v3610_v28  ;;  %v1810_v49 = vadd.f32 %v1809_v25, %v1803_v26 }
 0x193   :  { %v1605_v55 = vsel %vm1604_vm1, %v1582_v29, %v1603_v32  ;;  %v1685_v0 = vsub.s32 0, %v3627_v44  ;;  %v1699_v19 = vsub.s32 1, %v3627_v44 }
 0x194   :  { %v1791_v47 = vadd.f32 %v1790_v48, %v3614_v43  ;;  %v1811_v52 = vadd.f32 %v1810_v49, %v1804_v35  ;;  %v1606_v58 = vmul.f32 0.015625, %v1605_v55  ;;  %v3643_v35 = vld [vmem:[%s3721_s3] ss:$0 sm:$0xff] }
 0x196   :  { %v1792_v8 = vrot.slane %v1791_v47, 4  ;;  %v1812_v30 = vadd.f32 %v1811_v52, %v1805_v61  ;;  %2589 = vmatmul.mubr.f32.vlgmr.msra.gmra.mxu1 %v1606_v58 }
 0x198   :  { %v1793_v63 = vadd.f32 %v1792_v8, %v1791_v47  ;;  %v1813_v1 = vrot.slane %v1812_v30, 4 }
 0x19a   :  { %v1794_v54 = vrot.slane %v1793_v63, 2  ;;  %v1814_v56 = vadd.f32 %v1813_v1, %v1812_v30 }
 0x19c   :  { %v1795_v59 = vadd.f32 %v1794_v54, %v1793_v63  ;;  %v1815_v60 = vrot.slane %v1814_v56, 2 }
 0x19e   :  { %v1796_v62 = vrot.slane %v1795_v59, 1  ;;  %v1816_v42 = vadd.f32 %v1815_v60, %v1814_v56 }
 0x1a0   :  { %v1817_v31 = vrot.slane %v1816_v42, 1  ;;  %v1797_v4 = vadd.f32 %v1796_v62, %v1795_v59 }
 0x1a2   :  { %v1818_v3 = vadd.f32 %v1817_v31, %v1816_v42 }
 0x1a4   :  { %v1819_v6 = vsel %vm1604_vm1, %v1797_v4, %v1818_v3 }
 0x1a5   :  { %v1820_v17 = vmul.f32 0.015625, %v1819_v6 }
 0x1a7   :  { %2624 = vmatmul.mubr.f32.vlgmr.msra.gmra.mxu0 %v1820_v17 }
 0x256   :  { %v1673_v15 = vpop.f32.mrf.mxu1 }
 0x257   :  { %v1677_v27 = vmul.f32 %v1673_v15, %v1673_v15  ;;  %v1686_v20 = vrot.slane %v1673_v15, %v1685_v0 }
 0x258   :  { %v2590_v22 = vpop.f32.mrf.mxu1 }
 0x259   :  { %v1679_v33 = vrot.slane %v1677_v27, 7  ;;  %v1687_v34 = vsub.f32 %v3502_v50, %v1686_v20  ;;  %v1688_v36 = vsub.f32 %v3508_v2, %v1686_v20  ;;  %v1689_v37 = vsub.f32 %v3506_v5, %v1686_v20 }
 0x25a   :  { %v1690_v26 = vsub.f32 %v3516_v7, %v1686_v20  ;;  %v1691_v29 = vsub.f32 %v3529_v14, %v1686_v20  ;;  %v1692_v48 = vsub.f32 %v3550_v57, %v1686_v20  ;;  %v1693_v50 = vsub.f32 %v3545_v46, %v1686_v20  ;;  %v3648_v14 = vld [vmem:[#allocation2] ss:$0 sm:$0xff] }
 0x25b   :  { %v1681_v9 = vsub.f32 %v1673_v15, %v1679_v33  ;;  %v1694_v2 = vsub.f32 %v3558_v51, %v1686_v20 }
 0x25d   :  { %v1682_v41 = vmax.f32 %v1681_v9, 0.0 }
 0x25f   :  { %v1695_v12 = vadd.f32 1e-05, %v1682_v41 }
 0x261   :  { %2805 = vrsqrt.f32 %v1695_v12 }
 0x267   :  { %v1887_v13 = vpop.f32.mrf.mxu0 }
 0x268   :  { %v1891_v16 = vmul.f32 %v1887_v13, %v1887_v13 }
 0x269   :  { %v2625_v18 = vpop.f32.mrf.mxu0 }
 0x26a   :  { %v1893_v39 = vrot.slane %v1891_v16, 7 }
 0x26c   :  { %v1895_v21 = vsub.f32 %v1887_v13, %v1893_v39  ;;  %v1900_v39 = vrot.slane %v1887_v13, %v1685_v0 }
 0x26e   :  { %v2806_v23 = vpop.eup %2805  ;;  %v1896_v25 = vmax.f32 %v1895_v21, 0.0  ;;  %v1908_v0 = vsub.f32 %v3614_v43, %v1900_v39 }
 0x26f   :  { %v1700_v32 = vrot.slane %v2806_v23, %v1699_v19  ;;  %v1901_v23 = vsub.f32 %v3574_v24, %v1900_v39 }
 0x270   :  { %v1909_v49 = vadd.f32 1e-05, %v1896_v25  ;;  %v1904_v25 = vsub.f32 %v3590_v38, %v1900_v39 }
 0x271   :  { %v1701_v5 = vmul.f32 %v1700_v32, %v1687_v34  ;;  %v1702_v55 = vmul.f32 %v1700_v32, %v1688_v36  ;;  %v1703_v7 = vmul.f32 %v1700_v32, %v1689_v37  ;;  %v1704_v61 = vmul.f32 %v1700_v32, %v1690_v26 }
 0x272   :  { %v1705_v47 = vmul.f32 %v1700_v32, %v1691_v29  ;;  %v1706_v52 = vmul.f32 %v1700_v32, %v1692_v48  ;;  %v1707_v58 = vmul.f32 %v1700_v32, %v1693_v50  ;;  %v1708_v8 = vmul.f32 %v1700_v32, %v1694_v2 }
 0x273   :  { %v1715_v30 = vmul.f32 %v3643_v35, %v1701_v5  ;;  %v1716_v63 = vmul.f32 %v3643_v35, %v1702_v55  ;;  %v1717_v57 = vmul.f32 %v3643_v35, %v1703_v7  ;;  %v1718_v46 = vmul.f32 %v3643_v35, %v1704_v61 }
 0x274   :  { %v1719_v51 = vmul.f32 %v3643_v35, %v1705_v47  ;;  %v1720_v1 = vmul.f32 %v3643_v35, %v1706_v52  ;;  %v1721_v54 = vmul.f32 %v3643_v35, %v1707_v58  ;;  %v1722_v56 = vmul.f32 %v3643_v35, %v1708_v8 }
 0x275   :  { %v1729_v59 = vadd.f32 %v3648_v14, %v1715_v30  ;;  %v1730_v60 = vadd.f32 %v3648_v14, %v1716_v63  ;;  %v1731_v62 = vadd.f32 %v3648_v14, %v1717_v57  ;;  %v1732_v42 = vadd.f32 %v3648_v14, %v1718_v46 }
 0x276   :  { %v1733_v31 = vadd.f32 %v3648_v14, %v1719_v51  ;;  %v1734_v4 = vadd.f32 %v3648_v14, %v1720_v1  ;;  %v1735_v3 = vadd.f32 %v3648_v14, %v1721_v54  ;;  %v1736_v6 = vadd.f32 %v3648_v14, %v1722_v56 }
 0x277   :  { %v1737_v17 = vmax.f32 %v1729_v59, 0.0  ;;  %v1738_v15 = vmax.f32 %v1730_v60, 0.0  ;;  %v1739_v27 = vmax.f32 %v1731_v62, 0.0  ;;  %v1740_v22 = vmax.f32 %v1732_v42, 0.0 }
 0x278   :  { %v1741_v33 = vmax.f32 %v1733_v31, 0.0  ;;  %v1742_v9 = vmax.f32 %v1734_v4, 0.0  ;;  %v1743_v41 = vmax.f32 %v1735_v3, 0.0  ;;  %v1744_v11 = vmax.f32 %v1736_v6, 0.0 }
 0x279   :  { %v2174_v12 = vpack.c.bf16 %v1738_v15, %v1737_v17  ;;  %v2179_v16 = vpack.c.bf16 %v1740_v22, %v1739_v27  ;;  %2807 = vrsqrt.f32 %v1909_v49  ;;  %v1902_v34 = vsub.f32 %v3583_v53, %v1900_v39 }
 0x27a   :  { %v2184_v18 = vpack.c.bf16 %v1742_v9, %v1741_v33  ;;  %v2189_v20 = vpack.c.bf16 %v1744_v11, %v1743_v41  ;;  %v1903_v36 = vsub.f32 %v3581_v45, %v1900_v39  ;;  %v1905_v26 = vsub.f32 %v3604_v10, %v1900_v39 }
 0x27b   :  { %2175 = vst [vmem:[%s3724_s6] sm:$0xff] %v2174_v12   ;;  %2211 = vst [vmem:[%s3724_s6 + $0x8] sm:$0xff] %v2179_v16   ;;  %v1906_v29 = vsub.f32 %v3612_v40, %v1900_v39  ;;  %v1907_v32 = vsub.f32 %v3610_v28, %v1900_v39 }
 0x27c   :  { %2212 = vst [vmem:[%s3724_s6 + $0x10] sm:$0xff] %v2184_v18   ;;  %2213 = vst [vmem:[%s3724_s6 + $0x18] sm:$0xff] %v2189_v20  }
 0x286   :  { %v2808_v21 = vpop.eup %2807 }
 0x287   :  { %v1914_v37 = vrot.slane %v2808_v21, %v1699_v19 }
 0x289   :  { %v1915_v13 = vmul.f32 %v1914_v37, %v1901_v23  ;;  %v1916_v48 = vmul.f32 %v1914_v37, %v1902_v34  ;;  %v1917_v24 = vmul.f32 %v1914_v37, %v1903_v36  ;;  %v1918_v50 = vmul.f32 %v1914_v37, %v1904_v25 }
 0x28a   :  { %v1919_v53 = vmul.f32 %v1914_v37, %v1905_v26  ;;  %v1920_v2 = vmul.f32 %v1914_v37, %v1906_v29  ;;  %v1921_v45 = vmul.f32 %v1914_v37, %v1907_v32  ;;  %v1922_v49 = vmul.f32 %v1914_v37, %v1908_v0 }
 0x28b   :  { %v1923_v38 = vmul.f32 %v3643_v35, %v1915_v13  ;;  %v1924_v44 = vmul.f32 %v3643_v35, %v1916_v48  ;;  %v1925_v10 = vmul.f32 %v3643_v35, %v1917_v24  ;;  %v1926_v40 = vmul.f32 %v3643_v35, %v1918_v50 }
 0x28c   :  { %v1927_v28 = vmul.f32 %v3643_v35, %v1919_v53  ;;  %v1928_v43 = vmul.f32 %v3643_v35, %v1920_v2  ;;  %v1929_v19 = vmul.f32 %v3643_v35, %v1921_v45  ;;  %v1930_v5 = vmul.f32 %v3643_v35, %v1922_v49 }
 0x28d   :  { %v1931_v55 = vadd.f32 %v3648_v14, %v1923_v38  ;;  %v1932_v7 = vadd.f32 %v3648_v14, %v1924_v44  ;;  %v1933_v61 = vadd.f32 %v3648_v14, %v1925_v10  ;;  %v1934_v47 = vadd.f32 %v3648_v14, %v1926_v40 }
 0x28e   :  { %v1935_v52 = vadd.f32 %v3648_v14, %v1927_v28  ;;  %v1936_v58 = vadd.f32 %v3648_v14, %v1928_v43  ;;  %v1937_v8 = vadd.f32 %v3648_v14, %v1929_v19  ;;  %v1938_v30 = vadd.f32 %v3648_v14, %v1930_v5 }
 0x28f   :  { %v1939_v63 = vmax.f32 %v1931_v55, 0.0  ;;  %v1940_v57 = vmax.f32 %v1932_v7, 0.0  ;;  %v1941_v46 = vmax.f32 %v1933_v61, 0.0  ;;  %v1942_v35 = vmax.f32 %v1934_v47, 0.0 }
 0x290   :  { %v1943_v51 = vmax.f32 %v1935_v52, 0.0  ;;  %v1944_v1 = vmax.f32 %v1936_v58, 0.0  ;;  %v1945_v54 = vmax.f32 %v1937_v8, 0.0  ;;  %v1946_v56 = vmax.f32 %v1938_v30, 0.0 }
 0x291   :  { %v2194_v59 = vpack.c.bf16 %v1940_v57, %v1939_v63  ;;  %v2199_v60 = vpack.c.bf16 %v1942_v35, %v1941_v46 }
 0x292   :  { %v2204_v62 = vpack.c.bf16 %v1944_v1, %v1943_v51  ;;  %v2209_v42 = vpack.c.bf16 %v1946_v56, %v1945_v54 }
 0x293   :  { %2214 = vst [vmem:[%s3724_s6 + $0x20] sm:$0xff] %v2194_v59   ;;  %2215 = vst [vmem:[%s3724_s6 + $0x28] sm:$0xff] %v2199_v60  }
 0x294   :  { %2216 = vst [vmem:[%s3724_s6 + $0x30] sm:$0xff] %v2204_v62   ;;  %2217 = vst [vmem:[%s3724_s6 + $0x38] sm:$0xff] %v2209_v42  }
 0x295   :  { %1991 = vsyncpa [#allocation3], 1 }

// kernel: cnn_classifier_forward.17
= control target key start
LH: loop header
LB: loop body
LE: loop exit
PB: predicated region body
PF: predicated region fallthrough
CT: control target
= control target key end

     0   :  { %vm1710_vm0 = vmmov 0   ;;  %vm998_vm1 = vcmask 1040384   ;;  %s2137_s1 = inlined_call_operand.vmem [shape: bf16[1152,128], index: 1, kind: input, shape index: {}]   ;;  %s2138_s0 = inlined_call_operand.vmem [shape: bf16[32,1152], index: 0, kind: input, shape index: {}]   ;;  %s2139_s5 = inlined_call_operand.vmem [shape: f32[128,128], index: 5, kind: input, shape index: {}]   ;;  %s2140_s2 = inlined_call_operand.vmem [shape: f32[1,128], index: 2, kind: input, shape index: {}]   ;;  %s2141_s3 = inlined_call_operand.vmem [shape: f32[1,128], index: 3, kind: input, shape index: {}]   ;;  %s2142_s4 = inlined_call_operand.vmem [shape: f32[1,128], index: 4, kind: input, shape index: {}]   ;;  %s2143_s6 = inlined_call_operand.vmem [shape: bf16[32,128], index: 6, kind: output, shape index: {}]  }
   0x1   :  { %v1607_v0 = vld [vmem:[%s2137_s1 + $0x78] sm:$0xff]   ;;  %v1611_v4 = vld [vmem:[%s2137_s1 + $0x70] sm:$0xff]   ;;  %v1615_v8 = vld [vmem:[%s2137_s1 + $0x68] sm:$0xff]  }
   0x2   :  { %v1608_v1 = vld [vmem:[%s2137_s1 + $0x38] sm:$0xff]   ;;  %1359 = vmatprep.subr.bf16.mxu0 %v1607_v0  ;;  %v1612_v5 = vld [vmem:[%s2137_s1 + $0x30] sm:$0xff]   ;;  %v1616_v9 = vld [vmem:[%s2137_s1 + $0x28] sm:$0xff]  }
   0x3   :  { %v1609_v2 = vld [vmem:[%s2137_s1 + $0xf8] sm:$0xff]   ;;  %1360 = vmatpush3.bf16.msra.mxu0 %v1608_v1  ;;  %v1613_v6 = vld [vmem:[%s2137_s1 + $0xf0] sm:$0xff]   ;;  %v1617_v10 = vld [vmem:[%s2137_s1 + $0xe8] sm:$0xff]  }
   0x4   :  { %v1610_v3 = vld [vmem:[%s2137_s1 + $0xb8] sm:$0xff]   ;;  %1387 = vmatprep.subr.bf16.mxu1 %v1609_v2  ;;  %1361 = vmatprep.subr.bf16.mxu0 %v1611_v4  ;;  %v1614_v7 = vld [vmem:[%s2137_s1 + $0xb0] sm:$0xff]   ;;  %v1618_v11 = vld [vmem:[%s2137_s1 + $0xa8] sm:$0xff]  }
   0x5   :  { %1388 = vmatpush3.bf16.msra.mxu1 %v1610_v3  ;;  %v1619_v12 = vld [vmem:[%s2137_s1 + $0x60] sm:$0xff]   ;;  %v1623_v16 = vld [vmem:[%s2137_s1 + $0x58] sm:$0xff]   ;;  %v1627_v20 = vld [vmem:[%s2137_s1 + $0x50] sm:$0xff]  }
   0x6   :  { %1389 = vmatprep.subr.bf16.mxu1 %v1613_v6  ;;  %v1620_v13 = vld [vmem:[%s2137_s1 + $0x20] sm:$0xff]   ;;  %v1624_v17 = vld [vmem:[%s2137_s1 + $0x18] sm:$0xff]   ;;  %v1628_v21 = vld [vmem:[%s2137_s1 + $0x10] sm:$0xff]  }
   0x7   :  { %1362 = vmatpush3.bf16.msra.mxu0 %v1612_v5  ;;  %v1621_v14 = vld [vmem:[%s2137_s1 + $0xe0] sm:$0xff]   ;;  %v1625_v18 = vld [vmem:[%s2137_s1 + $0xd8] sm:$0xff]   ;;  %v1629_v22 = vld [vmem:[%s2137_s1 + $0xd0] sm:$0xff]  }
   0x8   :  { %1363 = vmatprep.subr.bf16.mxu0 %v1615_v8  ;;  %v1622_v15 = vld [vmem:[%s2137_s1 + $0xa0] sm:$0xff]   ;;  %v1626_v19 = vld [vmem:[%s2137_s1 + $0x98] sm:$0xff]   ;;  %v1630_v23 = vld [vmem:[%s2137_s1 + $0x90] sm:$0xff]  }
   0x9   :  { %1390 = vmatpush3.bf16.msra.mxu1 %v1614_v7  ;;  %v1631_v24 = vld [vmem:[%s2137_s1 + $0x48] sm:$0xff]   ;;  %v1635_v28 = vld [vmem:[%s2137_s1 + $0x40] sm:$0xff]   ;;  %v1642_v34 = vld [vmem:[%s2137_s1 + $0x178] sm:$0xff]  }
   0xa   :  { %1391 = vmatprep.subr.bf16.mxu1 %v1617_v10  ;;  %v1632_v25 = vld [vmem:[%s2137_s1 + $0x8] sm:$0xff]   ;;  %v1636_v29 = vld [vmem:[%s2137_s1] sm:$0xff]   ;;  %v1646_v37 = vld [vmem:[%s2137_s1 + $0x138] sm:$0xff]  }
   0xb   :  { %1364 = vmatpush3.bf16.msra.mxu0 %v1616_v9  ;;  %v1633_v26 = vld [vmem:[%s2137_s1 + $0xc8] sm:$0xff]   ;;  %v1637_v30 = vld [vmem:[%s2137_s1 + $0xc0] sm:$0xff]   ;;  %v1647_v38 = vld [vmem:[%s2137_s1 + $0x1f8] sm:$0xff]  }
   0xc   :  { %1365 = vmatprep.subr.bf16.mxu0 %v1619_v12  ;;  %v1634_v27 = vld [vmem:[%s2137_s1 + $0x88] sm:$0xff]   ;;  %v1638_v31 = vld [vmem:[%s2138_s0] ss:$36 sps:$4 sm:$0xff]   ;;  %v1648_v39 = vld [vmem:[%s2137_s1 + $0x1b8] sm:$0xff]  }
   0xd   :  { %1392 = vmatpush3.bf16.msra.mxu1 %v1618_v11  ;;  %v1640_v32 = vld [vmem:[%s2138_s0 + $0x4] ss:$36 sps:$4 sm:$0xff]   ;;  %v1645_v36 = vld [vmem:[%s2138_s0 + $0xc] ss:$36 sps:$4 sm:$0xff]   ;;  %v1661_v52 = vld [vmem:[%s2137_s1 + $0x158] sm:$0xff]  }
   0xe   :  { %1393 = vmatprep.subr.bf16.mxu1 %v1621_v14  ;;  %v1641_v33 = vld [vmem:[%s2137_s1 + $0x80] sm:$0xff]   ;;  %751 = vmatprep.mubr.bf16.mxu0 %v1640_v32  ;;  %v1643_v35 = vld [vmem:[%s2138_s0 + $0x8] ss:$36 sps:$4 sm:$0xff]   ;;  %v1649_v40 = vld [vmem:[%s2137_s1 + $0x170] sm:$0xff]  }
   0xf   :  { %1366 = vmatpush3.bf16.msra.mxu0 %v1620_v13  ;;  %800 = vmatprep.mubr.bf16.mxu1 %v1645_v36  ;;  %v1650_v41 = vld [vmem:[%s2137_s1 + $0x130] sm:$0xff]   ;;  %v1653_v44 = vld [vmem:[%s2137_s1 + $0x168] sm:$0xff]   ;;  %v1657_v48 = vld [vmem:[%s2137_s1 + $0x160] sm:$0xff]  }
  0x10   :  { %1367 = vmatprep.subr.bf16.mxu0 %v1623_v16  ;;  %v1651_v42 = vld [vmem:[%s2137_s1 + $0x1f0] sm:$0xff]   ;;  %v1654_v45 = vld [vmem:[%s2137_s1 + $0x128] sm:$0xff]   ;;  %v1658_v49 = vld [vmem:[%s2137_s1 + $0x120] sm:$0xff]  }
  0x11   :  { %1394 = vmatpush3.bf16.msra.mxu1 %v1622_v15  ;;  %v1652_v43 = vld [vmem:[%s2137_s1 + $0x1b0] sm:$0xff]   ;;  %v1655_v46 = vld [vmem:[%s2137_s1 + $0x1e8] sm:$0xff]   ;;  %v1659_v50 = vld [vmem:[%s2137_s1 + $0x1e0] sm:$0xff]  }
  0x12   :  { %1395 = vmatprep.subr.bf16.mxu1 %v1625_v18  ;;  %v1656_v47 = vld [vmem:[%s2137_s1 + $0x1a8] sm:$0xff]   ;;  %v1660_v51 = vld [vmem:[%s2137_s1 + $0x1a0] sm:$0xff]   ;;  %v1662_v53 = vld [vmem:[%s2137_s1 + $0x118] sm:$0xff]  }
  0x13   :  { %1368 = vmatpush3.bf16.msra.mxu0 %v1624_v17  ;;  %v1663_v54 = vld [vmem:[%s2138_s0 + $0x4c] ss:$36 sps:$4 sm:$0xff]   ;;  %v1665_v55 = vld [vmem:[%s2137_s1 + $0x1d8] sm:$0xff]   ;;  %v1679_v4 = vld [vmem:[%s2137_s1 + $0x140] sm:$0xff]  }
  0x14   :  { %1369 = vmatprep.subr.bf16.mxu0 %v1627_v20  ;;  %v1666_v56 = vld [vmem:[%s2138_s0 + $0x48] ss:$36 sps:$4 sm:$0xff]   ;;  %v1667_v57 = vld [vmem:[%s2137_s1 + $0x198] sm:$0xff]   ;;  %v1670_v59 = vld [vmem:[%s2137_s1 + $0x150] sm:$0xff]  }
  0x15   :  { %1396 = vmatpush3.bf16.msra.mxu1 %v1626_v19  ;;  %v1668_v58 = vld [vmem:[%s2138_s0 + $0x54] ss:$36 sps:$4 sm:$0xff]   ;;  %v1675_v0 = vld [vmem:[%s2137_s1 + $0x148] sm:$0xff]   ;;  %v1680_v5 = vld [vmem:[%s2137_s1 + $0x100] sm:$0xff]  }
  0x16   :  { %1397 = vmatprep.subr.bf16.mxu1 %v1629_v22  ;;  %v1671_v60 = vld [vmem:[%s2138_s0 + $0x50] ss:$36 sps:$4 sm:$0xff]   ;;  %v1676_v1 = vld [vmem:[%s2137_s1 + $0x108] sm:$0xff]   ;;  %v1681_v6 = vld [vmem:[%s2137_s1 + $0x1c0] sm:$0xff]  }
  0x17   :  { %1370 = vmatpush3.bf16.msra.mxu0 %v1628_v21  ;;  %v1672_v61 = vld [vmem:[%s2137_s1 + $0x110] sm:$0xff]   ;;  %v1677_v2 = vld [vmem:[%s2137_s1 + $0x1c8] sm:$0xff]   ;;  %v1685_v9 = vld [vmem:[%s2137_s1 + $0x180] sm:$0xff]  }
  0x18   :  { %1371 = vmatprep.subr.bf16.mxu0 %v1631_v24  ;;  %v1673_v62 = vld [vmem:[%s2137_s1 + $0x1d0] sm:$0xff]   ;;  %v1678_v3 = vld [vmem:[%s2137_s1 + $0x188] sm:$0xff]   ;;  %v1686_v10 = vld [vmem:[%s2137_s1 + $0x238] sm:$0xff]  }
  0x19   :  { %1398 = vmatpush3.bf16.msra.mxu1 %v1630_v23  ;;  %v1674_v63 = vld [vmem:[%s2137_s1 + $0x190] sm:$0xff]   ;;  %v1687_v11 = vld [vmem:[%s2138_s0 + $0x18] ss:$36 sps:$4 sm:$0xff]   ;;  %v1694_v16 = vld [vmem:[%s2137_s1 + $0x228] sm:$0xff]  }
  0x1a   :  { %1399 = vmatprep.subr.bf16.mxu1 %v1633_v26  ;;  %v1682_v7 = vld [vmem:[%s2138_s0 + $0x10] ss:$36 sps:$4 sm:$0xff]   ;;  %v1689_v12 = vld [vmem:[%s2138_s0 + $0x1c] ss:$36 sps:$4 sm:$0xff]   ;;  %v1695_v17 = vld [vmem:[%s2138_s0 + $0x64] ss:$36 sps:$4 sm:$0xff]  }
  0x1b   :  { %1372 = vmatpush3.bf16.msra.mxu0 %v1632_v25  ;;  %v1684_v8 = vld [vmem:[%s2138_s0 + $0x14] ss:$36 sps:$4 sm:$0xff]   ;;  %v1691_v14 = vld [vmem:[%s2138_s0 + $0x5c] ss:$36 sps:$4 sm:$0xff]   ;;  %v1701_v23 = vld [vmem:[%s2137_s1 + $0x208] sm:$0xff]   ;;  %v1709_v26 = vmov 0.0  }
  0x1c   :  { %1373 = vmatprep.subr.bf16.mxu0 %v1635_v28  ;;  %v1690_v13 = vld [vmem:[%s2137_s1 + $0x230] sm:$0xff]   ;;  %v1693_v15 = vld [vmem:[%s2138_s0 + $0x58] ss:$36 sps:$4 sm:$0xff]   ;;  %v1697_v18 = vld [vmem:[%s2138_s0 + $0x60] ss:$36 sps:$4 sm:$0xff]  }
  0x1d   :  { %1400 = vmatpush3.bf16.msra.mxu1 %v1634_v27  ;;  %v1698_v19 = vld [vmem:[%s2137_s1 + $0x220] sm:$0xff]   ;;  %v1699_v20 = vld [vmem:[%s2137_s1 + $0x218] sm:$0xff]   ;;  %v1700_v22 = vld [vmem:[%s2137_s1 + $0x210] sm:$0xff]  }
  0x1e   :  { %1401 = vmatprep.subr.bf16.mxu1 %v1637_v30  ;;  %v1703_v21 = vld [vmem:[%s2138_s0 + $0x20] ss:$36 sps:$4 sm:$0xff]   ;;  %v1704_v25 = vld [vmem:[%s2138_s0 + $0x68] ss:$36 sps:$4 sm:$0xff]   ;;  %v981_v27 = vld [vmem:[%s2139_s5 + $0x78] sm:$0xff] }
  0x1f   :  { %1374 = vmatpush3.bf16.msra.mxu0 %v1636_v29  ;;  %v1702_v24 = vld [vmem:[%s2137_s1 + $0x200] sm:$0xff]   ;;  %v980_v28 = vld [vmem:[%s2139_s5 + $0x70] sm:$0xff]  ;;  %v979_v29 = vld [vmem:[%s2139_s5 + $0x68] sm:$0xff] }
  0x20   :  { %1415 = vmatprep.subr.bf16.mxu0 %v1642_v34  ;;  %v978_v30 = vld [vmem:[%s2139_s5 + $0x60] sm:$0xff]  ;;  %v976_v32 = vld [vmem:[%s2139_s5 + $0x50] sm:$0xff] }
  0x21   :  { %1402 = vmatpush3.bf16.msra.mxu1 %v1641_v33  ;;  %v975_v33 = vld [vmem:[%s2139_s5 + $0x48] sm:$0xff]  ;;  %v974_v34 = vld [vmem:[%s2139_s5 + $0x40] sm:$0xff]  ;;  %v972_v36 = vld [vmem:[%s2139_s5 + $0x30] sm:$0xff] }
  0x22   :  { %752 = vmatmul.mubr.bf16.vlgmr.msra.gmra.mxu0 %v1638_v31  ;;  %1443 = vmatprep.subr.bf16.mxu1 %v1647_v38  ;;  %v977_v31 = vld [vmem:[%s2139_s5 + $0x58] sm:$0xff]  ;;  %v970_v38 = vld [vmem:[%s2139_s5 + $0x20] sm:$0xff] }
  0x23   :  { %1416 = vmatpush3.bf16.msra.mxu0 %v1646_v37  ;;  %759 = vmatprep.mubr.bf16.mxu0 %v1663_v54  ;;  %v971_v37 = vld [vmem:[%s2139_s5 + $0x28] sm:$0xff] }
  0x24   :  { %801 = vmatmul.mubr.bf16.vlgmr.msra.gmra.mxu1 %v1643_v35  ;;  %1417 = vmatprep.subr.bf16.mxu0 %v1649_v40  ;;  %v973_v35 = vld [vmem:[%s2139_s5 + $0x38] sm:$0xff]  ;;  %v968_v40 = vld [vmem:[%s2139_s5 + $0x10] sm:$0xff] }
  0x25   :  { %1444 = vmatpush3.bf16.msra.mxu1 %v1648_v39  ;;  %808 = vmatprep.mubr.bf16.mxu1 %v1668_v58  ;;  %v969_v39 = vld [vmem:[%s2139_s5 + $0x18] sm:$0xff] }
  0x26   :  { %1445 = vmatprep.subr.bf16.mxu1 %v1651_v42  ;;  %v966_v42 = vld [vmem:[%s2139_s5] sm:$0xff] }
  0x27   :  { %1418 = vmatpush3.bf16.msra.mxu0 %v1650_v41  ;;  %v967_v41 = vld [vmem:[%s2139_s5 + $0x8] sm:$0xff] }
  0x28   :  { %1419 = vmatprep.subr.bf16.mxu0 %v1653_v44 }
  0x29   :  { %1446 = vmatpush3.bf16.msra.mxu1 %v1652_v43 }
  0x2a   :  { %1447 = vmatprep.subr.bf16.mxu1 %v1655_v46  ;;  %760 = vmatmul.mubr.bf16.gmra.mxu0 %v1666_v56 }
  0x2b   :  { %1420 = vmatpush3.bf16.msra.mxu0 %v1654_v45  ;;  %849 = vmatprep.mubr.bf16.mxu0 %v1684_v8 }
  0x2c   :  { %1421 = vmatprep.subr.bf16.mxu0 %v1657_v48  ;;  %809 = vmatmul.mubr.bf16.gmra.mxu1 %v1671_v60 }
  0x2d   :  { %1448 = vmatpush3.bf16.msra.mxu1 %v1656_v47  ;;  %898 = vmatprep.mubr.bf16.mxu1 %v1689_v12 }
  0x2e   :  { %1449 = vmatprep.subr.bf16.mxu1 %v1659_v50 }
  0x2f   :  { %1422 = vmatpush3.bf16.msra.mxu0 %v1658_v49 }
  0x30   :  { %1423 = vmatprep.subr.bf16.mxu0 %v1661_v52 }
  0x31   :  { %1450 = vmatpush3.bf16.msra.mxu1 %v1660_v51 }
  0x32   :  { %1451 = vmatprep.subr.bf16.mxu1 %v1665_v55 }
  0x33   :  { %1424 = vmatpush3.bf16.msra.mxu0 %v1662_v53 }
  0x34   :  { %1425 = vmatprep.subr.bf16.mxu0 %v1670_v59 }
  0x35   :  { %1452 = vmatpush3.bf16.msra.mxu1 %v1667_v57 }
  0x36   :  { %1453 = vmatprep.subr.bf16.mxu1 %v1673_v62 }
  0x37   :  { %1426 = vmatpush3.bf16.msra.mxu0 %v1672_v61 }
  0x38   :  { %1427 = vmatprep.subr.bf16.mxu0 %v1675_v0 }
  0x39   :  { %1454 = vmatpush3.bf16.msra.mxu1 %v1674_v63 }
  0x3a   :  { %1455 = vmatprep.subr.bf16.mxu1 %v1677_v2 }
  0x3b   :  { %1428 = vmatpush3.bf16.msra.mxu0 %v1676_v1 }
  0x3c   :  { %1429 = vmatprep.subr.bf16.mxu0 %v1679_v4 }
  0x3d   :  { %1456 = vmatpush3.bf16.msra.mxu1 %v1678_v3 }
  0x3e   :  { %1457 = vmatprep.subr.bf16.mxu1 %v1681_v6 }
  0x3f   :  { %1430 = vmatpush3.bf16.msra.mxu0 %v1680_v5 }
  0x40   :  { %1515 = vmatprep.subr.bf16.mxu0 %v1686_v10 }
  0x41   :  { %1458 = vmatpush3.bf16.msra.mxu1 %v1685_v9 }
  0x42   :  { %850 = vmatmul.mubr.bf16.vlgmr.msra.gmra.mxu0 %v1682_v7  ;;  %1535 = vmatprep.subr.mxu1 %v1709_v26 }
  0x43   :  { %1516 = vmatpush3.bf16.msra.mxu0 %v1686_v10  ;;  %857 = vmatprep.mubr.bf16.mxu0 %v1691_v14  ;;  %v1247_v10 = vld [vmem:[%s2140_s2] ss:$0 sm:$0xff] }
  0x44   :  { %899 = vmatmul.mubr.bf16.vlgmr.msra.gmra.mxu1 %v1687_v11  ;;  %1517 = vmatprep.subr.bf16.mxu0 %v1690_v13 }
  0x45   :  { %906 = vmatprep.mubr.bf16.mxu1 %v1695_v17  ;;  %1536 = vmatpush3.msra.mxu1 %v981_v27 }
  0x46   :  { %1537 = vmatprep.subr.mxu1 %v1709_v26 }
  0x47   :  { %1518 = vmatpush3.bf16.msra.mxu0 %v1690_v13  ;;  %1538 = vmatpush3.msra.mxu1 %v980_v28 }
  0x48   :  { %1519 = vmatprep.subr.bf16.mxu0 %v1694_v16  ;;  %1539 = vmatprep.subr.mxu1 %v1709_v26 }
  0x49   :  { %1540 = vmatpush3.msra.mxu1 %v979_v29 }
  0x4a   :  { %858 = vmatmul.mubr.bf16.gmra.mxu0 %v1693_v15  ;;  %1541 = vmatprep.subr.mxu1 %v1709_v26 }
  0x4b   :  { %1520 = vmatpush3.bf16.msra.mxu0 %v1694_v16  ;;  %1531 = vmatprep.mubr.bf16.mxu0 %v1703_v21 }
  0x4c   :  { %907 = vmatmul.mubr.bf16.gmra.mxu1 %v1697_v18  ;;  %1521 = vmatprep.subr.bf16.mxu0 %v1698_v19 }
  0x4d   :  { %1542 = vmatpush3.msra.mxu1 %v978_v30  ;;  %1567 = vmatprep.mubr.msk.f32.mxu1 %vm1710_vm0, %v1709_v26 }
  0x4e   :  { %1543 = vmatprep.subr.mxu1 %v1709_v26 }
  0x4f   :  { %1522 = vmatpush3.bf16.msra.mxu0 %v1698_v19  ;;  %1544 = vmatpush3.msra.mxu1 %v977_v31 }
  0x50   :  { %1523 = vmatprep.subr.bf16.mxu0 %v1699_v20  ;;  %1545 = vmatprep.subr.mxu1 %v1709_v26 }
  0x51   :  { %1546 = vmatpush3.msra.mxu1 %v976_v32 }
  0x52   :  { %1547 = vmatprep.subr.mxu1 %v1709_v26 }
  0x53   :  { %1524 = vmatpush3.bf16.msra.mxu0 %v1699_v20  ;;  %1548 = vmatpush3.msra.mxu1 %v975_v33 }
  0x54   :  { %1525 = vmatprep.subr.bf16.mxu0 %v1700_v22  ;;  %1549 = vmatprep.subr.mxu1 %v1709_v26 }
  0x55   :  { %1550 = vmatpush3.msra.mxu1 %v974_v34 }
  0x56   :  { %1551 = vmatprep.subr.mxu1 %v1709_v26 }
  0x57   :  { %1526 = vmatpush3.bf16.msra.mxu0 %v1700_v22  ;;  %1552 = vmatpush3.msra.mxu1 %v973_v35 }
  0x58   :  { %1527 = vmatprep.subr.bf16.mxu0 %v1701_v23  ;;  %1553 = vmatprep.subr.mxu1 %v1709_v26 }
  0x59   :  { %1554 = vmatpush3.msra.mxu1 %v972_v36 }
  0x5a   :  { %1555 = vmatprep.subr.mxu1 %v1709_v26 }
  0x5b   :  { %1528 = vmatpush3.bf16.msra.mxu0 %v1701_v23  ;;  %1556 = vmatpush3.msra.mxu1 %v971_v37 }
  0x5c   :  { %1529 = vmatprep.subr.bf16.mxu0 %v1702_v24  ;;  %1557 = vmatprep.subr.mxu1 %v1709_v26 }
  0x5d   :  { %1558 = vmatpush3.msra.mxu1 %v970_v38 }
  0x5e   :  { %1559 = vmatprep.subr.mxu1 %v1709_v26 }
  0x5f   :  { %1530 = vmatpush3.bf16.msra.mxu0 %v1702_v24  ;;  %1560 = vmatpush3.msra.mxu1 %v969_v39 }
  0x60   :  { %1570 = vmatprep.subr.mxu0 %v1709_v26  ;;  %1561 = vmatprep.subr.mxu1 %v1709_v26 }
  0x61   :  { %1562 = vmatpush3.msra.mxu1 %v968_v40 }
  0x62   :  { %1532 = vmatmul.mubr.bf16.vlgmr.msra.gmra.mxu0 %v1704_v25  ;;  %1563 = vmatprep.subr.mxu1 %v1709_v26 }
  0x63   :  { %1571 = vmatpush3.msra.mxu0 %v981_v27  ;;  %1564 = vmatpush3.msra.mxu1 %v967_v41 }
  0x64   :  { %1572 = vmatprep.subr.mxu0 %v1709_v26  ;;  %1602 = vmatprep.mubr.msk.f32.mxu0 %vm1710_vm0, %v1709_v26 }
  0x65   :  { %1573 = vmatpush3.msra.mxu0 %v980_v28  ;;  %1565 = vmatprep.subr.mxu1 %v1709_v26 }
  0x66   :  { %1574 = vmatprep.subr.mxu0 %v1709_v26  ;;  %1566 = vmatpush3.msra.mxu1 %v966_v42 }
  0x67   :  { %1575 = vmatpush3.msra.mxu0 %v979_v29 }
  0x68   :  { %1576 = vmatprep.subr.mxu0 %v1709_v26 }
  0x69   :  { %1577 = vmatpush3.msra.mxu0 %v978_v30 }
  0x6a   :  { %1578 = vmatprep.subr.mxu0 %v1709_v26 }
  0x6b   :  { %1579 = vmatpush3.msra.mxu0 %v977_v31 }
  0x6c   :  { %1580 = vmatprep.subr.mxu0 %v1709_v26 }
  0x6d   :  { %1581 = vmatpush3.msra.mxu0 %v976_v32 }
  0x6e   :  { %1582 = vmatprep.subr.mxu0 %v1709_v26 }
  0x6f   :  { %1583 = vmatpush3.msra.mxu0 %v975_v33 }
  0x70   :  { %1584 = vmatprep.subr.mxu0 %v1709_v26 }
  0x71   :  { %1585 = vmatpush3.msra.mxu0 %v974_v34 }
  0x72   :  { %1586 = vmatprep.subr.mxu0 %v1709_v26 }
  0x73   :  { %1587 = vmatpush3.msra.mxu0 %v973_v35 }
  0x74   :  { %1588 = vmatprep.subr.mxu0 %v1709_v26 }
  0x75   :  { %1589 = vmatpush3.msra.mxu0 %v972_v36 }
  0x76   :  { %1590 = vmatprep.subr.mxu0 %v1709_v26 }
  0x77   :  { %1591 = vmatpush3.msra.mxu0 %v971_v37 }
  0x78   :  { %1592 = vmatprep.subr.mxu0 %v1709_v26 }
  0x79   :  { %1593 = vmatpush3.msra.mxu0 %v970_v38 }
  0x7a   :  { %1594 = vmatprep.subr.mxu0 %v1709_v26 }
  0x7b   :  { %1595 = vmatpush3.msra.mxu0 %v969_v39 }
  0x7c   :  { %1596 = vmatprep.subr.mxu0 %v1709_v26 }
  0x7d   :  { %1597 = vmatpush3.msra.mxu0 %v968_v40 }
  0x7e   :  { %1598 = vmatprep.subr.mxu0 %v1709_v26 }
  0x7f   :  { %1599 = vmatpush3.msra.mxu0 %v967_v41 }
  0x80   :  { %1600 = vmatprep.subr.mxu0 %v1709_v26 }
  0x81   :  { %1601 = vmatpush3.msra.mxu0 %v966_v42 }
  0xe2   :  { %v1375_v43 = vpop.f32.mrf.mxu0 }
  0xe4   :  { %v1403_v44 = vpop.f32.mrf.mxu1  ;;  %v1376_v45 = vpop.f32.mrf.mxu0 }
  0xe5   :  { %v1377_v7 = vadd.f32 %v1376_v45, %v1375_v43 }
  0xe6   :  { %v1404_v46 = vpop.f32.mrf.mxu1  ;;  %v1378_v47 = vpop.f32.mrf.mxu0 }
  0xe7   :  { %v754_v15 = vadd.f32 %v1377_v7, %v1247_v10  ;;  %v1405_v16 = vadd.f32 %v1404_v46, %v1403_v44 }
  0xe8   :  { %v1406_v48 = vpop.f32.mrf.mxu1  ;;  %v1379_v49 = vpop.f32.mrf.mxu0 }
  0xe9   :  { %v1380_v12 = vadd.f32 %v1379_v49, %v1378_v47  ;;  %v803_v27 = vadd.f32 %v1405_v16, %v754_v15 }
  0xea   :  { %v1381_v50 = vpop.f32.mrf.mxu0  ;;  %v1407_v51 = vpop.f32.mrf.mxu1 }
  0xeb   :  { %v757_v23 = vadd.f32 %v1380_v12, %v1247_v10  ;;  %v1408_v24 = vadd.f32 %v1407_v51, %v1406_v48 }
  0xec   :  { %v1409_v52 = vpop.f32.mrf.mxu1  ;;  %v1382_v53 = vpop.f32.mrf.mxu0 }
  0xed   :  { %v1383_v6 = vadd.f32 %v1382_v53, %v1381_v50  ;;  %v806_v35 = vadd.f32 %v1408_v24, %v757_v23 }
  0xee   :  { %v1410_v54 = vpop.f32.mrf.mxu1  ;;  %v1384_v55 = vpop.f32.mrf.mxu0 }
  0xef   :  { %v762_v13 = vadd.f32 %v1383_v6, %v1247_v10  ;;  %v1411_v14 = vadd.f32 %v1410_v54, %v1409_v52 }
  0xf0   :  { %v1412_v56 = vpop.f32.mrf.mxu1  ;;  %v1385_v57 = vpop.f32.mrf.mxu0 }
  0xf1   :  { %v1386_v11 = vadd.f32 %v1385_v57, %v1384_v55  ;;  %v811_v25 = vadd.f32 %v1411_v14, %v762_v13 }
  0xf2   :  { %v1413_v59 = vpop.f32.mrf.mxu1 }
  0xf3   :  { %v765_v19 = vadd.f32 %v1386_v11, %v1247_v10  ;;  %v1414_v20 = vadd.f32 %v1413_v59, %v1412_v56 }
  0xf5   :  { %v814_v29 = vadd.f32 %v1414_v20, %v765_v19 }
 0x102   :  { %v1431_v58 = vpop.f32.mrf.mxu0 }
 0x104   :  { %v1432_v60 = vpop.f32.mrf.mxu0  ;;  %v1459_v61 = vpop.f32.mrf.mxu1 }
 0x105   :  { %v1433_v22 = vadd.f32 %v1432_v60, %v1431_v58 }
 0x106   :  { %v1434_v62 = vpop.f32.mrf.mxu0  ;;  %v1460_v63 = vpop.f32.mrf.mxu1 }
 0x107   :  { %v852_v33 = vadd.f32 %v1433_v22, %v803_v27  ;;  %v1461_v34 = vadd.f32 %v1460_v63, %v1459_v61 }
 0x108   :  { %v1435_v0 = vpop.f32.mrf.mxu0  ;;  %v1462_v1 = vpop.f32.mrf.mxu1 }
 0x109   :  { %v1436_v30 = vadd.f32 %v1435_v0, %v1434_v62  ;;  %v901_v42 = vadd.f32 %v1461_v34, %v852_v33 }
 0x10a   :  { %v1437_v2 = vpop.f32.mrf.mxu0  ;;  %v1463_v3 = vpop.f32.mrf.mxu1 }
 0x10b   :  { %v855_v39 = vadd.f32 %v1436_v30, %v806_v35  ;;  %v1464_v40 = vadd.f32 %v1463_v3, %v1462_v1  ;;  %v1077_v35 = vlaneseq }
 0x10c   :  { %v1438_v4 = vpop.f32.mrf.mxu0  ;;  %v1465_v5 = vpop.f32.mrf.mxu1 }
 0x10d   :  { %v1439_v21 = vadd.f32 %v1438_v4, %v1437_v2  ;;  %v904_v49 = vadd.f32 %v1464_v40, %v855_v39  ;;  %v1078_v39 = vshrl.u32 %v1077_v35, 7 }
 0x10e   :  { %v1440_v8 = vpop.f32.mrf.mxu0  ;;  %v1466_v9 = vpop.f32.mrf.mxu1 }
 0x10f   :  { %v860_v31 = vadd.f32 %v1439_v21, %v811_v25  ;;  %v1467_v32 = vadd.f32 %v1466_v9, %v1465_v5  ;;  %v1079_v40 = vsub.s32 0, %v1078_v39 }
 0x110   :  { %v1441_v17 = vpop.f32.mrf.mxu0  ;;  %v1468_v18 = vpop.f32.mrf.mxu1 }
 0x111   :  { %v1442_v26 = vadd.f32 %v1441_v17, %v1440_v8  ;;  %v909_v41 = vadd.f32 %v1467_v32, %v860_v31 }
 0x112   :  { %v1469_v28 = vpop.f32.mrf.mxu1 }
 0x113   :  { %v863_v36 = vadd.f32 %v1442_v26, %v814_v29  ;;  %v1470_v37 = vadd.f32 %v1469_v28, %v1468_v18 }
 0x115   :  { %v912_v45 = vadd.f32 %v1470_v37, %v863_v36 }
 0x122   :  { %v1533_v38 = vpop.f32.mrf.mxu0 }
 0x123   :  { %v2101_v44 = vadd.f32 %v1533_v38, %v909_v41  ;;  %v1087_v41 = vsub.s32 1, %v1078_v39 }
 0x124   :  { %v949_v43 = vpop.f32.mrf.mxu0 }
 0x125   :  { %v2103_v46 = vadd.f32 %v949_v43, %v901_v42  ;;  %v1126_v51 = vmul.f32 %v2101_v44, %v2101_v44 }
 0x126   :  { %v1534_v47 = vpop.f32.mrf.mxu0 }
 0x127   :  { %v2105_v48 = vadd.f32 %v1534_v47, %v912_v45  ;;  %v989_v55 = vmul.f32 %v2103_v46, %v2103_v46 }
 0x128   :  { %v952_v50 = vpop.f32.mrf.mxu0 }
 0x129   :  { %v1119_v52 = vadd.f32 %v2105_v48, %v2101_v44  ;;  %v1127_v53 = vmul.f32 %v2105_v48, %v2105_v48  ;;  %v2113_v54 = vadd.f32 %v952_v50, %v904_v49 }
 0x12b   :  { %v1120_v56 = vrot.slane %v1119_v52, 4  ;;  %v1128_v57 = vadd.f32 %v1127_v53, %v1126_v51  ;;  %v982_v58 = vadd.f32 %v2113_v54, %v2103_v46  ;;  %v990_v59 = vmul.f32 %v2113_v54, %v2113_v54 }
 0x12d   :  { %v1121_v60 = vadd.f32 %v1120_v56, %v1119_v52  ;;  %v1129_v61 = vrot.slane %v1128_v57, 4  ;;  %v983_v62 = vrot.slane %v982_v58, 4  ;;  %v991_v63 = vadd.f32 %v990_v59, %v989_v55  ;;  %v1338_v52 = vld [vmem:[%s2141_s3] ss:$0 sm:$0xff] }
 0x12e   :  { %v1339_v59 = vld [vmem:[%s2142_s4] ss:$0 sm:$0xff] }
 0x12f   :  { %v1122_v0 = vrot.slane %v1121_v60, 2  ;;  %v1130_v1 = vadd.f32 %v1129_v61, %v1128_v57  ;;  %v984_v2 = vadd.f32 %v983_v62, %v982_v58  ;;  %v992_v3 = vrot.slane %v991_v63, 4 }
 0x131   :  { %v1123_v4 = vadd.f32 %v1122_v0, %v1121_v60  ;;  %v1131_v5 = vrot.slane %v1130_v1, 2  ;;  %v985_v6 = vrot.slane %v984_v2, 2  ;;  %v993_v7 = vadd.f32 %v992_v3, %v991_v63 }
 0x133   :  { %v1124_v8 = vrot.slane %v1123_v4, 1  ;;  %v1132_v9 = vadd.f32 %v1131_v5, %v1130_v1  ;;  %v986_v10 = vadd.f32 %v985_v6, %v984_v2  ;;  %v994_v11 = vrot.slane %v993_v7, 2 }
 0x135   :  { %v1133_v12 = vrot.slane %v1132_v9, 1  ;;  %v987_v13 = vrot.slane %v986_v10, 1  ;;  %v995_v14 = vadd.f32 %v994_v11, %v993_v7  ;;  %v1125_v15 = vadd.f32 %v1124_v8, %v1123_v4 }
 0x137   :  { %v996_v16 = vrot.slane %v995_v14, 1  ;;  %v1134_v17 = vadd.f32 %v1133_v12, %v1132_v9  ;;  %v988_v18 = vadd.f32 %v987_v13, %v986_v10 }
 0x139   :  { %v997_v19 = vadd.f32 %v996_v16, %v995_v14  ;;  %v1135_v20 = vsel %vm998_vm1, %v1125_v15, %v1134_v17 }
 0x13a   :  { %v1136_v21 = vmul.f32 0.0625, %v1135_v20 }
 0x13b   :  { %v999_v22 = vsel %vm998_vm1, %v988_v18, %v997_v19 }
 0x13c   :  { %1603 = vmatmul.mubr.f32.vlgmr.msra.gmra.mxu0 %v1136_v21  ;;  %v1000_v23 = vmul.f32 0.0625, %v999_v22 }
 0x13e   :  { %1568 = vmatmul.mubr.f32.vlgmr.msra.gmra.mxu1 %v1000_v23 }
 0x1fc   :  { %v1203_v24 = vpop.f32.mrf.mxu0 }
 0x1fd   :  { %v1207_v25 = vmul.f32 %v1203_v24, %v1203_v24  ;;  %v1216_v42 = vrot.slane %v1203_v24, %v1079_v40 }
 0x1fe   :  { %v1067_v26 = vpop.f32.mrf.mxu1  ;;  %v1604_v27 = vpop.f32.mrf.mxu0 }
 0x1ff   :  { %v1209_v28 = vrot.slane %v1207_v25, 7  ;;  %v1071_v29 = vmul.f32 %v1067_v26, %v1067_v26  ;;  %v1080_v43 = vrot.slane %v1067_v26, %v1079_v40  ;;  %v1217_v47 = vsub.f32 %v2101_v44, %v1216_v42 }
 0x200   :  { %v1569_v30 = vpop.f32.mrf.mxu1  ;;  %v1218_v49 = vsub.f32 %v2105_v48, %v1216_v42 }
 0x201   :  { %v1211_v31 = vsub.f32 %v1203_v24, %v1209_v28  ;;  %v1073_v32 = vrot.slane %v1071_v29, 7  ;;  %v1081_v53 = vsub.f32 %v2103_v46, %v1080_v43  ;;  %v1082_v57 = vsub.f32 %v2113_v54, %v1080_v43 }
 0x203   :  { %v1212_v33 = vmax.f32 %v1211_v31, 0.0  ;;  %v1075_v34 = vsub.f32 %v1067_v26, %v1073_v32 }
 0x205   :  { %v1219_v36 = vadd.f32 1e-05, %v1212_v33  ;;  %v1076_v37 = vmax.f32 %v1075_v34, 0.0 }
 0x207   :  { %1705 = vrsqrt.f32 %v1219_v36  ;;  %v1083_v38 = vadd.f32 1e-05, %v1076_v37 }
 0x209   :  { %1707 = vrsqrt.f32 %v1083_v38 }
 0x214   :  { %v1706_v45 = vpop.eup %1705 }
 0x215   :  { %v1224_v50 = vrot.slane %v1706_v45, %v1087_v41 }
 0x216   :  { %v1708_v51 = vpop.eup %1707 }
 0x217   :  { %v1225_v55 = vmul.f32 %v1224_v50, %v1217_v47  ;;  %v1226_v56 = vmul.f32 %v1224_v50, %v1218_v49  ;;  %v1088_v58 = vrot.slane %v1708_v51, %v1087_v41 }
 0x219   :  { %v1227_v44 = vmul.f32 %v1338_v52, %v1225_v55  ;;  %v1228_v60 = vmul.f32 %v1338_v52, %v1226_v56  ;;  %v1089_v48 = vmul.f32 %v1088_v58, %v1081_v53  ;;  %v1090_v61 = vmul.f32 %v1088_v58, %v1082_v57 }
 0x21b   :  { %v1229_v62 = vadd.f32 %v1339_v59, %v1227_v44  ;;  %v1230_v63 = vadd.f32 %v1339_v59, %v1228_v60  ;;  %v1097_v0 = vmul.f32 %v1338_v52, %v1089_v48  ;;  %v1098_v1 = vmul.f32 %v1338_v52, %v1090_v61 }
 0x21d   :  { %v1231_v2 = vmax.f32 %v1229_v62, 0.0  ;;  %v1232_v3 = vmax.f32 %v1230_v63, 0.0  ;;  %v1105_v46 = vadd.f32 %v1339_v59, %v1097_v0  ;;  %v1106_v4 = vadd.f32 %v1339_v59, %v1098_v1 }
 0x21f   :  { %v1356_v5 = vpack.c.bf16 %v1232_v3, %v1231_v2  ;;  %v1107_v6 = vmax.f32 %v1105_v46, 0.0  ;;  %v1108_v54 = vmax.f32 %v1106_v4, 0.0 }
 0x221   :  { %1358 = vst [vmem:[%s2143_s6 + $0x8] sm:$0xff] %v1356_v5   ;;  %v1351_v7 = vpack.c.bf16 %v1108_v54, %v1107_v6 }
 0x223   :  { %1352 = vst [vmem:[%s2143_s6] sm:$0xff] %v1351_v7  }

// kernel: cnn_classifier_forward.19
= control target key start
LH: loop header
LB: loop body
LE: loop exit
PB: predicated region body
PF: predicated region fallthrough
CT: control target
= control target key end

     0   :  { %v645_v1 = vmov 0.0   ;;  %vm646_vm0 = vmmov 0   ;;  %vm197_vm1 = vcmask 1040384   ;;  %s844_s1 = inlined_call_operand.vmem [shape: bf16[128,128], index: 1, kind: input, shape index: {}]   ;;  %s845_s0 = inlined_call_operand.vmem [shape: bf16[32,128], index: 0, kind: input, shape index: {}]   ;;  %s846_s5 = inlined_call_operand.vmem [shape: f32[128,128], index: 5, kind: input, shape index: {}]   ;;  %s847_s2 = inlined_call_operand.vmem [shape: f32[1,128], index: 2, kind: input, shape index: {}]   ;;  %s848_s6 = inlined_call_operand.vmem [shape: bf16[32,128], index: 6, kind: input, shape index: {}]   ;;  %s849_s3 = inlined_call_operand.vmem [shape: f32[1,128], index: 3, kind: input, shape index: {}]   ;;  %s850_s4 = inlined_call_operand.vmem [shape: f32[1,128], index: 4, kind: input, shape index: {}]   ;;  %s851_s7 = inlined_call_operand.vmem [shape: bf16[32,128], index: 7, kind: output, shape index: {}]  }
   0x1   :  { %v631_v0 = vld [vmem:[%s844_s1 + $0x38] sm:$0xff]   ;;  %559 = vmatprep.subr.mxu1 %v645_v1  ;;  %v632_v2 = vld [vmem:[%s844_s1 + $0x30] sm:$0xff]   ;;  %v633_v3 = vld [vmem:[%s844_s1 + $0x28] sm:$0xff]   ;;  %591 = vmatprep.mubr.msk.f32.mxu1 %vm646_vm0, %v645_v1 }
   0x2   :  { %539 = vmatprep.subr.bf16.mxu0 %v631_v0  ;;  %v634_v4 = vld [vmem:[%s844_s1 + $0x20] sm:$0xff]   ;;  %v180_v6 = vld [vmem:[%s846_s5 + $0x78] sm:$0xff]  ;;  %v179_v8 = vld [vmem:[%s846_s5 + $0x70] sm:$0xff] }
   0x3   :  { %540 = vmatpush3.bf16.msra.mxu0 %v631_v0  ;;  %v639_v5 = vld [vmem:[%s845_s0] sm:$0xff]   ;;  %560 = vmatpush3.msra.mxu1 %v180_v6  ;;  %v635_v7 = vld [vmem:[%s844_s1 + $0x18] sm:$0xff]   ;;  %v178_v9 = vld [vmem:[%s846_s5 + $0x68] sm:$0xff] }
   0x4   :  { %541 = vmatprep.subr.bf16.mxu0 %v632_v2  ;;  %555 = vmatprep.mubr.bf16.mxu0 %v639_v5  ;;  %v636_v10 = vld [vmem:[%s844_s1 + $0x10] sm:$0xff]   ;;  %v637_v11 = vld [vmem:[%s844_s1 + $0x8] sm:$0xff]   ;;  %v638_v12 = vld [vmem:[%s844_s1] sm:$0xff]  }
   0x5   :  { %561 = vmatprep.subr.mxu1 %v645_v1  ;;  %v640_v13 = vld [vmem:[%s845_s0 + $0x8] sm:$0xff]   ;;  %v177_v14 = vld [vmem:[%s846_s5 + $0x60] sm:$0xff]  ;;  %v176_v15 = vld [vmem:[%s846_s5 + $0x58] sm:$0xff] }
   0x6   :  { %562 = vmatpush3.msra.mxu1 %v179_v8  ;;  %v175_v16 = vld [vmem:[%s846_s5 + $0x50] sm:$0xff]  ;;  %v174_v17 = vld [vmem:[%s846_s5 + $0x48] sm:$0xff]  ;;  %v173_v18 = vld [vmem:[%s846_s5 + $0x40] sm:$0xff] }
   0x7   :  { %542 = vmatpush3.bf16.msra.mxu0 %v632_v2  ;;  %563 = vmatprep.subr.mxu1 %v645_v1  ;;  %v172_v19 = vld [vmem:[%s846_s5 + $0x38] sm:$0xff]  ;;  %v171_v20 = vld [vmem:[%s846_s5 + $0x30] sm:$0xff]  ;;  %v170_v21 = vld [vmem:[%s846_s5 + $0x28] sm:$0xff] }
   0x8   :  { %543 = vmatprep.subr.bf16.mxu0 %v633_v3  ;;  %564 = vmatpush3.msra.mxu1 %v178_v9  ;;  %v169_v22 = vld [vmem:[%s846_s5 + $0x20] sm:$0xff]  ;;  %v168_v23 = vld [vmem:[%s846_s5 + $0x18] sm:$0xff]  ;;  %v167_v24 = vld [vmem:[%s846_s5 + $0x10] sm:$0xff] }
   0x9   :  { %565 = vmatprep.subr.mxu1 %v645_v1  ;;  %v166_v25 = vld [vmem:[%s846_s5 + $0x8] sm:$0xff]  ;;  %v165_v26 = vld [vmem:[%s846_s5] sm:$0xff] }
   0xa   :  { %566 = vmatpush3.msra.mxu1 %v177_v14  ;;  %v454_v28 = vld [vmem:[%s847_s2] ss:$0 sm:$0xff] }
   0xb   :  { %544 = vmatpush3.bf16.msra.mxu0 %v633_v3  ;;  %567 = vmatprep.subr.mxu1 %v645_v1 }
   0xc   :  { %545 = vmatprep.subr.bf16.mxu0 %v634_v4  ;;  %568 = vmatpush3.msra.mxu1 %v176_v15 }
   0xd   :  { %569 = vmatprep.subr.mxu1 %v645_v1 }
   0xe   :  { %570 = vmatpush3.msra.mxu1 %v175_v16 }
   0xf   :  { %546 = vmatpush3.bf16.msra.mxu0 %v634_v4  ;;  %571 = vmatprep.subr.mxu1 %v645_v1 }
  0x10   :  { %547 = vmatprep.subr.bf16.mxu0 %v635_v7  ;;  %572 = vmatpush3.msra.mxu1 %v174_v17 }
  0x11   :  { %573 = vmatprep.subr.mxu1 %v645_v1 }
  0x12   :  { %574 = vmatpush3.msra.mxu1 %v173_v18 }
  0x13   :  { %548 = vmatpush3.bf16.msra.mxu0 %v635_v7  ;;  %575 = vmatprep.subr.mxu1 %v645_v1 }
  0x14   :  { %549 = vmatprep.subr.bf16.mxu0 %v636_v10  ;;  %576 = vmatpush3.msra.mxu1 %v172_v19 }
  0x15   :  { %577 = vmatprep.subr.mxu1 %v645_v1 }
  0x16   :  { %578 = vmatpush3.msra.mxu1 %v171_v20 }
  0x17   :  { %550 = vmatpush3.bf16.msra.mxu0 %v636_v10  ;;  %579 = vmatprep.subr.mxu1 %v645_v1 }
  0x18   :  { %551 = vmatprep.subr.bf16.mxu0 %v637_v11  ;;  %580 = vmatpush3.msra.mxu1 %v170_v21 }
  0x19   :  { %581 = vmatprep.subr.mxu1 %v645_v1 }
  0x1a   :  { %582 = vmatpush3.msra.mxu1 %v169_v22 }
  0x1b   :  { %552 = vmatpush3.bf16.msra.mxu0 %v637_v11  ;;  %583 = vmatprep.subr.mxu1 %v645_v1 }
  0x1c   :  { %553 = vmatprep.subr.bf16.mxu0 %v638_v12  ;;  %584 = vmatpush3.msra.mxu1 %v168_v23 }
  0x1d   :  { %585 = vmatprep.subr.mxu1 %v645_v1 }
  0x1e   :  { %586 = vmatpush3.msra.mxu1 %v167_v24 }
  0x1f   :  { %554 = vmatpush3.bf16.msra.mxu0 %v638_v12  ;;  %587 = vmatprep.subr.mxu1 %v645_v1 }
  0x20   :  { %594 = vmatprep.subr.mxu0 %v645_v1  ;;  %588 = vmatpush3.msra.mxu1 %v166_v25 }
  0x21   :  { %589 = vmatprep.subr.mxu1 %v645_v1 }
  0x22   :  { %556 = vmatmul.mubr.bf16.vlgmr.msra.gmra.mxu0 %v640_v13  ;;  %590 = vmatpush3.msra.mxu1 %v165_v26 }
  0x23   :  { %595 = vmatpush3.msra.mxu0 %v180_v6  ;;  %626 = vmatprep.mubr.msk.f32.mxu0 %vm646_vm0, %v645_v1 }
  0x24   :  { %596 = vmatprep.subr.mxu0 %v645_v1 }
  0x25   :  { %597 = vmatpush3.msra.mxu0 %v179_v8 }
  0x26   :  { %598 = vmatprep.subr.mxu0 %v645_v1 }
  0x27   :  { %599 = vmatpush3.msra.mxu0 %v178_v9 }
  0x28   :  { %600 = vmatprep.subr.mxu0 %v645_v1 }
  0x29   :  { %601 = vmatpush3.msra.mxu0 %v177_v14 }
  0x2a   :  { %602 = vmatprep.subr.mxu0 %v645_v1 }
  0x2b   :  { %603 = vmatpush3.msra.mxu0 %v176_v15 }
  0x2c   :  { %604 = vmatprep.subr.mxu0 %v645_v1 }
  0x2d   :  { %605 = vmatpush3.msra.mxu0 %v175_v16 }
  0x2e   :  { %606 = vmatprep.subr.mxu0 %v645_v1 }
  0x2f   :  { %607 = vmatpush3.msra.mxu0 %v174_v17 }
  0x30   :  { %608 = vmatprep.subr.mxu0 %v645_v1 }
  0x31   :  { %609 = vmatpush3.msra.mxu0 %v173_v18 }
  0x32   :  { %610 = vmatprep.subr.mxu0 %v645_v1 }
  0x33   :  { %611 = vmatpush3.msra.mxu0 %v172_v19  ;;  %v276_v19 = vlaneseq }
  0x34   :  { %612 = vmatprep.subr.mxu0 %v645_v1 }
  0x35   :  { %613 = vmatpush3.msra.mxu0 %v171_v20 }
  0x36   :  { %614 = vmatprep.subr.mxu0 %v645_v1 }
  0x37   :  { %615 = vmatpush3.msra.mxu0 %v170_v21 }
  0x38   :  { %616 = vmatprep.subr.mxu0 %v645_v1 }
  0x39   :  { %617 = vmatpush3.msra.mxu0 %v169_v22 }
  0x3a   :  { %618 = vmatprep.subr.mxu0 %v645_v1 }
  0x3b   :  { %619 = vmatpush3.msra.mxu0 %v168_v23  ;;  %v277_v23 = vshrl.u32 %v276_v19, 7 }
  0x3c   :  { %620 = vmatprep.subr.mxu0 %v645_v1 }
  0x3d   :  { %621 = vmatpush3.msra.mxu0 %v167_v24  ;;  %v278_v24 = vsub.s32 0, %v277_v23 }
  0x3e   :  { %622 = vmatprep.subr.mxu0 %v645_v1 }
  0x3f   :  { %623 = vmatpush3.msra.mxu0 %v166_v25  ;;  %v286_v25 = vsub.s32 1, %v277_v23 }
  0x40   :  { %624 = vmatprep.subr.mxu0 %v645_v1 }
  0x41   :  { %625 = vmatpush3.msra.mxu0 %v165_v26 }
  0xe2   :  { %v557_v27 = vpop.f32.mrf.mxu0 }
  0xe3   :  { %v802_v30 = vadd.f32 %v557_v27, %v454_v28 }
  0xe4   :  { %v148_v29 = vpop.f32.mrf.mxu0 }
  0xe5   :  { %v804_v31 = vadd.f32 %v454_v28, %v148_v29  ;;  %v329_v35 = vmul.f32 %v802_v30, %v802_v30 }
  0xe6   :  { %v558_v32 = vpop.f32.mrf.mxu0 }
  0xe7   :  { %v806_v33 = vadd.f32 %v558_v32, %v454_v28  ;;  %v188_v39 = vmul.f32 %v804_v31, %v804_v31 }
  0xe8   :  { %v151_v34 = vpop.f32.mrf.mxu0 }
  0xe9   :  { %v322_v36 = vadd.f32 %v806_v33, %v802_v30  ;;  %v330_v37 = vmul.f32 %v806_v33, %v806_v33  ;;  %v814_v38 = vadd.f32 %v454_v28, %v151_v34 }
  0xeb   :  { %v323_v40 = vrot.slane %v322_v36, 4  ;;  %v331_v41 = vadd.f32 %v330_v37, %v329_v35  ;;  %v181_v42 = vadd.f32 %v814_v38, %v804_v31  ;;  %v189_v43 = vmul.f32 %v814_v38, %v814_v38  ;;  %v493_v35 = vld [vmem:[%s848_s6 + $0x8] sm:$0xff]   ;;  %v465_v37 = vld [vmem:[%s849_s3] ss:$0 sm:$0xff] }
  0xed   :  { %v324_v44 = vadd.f32 %v323_v40, %v322_v36  ;;  %v332_v45 = vrot.slane %v331_v41, 4  ;;  %v182_v46 = vrot.slane %v181_v42, 4  ;;  %v190_v47 = vadd.f32 %v189_v43, %v188_v39 }
  0xef   :  { %v325_v48 = vrot.slane %v324_v44, 2  ;;  %v333_v49 = vadd.f32 %v332_v45, %v331_v41  ;;  %v183_v50 = vadd.f32 %v182_v46, %v181_v42  ;;  %v191_v51 = vrot.slane %v190_v47, 4 }
  0xf0   :  { %v487_v45 = vunpack.c.h.bf16 %v493_v35 }
  0xf1   :  { %v326_v52 = vadd.f32 %v325_v48, %v324_v44  ;;  %v334_v53 = vrot.slane %v333_v49, 2  ;;  %v184_v54 = vrot.slane %v183_v50, 2  ;;  %v192_v55 = vadd.f32 %v191_v51, %v190_v47 }
  0xf2   :  { %v486_v44 = vunpack.c.l.bf16 %v493_v35 }
  0xf3   :  { %v327_v56 = vrot.slane %v326_v52, 1  ;;  %v335_v57 = vadd.f32 %v334_v53, %v333_v49  ;;  %v185_v58 = vadd.f32 %v184_v54, %v183_v50  ;;  %v193_v59 = vrot.slane %v192_v55, 2 }
  0xf5   :  { %v336_v60 = vrot.slane %v335_v57, 1  ;;  %v186_v61 = vrot.slane %v185_v58, 1  ;;  %v194_v62 = vadd.f32 %v193_v59, %v192_v55  ;;  %v328_v63 = vadd.f32 %v327_v56, %v326_v52 }
  0xf7   :  { %v337_v0 = vadd.f32 %v336_v60, %v335_v57  ;;  %v195_v1 = vrot.slane %v194_v62, 1  ;;  %v187_v3 = vadd.f32 %v186_v61, %v185_v58 }
  0xf9   :  { %v338_v2 = vsel %vm197_vm1, %v328_v63, %v337_v0  ;;  %v196_v4 = vadd.f32 %v195_v1, %v194_v62 }
  0xfa   :  { %v339_v5 = vmul.f32 0.0625, %v338_v2 }
  0xfb   :  { %v198_v6 = vsel %vm197_vm1, %v187_v3, %v196_v4 }
  0xfc   :  { %627 = vmatmul.mubr.f32.vlgmr.msra.gmra.mxu0 %v339_v5  ;;  %v199_v7 = vmul.f32 0.0625, %v198_v6 }
  0xfe   :  { %592 = vmatmul.mubr.f32.vlgmr.msra.gmra.mxu1 %v199_v7 }
 0x1bc   :  { %v406_v8 = vpop.f32.mrf.mxu0 }
 0x1bd   :  { %v410_v9 = vmul.f32 %v406_v8, %v406_v8  ;;  %v419_v26 = vrot.slane %v406_v8, %v278_v24 }
 0x1be   :  { %v266_v10 = vpop.f32.mrf.mxu1  ;;  %v628_v11 = vpop.f32.mrf.mxu0 }
 0x1bf   :  { %v412_v12 = vrot.slane %v410_v9, 7  ;;  %v270_v13 = vmul.f32 %v266_v10, %v266_v10  ;;  %v279_v27 = vrot.slane %v266_v10, %v278_v24  ;;  %v420_v29 = vsub.f32 %v802_v30, %v419_v26  ;;  %v476_v30 = vld [vmem:[%s848_s6] sm:$0xff]  }
 0x1c0   :  { %v593_v14 = vpop.f32.mrf.mxu1  ;;  %v421_v32 = vsub.f32 %v806_v33, %v419_v26  ;;  %v466_v33 = vld [vmem:[%s850_s4] ss:$0 sm:$0xff]  ;;  %v478_v50 = vunpack.c.h.bf16 %v476_v30 }
 0x1c1   :  { %v414_v15 = vsub.f32 %v406_v8, %v412_v12  ;;  %v272_v16 = vrot.slane %v270_v13, 7  ;;  %v280_v39 = vsub.f32 %v804_v31, %v279_v27  ;;  %v281_v42 = vsub.f32 %v814_v38, %v279_v27 }
 0x1c2   :  { %v477_v31 = vunpack.c.l.bf16 %v476_v30 }
 0x1c3   :  { %v415_v17 = vmax.f32 %v414_v15, 0.0  ;;  %v274_v18 = vsub.f32 %v266_v10, %v272_v16 }
 0x1c5   :  { %v422_v20 = vadd.f32 1e-05, %v415_v17  ;;  %v275_v21 = vmax.f32 %v274_v18, 0.0 }
 0x1c7   :  { %641 = vrsqrt.f32 %v422_v20  ;;  %v282_v22 = vadd.f32 1e-05, %v275_v21 }
 0x1c9   :  { %643 = vrsqrt.f32 %v282_v22 }
 0x1d4   :  { %v642_v28 = vpop.eup %641 }
 0x1d5   :  { %v427_v34 = vrot.slane %v642_v28, %v286_v25 }
 0x1d6   :  { %v644_v36 = vpop.eup %643 }
 0x1d7   :  { %v428_v40 = vmul.f32 %v427_v34, %v420_v29  ;;  %v429_v41 = vmul.f32 %v427_v34, %v421_v32  ;;  %v287_v43 = vrot.slane %v644_v36, %v286_v25 }
 0x1d9   :  { %v430_v46 = vmul.f32 %v465_v37, %v428_v40  ;;  %v431_v47 = vmul.f32 %v465_v37, %v429_v41  ;;  %v288_v48 = vmul.f32 %v287_v43, %v280_v39  ;;  %v289_v49 = vmul.f32 %v287_v43, %v281_v42 }
 0x1db   :  { %v432_v51 = vadd.f32 %v466_v33, %v430_v46  ;;  %v433_v52 = vadd.f32 %v466_v33, %v431_v47  ;;  %v296_v38 = vmul.f32 %v465_v37, %v288_v48  ;;  %v297_v53 = vmul.f32 %v465_v37, %v289_v49 }
 0x1dd   :  { %v438_v54 = vadd.f32 %v486_v44, %v432_v51  ;;  %v439_v55 = vadd.f32 %v487_v45, %v433_v52  ;;  %v304_v56 = vadd.f32 %v466_v33, %v296_v38  ;;  %v305_v57 = vadd.f32 %v466_v33, %v297_v53 }
 0x1df   :  { %v491_v58 = vpack.c.bf16 %v439_v55, %v438_v54  ;;  %v310_v59 = vadd.f32 %v477_v31, %v304_v56  ;;  %v311_v60 = vadd.f32 %v478_v50, %v305_v57 }
 0x1e1   :  { %494 = vst [vmem:[%s851_s7 + $0x8] sm:$0xff] %v491_v58   ;;  %v482_v61 = vpack.c.bf16 %v311_v60, %v310_v59 }
 0x1e3   :  { %483 = vst [vmem:[%s851_s7] sm:$0xff] %v482_v61  }

// kernel: cnn_classifier_forward.23
= control target key start
LH: loop header
LB: loop body
LE: loop exit
PB: predicated region body
PF: predicated region fallthrough
CT: control target
= control target key end

     0   :  { %v245_v1 = vmov 0.0   ;;  %vm246_vm0 = vmmov 0   ;;  %vm20_vm1 = vcmask 1043456   ;;  %s304_s0 = inlined_call_operand.vmem [shape: bf16[2,4,128], index: 0, kind: input, shape index: {}]   ;;  %s305_s1 = inlined_call_operand.vmem [shape: bf16[128,128], index: 1, kind: input, shape index: {}]   ;;  %s306_s2 = inlined_call_operand.vmem [shape: f32[1,128], index: 2, kind: input, shape index: {}]   ;;  %s307_s3 = inlined_call_operand.hbm [shape: f32[2,128], index: 3, kind: output, shape index: {}]  }
   0x1   :  { %v215_v0 = vld [vmem:[%s305_s1 + $0x38] sm:$0xff]   ;;  %192 = vmatprep.subr.bf16.mxu0 %v245_v1  ;;  %v216_v2 = vld [vmem:[%s305_s1 + $0x30] sm:$0xff]   ;;  %208 = vmatprep.mubr.msk.bf16.mxu0 %vm246_vm0, %v245_v1  ;;  %v217_v3 = vld [vmem:[%s305_s1 + $0x28] sm:$0xff]  }
   0x2   :  { %193 = vmatpush3.bf16.msra.mxu0 %v215_v0  ;;  %v16_v4 = vld [vmem:[%s304_s0] sm:$0x3]  ;;  %v17_v5 = vld [vmem:[%s304_s0 + $0x2] sm:$0x3] }
   0x3   :  { %194 = vmatprep.subr.bf16.mxu0 %v245_v1  ;;  %v18_v6 = vunpack.c.l.bf16 %v16_v4  ;;  %v19_v7 = vunpack.c.l.bf16 %v17_v5 }
   0x6   :  { %195 = vmatpush3.bf16.msra.mxu0 %v216_v2 }
   0x7   :  { %196 = vmatprep.subr.bf16.mxu0 %v245_v1 }
   0x8   :  { %8 = vsyncpa [#allocation3], 0  ;;  %v218_v8 = vld [vmem:[%s305_s1 + $0x20] sm:$0xff]   ;;  %v21_v9 = vsel %vm20_vm1, %v18_v6, 0.0  ;;  %v28_v10 = vsel %vm20_vm1, %v19_v7, 0.0  ;;  %v219_v13 = vld [vmem:[%s305_s1 + $0x18] sm:$0xff]  }
   0x9   :  { %v22_v11 = vrot.slane %v21_v9, 4  ;;  %v29_v12 = vrot.slane %v28_v10, 4  ;;  %v220_v18 = vld [vmem:[%s305_s1 + $0x10] sm:$0xff]   ;;  %v221_v23 = vld [vmem:[%s305_s1 + $0x8] sm:$0xff]   ;;  %v222_v28 = vld [vmem:[%s305_s1] sm:$0xff]   ;;  %vm67_vm2 = vcmask 1041409  }
   0xa   :  { %197 = vmatpush3.bf16.msra.mxu0 %v217_v3  ;;  %v174_v35 = vld [vmem:[%s306_s2] ss:$0 sm:$0xff]  ;;  %s247_s6 = smov [#allocation2]  }
   0xb   :  { %198 = vmatprep.subr.bf16.mxu0 %v245_v1  ;;  %v23_v14 = vadd.f32 %v22_v11, %v21_v9  ;;  %v30_v15 = vadd.f32 %v29_v12, %v28_v10  ;;  %s166_s7 = sshll.u32 %s247_s6, 4  ;;  %s167_s7 = int_to_ptr.vmem [resolvable:$true] %s166_s7 }
   0xc   :  { %s223_s1 = scalar_lea.vmem %s167_s7, 32  ;;  %p228_p1 = scmp.lt.s32.totalorder %s167_s7, %s167_s7 }
   0xd   :  { %v24_v16 = vrot.slane %v23_v14, 2  ;;  %v31_v17 = vrot.slane %v30_v15, 2  ;;  %p224_p0 = scmp.ne.s32.totalorder %s167_s7, %s223_s1  ;;  %p229_p2 = scmp.lt.s32.totalorder %s223_s1, %s223_s1 }
   0xe   :  { %199 = vmatpush3.bf16.msra.mxu0 %v218_v8 }
   0xf   :  { %200 = vmatprep.subr.bf16.mxu0 %v245_v1  ;;  %v25_v19 = vadd.f32 %v24_v16, %v23_v14  ;;  %v32_v20 = vadd.f32 %v31_v17, %v30_v15  ;;  %p230_p3 = por %p229_p2, %p228_p1 }
  0x11   :  { %v26_v21 = vrot.slane %v25_v19, 1  ;;  %v33_v22 = vrot.slane %v32_v20, 1  ;;  %p231_p4 = pnand %p230_p3, %p224_p0 }
  0x12   :  { %201 = vmatpush3.bf16.msra.mxu0 %v219_v13 }
  0x13   :  { %202 = vmatprep.subr.bf16.mxu0 %v245_v1  ;;  %v27_v24 = vadd.f32 %v26_v21, %v25_v19  ;;  %v34_v25 = vadd.f32 %v33_v22, %v32_v20 }
  0x15   :  { %v36_v26 = vmul.f32 0.25, %v27_v24  ;;  %v37_v27 = vmul.f32 0.25, %v34_v25 }
  0x16   :  { %203 = vmatpush3.bf16.msra.mxu0 %v220_v18 }
  0x17   :  { %204 = vmatprep.subr.bf16.mxu0 %v245_v1  ;;  %v38_v29 = vpack.c.bf16 %v36_v26, %v36_v26  ;;  %v39_v30 = vpack.c.bf16 %v37_v27, %v37_v27 }
  0x19   :  { %v65_v31 = vunpack.c.l.b16 %v38_v29  ;;  %v66_v32 = vunpack.c.l.b16 %v39_v30 }
  0x1a   :  { %205 = vmatpush3.bf16.msra.mxu0 %v221_v23 }
  0x1b   :  { %206 = vmatprep.subr.bf16.mxu0 %v245_v1  ;;  %v68_v33 = vsel %vm67_vm2, %v66_v32, %v65_v31 }
  0x1c   :  { %v69_v34 = vpack.c.b16 %v68_v33, %v68_v33 }
  0x1e   :  { %207 = vmatpush3.bf16.msra.mxu0 %v222_v28 }
  0x21   :  { %209 = vmatmul.mubr.bf16.vlgmr.msra.gmra.mxu0 %v69_v34 }
  0xe1   :  { %v153_v36 = vpop.f32.mrf.mxu0 }
  0xe2   :  { %v154_v37 = vadd.f32 %v174_v35, %v153_v36 }
  0xe3   :  { %v210_v38 = vpop.f32.mrf.mxu0 }
  0xe4   :  { %159 = vst [vmem:[#allocation2] sm:$0x3] %v154_v37 }
  0xe5   :  { %v156_v39 = vpop.f32.mrf.mxu0 }
  0xe6   :  { %234 = shalt.err (!%p231_p4)
}
  0xe7   :  { %169 = dma.vmem_to_hbm [thread:$0]  %s167_s7, 32, %s307_s3, [#allocation3]   ;;  %v211_v40 = vpop.f32.mrf.mxu0 }
  0xe8   :  { %243 = dma.done.wait [#allocation3], 32  }
  0xe9   :  { %244 = vsyncadd [#allocation3], 4294967264 }
  0xea   :  { %173 = vsyncpa [#allocation3], 1 }

// kernel: cnn_classifier_forward.20
= control target key start
LH: loop header
LB: loop body
LE: loop exit
PB: predicated region body
PF: predicated region fallthrough
CT: control target
= control target key end

     0   :  { %vm1498_vm0 = vmmov 0   ;;  %vm862_vm1 = vcmask 1043456   ;;  %vm878_vm2 = vcmask 1040384   ;;  %s1882_s1 = inlined_call_operand.vmem [shape: bf16[1152,128], index: 1, kind: input, shape index: {}]   ;;  %s1883_s0 = inlined_call_operand.vmem [shape: bf16[8,1152], index: 0, kind: input, shape index: {}]   ;;  %s1884_s5 = inlined_call_operand.vmem [shape: f32[128,128], index: 5, kind: input, shape index: {}]   ;;  %s1885_s2 = inlined_call_operand.vmem [shape: f32[1,128], index: 2, kind: input, shape index: {}]   ;;  %s1886_s3 = inlined_call_operand.vmem [shape: f32[1,128], index: 3, kind: input, shape index: {}]   ;;  %s1887_s4 = inlined_call_operand.vmem [shape: f32[1,128], index: 4, kind: input, shape index: {}]   ;;  %s1888_s6 = inlined_call_operand.vmem [shape: bf16[8,128], index: 6, kind: output, shape index: {}]  }
   0x1   :  { %v1412_v0 = vld [vmem:[%s1882_s1 + $0x78] sm:$0xff]   ;;  %v1416_v4 = vld [vmem:[%s1882_s1 + $0x70] sm:$0xff]   ;;  %v1420_v8 = vld [vmem:[%s1882_s1 + $0x68] sm:$0xff]  }
   0x2   :  { %v1413_v1 = vld [vmem:[%s1882_s1 + $0x38] sm:$0xff]   ;;  %1189 = vmatprep.subr.bf16.mxu0 %v1412_v0  ;;  %v1417_v5 = vld [vmem:[%s1882_s1 + $0x30] sm:$0xff]   ;;  %v1421_v9 = vld [vmem:[%s1882_s1 + $0x28] sm:$0xff]  }
   0x3   :  { %v1414_v2 = vld [vmem:[%s1882_s1 + $0xf8] sm:$0xff]   ;;  %1190 = vmatpush3.bf16.msra.mxu0 %v1413_v1  ;;  %v1418_v6 = vld [vmem:[%s1882_s1 + $0xf0] sm:$0xff]   ;;  %v1422_v10 = vld [vmem:[%s1882_s1 + $0xe8] sm:$0xff]  }
   0x4   :  { %v1415_v3 = vld [vmem:[%s1882_s1 + $0xb8] sm:$0xff]   ;;  %1211 = vmatprep.subr.bf16.mxu1 %v1414_v2  ;;  %1191 = vmatprep.subr.bf16.mxu0 %v1416_v4  ;;  %v1419_v7 = vld [vmem:[%s1882_s1 + $0xb0] sm:$0xff]   ;;  %v1423_v11 = vld [vmem:[%s1882_s1 + $0xa8] sm:$0xff]  }
   0x5   :  { %1212 = vmatpush3.bf16.msra.mxu1 %v1415_v3  ;;  %v1424_v12 = vld [vmem:[%s1882_s1 + $0x60] sm:$0xff]   ;;  %v1428_v16 = vld [vmem:[%s1882_s1 + $0x58] sm:$0xff]   ;;  %v1432_v20 = vld [vmem:[%s1882_s1 + $0x50] sm:$0xff]  }
   0x6   :  { %1213 = vmatprep.subr.bf16.mxu1 %v1418_v6  ;;  %v1425_v13 = vld [vmem:[%s1882_s1 + $0x20] sm:$0xff]   ;;  %v1429_v17 = vld [vmem:[%s1882_s1 + $0x18] sm:$0xff]   ;;  %v1433_v21 = vld [vmem:[%s1882_s1 + $0x10] sm:$0xff]  }
   0x7   :  { %1192 = vmatpush3.bf16.msra.mxu0 %v1417_v5  ;;  %v1426_v14 = vld [vmem:[%s1882_s1 + $0xe0] sm:$0xff]   ;;  %v1430_v18 = vld [vmem:[%s1882_s1 + $0xd8] sm:$0xff]   ;;  %v1434_v22 = vld [vmem:[%s1882_s1 + $0xd0] sm:$0xff]  }
   0x8   :  { %1193 = vmatprep.subr.bf16.mxu0 %v1420_v8  ;;  %v1427_v15 = vld [vmem:[%s1882_s1 + $0xa0] sm:$0xff]   ;;  %v1431_v19 = vld [vmem:[%s1882_s1 + $0x98] sm:$0xff]   ;;  %v1435_v23 = vld [vmem:[%s1882_s1 + $0x90] sm:$0xff]  }
   0x9   :  { %1214 = vmatpush3.bf16.msra.mxu1 %v1419_v7  ;;  %v1436_v24 = vld [vmem:[%s1882_s1 + $0x48] sm:$0xff]   ;;  %v1440_v28 = vld [vmem:[%s1882_s1 + $0x40] sm:$0xff]   ;;  %v1446_v35 = vld [vmem:[%s1882_s1 + $0x178] sm:$0xff]  }
   0xa   :  { %1215 = vmatprep.subr.bf16.mxu1 %v1422_v10  ;;  %v1437_v25 = vld [vmem:[%s1882_s1 + $0x8] sm:$0xff]   ;;  %v1441_v29 = vld [vmem:[%s1882_s1] sm:$0xff]   ;;  %v1449_v39 = vld [vmem:[%s1882_s1 + $0x138] sm:$0xff]  }
   0xb   :  { %1194 = vmatpush3.bf16.msra.mxu0 %v1421_v9  ;;  %v1438_v26 = vld [vmem:[%s1882_s1 + $0xc8] sm:$0xff]   ;;  %v1442_v30 = vld [vmem:[%s1882_s1 + $0xc0] sm:$0xff]   ;;  %v1450_v40 = vld [vmem:[%s1882_s1 + $0x1f8] sm:$0xff]   ;;  %v1497_v9 = vmov 0.0  }
   0xc   :  { %1195 = vmatprep.subr.bf16.mxu0 %v1424_v12  ;;  %v1439_v27 = vld [vmem:[%s1882_s1 + $0x88] sm:$0xff]   ;;  %v24_v31 = vld [vmem:[%s1883_s0] sm:$0xff]  ;;  %v1451_v41 = vld [vmem:[%s1882_s1 + $0x1b8] sm:$0xff]  }
   0xd   :  { %1216 = vmatpush3.bf16.msra.mxu1 %v1423_v11  ;;  %v1106_v32 = vcombine.low %v24_v31, %v24_v31  ;;  %v1107_v33 = vcombine.high %v24_v31, %v24_v31  ;;  %v1445_v34 = vld [vmem:[%s1882_s1 + $0x80] sm:$0xff]   ;;  %v25_v36 = vld [vmem:[%s1883_s0 + $0x8] sm:$0xff]  ;;  %v1452_v42 = vld [vmem:[%s1882_s1 + $0x170] sm:$0xff]  }
   0xe   :  { %1217 = vmatprep.subr.bf16.mxu1 %v1426_v14  ;;  %v1108_v37 = vcombine.low %v25_v36, %v25_v36  ;;  %v1109_v38 = vcombine.high %v25_v36, %v25_v36  ;;  %v1453_v43 = vld [vmem:[%s1882_s1 + $0x130] sm:$0xff]   ;;  %v1456_v46 = vld [vmem:[%s1882_s1 + $0x168] sm:$0xff]   ;;  %v1460_v50 = vld [vmem:[%s1882_s1 + $0x160] sm:$0xff]  }
   0xf   :  { %1196 = vmatpush3.bf16.msra.mxu0 %v1425_v13  ;;  %676 = vmatprep.mubr.bf16.mxu0 %v1107_v33  ;;  %v1454_v44 = vld [vmem:[%s1882_s1 + $0x1f0] sm:$0xff]   ;;  %v1457_v47 = vld [vmem:[%s1882_s1 + $0x128] sm:$0xff]   ;;  %v1461_v51 = vld [vmem:[%s1882_s1 + $0x120] sm:$0xff]  }
  0x10   :  { %1197 = vmatprep.subr.bf16.mxu0 %v1428_v16  ;;  %716 = vmatprep.mubr.bf16.mxu1 %v1109_v38  ;;  %v1455_v45 = vld [vmem:[%s1882_s1 + $0x1b0] sm:$0xff]   ;;  %v1458_v48 = vld [vmem:[%s1882_s1 + $0x1e8] sm:$0xff]   ;;  %v1462_v52 = vld [vmem:[%s1882_s1 + $0x1e0] sm:$0xff]  }
  0x11   :  { %1218 = vmatpush3.bf16.msra.mxu1 %v1427_v15  ;;  %v1459_v49 = vld [vmem:[%s1882_s1 + $0x1a8] sm:$0xff]   ;;  %v1463_v53 = vld [vmem:[%s1882_s1 + $0x1a0] sm:$0xff]   ;;  %v1464_v54 = vld [vmem:[%s1882_s1 + $0x158] sm:$0xff]  }
  0x12   :  { %1219 = vmatprep.subr.bf16.mxu1 %v1430_v18  ;;  %v1465_v55 = vld [vmem:[%s1882_s1 + $0x118] sm:$0xff]   ;;  %v1468_v58 = vld [vmem:[%s1882_s1 + $0x150] sm:$0xff]   ;;  %v1472_v62 = vld [vmem:[%s1882_s1 + $0x148] sm:$0xff]  }
  0x13   :  { %1198 = vmatpush3.bf16.msra.mxu0 %v1429_v17  ;;  %v1466_v56 = vld [vmem:[%s1882_s1 + $0x1d8] sm:$0xff]   ;;  %v1469_v59 = vld [vmem:[%s1882_s1 + $0x110] sm:$0xff]   ;;  %v1473_v63 = vld [vmem:[%s1882_s1 + $0x108] sm:$0xff]  }
  0x14   :  { %1199 = vmatprep.subr.bf16.mxu0 %v1432_v20  ;;  %v1467_v57 = vld [vmem:[%s1882_s1 + $0x198] sm:$0xff]   ;;  %v1470_v60 = vld [vmem:[%s1882_s1 + $0x1d0] sm:$0xff]   ;;  %v1474_v0 = vld [vmem:[%s1882_s1 + $0x1c8] sm:$0xff]  }
  0x15   :  { %1220 = vmatpush3.bf16.msra.mxu1 %v1431_v19  ;;  %v1471_v61 = vld [vmem:[%s1882_s1 + $0x190] sm:$0xff]   ;;  %v1475_v1 = vld [vmem:[%s1882_s1 + $0x188] sm:$0xff]   ;;  %v1476_v2 = vld [vmem:[%s1882_s1 + $0x140] sm:$0xff]  }
  0x16   :  { %1221 = vmatprep.subr.bf16.mxu1 %v1434_v22  ;;  %v1477_v3 = vld [vmem:[%s1882_s1 + $0x100] sm:$0xff]   ;;  %v26_v5 = vld [vmem:[%s1883_s0 + $0x10] sm:$0xff]  ;;  %v27_v10 = vld [vmem:[%s1883_s0 + $0x18] sm:$0xff] }
  0x17   :  { %1200 = vmatpush3.bf16.msra.mxu0 %v1433_v21  ;;  %v1478_v4 = vld [vmem:[%s1882_s1 + $0x1c0] sm:$0xff]   ;;  %v1110_v6 = vcombine.low %v26_v5, %v26_v5  ;;  %v1111_v7 = vcombine.high %v26_v5, %v26_v5  ;;  %v1112_v11 = vcombine.low %v27_v10, %v27_v10  ;;  %v1113_v12 = vcombine.high %v27_v10, %v27_v10  ;;  %v1484_v13 = vld [vmem:[%s1882_s1 + $0x238] sm:$0xff]   ;;  %v1485_v14 = vld [vmem:[%s1882_s1 + $0x230] sm:$0xff]  }
  0x18   :  { %1201 = vmatprep.subr.bf16.mxu0 %v1436_v24  ;;  %v1481_v8 = vld [vmem:[%s1882_s1 + $0x180] sm:$0xff]   ;;  %v1486_v15 = vld [vmem:[%s1882_s1 + $0x228] sm:$0xff]   ;;  %v1488_v17 = vld [vmem:[%s1882_s1 + $0x218] sm:$0xff]  }
  0x19   :  { %1222 = vmatpush3.bf16.msra.mxu1 %v1435_v23  ;;  %v1487_v16 = vld [vmem:[%s1882_s1 + $0x220] sm:$0xff]   ;;  %v1489_v18 = vld [vmem:[%s1882_s1 + $0x210] sm:$0xff]   ;;  %v1490_v19 = vld [vmem:[%s1882_s1 + $0x208] sm:$0xff]  }
  0x1a   :  { %1223 = vmatprep.subr.bf16.mxu1 %v1438_v26  ;;  %v1491_v20 = vld [vmem:[%s1882_s1 + $0x200] sm:$0xff]   ;;  %v861_v22 = vld [vmem:[%s1884_s5 + $0x78] sm:$0xff]  ;;  %v860_v23 = vld [vmem:[%s1884_s5 + $0x70] sm:$0xff] }
  0x1b   :  { %1202 = vmatpush3.bf16.msra.mxu0 %v1437_v25  ;;  %v1492_v21 = vld [vmem:[%s1883_s0 + $0x20] ss:$0 sps:$4 sm:$0xff]   ;;  %v859_v24 = vld [vmem:[%s1884_s5 + $0x68] sm:$0xff]  ;;  %v857_v26 = vld [vmem:[%s1884_s5 + $0x58] sm:$0xff] }
  0x1c   :  { %1203 = vmatprep.subr.bf16.mxu0 %v1440_v28  ;;  %v858_v25 = vld [vmem:[%s1884_s5 + $0x60] sm:$0xff]  ;;  %v855_v28 = vld [vmem:[%s1884_s5 + $0x48] sm:$0xff]  ;;  %v852_v31 = vld [vmem:[%s1884_s5 + $0x30] sm:$0xff] }
  0x1d   :  { %1224 = vmatpush3.bf16.msra.mxu1 %v1439_v27  ;;  %v856_v27 = vld [vmem:[%s1884_s5 + $0x50] sm:$0xff]  ;;  %v850_v33 = vld [vmem:[%s1884_s5 + $0x20] sm:$0xff]  ;;  %v847_v36 = vld [vmem:[%s1884_s5 + $0x8] sm:$0xff] }
  0x1e   :  { %1225 = vmatprep.subr.bf16.mxu1 %v1442_v30  ;;  %v853_v30 = vld [vmem:[%s1884_s5 + $0x38] sm:$0xff] }
  0x1f   :  { %1204 = vmatpush3.bf16.msra.mxu0 %v1441_v29  ;;  %v854_v29 = vld [vmem:[%s1884_s5 + $0x40] sm:$0xff] }
  0x20   :  { %1233 = vmatprep.subr.bf16.mxu0 %v1446_v35  ;;  %v848_v35 = vld [vmem:[%s1884_s5 + $0x10] sm:$0xff] }
  0x21   :  { %1226 = vmatpush3.bf16.msra.mxu1 %v1445_v34  ;;  %v849_v34 = vld [vmem:[%s1884_s5 + $0x18] sm:$0xff] }
  0x22   :  { %677 = vmatmul.mubr.bf16.vlgmr.msra.gmra.mxu0 %v1106_v32  ;;  %1255 = vmatprep.subr.bf16.mxu1 %v1450_v40  ;;  %v851_v32 = vld [vmem:[%s1884_s5 + $0x28] sm:$0xff] }
  0x23   :  { %1234 = vmatpush3.bf16.msra.mxu0 %v1449_v39  ;;  %756 = vmatprep.mubr.bf16.mxu0 %v1111_v7 }
  0x24   :  { %717 = vmatmul.mubr.bf16.vlgmr.msra.gmra.mxu1 %v1108_v37  ;;  %1235 = vmatprep.subr.bf16.mxu0 %v1452_v42  ;;  %v846_v37 = vld [vmem:[%s1884_s5] sm:$0xff] }
  0x25   :  { %1256 = vmatpush3.bf16.msra.mxu1 %v1451_v41  ;;  %796 = vmatprep.mubr.bf16.mxu1 %v1113_v12 }
  0x26   :  { %1257 = vmatprep.subr.bf16.mxu1 %v1454_v44 }
  0x27   :  { %1236 = vmatpush3.bf16.msra.mxu0 %v1453_v43 }
  0x28   :  { %1237 = vmatprep.subr.bf16.mxu0 %v1456_v46 }
  0x29   :  { %1258 = vmatpush3.bf16.msra.mxu1 %v1455_v45 }
  0x2a   :  { %1259 = vmatprep.subr.bf16.mxu1 %v1458_v48 }
  0x2b   :  { %1238 = vmatpush3.bf16.msra.mxu0 %v1457_v47 }
  0x2c   :  { %1239 = vmatprep.subr.bf16.mxu0 %v1460_v50 }
  0x2d   :  { %1260 = vmatpush3.bf16.msra.mxu1 %v1459_v49 }
  0x2e   :  { %1261 = vmatprep.subr.bf16.mxu1 %v1462_v52 }
  0x2f   :  { %1240 = vmatpush3.bf16.msra.mxu0 %v1461_v51 }
  0x30   :  { %1241 = vmatprep.subr.bf16.mxu0 %v1464_v54 }
  0x31   :  { %1262 = vmatpush3.bf16.msra.mxu1 %v1463_v53 }
  0x32   :  { %1263 = vmatprep.subr.bf16.mxu1 %v1466_v56 }
  0x33   :  { %1242 = vmatpush3.bf16.msra.mxu0 %v1465_v55  ;;  %v1105_v55 = vld [vmem:[%s1885_s2] ss:$0 sm:$0xff] }
  0x34   :  { %1243 = vmatprep.subr.bf16.mxu0 %v1468_v58 }
  0x35   :  { %1264 = vmatpush3.bf16.msra.mxu1 %v1467_v57 }
  0x36   :  { %1265 = vmatprep.subr.bf16.mxu1 %v1470_v60 }
  0x37   :  { %1244 = vmatpush3.bf16.msra.mxu0 %v1469_v59 }
  0x38   :  { %1245 = vmatprep.subr.bf16.mxu0 %v1472_v62 }
  0x39   :  { %1266 = vmatpush3.bf16.msra.mxu1 %v1471_v61 }
  0x3a   :  { %1267 = vmatprep.subr.bf16.mxu1 %v1474_v0 }
  0x3b   :  { %1246 = vmatpush3.bf16.msra.mxu0 %v1473_v63 }
  0x3c   :  { %1247 = vmatprep.subr.bf16.mxu0 %v1476_v2 }
  0x3d   :  { %1268 = vmatpush3.bf16.msra.mxu1 %v1475_v1 }
  0x3e   :  { %1269 = vmatprep.subr.bf16.mxu1 %v1478_v4 }
  0x3f   :  { %1248 = vmatpush3.bf16.msra.mxu0 %v1477_v3 }
  0x40   :  { %1320 = vmatprep.subr.bf16.mxu0 %v1497_v9 }
  0x41   :  { %1270 = vmatpush3.bf16.msra.mxu1 %v1481_v8 }
  0x42   :  { %757 = vmatmul.mubr.bf16.vlgmr.msra.gmra.mxu0 %v1110_v6  ;;  %1340 = vmatprep.subr.mxu1 %v1497_v9 }
  0x43   :  { %1321 = vmatpush3.bf16.msra.mxu0 %v1484_v13  ;;  %1336 = vmatprep.mubr.msk.bf16.mxu0 %vm1498_vm0, %v1497_v9 }
  0x44   :  { %797 = vmatmul.mubr.bf16.vlgmr.msra.gmra.mxu1 %v1112_v11  ;;  %1322 = vmatprep.subr.bf16.mxu0 %v1497_v9 }
  0x45   :  { %1372 = vmatprep.mubr.msk.f32.mxu1 %vm1498_vm0, %v1497_v9  ;;  %1341 = vmatpush3.msra.mxu1 %v861_v22 }
  0x46   :  { %1342 = vmatprep.subr.mxu1 %v1497_v9 }
  0x47   :  { %1323 = vmatpush3.bf16.msra.mxu0 %v1485_v14  ;;  %1343 = vmatpush3.msra.mxu1 %v860_v23 }
  0x48   :  { %1324 = vmatprep.subr.bf16.mxu0 %v1497_v9  ;;  %1344 = vmatprep.subr.mxu1 %v1497_v9 }
  0x49   :  { %1345 = vmatpush3.msra.mxu1 %v859_v24 }
  0x4a   :  { %1346 = vmatprep.subr.mxu1 %v1497_v9 }
  0x4b   :  { %1325 = vmatpush3.bf16.msra.mxu0 %v1486_v15  ;;  %1347 = vmatpush3.msra.mxu1 %v858_v25 }
  0x4c   :  { %1326 = vmatprep.subr.bf16.mxu0 %v1497_v9  ;;  %1348 = vmatprep.subr.mxu1 %v1497_v9 }
  0x4d   :  { %1349 = vmatpush3.msra.mxu1 %v857_v26 }
  0x4e   :  { %1350 = vmatprep.subr.mxu1 %v1497_v9 }
  0x4f   :  { %1327 = vmatpush3.bf16.msra.mxu0 %v1487_v16  ;;  %1351 = vmatpush3.msra.mxu1 %v856_v27 }
  0x50   :  { %1328 = vmatprep.subr.bf16.mxu0 %v1497_v9  ;;  %1352 = vmatprep.subr.mxu1 %v1497_v9 }
  0x51   :  { %1353 = vmatpush3.msra.mxu1 %v855_v28 }
  0x52   :  { %1354 = vmatprep.subr.mxu1 %v1497_v9 }
  0x53   :  { %1329 = vmatpush3.bf16.msra.mxu0 %v1488_v17  ;;  %1355 = vmatpush3.msra.mxu1 %v854_v29 }
  0x54   :  { %1330 = vmatprep.subr.bf16.mxu0 %v1497_v9  ;;  %1356 = vmatprep.subr.mxu1 %v1497_v9 }
  0x55   :  { %1357 = vmatpush3.msra.mxu1 %v853_v30 }
  0x56   :  { %1358 = vmatprep.subr.mxu1 %v1497_v9 }
  0x57   :  { %1331 = vmatpush3.bf16.msra.mxu0 %v1489_v18  ;;  %1359 = vmatpush3.msra.mxu1 %v852_v31 }
  0x58   :  { %1332 = vmatprep.subr.bf16.mxu0 %v1497_v9  ;;  %1360 = vmatprep.subr.mxu1 %v1497_v9 }
  0x59   :  { %1361 = vmatpush3.msra.mxu1 %v851_v32 }
  0x5a   :  { %1362 = vmatprep.subr.mxu1 %v1497_v9 }
  0x5b   :  { %1333 = vmatpush3.bf16.msra.mxu0 %v1490_v19  ;;  %1363 = vmatpush3.msra.mxu1 %v850_v33 }
  0x5c   :  { %1334 = vmatprep.subr.bf16.mxu0 %v1497_v9  ;;  %1364 = vmatprep.subr.mxu1 %v1497_v9 }
  0x5d   :  { %1365 = vmatpush3.msra.mxu1 %v849_v34 }
  0x5e   :  { %1366 = vmatprep.subr.mxu1 %v1497_v9 }
  0x5f   :  { %1335 = vmatpush3.bf16.msra.mxu0 %v1491_v20  ;;  %1367 = vmatpush3.msra.mxu1 %v848_v35 }
  0x60   :  { %1375 = vmatprep.subr.mxu0 %v1497_v9  ;;  %1368 = vmatprep.subr.mxu1 %v1497_v9 }
  0x61   :  { %1369 = vmatpush3.msra.mxu1 %v847_v36 }
  0x62   :  { %1337 = vmatmul.mubr.bf16.vlgmr.msra.gmra.mxu0 %v1492_v21  ;;  %1370 = vmatprep.subr.mxu1 %v1497_v9 }
  0x63   :  { %1407 = vmatprep.mubr.msk.f32.mxu0 %vm1498_vm0, %v1497_v9  ;;  %1376 = vmatpush3.msra.mxu0 %v861_v22 }
  0x64   :  { %1377 = vmatprep.subr.mxu0 %v1497_v9  ;;  %1371 = vmatpush3.msra.mxu1 %v846_v37 }
  0x65   :  { %1378 = vmatpush3.msra.mxu0 %v860_v23 }
  0x66   :  { %1379 = vmatprep.subr.mxu0 %v1497_v9 }
  0x67   :  { %1380 = vmatpush3.msra.mxu0 %v859_v24 }
  0x68   :  { %1381 = vmatprep.subr.mxu0 %v1497_v9 }
  0x69   :  { %1382 = vmatpush3.msra.mxu0 %v858_v25 }
  0x6a   :  { %1383 = vmatprep.subr.mxu0 %v1497_v9 }
  0x6b   :  { %1384 = vmatpush3.msra.mxu0 %v857_v26 }
  0x6c   :  { %1385 = vmatprep.subr.mxu0 %v1497_v9 }
  0x6d   :  { %1386 = vmatpush3.msra.mxu0 %v856_v27 }
  0x6e   :  { %1387 = vmatprep.subr.mxu0 %v1497_v9 }
  0x6f   :  { %1388 = vmatpush3.msra.mxu0 %v855_v28 }
  0x70   :  { %1389 = vmatprep.subr.mxu0 %v1497_v9 }
  0x71   :  { %1390 = vmatpush3.msra.mxu0 %v854_v29 }
  0x72   :  { %1391 = vmatprep.subr.mxu0 %v1497_v9 }
  0x73   :  { %1392 = vmatpush3.msra.mxu0 %v853_v30 }
  0x74   :  { %1393 = vmatprep.subr.mxu0 %v1497_v9 }
  0x75   :  { %1394 = vmatpush3.msra.mxu0 %v852_v31 }
  0x76   :  { %1395 = vmatprep.subr.mxu0 %v1497_v9 }
  0x77   :  { %1396 = vmatpush3.msra.mxu0 %v851_v32 }
  0x78   :  { %1397 = vmatprep.subr.mxu0 %v1497_v9 }
  0x79   :  { %1398 = vmatpush3.msra.mxu0 %v850_v33 }
  0x7a   :  { %1399 = vmatprep.subr.mxu0 %v1497_v9 }
  0x7b   :  { %1400 = vmatpush3.msra.mxu0 %v849_v34 }
  0x7c   :  { %1401 = vmatprep.subr.mxu0 %v1497_v9 }
  0x7d   :  { %1402 = vmatpush3.msra.mxu0 %v848_v35 }
  0x7e   :  { %1403 = vmatprep.subr.mxu0 %v1497_v9 }
  0x7f   :  { %1404 = vmatpush3.msra.mxu0 %v847_v36 }
  0x80   :  { %1405 = vmatprep.subr.mxu0 %v1497_v9 }
  0x81   :  { %1406 = vmatpush3.msra.mxu0 %v846_v37 }
  0xe2   :  { %v1205_v38 = vpop.f32.mrf.mxu0 }
  0xe4   :  { %v1206_v39 = vpop.f32.mrf.mxu0  ;;  %v1227_v40 = vpop.f32.mrf.mxu1 }
  0xe5   :  { %v1207_v54 = vadd.f32 %v1206_v39, %v1205_v38 }
  0xe6   :  { %v1208_v41 = vpop.f32.mrf.mxu0  ;;  %v1228_v42 = vpop.f32.mrf.mxu1 }
  0xe7   :  { %v679_v56 = vadd.f32 %v1207_v54, %v1105_v55  ;;  %v1229_v57 = vadd.f32 %v1228_v42, %v1227_v40 }
  0xe8   :  { %v1209_v43 = vpop.f32.mrf.mxu0  ;;  %v1230_v44 = vpop.f32.mrf.mxu1 }
  0xe9   :  { %v719_v59 = vadd.f32 %v1229_v57, %v679_v56 }
  0xea   :  { %v1231_v45 = vpop.f32.mrf.mxu1 }
 0x102   :  { %v1249_v46 = vpop.f32.mrf.mxu0 }
 0x104   :  { %v1250_v47 = vpop.f32.mrf.mxu0  ;;  %v1271_v48 = vpop.f32.mrf.mxu1 }
 0x105   :  { %v1251_v58 = vadd.f32 %v1250_v47, %v1249_v46 }
 0x106   :  { %v1252_v49 = vpop.f32.mrf.mxu0  ;;  %v1272_v50 = vpop.f32.mrf.mxu1 }
 0x107   :  { %v759_v60 = vadd.f32 %v1251_v58, %v719_v59  ;;  %v1273_v61 = vadd.f32 %v1272_v50, %v1271_v48  ;;  %v957_v50 = vlaneseq }
 0x108   :  { %v1253_v51 = vpop.f32.mrf.mxu0  ;;  %v1274_v52 = vpop.f32.mrf.mxu1 }
 0x109   :  { %v799_v62 = vadd.f32 %v1273_v61, %v759_v60  ;;  %v958_v54 = vshrl.u32 %v957_v50, 7 }
 0x10a   :  { %v1275_v53 = vpop.f32.mrf.mxu1 }
 0x10b   :  { %v959_v55 = vsub.s32 0, %v958_v54  ;;  %v966_v57 = vsub.s32 1, %v958_v54 }
 0x122   :  { %v838_v63 = vpop.f32.mrf.mxu0 }
 0x123   :  { %v1862_v0 = vadd.f32 %v838_v63, %v799_v62  ;;  %v1187_v63 = vld [vmem:[%s1886_s3] ss:$0 sm:$0xff] }
 0x124   :  { %v1338_v1 = vpop.f32.mrf.mxu0 }
 0x125   :  { %v863_v2 = vsel %vm862_vm1, %v1862_v0, 0.0  ;;  %v870_v3 = vmul.f32 %v1862_v0, %v1862_v0  ;;  %v987_v4 = vrot.slane %v1862_v0, 4 }
 0x126   :  { %v864_v5 = vrot.slane %v863_v2, 4  ;;  %v841_v6 = vpop.f32.mrf.mxu0 }
 0x127   :  { %v871_v7 = vsel %vm862_vm1, %v870_v3, 0.0  ;;  %v989_v8 = vsel %vm862_vm1, %v987_v4, 0.0  ;;  %v997_v9 = vrot.slane %v870_v3, 4  ;;  %v1188_v4 = vld [vmem:[%s1887_s4] ss:$0 sm:$0xff] }
 0x128   :  { %v865_v10 = vadd.f32 %v864_v5, %v863_v2  ;;  %v872_v11 = vrot.slane %v871_v7, 4  ;;  %v990_v12 = vrot.slane %v989_v8, 4  ;;  %v1339_v13 = vpop.f32.mrf.mxu0 }
 0x129   :  { %v999_v14 = vsel %vm862_vm1, %v997_v9, 0.0 }
 0x12a   :  { %v866_v15 = vrot.slane %v865_v10, 2  ;;  %v873_v16 = vadd.f32 %v872_v11, %v871_v7  ;;  %v991_v17 = vadd.f32 %v990_v12, %v989_v8  ;;  %v1000_v18 = vrot.slane %v999_v14, 4 }
 0x12c   :  { %v867_v19 = vadd.f32 %v866_v15, %v865_v10  ;;  %v874_v20 = vrot.slane %v873_v16, 2  ;;  %v992_v21 = vrot.slane %v991_v17, 2  ;;  %v1001_v22 = vadd.f32 %v1000_v18, %v999_v14 }
 0x12e   :  { %v868_v23 = vrot.slane %v867_v19, 1  ;;  %v875_v24 = vadd.f32 %v874_v20, %v873_v16  ;;  %v993_v25 = vadd.f32 %v992_v21, %v991_v17  ;;  %v1002_v26 = vrot.slane %v1001_v22, 2 }
 0x130   :  { %v876_v27 = vrot.slane %v875_v24, 1  ;;  %v994_v28 = vrot.slane %v993_v25, 1  ;;  %v1003_v29 = vadd.f32 %v1002_v26, %v1001_v22  ;;  %v869_v30 = vadd.f32 %v868_v23, %v867_v19 }
 0x132   :  { %v877_v31 = vadd.f32 %v876_v27, %v875_v24  ;;  %v1004_v32 = vrot.slane %v1003_v29, 1  ;;  %v995_v34 = vadd.f32 %v994_v28, %v993_v25 }
 0x134   :  { %v879_v33 = vsel %vm878_vm2, %v869_v30, %v877_v31  ;;  %v1005_v35 = vadd.f32 %v1004_v32, %v1003_v29 }
 0x135   :  { %v880_v36 = vmul.f32 0.25, %v879_v33 }
 0x136   :  { %v1006_v37 = vsel %vm878_vm2, %v995_v34, %v1005_v35 }
 0x137   :  { %1373 = vmatmul.mubr.f32.vlgmr.msra.gmra.mxu1 %v880_v36  ;;  %v1007_v38 = vmul.f32 0.25, %v1006_v37 }
 0x139   :  { %1408 = vmatmul.mubr.f32.vlgmr.msra.gmra.mxu0 %v1007_v38 }
 0x1f7   :  { %v947_v39 = vpop.f32.mrf.mxu1 }
 0x1f8   :  { %v951_v40 = vmul.f32 %v947_v39, %v947_v39  ;;  %v960_v56 = vrot.slane %v947_v39, %v959_v55 }
 0x1f9   :  { %v1374_v41 = vpop.f32.mrf.mxu1  ;;  %v1074_v42 = vpop.f32.mrf.mxu0 }
 0x1fa   :  { %v953_v43 = vrot.slane %v951_v40, 7  ;;  %v1078_v44 = vmul.f32 %v1074_v42, %v1074_v42  ;;  %v1087_v58 = vrot.slane %v1074_v42, %v959_v55  ;;  %v961_v60 = vsub.f32 %v1862_v0, %v960_v56 }
 0x1fb   :  { %v1409_v45 = vpop.f32.mrf.mxu0 }
 0x1fc   :  { %v955_v46 = vsub.f32 %v947_v39, %v953_v43  ;;  %v1080_v47 = vrot.slane %v1078_v44, 7  ;;  %v1088_v2 = vsub.f32 %v1862_v0, %v1087_v58 }
 0x1fe   :  { %v956_v48 = vmax.f32 %v955_v46, 0.0  ;;  %v1082_v49 = vsub.f32 %v1074_v42, %v1080_v47 }
 0x200   :  { %v962_v51 = vadd.f32 1e-05, %v956_v48  ;;  %v1083_v52 = vmax.f32 %v1082_v49, 0.0 }
 0x202   :  { %1493 = vrsqrt.f32 %v962_v51  ;;  %v1089_v53 = vadd.f32 1e-05, %v1083_v52 }
 0x204   :  { %1495 = vrsqrt.f32 %v1089_v53 }
 0x20f   :  { %v1494_v59 = vpop.eup %1493 }
 0x210   :  { %v967_v61 = vrot.slane %v1494_v59, %v966_v57 }
 0x211   :  { %v1496_v62 = vpop.eup %1495 }
 0x212   :  { %v968_v1 = vmul.f32 %v967_v61, %v961_v60  ;;  %v1094_v3 = vrot.slane %v1496_v62, %v966_v57 }
 0x214   :  { %v975_v5 = vmul.f32 %v1187_v63, %v968_v1  ;;  %v1095_v6 = vmul.f32 %v1094_v3, %v1088_v2 }
 0x216   :  { %v982_v7 = vadd.f32 %v1188_v4, %v975_v5  ;;  %v1096_v8 = vmul.f32 %v1187_v63, %v1095_v6 }
 0x218   :  { %v983_v9 = vmax.f32 %v982_v7, 0.0  ;;  %v1097_v10 = vadd.f32 %v1188_v4, %v1096_v8 }
 0x21a   :  { %v984_v11 = vpack.c.bf16 %v983_v9, %v983_v9  ;;  %v1098_v12 = vmax.f32 %v1097_v10, 0.0 }
 0x21c   :  { %985 = vst [vmem:[%s1888_s6] sm:$0x3] %v984_v11  ;;  %v1099_v13 = vpack.c.bf16 %v1098_v12, %v1098_v12 }
 0x21e   :  { %1100 = vst [vmem:[%s1888_s6] sm:$0xc] %v1099_v13 }

// kernel: cnn_classifier_forward.22
= control target key start
LH: loop header
LB: loop body
LE: loop exit
PB: predicated region body
PF: predicated region fallthrough
CT: control target
= control target key end

     0   :  { %v562_v0 = vmov 0.0   ;;  %vm563_vm0 = vmmov 0   ;;  %vm157_vm1 = vcmask 1043456   ;;  %vm173_vm2 = vcmask 1040384   ;;  %s754_s1 = inlined_call_operand.vmem [shape: bf16[128,128], index: 1, kind: input, shape index: {}]   ;;  %s755_s5 = inlined_call_operand.vmem [shape: f32[128,128], index: 5, kind: input, shape index: {}]   ;;  %s756_s0 = inlined_call_operand.vmem [shape: bf16[8,128], index: 0, kind: input, shape index: {}]   ;;  %s757_s2 = inlined_call_operand.vmem [shape: f32[1,128], index: 2, kind: input, shape index: {}]   ;;  %s758_s3 = inlined_call_operand.vmem [shape: f32[1,128], index: 3, kind: input, shape index: {}]   ;;  %s759_s6 = inlined_call_operand.vmem [shape: bf16[8,128], index: 6, kind: input, shape index: {}]   ;;  %s760_s4 = inlined_call_operand.vmem [shape: f32[1,128], index: 4, kind: input, shape index: {}]   ;;  %s761_s7 = inlined_call_operand.vmem [shape: bf16[8,128], index: 7, kind: output, shape index: {}]  }
   0x1   :  { %458 = vmatprep.subr.bf16.mxu0 %v562_v0  ;;  %v550_v1 = vld [vmem:[%s754_s1 + $0x38] sm:$0xff]   ;;  %474 = vmatprep.mubr.msk.bf16.mxu0 %vm563_vm0, %v562_v0  ;;  %v551_v2 = vld [vmem:[%s754_s1 + $0x30] sm:$0xff]   ;;  %v552_v3 = vld [vmem:[%s754_s1 + $0x28] sm:$0xff]  }
   0x2   :  { %478 = vmatprep.subr.mxu1 %v562_v0  ;;  %510 = vmatprep.mubr.msk.f32.mxu1 %vm563_vm0, %v562_v0  ;;  %v156_v4 = vld [vmem:[%s755_s5 + $0x78] sm:$0xff]  ;;  %v155_v5 = vld [vmem:[%s755_s5 + $0x70] sm:$0xff]  ;;  %v553_v6 = vld [vmem:[%s754_s1 + $0x20] sm:$0xff]  }
   0x3   :  { %459 = vmatpush3.bf16.msra.mxu0 %v550_v1  ;;  %479 = vmatpush3.msra.mxu1 %v156_v4  ;;  %v154_v7 = vld [vmem:[%s755_s5 + $0x68] sm:$0xff]  ;;  %v153_v8 = vld [vmem:[%s755_s5 + $0x60] sm:$0xff]  ;;  %v554_v9 = vld [vmem:[%s754_s1 + $0x18] sm:$0xff]  }
   0x4   :  { %460 = vmatprep.subr.bf16.mxu0 %v562_v0  ;;  %480 = vmatprep.subr.mxu1 %v562_v0  ;;  %v152_v10 = vld [vmem:[%s755_s5 + $0x58] sm:$0xff]  ;;  %v555_v11 = vld [vmem:[%s754_s1 + $0x10] sm:$0xff]   ;;  %v556_v12 = vld [vmem:[%s754_s1 + $0x8] sm:$0xff]  }
   0x5   :  { %481 = vmatpush3.msra.mxu1 %v155_v5  ;;  %v557_v13 = vld [vmem:[%s754_s1] sm:$0xff]   ;;  %v151_v15 = vld [vmem:[%s755_s5 + $0x50] sm:$0xff]  ;;  %v150_v16 = vld [vmem:[%s755_s5 + $0x48] sm:$0xff] }
   0x6   :  { %482 = vmatprep.subr.mxu1 %v562_v0  ;;  %v27_v14 = vld [vmem:[%s756_s0] sm:$0xf]  ;;  %v148_v18 = vld [vmem:[%s755_s5 + $0x38] sm:$0xff]  ;;  %v147_v19 = vld [vmem:[%s755_s5 + $0x30] sm:$0xff] }
   0x7   :  { %461 = vmatpush3.bf16.msra.mxu0 %v551_v2  ;;  %483 = vmatpush3.msra.mxu1 %v154_v7  ;;  %v149_v17 = vld [vmem:[%s755_s5 + $0x40] sm:$0xff]  ;;  %v146_v20 = vld [vmem:[%s755_s5 + $0x28] sm:$0xff]  ;;  %v144_v22 = vld [vmem:[%s755_s5 + $0x18] sm:$0xff] }
   0x8   :  { %462 = vmatprep.subr.bf16.mxu0 %v562_v0  ;;  %484 = vmatprep.subr.mxu1 %v562_v0  ;;  %v145_v21 = vld [vmem:[%s755_s5 + $0x20] sm:$0xff]  ;;  %v143_v23 = vld [vmem:[%s755_s5 + $0x10] sm:$0xff]  ;;  %v142_v24 = vld [vmem:[%s755_s5 + $0x8] sm:$0xff] }
   0x9   :  { %485 = vmatpush3.msra.mxu1 %v153_v8  ;;  %v141_v25 = vld [vmem:[%s755_s5] sm:$0xff] }
   0xa   :  { %486 = vmatprep.subr.mxu1 %v562_v0  ;;  %v404_v26 = vld [vmem:[%s757_s2] ss:$0 sm:$0xff] }
   0xb   :  { %463 = vmatpush3.bf16.msra.mxu0 %v552_v3  ;;  %487 = vmatpush3.msra.mxu1 %v152_v10 }
   0xc   :  { %464 = vmatprep.subr.bf16.mxu0 %v562_v0  ;;  %488 = vmatprep.subr.mxu1 %v562_v0 }
   0xd   :  { %489 = vmatpush3.msra.mxu1 %v151_v15 }
   0xe   :  { %490 = vmatprep.subr.mxu1 %v562_v0 }
   0xf   :  { %465 = vmatpush3.bf16.msra.mxu0 %v553_v6  ;;  %491 = vmatpush3.msra.mxu1 %v150_v16 }
  0x10   :  { %466 = vmatprep.subr.bf16.mxu0 %v562_v0  ;;  %492 = vmatprep.subr.mxu1 %v562_v0 }
  0x11   :  { %493 = vmatpush3.msra.mxu1 %v149_v17 }
  0x12   :  { %494 = vmatprep.subr.mxu1 %v562_v0 }
  0x13   :  { %467 = vmatpush3.bf16.msra.mxu0 %v554_v9  ;;  %495 = vmatpush3.msra.mxu1 %v148_v18 }
  0x14   :  { %468 = vmatprep.subr.bf16.mxu0 %v562_v0  ;;  %496 = vmatprep.subr.mxu1 %v562_v0 }
  0x15   :  { %497 = vmatpush3.msra.mxu1 %v147_v19 }
  0x16   :  { %498 = vmatprep.subr.mxu1 %v562_v0 }
  0x17   :  { %469 = vmatpush3.bf16.msra.mxu0 %v555_v11  ;;  %499 = vmatpush3.msra.mxu1 %v146_v20 }
  0x18   :  { %470 = vmatprep.subr.bf16.mxu0 %v562_v0  ;;  %500 = vmatprep.subr.mxu1 %v562_v0 }
  0x19   :  { %501 = vmatpush3.msra.mxu1 %v145_v21 }
  0x1a   :  { %502 = vmatprep.subr.mxu1 %v562_v0 }
  0x1b   :  { %471 = vmatpush3.bf16.msra.mxu0 %v556_v12  ;;  %503 = vmatpush3.msra.mxu1 %v144_v22 }
  0x1c   :  { %472 = vmatprep.subr.bf16.mxu0 %v562_v0  ;;  %504 = vmatprep.subr.mxu1 %v562_v0 }
  0x1d   :  { %505 = vmatpush3.msra.mxu1 %v143_v23 }
  0x1e   :  { %506 = vmatprep.subr.mxu1 %v562_v0 }
  0x1f   :  { %473 = vmatpush3.bf16.msra.mxu0 %v557_v13  ;;  %507 = vmatpush3.msra.mxu1 %v142_v24 }
  0x20   :  { %513 = vmatprep.subr.mxu0 %v562_v0  ;;  %508 = vmatprep.subr.mxu1 %v562_v0 }
  0x21   :  { %509 = vmatpush3.msra.mxu1 %v141_v25 }
  0x22   :  { %475 = vmatmul.mubr.bf16.vlgmr.msra.gmra.mxu0 %v27_v14  ;;  %v252_v14 = vlaneseq }
  0x23   :  { %514 = vmatpush3.msra.mxu0 %v156_v4  ;;  %545 = vmatprep.mubr.msk.f32.mxu0 %vm563_vm0, %v562_v0 }
  0x24   :  { %515 = vmatprep.subr.mxu0 %v562_v0 }
  0x25   :  { %516 = vmatpush3.msra.mxu0 %v155_v5 }
  0x26   :  { %517 = vmatprep.subr.mxu0 %v562_v0 }
  0x27   :  { %518 = vmatpush3.msra.mxu0 %v154_v7 }
  0x28   :  { %519 = vmatprep.subr.mxu0 %v562_v0 }
  0x29   :  { %520 = vmatpush3.msra.mxu0 %v153_v8 }
  0x2a   :  { %521 = vmatprep.subr.mxu0 %v562_v0 }
  0x2b   :  { %522 = vmatpush3.msra.mxu0 %v152_v10 }
  0x2c   :  { %523 = vmatprep.subr.mxu0 %v562_v0 }
  0x2d   :  { %524 = vmatpush3.msra.mxu0 %v151_v15 }
  0x2e   :  { %525 = vmatprep.subr.mxu0 %v562_v0 }
  0x2f   :  { %526 = vmatpush3.msra.mxu0 %v150_v16 }
  0x30   :  { %527 = vmatprep.subr.mxu0 %v562_v0 }
  0x31   :  { %528 = vmatpush3.msra.mxu0 %v149_v17 }
  0x32   :  { %529 = vmatprep.subr.mxu0 %v562_v0 }
  0x33   :  { %530 = vmatpush3.msra.mxu0 %v148_v18  ;;  %v253_v18 = vshrl.u32 %v252_v14, 7 }
  0x34   :  { %531 = vmatprep.subr.mxu0 %v562_v0 }
  0x35   :  { %532 = vmatpush3.msra.mxu0 %v147_v19  ;;  %v254_v19 = vsub.s32 0, %v253_v18 }
  0x36   :  { %533 = vmatprep.subr.mxu0 %v562_v0 }
  0x37   :  { %534 = vmatpush3.msra.mxu0 %v146_v20 }
  0x38   :  { %535 = vmatprep.subr.mxu0 %v562_v0 }
  0x39   :  { %536 = vmatpush3.msra.mxu0 %v145_v21  ;;  %v261_v21 = vsub.s32 1, %v253_v18 }
  0x3a   :  { %537 = vmatprep.subr.mxu0 %v562_v0 }
  0x3b   :  { %538 = vmatpush3.msra.mxu0 %v144_v22 }
  0x3c   :  { %539 = vmatprep.subr.mxu0 %v562_v0 }
  0x3d   :  { %540 = vmatpush3.msra.mxu0 %v143_v23 }
  0x3e   :  { %541 = vmatprep.subr.mxu0 %v562_v0 }
  0x3f   :  { %542 = vmatpush3.msra.mxu0 %v142_v24 }
  0x40   :  { %543 = vmatprep.subr.mxu0 %v562_v0 }
  0x41   :  { %544 = vmatpush3.msra.mxu0 %v141_v25 }
  0xe2   :  { %v133_v27 = vpop.f32.mrf.mxu0 }
  0xe3   :  { %v728_v28 = vadd.f32 %v404_v26, %v133_v27  ;;  %v413_v27 = vld [vmem:[%s758_s3] ss:$0 sm:$0xff] }
  0xe4   :  { %v476_v29 = vpop.f32.mrf.mxu0 }
  0xe5   :  { %v158_v30 = vsel %vm157_vm1, %v728_v28, 0.0  ;;  %v165_v31 = vmul.f32 %v728_v28, %v728_v28  ;;  %v284_v32 = vrot.slane %v728_v28, 4  ;;  %v278_v29 = vld [vmem:[%s759_s6] sm:$0x3] }
  0xe6   :  { %v159_v33 = vrot.slane %v158_v30, 4  ;;  %v136_v34 = vpop.f32.mrf.mxu0 }
  0xe7   :  { %v286_v35 = vsel %vm157_vm1, %v284_v32, 0.0  ;;  %v294_v36 = vrot.slane %v165_v31, 4  ;;  %v166_v37 = vsel %vm157_vm1, %v165_v31, 0.0  ;;  %v395_v34 = vld [vmem:[%s759_s6] sm:$0xc] }
  0xe8   :  { %v287_v38 = vrot.slane %v286_v35, 4  ;;  %v477_v39 = vpop.f32.mrf.mxu0  ;;  %v160_v40 = vadd.f32 %v159_v33, %v158_v30  ;;  %v167_v41 = vrot.slane %v166_v37, 4  ;;  %v414_v33 = vld [vmem:[%s760_s4] ss:$0 sm:$0xff] }
  0xe9   :  { %v296_v42 = vsel %vm157_vm1, %v294_v36, 0.0  ;;  %v279_v36 = vunpack.c.l.bf16 %v278_v29 }
  0xea   :  { %v288_v43 = vadd.f32 %v287_v38, %v286_v35  ;;  %v297_v44 = vrot.slane %v296_v42, 4  ;;  %v161_v45 = vrot.slane %v160_v40, 2  ;;  %v168_v46 = vadd.f32 %v167_v41, %v166_v37 }
  0xec   :  { %v162_v47 = vadd.f32 %v161_v45, %v160_v40  ;;  %v169_v48 = vrot.slane %v168_v46, 2  ;;  %v289_v49 = vrot.slane %v288_v43, 2  ;;  %v298_v50 = vadd.f32 %v297_v44, %v296_v42 }
  0xed   :  { %v396_v40 = vunpack.c.l.bf16 %v395_v34 }
  0xee   :  { %v163_v51 = vrot.slane %v162_v47, 1  ;;  %v170_v52 = vadd.f32 %v169_v48, %v168_v46  ;;  %v290_v53 = vadd.f32 %v289_v49, %v288_v43  ;;  %v299_v54 = vrot.slane %v298_v50, 2 }
  0xf0   :  { %v171_v55 = vrot.slane %v170_v52, 1  ;;  %v291_v56 = vrot.slane %v290_v53, 1  ;;  %v300_v57 = vadd.f32 %v299_v54, %v298_v50  ;;  %v164_v58 = vadd.f32 %v163_v51, %v162_v47 }
  0xf2   :  { %v172_v59 = vadd.f32 %v171_v55, %v170_v52  ;;  %v301_v60 = vrot.slane %v300_v57, 1  ;;  %v292_v62 = vadd.f32 %v291_v56, %v290_v53 }
  0xf4   :  { %v174_v61 = vsel %vm173_vm2, %v164_v58, %v172_v59  ;;  %v302_v63 = vadd.f32 %v301_v60, %v300_v57 }
  0xf5   :  { %v175_v0 = vmul.f32 0.25, %v174_v61 }
  0xf6   :  { %v303_v1 = vsel %vm173_vm2, %v292_v62, %v302_v63 }
  0xf7   :  { %511 = vmatmul.mubr.f32.vlgmr.msra.gmra.mxu1 %v175_v0  ;;  %v304_v2 = vmul.f32 0.25, %v303_v1 }
  0xf9   :  { %546 = vmatmul.mubr.f32.vlgmr.msra.gmra.mxu0 %v304_v2 }
 0x1b7   :  { %v242_v3 = vpop.f32.mrf.mxu1 }
 0x1b8   :  { %v246_v4 = vmul.f32 %v242_v3, %v242_v3  ;;  %v255_v20 = vrot.slane %v242_v3, %v254_v19 }
 0x1b9   :  { %v512_v5 = vpop.f32.mrf.mxu1  ;;  %v371_v6 = vpop.f32.mrf.mxu0 }
 0x1ba   :  { %v248_v7 = vrot.slane %v246_v4, 7  ;;  %v375_v8 = vmul.f32 %v371_v6, %v371_v6  ;;  %v384_v22 = vrot.slane %v371_v6, %v254_v19  ;;  %v256_v24 = vsub.f32 %v728_v28, %v255_v20 }
 0x1bb   :  { %v547_v9 = vpop.f32.mrf.mxu0 }
 0x1bc   :  { %v250_v10 = vsub.f32 %v242_v3, %v248_v7  ;;  %v377_v11 = vrot.slane %v375_v8, 7  ;;  %v385_v31 = vsub.f32 %v728_v28, %v384_v22 }
 0x1be   :  { %v251_v12 = vmax.f32 %v250_v10, 0.0  ;;  %v379_v13 = vsub.f32 %v371_v6, %v377_v11 }
 0x1c0   :  { %v257_v15 = vadd.f32 1e-05, %v251_v12  ;;  %v380_v16 = vmax.f32 %v379_v13, 0.0 }
 0x1c2   :  { %558 = vrsqrt.f32 %v257_v15  ;;  %v386_v17 = vadd.f32 1e-05, %v380_v16 }
 0x1c4   :  { %560 = vrsqrt.f32 %v386_v17 }
 0x1cf   :  { %v559_v23 = vpop.eup %558 }
 0x1d0   :  { %v262_v25 = vrot.slane %v559_v23, %v261_v21 }
 0x1d1   :  { %v561_v26 = vpop.eup %560 }
 0x1d2   :  { %v263_v30 = vmul.f32 %v262_v25, %v256_v24  ;;  %v391_v32 = vrot.slane %v561_v26, %v261_v21 }
 0x1d4   :  { %v270_v35 = vmul.f32 %v413_v27, %v263_v30  ;;  %v392_v37 = vmul.f32 %v391_v32, %v385_v31 }
 0x1d6   :  { %v277_v38 = vadd.f32 %v414_v33, %v270_v35  ;;  %v393_v39 = vmul.f32 %v413_v27, %v392_v37 }
 0x1d8   :  { %v280_v41 = vadd.f32 %v279_v36, %v277_v38  ;;  %v394_v42 = vadd.f32 %v414_v33, %v393_v39 }
 0x1da   :  { %v281_v43 = vpack.c.bf16 %v280_v41, %v280_v41  ;;  %v397_v44 = vadd.f32 %v396_v40, %v394_v42 }
 0x1dc   :  { %282 = vst [vmem:[%s761_s7] sm:$0x3] %v281_v43  ;;  %v398_v28 = vpack.c.bf16 %v397_v44, %v397_v44 }
 0x1de   :  { %399 = vst [vmem:[%s761_s7] sm:$0xc] %v398_v28 }

</bundles_post_ra>
